<compile_context>
chip_gen: v7x
topology: tpu7x:2x2x1
jax: 0.10.0
libtpu: 0.0.40
codegen_flags: <defaults>
</compile_context>

<pallas_src>
import functools

import numpy as np
import jax
import jax.numpy as jnp
from jax.experimental import pallas as pl
from jax.experimental.pallas import tpu as pltpu

LANE = 128
FILTER_PARAM_DICT = {0: 1, 1: 2, 2: 4, 3: 8}


def _round_up(x, m):
    return (x + m - 1) // m * m


# ----------------------------------------------------------------------------
# Pallas kernel: fused conv
#   (pre-ReLU?) -> sum_t x_tap[t] @ W[t] (f32 accumulation in VMEM scratch)
#   -> + BN-folded shift -> (post-ReLU?) -> bf16 store.
# ----------------------------------------------------------------------------
def _conv_kernel(x_ref, w_ref, s_ref, o_ref, acc_ref, *,
                 taps, ho, wo, pre_relu, post_relu):
    for t, (ph, ro, co) in enumerate(taps):
        xs = x_ref[ph, pl.ds(ro, ho), pl.ds(co, wo), :]      # (ho, wo, Cp) bf16
        if pre_relu:
            xs = jnp.maximum(xs, 0)
        xs2 = xs.reshape(ho * wo, xs.shape[-1])
        y = jnp.dot(xs2, w_ref[t], preferred_element_type=jnp.float32)
        if t == 0:
            acc_ref[...] = y
        else:
            acc_ref[...] += y
    out = acc_ref[...] + s_ref[...]
    if post_relu:
        out = jnp.maximum(out, 0.0)
    o_ref[...] = out.astype(o_ref.dtype)


def conv_bn_act(x, w_packed, shift, *, k, stride, pad, pre_relu, post_relu):
    """Fused Conv(k x k) + folded BN + optional ReLUs, no im2col in HBM.

    x        : (B, H, W, Cp) bf16, channels lane-padded (Cp % 128 == 0),
               padded lanes exactly zero.
    w_packed : (k*k, Cp, Np) bf16, BN scale folded, rows scattered to the real
               channel positions of x's layout, Np % 128 == 0 (zeros elsewhere).
    shift    : (1, Np) f32, zero in padded lanes.
    Returns (B, Ho, Wo, Np) bf16 with padded lanes exactly zero.
    """
    B, H, W, C = x.shape
    Ho = (H + 2 * pad - k) // stride + 1
    Wo = (W + 2 * pad - k) // stride + 1
    Np = shift.shape[-1]
    assert Wo % 8 == 0, "fused conv kernel assumes the output width is a sublane multiple"

    xp = jnp.pad(x, ((0, 0), (pad, pad), (pad, pad), (0, 0))) if pad else x
    if stride == 1:
        xph = xp[None]                                # (1, B, Hp, Wp, C) -- free
        taps = tuple((0, kh, kw) for kh in range(k) for kw in range(k))
    elif stride == 2:
        eh = (-xp.shape[1]) % 2
        ew = (-xp.shape[2]) % 2
        if eh or ew:
            xp = jnp.pad(xp, ((0, 0), (0, eh), (0, ew), (0, 0)))
        # Parity phase split (one cheap XLA pass over a small tensor) so every
        # tap is a contiguous, unit-stride window of one phase and the kernel
        # never needs strided slicing.
        xph = jnp.stack([xp[:, a::2, b::2, :] for a in range(2) for b in range(2)],
                        axis=0)                        # (4, B, Hp/2, Wp/2, C)
        taps = tuple(((kh % 2) * 2 + (kw % 2), kh // 2, kw // 2)
                     for kh in range(k) for kw in range(k))
    else:
        raise NotImplementedError("stride must be 1 or 2")

    nph, _, Hin, Win, _ = xph.shape
    Mb = Ho * Wo
    kernel = functools.partial(_conv_kernel, taps=taps, ho=Ho, wo=Wo,
                               pre_relu=pre_relu, post_relu=post_relu)
    out = pl.pallas_call(
        kernel,
        grid=(B,),                 # >= 2 tiles so both v7x TensorCores get work
        in_specs=[
            pl.BlockSpec((nph, None, Hin, Win, C), lambda b: (0, b, 0, 0, 0)),
            pl.BlockSpec((k * k, C, Np), lambda b: (0, 0, 0)),
            pl.BlockSpec((1, Np), lambda b: (0, 0)),
        ],
        out_specs=pl.BlockSpec((None, Mb, Np), lambda b: (b, 0, 0)),
        out_shape=jax.ShapeDtypeStruct((B, Mb, Np), jnp.bfloat16),
        scratch_shapes=[pltpu.VMEM((Mb, Np), jnp.float32)],
        compiler_params=pltpu.CompilerParams(
            dimension_semantics=("parallel",),
            vmem_limit_bytes=32 * 1024 * 1024,
        ),
    )(xph, w_packed, shift)
    return out.reshape(B, Ho, Wo, Np)


# ----------------------------------------------------------------------------
# Bilinear resize matching F.interpolate(mode='bilinear', align_corners=False)
# -- glue, negligible compute (operates on the padded bf16 layout; zeros stay
# zero under interpolation).
# ----------------------------------------------------------------------------
def bilinear_resize(x, out_h, out_w):
    B, H, W, C = x.shape
    if out_h == H and out_w == W:
        return x
    dt = x.dtype
    xf = x.astype(jnp.float32)

    def idx(out_len, in_len):
        i = jnp.arange(out_len, dtype=jnp.float32)
        src = (i + 0.5) * (in_len / out_len) - 0.5
        src = jnp.clip(src, 0.0, in_len - 1)
        lo = jnp.floor(src).astype(jnp.int32)
        hi = jnp.minimum(lo + 1, in_len - 1)
        w = src - lo.astype(jnp.float32)
        return lo, hi, w

    hlo, hhi, hw = idx(out_h, H)
    wlo, whi, ww = idx(out_w, W)
    top = (xf[:, hlo, :, :] * (1.0 - hw)[None, :, None, None]
           + xf[:, hhi, :, :] * hw[None, :, None, None])
    out = (top[:, :, wlo, :] * (1.0 - ww)[None, None, :, None]
           + top[:, :, whi, :] * ww[None, None, :, None])
    return out.astype(dt)


# ----------------------------------------------------------------------------
# Cell forward (NHWC, persistent padded layout); static config comes from cfg.
# ----------------------------------------------------------------------------
def _scale_dimension(dim, scale):
    return int((float(dim) - 1.0) * scale + 1.0) if dim % 2 == 1 else int(float(dim) * scale)


def cell_forward(cell_params, cell_cfg, prev_prev, prev, cell_arch, steps, block_multiplier):
    downup = cell_cfg["downup"]          # python int (static)
    C_out = cell_cfg["C_out"]
    canon_w = cell_cfg["canon_width"]

    if downup != 0:
        scale = 0.5 if downup == -1 else 2
        h = _scale_dimension(prev.shape[1], scale)
        w = _scale_dimension(prev.shape[2], scale)
        prev = bilinear_resize(prev, h, w)
    if prev_prev.shape[1] != prev.shape[1] or prev_prev.shape[2] != prev.shape[2]:
        prev_prev = bilinear_resize(prev_prev, prev.shape[1], prev.shape[2])

    mode = cell_cfg["s0_mode"]
    if mode == "conv":
        s0 = conv_bn_act(prev_prev, cell_params["pre_pre"]["W"], cell_params["pre_pre"]["shift"],
                         k=1, stride=1, pad=0, pre_relu=True, post_relu=False)
    elif mode == "identity":
        s0 = prev_prev
    else:  # 'repack': identity branch but the padded layout is not canonical
        pos = jnp.asarray(cell_cfg["s0_positions"], dtype=jnp.int32)
        real = jnp.take(prev_prev, pos, axis=-1)
        s0 = jnp.pad(real, ((0, 0), (0, 0), (0, 0), (0, canon_w - C_out)))

    s1 = conv_bn_act(prev, cell_params["pre"]["W"], cell_params["pre"]["shift"],
                     k=1, stride=1, pad=0, pre_relu=True, post_relu=False)

    states = [s0, s1]
    branch_set = set(int(r) for r in np.asarray(cell_arch)[:, 0])
    offset = 0
    for _ in range(steps):
        new_states = [h for j, h in enumerate(states) if (offset + j) in branch_set]
        # assumes >= 1 selected branch per step (as in the synthetic arch)
        s = new_states[0]
        for ns in new_states[1:]:
            s = s + ns
        offset += len(states)
        states.append(s)
    concat = jnp.concatenate(states[-block_multiplier:], axis=-1)
    return prev, concat


# ----------------------------------------------------------------------------
# Parameter construction: BN-folded, layout-scattered, lane-padded bf16 weights
# + f32 shifts are built ONCE here (eagerly, outside the jit).  Static per-cell
# config (downup, C_out, channel-layout bookkeeping) is returned separately so
# it never becomes a traced value.
# ----------------------------------------------------------------------------
def build_params(key, network_arch, num_layers, filter_multiplier, block_multiplier):
    initial_fm, ini_initial_fm = 128, 64
    del ini_initial_fm  # channel counts are tracked from the actual layouts
    keys = iter(jax.random.split(key, 256))

    def make_conv(in_positions, in_width, cout, k, bias, eps=1e-5):
        cin = len(in_positions)
        W = np.asarray(jax.random.normal(next(keys), (cout, cin, k, k), jnp.float32)) \
            / np.sqrt(cin * k * k)
        b = (0.01 * np.asarray(jax.random.normal(next(keys), (cout,), jnp.float32))
             if bias else np.zeros((cout,), np.float32))
        gamma = 1.0 + 0.1 * np.asarray(jax.random.normal(next(keys), (cout,), jnp.float32))
        beta = 0.05 * np.asarray(jax.random.normal(next(keys), (cout,), jnp.float32))
        mean = 0.02 * np.asarray(jax.random.normal(next(keys), (cout,), jnp.float32))
        var = 0.5 + np.asarray(jax.random.uniform(next(keys), (cout,), jnp.float32))

        scale = gamma / np.sqrt(var + eps)
        shift = (b - mean) * scale + beta
        npad = _round_up(cout, LANE)
        wt = np.transpose(W, (2, 3, 1, 0)) * scale[None, None, None, :]   # (k,k,cin,cout)
        packed = np.zeros((k * k, in_width, npad), np.float32)
        pos = np.asarray(in_positions, np.int64)
        for kh in range(k):
            for kw in range(k):
                packed[kh * k + kw, pos, :cout] = wt[kh, kw]
        shift_p = np.zeros((1, npad), np.float32)
        shift_p[0, :cout] = shift
        return {"W": jnp.asarray(packed, jnp.bfloat16),
                "shift": jnp.asarray(shift_p, jnp.float32)}

    params = {
        "stem0": make_conv(list(range(3)), LANE, 64, 3, True),
        "stem1": make_conv(list(range(64)), LANE, 64, 3, True),
        "stem2": make_conv(list(range(64)), LANE, initial_fm, 3, True),
        "cells": [],
    }
    cfg = {"cells": []}

    # activation channel layouts: (padded_width, real_channel_positions)
    pp_layout = (LANE, tuple(range(64)))            # stem1 output (prev_prev of cell 0)
    p_layout = (LANE, tuple(range(initial_fm)))     # stem2 output (prev of cell 0)

    for i in range(num_layers):
        level = int(np.argmax(network_arch[i].sum(axis=1)))
        downup = 0 if i == 0 else int(np.argmax(network_arch[i].sum(axis=0))) - 1
        C_out = filter_multiplier * FILTER_PARAM_DICT[level]
        canon_w = _round_up(C_out, LANE)
        pp_width, pp_pos = pp_layout
        p_width, p_pos = p_layout

        cell_p = {}
        if len(pp_pos) != C_out:
            s0_mode = "conv"
            cell_p["pre_pre"] = make_conv(list(pp_pos), pp_width, C_out, 1, False)
        elif pp_width == canon_w and tuple(pp_pos) == tuple(range(C_out)):
            s0_mode = "identity"
        else:
            s0_mode = "repack"
        cell_p["pre"] = make_conv(list(p_pos), p_width, C_out, 1, False)

        params["cells"].append(cell_p)
        cfg["cells"].append({
            "downup": downup,
            "C_out": C_out,
            "canon_width": canon_w,
            "s0_mode": s0_mode,
            "s0_positions": tuple(pp_pos),
        })

        concat_pos = tuple(b * canon_w + c for b in range(block_multiplier) for c in range(C_out))
        concat_layout = (block_multiplier * canon_w, concat_pos)
        # cell returns (prev, concat)  ->  next cell sees (prev_prev, prev) = (prev, concat)
        pp_layout, p_layout = p_layout, concat_layout

    return params, cfg


# ----------------------------------------------------------------------------
# Full forward (NCHW in / NCHW f32 out, like the PyTorch module)
# ----------------------------------------------------------------------------
def new_model_forward(params, x_nchw, *, cfg, cell_arch, step, block_multiplier, num_layers):
    x = jnp.transpose(x_nchw, (0, 2, 3, 1))                      # NCHW -> NHWC
    cin = x.shape[-1]
    x = jnp.pad(x, ((0, 0), (0, 0), (0, 0), (0, _round_up(cin, LANE) - cin))) \
         .astype(jnp.bfloat16)                                   # persistent padded layout

    stem = conv_bn_act(x, params["stem0"]["W"], params["stem0"]["shift"],
                       k=3, stride=2, pad=1, pre_relu=False, post_relu=True)
    stem0 = conv_bn_act(stem, params["stem1"]["W"], params["stem1"]["shift"],
                        k=3, stride=1, pad=1, pre_relu=False, post_relu=True)
    stem1 = conv_bn_act(stem0, params["stem2"]["W"], params["stem2"]["shift"],
                        k=3, stride=2, pad=1, pre_relu=False, post_relu=True)

    two_last = (stem0, stem1)
    low_level = None
    for i in range(num_layers):
        two_last = cell_forward(params["cells"][i], cfg["cells"][i],
                                two_last[0], two_last[1],
                                cell_arch, step, block_multiplier)
        if i == 2:
            low_level = two_last[1]
    last_output = two_last[-1]

    def to_output(feat, c_cfg):
        c_out, wc = c_cfg["C_out"], c_cfg["canon_width"]
        parts = [feat[..., j * wc: j * wc + c_out] for j in range(block_multiplier)]
        real = jnp.concatenate(parts, axis=-1).astype(jnp.float32)
        return jnp.transpose(real, (0, 3, 1, 2))                  # NHWC -> NCHW

    return (to_output(last_output, cfg["cells"][num_layers - 1]),
            to_output(low_level, cfg["cells"][2]))


if __name__ == "__main__":
    # Small synthetic architecture: 4 layers, every layer stays at level 0,
    # downup_sample == 0 everywhere; cell ops are skip_connect only.
    num_layers = 4
    block_multiplier = 2
    step = 2
    filter_multiplier = 4

    network_arch = np.zeros((num_layers, 4, 3), dtype=np.float32)
    network_arch[:, 0, 1] = 1.0                       # level 0, middle column -> downup 0
    cell_arch = np.array([[0, 3], [1, 3], [2, 3], [3, 3]], dtype=np.int64)  # skip_connect

    key = jax.random.PRNGKey(0)
    pkey, xkey = jax.random.split(key)
    params, cfg = build_params(pkey, network_arch, num_layers, filter_multiplier,
                               block_multiplier)

    x = jax.random.normal(xkey, (2, 3, 32, 32), jnp.float32)      # NCHW, like PyTorch

    fwd = jax.jit(functools.partial(
        new_model_forward, cfg=cfg, cell_arch=cell_arch, step=step,
        block_multiplier=block_multiplier, num_layers=num_layers))
    last_output, low_level_feature = fwd(params, x)
    jax.block_until_ready((last_output, low_level_feature))

    assert last_output.shape == (2, block_multiplier * filter_multiplier, 8, 8)
    assert low_level_feature.shape == (2, block_multiplier * filter_multiplier, 8, 8)
    print("KERNEL_OK")
</pallas_src>

<mosaic_0001>
module attributes {stable_mosaic.version = 11 : i64} {
  func.func @_conv_kernel(%arg0: i32, %arg1: memref<4x1x17x17x128xbf16, #tpu.memory_space<vmem>>, %arg2: memref<9x128x128xbf16, #tpu.memory_space<vmem>>, %arg3: memref<1x128xf32, #tpu.memory_space<vmem>>, %arg4: memref<1x256x128xbf16, #tpu.memory_space<vmem>>, %arg5: memref<256x128xf32, #tpu.memory_space<vmem>>) attributes {dimension_semantics = [#tpu.dimension_semantics<parallel>], iteration_bounds = array<i64: 2>, scalar_prefetch = 0 : i64, scratch_operands = 1 : i64, tpu.core_type = #tpu.core_type<tc>, window_params = [{transform_indices = @transform_0, window_bounds = array<i64: 4, 1, 17, 17, 128>}, {pipeline_mode = #tpu.pipeline_mode<synchronous>, transform_indices = @transform_1, window_bounds = array<i64: 9, 128, 128>}, {pipeline_mode = #tpu.pipeline_mode<synchronous>, transform_indices = @transform_2, window_bounds = array<i64: 1, 128>}, {transform_indices = @transform_3, window_bounds = array<i64: 1, 256, 128>}]} {
    %c0 = arith.constant 0 : index
    %c0_0 = arith.constant 0 : index
    %c0_1 = arith.constant 0 : index
    %c0_2 = arith.constant 0 : index
    %c0_3 = arith.constant 0 : index
    %0 = vector.load %arg1[%c0, %c0_0, %c0_1, %c0_2, %c0_3] : memref<4x1x17x17x128xbf16, #tpu.memory_space<vmem>>, vector<1x1x16x16x128xbf16>
    %1 = vector.shape_cast %0 : vector<1x1x16x16x128xbf16> to vector<16x16x128xbf16>
    %2 = vector.shape_cast %1 : vector<16x16x128xbf16> to vector<256x128xbf16>
    %c0_4 = arith.constant 0 : index
    %c0_5 = arith.constant 0 : index
    %c0_6 = arith.constant 0 : index
    %3 = vector.load %arg2[%c0_4, %c0_5, %c0_6] : memref<9x128x128xbf16, #tpu.memory_space<vmem>>, vector<1x128x128xbf16>
    %4 = vector.shape_cast %3 : vector<1x128x128xbf16> to vector<128x128xbf16>
    %cst = arith.constant dense<0.000000e+00> : vector<256x128xf32>
    %5 = tpu.matmul %2, %4, %cst {dimension_numbers = #tpu.dot_dimension_numbers<[1], [0], [0], [1], [0, 0, 1, 1], [], []>} : vector<256x128xbf16>, vector<128x128xbf16>, vector<256x128xf32> -> vector<256x128xf32>
    %c0_7 = arith.constant 0 : index
    %c0_8 = arith.constant 0 : index
    %6 = vector.load %arg5[%c0_7, %c0_8] : memref<256x128xf32, #tpu.memory_space<vmem>>, vector<256x128xf32>
    tpu.vector_store %arg5[%c0_7, %c0_8], %5 {strides = array<i32>} : memref<256x128xf32, #tpu.memory_space<vmem>>, vector<256x128xf32>,
    %c1 = arith.constant 1 : index
    %c0_9 = arith.constant 0 : index
    %c0_10 = arith.constant 0 : index
    %c0_11 = arith.constant 0 : index
    %c0_12 = arith.constant 0 : index
    %7 = vector.load %arg1[%c1, %c0_9, %c0_10, %c0_11, %c0_12] : memref<4x1x17x17x128xbf16, #tpu.memory_space<vmem>>, vector<1x1x16x16x128xbf16>
    %8 = vector.shape_cast %7 : vector<1x1x16x16x128xbf16> to vector<16x16x128xbf16>
    %9 = vector.shape_cast %8 : vector<16x16x128xbf16> to vector<256x128xbf16>
    %c1_13 = arith.constant 1 : index
    %c0_14 = arith.constant 0 : index
    %c0_15 = arith.constant 0 : index
    %10 = vector.load %arg2[%c1_13, %c0_14, %c0_15] : memref<9x128x128xbf16, #tpu.memory_space<vmem>>, vector<1x128x128xbf16>
    %11 = vector.shape_cast %10 : vector<1x128x128xbf16> to vector<128x128xbf16>
    %cst_16 = arith.constant dense<0.000000e+00> : vector<256x128xf32>
    %12 = tpu.matmul %9, %11, %cst_16 {dimension_numbers = #tpu.dot_dimension_numbers<[1], [0], [0], [1], [0, 0, 1, 1], [], []>} : vector<256x128xbf16>, vector<128x128xbf16>, vector<256x128xf32> -> vector<256x128xf32>
    %c0_17 = arith.constant 0 : index
    %c0_18 = arith.constant 0 : index
    %13 = vector.load %arg5[%c0_17, %c0_18] : memref<256x128xf32, #tpu.memory_space<vmem>>, vector<256x128xf32>
    %14 = arith.addf %13, %12 : vector<256x128xf32>
    %c0_19 = arith.constant 0 : index
    %c0_20 = arith.constant 0 : index
    %15 = vector.load %arg5[%c0_19, %c0_20] : memref<256x128xf32, #tpu.memory_space<vmem>>, vector<256x128xf32>
    tpu.vector_store %arg5[%c0_19, %c0_20], %14 {strides = array<i32>} : memref<256x128xf32, #tpu.memory_space<vmem>>, vector<256x128xf32>,
    %c0_21 = arith.constant 0 : index
    %c0_22 = arith.constant 0 : index
    %c0_23 = arith.constant 0 : index
    %c1_24 = arith.constant 1 : index
    %c0_25 = arith.constant 0 : index
    %16 = vector.load %arg1[%c0_21, %c0_22, %c0_23, %c1_24, %c0_25] : memref<4x1x17x17x128xbf16, #tpu.memory_space<vmem>>, vector<1x1x16x16x128xbf16>
    %17 = vector.shape_cast %16 : vector<1x1x16x16x128xbf16> to vector<16x16x128xbf16>
    %18 = vector.shape_cast %17 : vector<16x16x128xbf16> to vector<256x128xbf16>
    %c2 = arith.constant 2 : index
    %c0_26 = arith.constant 0 : index
    %c0_27 = arith.constant 0 : index
    %19 = vector.load %arg2[%c2, %c0_26, %c0_27] : memref<9x128x128xbf16, #tpu.memory_space<vmem>>, vector<1x128x128xbf16>
    %20 = vector.shape_cast %19 : vector<1x128x128xbf16> to vector<128x128xbf16>
    %cst_28 = arith.constant dense<0.000000e+00> : vector<256x128xf32>
    %21 = tpu.matmul %18, %20, %cst_28 {dimension_numbers = #tpu.dot_dimension_numbers<[1], [0], [0], [1], [0, 0, 1, 1], [], []>} : vector<256x128xbf16>, vector<128x128xbf16>, vector<256x128xf32> -> vector<256x128xf32>
    %c0_29 = arith.constant 0 : index
    %c0_30 = arith.constant 0 : index
    %22 = vector.load %arg5[%c0_29, %c0_30] : memref<256x128xf32, #tpu.memory_space<vmem>>, vector<256x128xf32>
    %23 = arith.addf %22, %21 : vector<256x128xf32>
    %c0_31 = arith.constant 0 : index
    %c0_32 = arith.constant 0 : index
    %24 = vector.load %arg5[%c0_31, %c0_32] : memref<256x128xf32, #tpu.memory_space<vmem>>, vector<256x128xf32>
    tpu.vector_store %arg5[%c0_31, %c0_32], %23 {strides = array<i32>} : memref<256x128xf32, #tpu.memory_space<vmem>>, vector<256x128xf32>,
    %c2_33 = arith.constant 2 : index
    %c0_34 = arith.constant 0 : index
    %c0_35 = arith.constant 0 : index
    %c0_36 = arith.constant 0 : index
    %c0_37 = arith.constant 0 : index
    %25 = vector.load %arg1[%c2_33, %c0_34, %c0_35, %c0_36, %c0_37] : memref<4x1x17x17x128xbf16, #tpu.memory_space<vmem>>, vector<1x1x16x16x128xbf16>
    %26 = vector.shape_cast %25 : vector<1x1x16x16x128xbf16> to vector<16x16x128xbf16>
    %27 = vector.shape_cast %26 : vector<16x16x128xbf16> to vector<256x128xbf16>
    %c3 = arith.constant 3 : index
    %c0_38 = arith.constant 0 : index
    %c0_39 = arith.constant 0 : index
    %28 = vector.load %arg2[%c3, %c0_38, %c0_39] : memref<9x128x128xbf16, #tpu.memory_space<vmem>>, vector<1x128x128xbf16>
    %29 = vector.shape_cast %28 : vector<1x128x128xbf16> to vector<128x128xbf16>
    %cst_40 = arith.constant dense<0.000000e+00> : vector<256x128xf32>
    %30 = tpu.matmul %27, %29, %cst_40 {dimension_numbers = #tpu.dot_dimension_numbers<[1], [0], [0], [1], [0, 0, 1, 1], [], []>} : vector<256x128xbf16>, vector<128x128xbf16>, vector<256x128xf32> -> vector<256x128xf32>
    %c0_41 = arith.constant 0 : index
    %c0_42 = arith.constant 0 : index
    %31 = vector.load %arg5[%c0_41, %c0_42] : memref<256x128xf32, #tpu.memory_space<vmem>>, vector<256x128xf32>
    %32 = arith.addf %31, %30 : vector<256x128xf32>
    %c0_43 = arith.constant 0 : index
    %c0_44 = arith.constant 0 : index
    %33 = vector.load %arg5[%c0_43, %c0_44] : memref<256x128xf32, #tpu.memory_space<vmem>>, vector<256x128xf32>
    tpu.vector_store %arg5[%c0_43, %c0_44], %32 {strides = array<i32>} : memref<256x128xf32, #tpu.memory_space<vmem>>, vector<256x128xf32>,
    %c3_45 = arith.constant 3 : index
    %c0_46 = arith.constant 0 : index
    %c0_47 = arith.constant 0 : index
    %c0_48 = arith.constant 0 : index
    %c0_49 = arith.constant 0 : index
    %34 = vector.load %arg1[%c3_45, %c0_46, %c0_47, %c0_48, %c0_49] : memref<4x1x17x17x128xbf16, #tpu.memory_space<vmem>>, vector<1x1x16x16x128xbf16>
    %35 = vector.shape_cast %34 : vector<1x1x16x16x128xbf16> to vector<16x16x128xbf16>
    %36 = vector.shape_cast %35 : vector<16x16x128xbf16> to vector<256x128xbf16>
    %c4 = arith.constant 4 : index
    %c0_50 = arith.constant 0 : index
    %c0_51 = arith.constant 0 : index
    %37 = vector.load %arg2[%c4, %c0_50, %c0_51] : memref<9x128x128xbf16, #tpu.memory_space<vmem>>, vector<1x128x128xbf16>
    %38 = vector.shape_cast %37 : vector<1x128x128xbf16> to vector<128x128xbf16>
    %cst_52 = arith.constant dense<0.000000e+00> : vector<256x128xf32>
    %39 = tpu.matmul %36, %38, %cst_52 {dimension_numbers = #tpu.dot_dimension_numbers<[1], [0], [0], [1], [0, 0, 1, 1], [], []>} : vector<256x128xbf16>, vector<128x128xbf16>, vector<256x128xf32> -> vector<256x128xf32>
    %c0_53 = arith.constant 0 : index
    %c0_54 = arith.constant 0 : index
    %40 = vector.load %arg5[%c0_53, %c0_54] : memref<256x128xf32, #tpu.memory_space<vmem>>, vector<256x128xf32>
    %41 = arith.addf %40, %39 : vector<256x128xf32>
    %c0_55 = arith.constant 0 : index
    %c0_56 = arith.constant 0 : index
    %42 = vector.load %arg5[%c0_55, %c0_56] : memref<256x128xf32, #tpu.memory_space<vmem>>, vector<256x128xf32>
    tpu.vector_store %arg5[%c0_55, %c0_56], %41 {strides = array<i32>} : memref<256x128xf32, #tpu.memory_space<vmem>>, vector<256x128xf32>,
    %c2_57 = arith.constant 2 : index
    %c0_58 = arith.constant 0 : index
    %c0_59 = arith.constant 0 : index
    %c1_60 = arith.constant 1 : index
    %c0_61 = arith.constant 0 : index
    %43 = vector.load %arg1[%c2_57, %c0_58, %c0_59, %c1_60, %c0_61] : memref<4x1x17x17x128xbf16, #tpu.memory_space<vmem>>, vector<1x1x16x16x128xbf16>
    %44 = vector.shape_cast %43 : vector<1x1x16x16x128xbf16> to vector<16x16x128xbf16>
    %45 = vector.shape_cast %44 : vector<16x16x128xbf16> to vector<256x128xbf16>
    %c5 = arith.constant 5 : index
    %c0_62 = arith.constant 0 : index
    %c0_63 = arith.constant 0 : index
    %46 = vector.load %arg2[%c5, %c0_62, %c0_63] : memref<9x128x128xbf16, #tpu.memory_space<vmem>>, vector<1x128x128xbf16>
    %47 = vector.shape_cast %46 : vector<1x128x128xbf16> to vector<128x128xbf16>
    %cst_64 = arith.constant dense<0.000000e+00> : vector<256x128xf32>
    %48 = tpu.matmul %45, %47, %cst_64 {dimension_numbers = #tpu.dot_dimension_numbers<[1], [0], [0], [1], [0, 0, 1, 1], [], []>} : vector<256x128xbf16>, vector<128x128xbf16>, vector<256x128xf32> -> vector<256x128xf32>
    %c0_65 = arith.constant 0 : index
    %c0_66 = arith.constant 0 : index
    %49 = vector.load %arg5[%c0_65, %c0_66] : memref<256x128xf32, #tpu.memory_space<vmem>>, vector<256x128xf32>
    %50 = arith.addf %49, %48 : vector<256x128xf32>
    %c0_67 = arith.constant 0 : index
    %c0_68 = arith.constant 0 : index
    %51 = vector.load %arg5[%c0_67, %c0_68] : memref<256x128xf32, #tpu.memory_space<vmem>>, vector<256x128xf32>
    tpu.vector_store %arg5[%c0_67, %c0_68], %50 {strides = array<i32>} : memref<256x128xf32, #tpu.memory_space<vmem>>, vector<256x128xf32>,
    %c0_69 = arith.constant 0 : index
    %c0_70 = arith.constant 0 : index
    %c1_71 = arith.constant 1 : index
    %c0_72 = arith.constant 0 : index
    %c0_73 = arith.constant 0 : index
    %52 = vector.load %arg1[%c0_69, %c0_70, %c1_71, %c0_72, %c0_73] : memref<4x1x17x17x128xbf16, #tpu.memory_space<vmem>>, vector<1x1x16x16x128xbf16>
    %53 = vector.shape_cast %52 : vector<1x1x16x16x128xbf16> to vector<16x16x128xbf16>
    %54 = vector.shape_cast %53 : vector<16x16x128xbf16> to vector<256x128xbf16>
    %c6 = arith.constant 6 : index
    %c0_74 = arith.constant 0 : index
    %c0_75 = arith.constant 0 : index
    %55 = vector.load %arg2[%c6, %c0_74, %c0_75] : memref<9x128x128xbf16, #tpu.memory_space<vmem>>, vector<1x128x128xbf16>
    %56 = vector.shape_cast %55 : vector<1x128x128xbf16> to vector<128x128xbf16>
    %cst_76 = arith.constant dense<0.000000e+00> : vector<256x128xf32>
    %57 = tpu.matmul %54, %56, %cst_76 {dimension_numbers = #tpu.dot_dimension_numbers<[1], [0], [0], [1], [0, 0, 1, 1], [], []>} : vector<256x128xbf16>, vector<128x128xbf16>, vector<256x128xf32> -> vector<256x128xf32>
    %c0_77 = arith.constant 0 : index
    %c0_78 = arith.constant 0 : index
    %58 = vector.load %arg5[%c0_77, %c0_78] : memref<256x128xf32, #tpu.memory_space<vmem>>, vector<256x128xf32>
    %59 = arith.addf %58, %57 : vector<256x128xf32>
    %c0_79 = arith.constant 0 : index
    %c0_80 = arith.constant 0 : index
    %60 = vector.load %arg5[%c0_79, %c0_80] : memref<256x128xf32, #tpu.memory_space<vmem>>, vector<256x128xf32>
    tpu.vector_store %arg5[%c0_79, %c0_80], %59 {strides = array<i32>} : memref<256x128xf32, #tpu.memory_space<vmem>>, vector<256x128xf32>,
    %c1_81 = arith.constant 1 : index
    %c0_82 = arith.constant 0 : index
    %c1_83 = arith.constant 1 : index
    %c0_84 = arith.constant 0 : index
    %c0_85 = arith.constant 0 : index
    %61 = vector.load %arg1[%c1_81, %c0_82, %c1_83, %c0_84, %c0_85] : memref<4x1x17x17x128xbf16, #tpu.memory_space<vmem>>, vector<1x1x16x16x128xbf16>
    %62 = vector.shape_cast %61 : vector<1x1x16x16x128xbf16> to vector<16x16x128xbf16>
    %63 = vector.shape_cast %62 : vector<16x16x128xbf16> to vector<256x128xbf16>
    %c7 = arith.constant 7 : index
    %c0_86 = arith.constant 0 : index
    %c0_87 = arith.constant 0 : index
    %64 = vector.load %arg2[%c7, %c0_86, %c0_87] : memref<9x128x128xbf16, #tpu.memory_space<vmem>>, vector<1x128x128xbf16>
    %65 = vector.shape_cast %64 : vector<1x128x128xbf16> to vector<128x128xbf16>
    %cst_88 = arith.constant dense<0.000000e+00> : vector<256x128xf32>
    %66 = tpu.matmul %63, %65, %cst_88 {dimension_numbers = #tpu.dot_dimension_numbers<[1], [0], [0], [1], [0, 0, 1, 1], [], []>} : vector<256x128xbf16>, vector<128x128xbf16>, vector<256x128xf32> -> vector<256x128xf32>
    %c0_89 = arith.constant 0 : index
    %c0_90 = arith.constant 0 : index
    %67 = vector.load %arg5[%c0_89, %c0_90] : memref<256x128xf32, #tpu.memory_space<vmem>>, vector<256x128xf32>
    %68 = arith.addf %67, %66 : vector<256x128xf32>
    %c0_91 = arith.constant 0 : index
    %c0_92 = arith.constant 0 : index
    %69 = vector.load %arg5[%c0_91, %c0_92] : memref<256x128xf32, #tpu.memory_space<vmem>>, vector<256x128xf32>
    tpu.vector_store %arg5[%c0_91, %c0_92], %68 {strides = array<i32>} : memref<256x128xf32, #tpu.memory_space<vmem>>, vector<256x128xf32>,
    %c0_93 = arith.constant 0 : index
    %c0_94 = arith.constant 0 : index
    %c1_95 = arith.constant 1 : index
    %c1_96 = arith.constant 1 : index
    %c0_97 = arith.constant 0 : index
    %70 = vector.load %arg1[%c0_93, %c0_94, %c1_95, %c1_96, %c0_97] : memref<4x1x17x17x128xbf16, #tpu.memory_space<vmem>>, vector<1x1x16x16x128xbf16>
    %71 = vector.shape_cast %70 : vector<1x1x16x16x128xbf16> to vector<16x16x128xbf16>
    %72 = vector.shape_cast %71 : vector<16x16x128xbf16> to vector<256x128xbf16>
    %c8 = arith.constant 8 : index
    %c0_98 = arith.constant 0 : index
    %c0_99 = arith.constant 0 : index
    %73 = vector.load %arg2[%c8, %c0_98, %c0_99] : memref<9x128x128xbf16, #tpu.memory_space<vmem>>, vector<1x128x128xbf16>
    %74 = vector.shape_cast %73 : vector<1x128x128xbf16> to vector<128x128xbf16>
    %cst_100 = arith.constant dense<0.000000e+00> : vector<256x128xf32>
    %75 = tpu.matmul %72, %74, %cst_100 {dimension_numbers = #tpu.dot_dimension_numbers<[1], [0], [0], [1], [0, 0, 1, 1], [], []>} : vector<256x128xbf16>, vector<128x128xbf16>, vector<256x128xf32> -> vector<256x128xf32>
    %c0_101 = arith.constant 0 : index
    %c0_102 = arith.constant 0 : index
    %76 = vector.load %arg5[%c0_101, %c0_102] : memref<256x128xf32, #tpu.memory_space<vmem>>, vector<256x128xf32>
    %77 = arith.addf %76, %75 : vector<256x128xf32>
    %c0_103 = arith.constant 0 : index
    %c0_104 = arith.constant 0 : index
    %78 = vector.load %arg5[%c0_103, %c0_104] : memref<256x128xf32, #tpu.memory_space<vmem>>, vector<256x128xf32>
    tpu.vector_store %arg5[%c0_103, %c0_104], %77 {strides = array<i32>} : memref<256x128xf32, #tpu.memory_space<vmem>>, vector<256x128xf32>,
    %c0_105 = arith.constant 0 : index
    %c0_106 = arith.constant 0 : index
    %79 = vector.load %arg5[%c0_105, %c0_106] : memref<256x128xf32, #tpu.memory_space<vmem>>, vector<256x128xf32>
    %c0_107 = arith.constant 0 : index
    %c0_108 = arith.constant 0 : index
    %80 = vector.load %arg3[%c0_107, %c0_108] : memref<1x128xf32, #tpu.memory_space<vmem>>, vector<1x128xf32>
    %81 = vector.broadcast %80 : vector<1x128xf32> to vector<256x128xf32>
    %82 = arith.addf %79, %81 : vector<256x128xf32>
    %cst_109 = arith.constant 0.000000e+00 : f32
    %83 = vector.broadcast %cst_109 : f32 to vector<256x128xf32>
    %84 = arith.maximumf %82, %83 : vector<256x128xf32>
    %85 = arith.truncf %84 : vector<256x128xf32> to vector<256x128xbf16>
    %c0_110 = arith.constant 0 : index
    %c0_111 = arith.constant 0 : index
    %c0_112 = arith.constant 0 : index
    %86 = vector.load %arg4[%c0_110, %c0_111, %c0_112] : memref<1x256x128xbf16, #tpu.memory_space<vmem>>, vector<1x256x128xbf16>
    %87 = vector.shape_cast %86 : vector<1x256x128xbf16> to vector<256x128xbf16>
    %88 = vector.shape_cast %85 : vector<256x128xbf16> to vector<1x256x128xbf16>
    tpu.vector_store %arg4[%c0_110, %c0_111, %c0_112], %88 {strides = array<i32>} : memref<1x256x128xbf16, #tpu.memory_space<vmem>>, vector<1x256x128xbf16>,
    return
  }
  func.func @transform_0(%arg0: i32) -> (i32, i32, i32, i32, i32) {
    %c0_i32 = arith.constant 0 : i32
    %c0_i32_0 = arith.constant 0 : i32
    %c0_i32_1 = arith.constant 0 : i32
    %c0_i32_2 = arith.constant 0 : i32
    %c0_i32_3 = arith.constant 0 : i32
    return %c0_i32, %arg0, %c0_i32_0, %c0_i32_1, %c0_i32_2 : i32, i32, i32, i32, i32
  }
  func.func @transform_1(%arg0: i32) -> (i32, i32, i32) {
    %c0_i32 = arith.constant 0 : i32
    %c0_i32_0 = arith.constant 0 : i32
    %c0_i32_1 = arith.constant 0 : i32
    %c0_i32_2 = arith.constant 0 : i32
    return %c0_i32, %c0_i32_0, %c0_i32_1 : i32, i32, i32
  }
  func.func @transform_2(%arg0: i32) -> (i32, i32) {
    %c0_i32 = arith.constant 0 : i32
    %c0_i32_0 = arith.constant 0 : i32
    %c0_i32_1 = arith.constant 0 : i32
    return %c0_i32, %c0_i32_0 : i32, i32
  }
  func.func @transform_3(%arg0: i32) -> (i32, i32, i32) {
    %c0_i32 = arith.constant 0 : i32
    %c0_i32_0 = arith.constant 0 : i32
    %c0_i32_1 = arith.constant 0 : i32
    return %arg0, %c0_i32, %c0_i32_0 : i32, i32, i32
  }
}

module attributes {stable_mosaic.version = 11 : i64} {
  func.func @_conv_kernel(%arg0: i32, %arg1: memref<1x1x18x18x128xbf16, #tpu.memory_space<vmem>>, %arg2: memref<9x128x128xbf16, #tpu.memory_space<vmem>>, %arg3: memref<1x128xf32, #tpu.memory_space<vmem>>, %arg4: memref<1x256x128xbf16, #tpu.memory_space<vmem>>, %arg5: memref<256x128xf32, #tpu.memory_space<vmem>>) attributes {dimension_semantics = [#tpu.dimension_semantics<parallel>], iteration_bounds = array<i64: 2>, scalar_prefetch = 0 : i64, scratch_operands = 1 : i64, tpu.core_type = #tpu.core_type<tc>, window_params = [{transform_indices = @transform_0, window_bounds = array<i64: 1, 1, 18, 18, 128>}, {pipeline_mode = #tpu.pipeline_mode<synchronous>, transform_indices = @transform_1, window_bounds = array<i64: 9, 128, 128>}, {pipeline_mode = #tpu.pipeline_mode<synchronous>, transform_indices = @transform_2, window_bounds = array<i64: 1, 128>}, {transform_indices = @transform_3, window_bounds = array<i64: 1, 256, 128>}]} {
    %c0 = arith.constant 0 : index
    %c0_0 = arith.constant 0 : index
    %c0_1 = arith.constant 0 : index
    %c0_2 = arith.constant 0 : index
    %c0_3 = arith.constant 0 : index
    %0 = vector.load %arg1[%c0, %c0_0, %c0_1, %c0_2, %c0_3] : memref<1x1x18x18x128xbf16, #tpu.memory_space<vmem>>, vector<1x1x16x16x128xbf16>
    %1 = vector.shape_cast %0 : vector<1x1x16x16x128xbf16> to vector<16x16x128xbf16>
    %2 = vector.shape_cast %1 : vector<16x16x128xbf16> to vector<256x128xbf16>
    %c0_4 = arith.constant 0 : index
    %c0_5 = arith.constant 0 : index
    %c0_6 = arith.constant 0 : index
    %3 = vector.load %arg2[%c0_4, %c0_5, %c0_6] : memref<9x128x128xbf16, #tpu.memory_space<vmem>>, vector<1x128x128xbf16>
    %4 = vector.shape_cast %3 : vector<1x128x128xbf16> to vector<128x128xbf16>
    %cst = arith.constant dense<0.000000e+00> : vector<256x128xf32>
    %5 = tpu.matmul %2, %4, %cst {dimension_numbers = #tpu.dot_dimension_numbers<[1], [0], [0], [1], [0, 0, 1, 1], [], []>} : vector<256x128xbf16>, vector<128x128xbf16>, vector<256x128xf32> -> vector<256x128xf32>
    %c0_7 = arith.constant 0 : index
    %c0_8 = arith.constant 0 : index
    %6 = vector.load %arg5[%c0_7, %c0_8] : memref<256x128xf32, #tpu.memory_space<vmem>>, vector<256x128xf32>
    tpu.vector_store %arg5[%c0_7, %c0_8], %5 {strides = array<i32>} : memref<256x128xf32, #tpu.memory_space<vmem>>, vector<256x128xf32>,
    %c0_9 = arith.constant 0 : index
    %c0_10 = arith.constant 0 : index
    %c0_11 = arith.constant 0 : index
    %c1 = arith.constant 1 : index
    %c0_12 = arith.constant 0 : index
    %7 = vector.load %arg1[%c0_9, %c0_10, %c0_11, %c1, %c0_12] : memref<1x1x18x18x128xbf16, #tpu.memory_space<vmem>>, vector<1x1x16x16x128xbf16>
    %8 = vector.shape_cast %7 : vector<1x1x16x16x128xbf16> to vector<16x16x128xbf16>
    %9 = vector.shape_cast %8 : vector<16x16x128xbf16> to vector<256x128xbf16>
    %c1_13 = arith.constant 1 : index
    %c0_14 = arith.constant 0 : index
    %c0_15 = arith.constant 0 : index
    %10 = vector.load %arg2[%c1_13, %c0_14, %c0_15] : memref<9x128x128xbf16, #tpu.memory_space<vmem>>, vector<1x128x128xbf16>
    %11 = vector.shape_cast %10 : vector<1x128x128xbf16> to vector<128x128xbf16>
    %cst_16 = arith.constant dense<0.000000e+00> : vector<256x128xf32>
    %12 = tpu.matmul %9, %11, %cst_16 {dimension_numbers = #tpu.dot_dimension_numbers<[1], [0], [0], [1], [0, 0, 1, 1], [], []>} : vector<256x128xbf16>, vector<128x128xbf16>, vector<256x128xf32> -> vector<256x128xf32>
    %c0_17 = arith.constant 0 : index
    %c0_18 = arith.constant 0 : index
    %13 = vector.load %arg5[%c0_17, %c0_18] : memref<256x128xf32, #tpu.memory_space<vmem>>, vector<256x128xf32>
    %14 = arith.addf %13, %12 : vector<256x128xf32>
    %c0_19 = arith.constant 0 : index
    %c0_20 = arith.constant 0 : index
    %15 = vector.load %arg5[%c0_19, %c0_20] : memref<256x128xf32, #tpu.memory_space<vmem>>, vector<256x128xf32>
    tpu.vector_store %arg5[%c0_19, %c0_20], %14 {strides = array<i32>} : memref<256x128xf32, #tpu.memory_space<vmem>>, vector<256x128xf32>,
    %c0_21 = arith.constant 0 : index
    %c0_22 = arith.constant 0 : index
    %c0_23 = arith.constant 0 : index
    %c2 = arith.constant 2 : index
    %c0_24 = arith.constant 0 : index
    %16 = vector.load %arg1[%c0_21, %c0_22, %c0_23, %c2, %c0_24] : memref<1x1x18x18x128xbf16, #tpu.memory_space<vmem>>, vector<1x1x16x16x128xbf16>
    %17 = vector.shape_cast %16 : vector<1x1x16x16x128xbf16> to vector<16x16x128xbf16>
    %18 = vector.shape_cast %17 : vector<16x16x128xbf16> to vector<256x128xbf16>
    %c2_25 = arith.constant 2 : index
    %c0_26 = arith.constant 0 : index
    %c0_27 = arith.constant 0 : index
    %19 = vector.load %arg2[%c2_25, %c0_26, %c0_27] : memref<9x128x128xbf16, #tpu.memory_space<vmem>>, vector<1x128x128xbf16>
    %20 = vector.shape_cast %19 : vector<1x128x128xbf16> to vector<128x128xbf16>
    %cst_28 = arith.constant dense<0.000000e+00> : vector<256x128xf32>
    %21 = tpu.matmul %18, %20, %cst_28 {dimension_numbers = #tpu.dot_dimension_numbers<[1], [0], [0], [1], [0, 0, 1, 1], [], []>} : vector<256x128xbf16>, vector<128x128xbf16>, vector<256x128xf32> -> vector<256x128xf32>
    %c0_29 = arith.constant 0 : index
    %c0_30 = arith.constant 0 : index
    %22 = vector.load %arg5[%c0_29, %c0_30] : memref<256x128xf32, #tpu.memory_space<vmem>>, vector<256x128xf32>
    %23 = arith.addf %22, %21 : vector<256x128xf32>
    %c0_31 = arith.constant 0 : index
    %c0_32 = arith.constant 0 : index
    %24 = vector.load %arg5[%c0_31, %c0_32] : memref<256x128xf32, #tpu.memory_space<vmem>>, vector<256x128xf32>
    tpu.vector_store %arg5[%c0_31, %c0_32], %23 {strides = array<i32>} : memref<256x128xf32, #tpu.memory_space<vmem>>, vector<256x128xf32>,
    %c0_33 = arith.constant 0 : index
    %c0_34 = arith.constant 0 : index
    %c1_35 = arith.constant 1 : index
    %c0_36 = arith.constant 0 : index
    %c0_37 = arith.constant 0 : index
    %25 = vector.load %arg1[%c0_33, %c0_34, %c1_35, %c0_36, %c0_37] : memref<1x1x18x18x128xbf16, #tpu.memory_space<vmem>>, vector<1x1x16x16x128xbf16>
    %26 = vector.shape_cast %25 : vector<1x1x16x16x128xbf16> to vector<16x16x128xbf16>
    %27 = vector.shape_cast %26 : vector<16x16x128xbf16> to vector<256x128xbf16>
    %c3 = arith.constant 3 : index
    %c0_38 = arith.constant 0 : index
    %c0_39 = arith.constant 0 : index
    %28 = vector.load %arg2[%c3, %c0_38, %c0_39] : memref<9x128x128xbf16, #tpu.memory_space<vmem>>, vector<1x128x128xbf16>
    %29 = vector.shape_cast %28 : vector<1x128x128xbf16> to vector<128x128xbf16>
    %cst_40 = arith.constant dense<0.000000e+00> : vector<256x128xf32>
    %30 = tpu.matmul %27, %29, %cst_40 {dimension_numbers = #tpu.dot_dimension_numbers<[1], [0], [0], [1], [0, 0, 1, 1], [], []>} : vector<256x128xbf16>, vector<128x128xbf16>, vector<256x128xf32> -> vector<256x128xf32>
    %c0_41 = arith.constant 0 : index
    %c0_42 = arith.constant 0 : index
    %31 = vector.load %arg5[%c0_41, %c0_42] : memref<256x128xf32, #tpu.memory_space<vmem>>, vector<256x128xf32>
    %32 = arith.addf %31, %30 : vector<256x128xf32>
    %c0_43 = arith.constant 0 : index
    %c0_44 = arith.constant 0 : index
    %33 = vector.load %arg5[%c0_43, %c0_44] : memref<256x128xf32, #tpu.memory_space<vmem>>, vector<256x128xf32>
    tpu.vector_store %arg5[%c0_43, %c0_44], %32 {strides = array<i32>} : memref<256x128xf32, #tpu.memory_space<vmem>>, vector<256x128xf32>,
    %c0_45 = arith.constant 0 : index
    %c0_46 = arith.constant 0 : index
    %c1_47 = arith.constant 1 : index
    %c1_48 = arith.constant 1 : index
    %c0_49 = arith.constant 0 : index
    %34 = vector.load %arg1[%c0_45, %c0_46, %c1_47, %c1_48, %c0_49] : memref<1x1x18x18x128xbf16, #tpu.memory_space<vmem>>, vector<1x1x16x16x128xbf16>
    %35 = vector.shape_cast %34 : vector<1x1x16x16x128xbf16> to vector<16x16x128xbf16>
    %36 = vector.shape_cast %35 : vector<16x16x128xbf16> to vector<256x128xbf16>
    %c4 = arith.constant 4 : index
    %c0_50 = arith.constant 0 : index
    %c0_51 = arith.constant 0 : index
    %37 = vector.load %arg2[%c4, %c0_50, %c0_51] : memref<9x128x128xbf16, #tpu.memory_space<vmem>>, vector<1x128x128xbf16>
    %38 = vector.shape_cast %37 : vector<1x128x128xbf16> to vector<128x128xbf16>
    %cst_52 = arith.constant dense<0.000000e+00> : vector<256x128xf32>
    %39 = tpu.matmul %36, %38, %cst_52 {dimension_numbers = #tpu.dot_dimension_numbers<[1], [0], [0], [1], [0, 0, 1, 1], [], []>} : vector<256x128xbf16>, vector<128x128xbf16>, vector<256x128xf32> -> vector<256x128xf32>
    %c0_53 = arith.constant 0 : index
    %c0_54 = arith.constant 0 : index
    %40 = vector.load %arg5[%c0_53, %c0_54] : memref<256x128xf32, #tpu.memory_space<vmem>>, vector<256x128xf32>
    %41 = arith.addf %40, %39 : vector<256x128xf32>
    %c0_55 = arith.constant 0 : index
    %c0_56 = arith.constant 0 : index
    %42 = vector.load %arg5[%c0_55, %c0_56] : memref<256x128xf32, #tpu.memory_space<vmem>>, vector<256x128xf32>
    tpu.vector_store %arg5[%c0_55, %c0_56], %41 {strides = array<i32>} : memref<256x128xf32, #tpu.memory_space<vmem>>, vector<256x128xf32>,
    %c0_57 = arith.constant 0 : index
    %c0_58 = arith.constant 0 : index
    %c1_59 = arith.constant 1 : index
    %c2_60 = arith.constant 2 : index
    %c0_61 = arith.constant 0 : index
    %43 = vector.load %arg1[%c0_57, %c0_58, %c1_59, %c2_60, %c0_61] : memref<1x1x18x18x128xbf16, #tpu.memory_space<vmem>>, vector<1x1x16x16x128xbf16>
    %44 = vector.shape_cast %43 : vector<1x1x16x16x128xbf16> to vector<16x16x128xbf16>
    %45 = vector.shape_cast %44 : vector<16x16x128xbf16> to vector<256x128xbf16>
    %c5 = arith.constant 5 : index
    %c0_62 = arith.constant 0 : index
    %c0_63 = arith.constant 0 : index
    %46 = vector.load %arg2[%c5, %c0_62, %c0_63] : memref<9x128x128xbf16, #tpu.memory_space<vmem>>, vector<1x128x128xbf16>
    %47 = vector.shape_cast %46 : vector<1x128x128xbf16> to vector<128x128xbf16>
    %cst_64 = arith.constant dense<0.000000e+00> : vector<256x128xf32>
    %48 = tpu.matmul %45, %47, %cst_64 {dimension_numbers = #tpu.dot_dimension_numbers<[1], [0], [0], [1], [0, 0, 1, 1], [], []>} : vector<256x128xbf16>, vector<128x128xbf16>, vector<256x128xf32> -> vector<256x128xf32>
    %c0_65 = arith.constant 0 : index
    %c0_66 = arith.constant 0 : index
    %49 = vector.load %arg5[%c0_65, %c0_66] : memref<256x128xf32, #tpu.memory_space<vmem>>, vector<256x128xf32>
    %50 = arith.addf %49, %48 : vector<256x128xf32>
    %c0_67 = arith.constant 0 : index
    %c0_68 = arith.constant 0 : index
    %51 = vector.load %arg5[%c0_67, %c0_68] : memref<256x128xf32, #tpu.memory_space<vmem>>, vector<256x128xf32>
    tpu.vector_store %arg5[%c0_67, %c0_68], %50 {strides = array<i32>} : memref<256x128xf32, #tpu.memory_space<vmem>>, vector<256x128xf32>,
    %c0_69 = arith.constant 0 : index
    %c0_70 = arith.constant 0 : index
    %c2_71 = arith.constant 2 : index
    %c0_72 = arith.constant 0 : index
    %c0_73 = arith.constant 0 : index
    %52 = vector.load %arg1[%c0_69, %c0_70, %c2_71, %c0_72, %c0_73] : memref<1x1x18x18x128xbf16, #tpu.memory_space<vmem>>, vector<1x1x16x16x128xbf16>
    %53 = vector.shape_cast %52 : vector<1x1x16x16x128xbf16> to vector<16x16x128xbf16>
    %54 = vector.shape_cast %53 : vector<16x16x128xbf16> to vector<256x128xbf16>
    %c6 = arith.constant 6 : index
    %c0_74 = arith.constant 0 : index
    %c0_75 = arith.constant 0 : index
    %55 = vector.load %arg2[%c6, %c0_74, %c0_75] : memref<9x128x128xbf16, #tpu.memory_space<vmem>>, vector<1x128x128xbf16>
    %56 = vector.shape_cast %55 : vector<1x128x128xbf16> to vector<128x128xbf16>
    %cst_76 = arith.constant dense<0.000000e+00> : vector<256x128xf32>
    %57 = tpu.matmul %54, %56, %cst_76 {dimension_numbers = #tpu.dot_dimension_numbers<[1], [0], [0], [1], [0, 0, 1, 1], [], []>} : vector<256x128xbf16>, vector<128x128xbf16>, vector<256x128xf32> -> vector<256x128xf32>
    %c0_77 = arith.constant 0 : index
    %c0_78 = arith.constant 0 : index
    %58 = vector.load %arg5[%c0_77, %c0_78] : memref<256x128xf32, #tpu.memory_space<vmem>>, vector<256x128xf32>
    %59 = arith.addf %58, %57 : vector<256x128xf32>
    %c0_79 = arith.constant 0 : index
    %c0_80 = arith.constant 0 : index
    %60 = vector.load %arg5[%c0_79, %c0_80] : memref<256x128xf32, #tpu.memory_space<vmem>>, vector<256x128xf32>
    tpu.vector_store %arg5[%c0_79, %c0_80], %59 {strides = array<i32>} : memref<256x128xf32, #tpu.memory_space<vmem>>, vector<256x128xf32>,
    %c0_81 = arith.constant 0 : index
    %c0_82 = arith.constant 0 : index
    %c2_83 = arith.constant 2 : index
    %c1_84 = arith.constant 1 : index
    %c0_85 = arith.constant 0 : index
    %61 = vector.load %arg1[%c0_81, %c0_82, %c2_83, %c1_84, %c0_85] : memref<1x1x18x18x128xbf16, #tpu.memory_space<vmem>>, vector<1x1x16x16x128xbf16>
    %62 = vector.shape_cast %61 : vector<1x1x16x16x128xbf16> to vector<16x16x128xbf16>
    %63 = vector.shape_cast %62 : vector<16x16x128xbf16> to vector<256x128xbf16>
    %c7 = arith.constant 7 : index
    %c0_86 = arith.constant 0 : index
    %c0_87 = arith.constant 0 : index
    %64 = vector.load %arg2[%c7, %c0_86, %c0_87] : memref<9x128x128xbf16, #tpu.memory_space<vmem>>, vector<1x128x128xbf16>
    %65 = vector.shape_cast %64 : vector<1x128x128xbf16> to vector<128x128xbf16>
    %cst_88 = arith.constant dense<0.000000e+00> : vector<256x128xf32>
    %66 = tpu.matmul %63, %65, %cst_88 {dimension_numbers = #tpu.dot_dimension_numbers<[1], [0], [0], [1], [0, 0, 1, 1], [], []>} : vector<256x128xbf16>, vector<128x128xbf16>, vector<256x128xf32> -> vector<256x128xf32>
    %c0_89 = arith.constant 0 : index
    %c0_90 = arith.constant 0 : index
    %67 = vector.load %arg5[%c0_89, %c0_90] : memref<256x128xf32, #tpu.memory_space<vmem>>, vector<256x128xf32>
    %68 = arith.addf %67, %66 : vector<256x128xf32>
    %c0_91 = arith.constant 0 : index
    %c0_92 = arith.constant 0 : index
    %69 = vector.load %arg5[%c0_91, %c0_92] : memref<256x128xf32, #tpu.memory_space<vmem>>, vector<256x128xf32>
    tpu.vector_store %arg5[%c0_91, %c0_92], %68 {strides = array<i32>} : memref<256x128xf32, #tpu.memory_space<vmem>>, vector<256x128xf32>,
    %c0_93 = arith.constant 0 : index
    %c0_94 = arith.constant 0 : index
    %c2_95 = arith.constant 2 : index
    %c2_96 = arith.constant 2 : index
    %c0_97 = arith.constant 0 : index
    %70 = vector.load %arg1[%c0_93, %c0_94, %c2_95, %c2_96, %c0_97] : memref<1x1x18x18x128xbf16, #tpu.memory_space<vmem>>, vector<1x1x16x16x128xbf16>
    %71 = vector.shape_cast %70 : vector<1x1x16x16x128xbf16> to vector<16x16x128xbf16>
    %72 = vector.shape_cast %71 : vector<16x16x128xbf16> to vector<256x128xbf16>
    %c8 = arith.constant 8 : index
    %c0_98 = arith.constant 0 : index
    %c0_99 = arith.constant 0 : index
    %73 = vector.load %arg2[%c8, %c0_98, %c0_99] : memref<9x128x128xbf16, #tpu.memory_space<vmem>>, vector<1x128x128xbf16>
    %74 = vector.shape_cast %73 : vector<1x128x128xbf16> to vector<128x128xbf16>
    %cst_100 = arith.constant dense<0.000000e+00> : vector<256x128xf32>
    %75 = tpu.matmul %72, %74, %cst_100 {dimension_numbers = #tpu.dot_dimension_numbers<[1], [0], [0], [1], [0, 0, 1, 1], [], []>} : vector<256x128xbf16>, vector<128x128xbf16>, vector<256x128xf32> -> vector<256x128xf32>
    %c0_101 = arith.constant 0 : index
    %c0_102 = arith.constant 0 : index
    %76 = vector.load %arg5[%c0_101, %c0_102] : memref<256x128xf32, #tpu.memory_space<vmem>>, vector<256x128xf32>
    %77 = arith.addf %76, %75 : vector<256x128xf32>
    %c0_103 = arith.constant 0 : index
    %c0_104 = arith.constant 0 : index
    %78 = vector.load %arg5[%c0_103, %c0_104] : memref<256x128xf32, #tpu.memory_space<vmem>>, vector<256x128xf32>
    tpu.vector_store %arg5[%c0_103, %c0_104], %77 {strides = array<i32>} : memref<256x128xf32, #tpu.memory_space<vmem>>, vector<256x128xf32>,
    %c0_105 = arith.constant 0 : index
    %c0_106 = arith.constant 0 : index
    %79 = vector.load %arg5[%c0_105, %c0_106] : memref<256x128xf32, #tpu.memory_space<vmem>>, vector<256x128xf32>
    %c0_107 = arith.constant 0 : index
    %c0_108 = arith.constant 0 : index
    %80 = vector.load %arg3[%c0_107, %c0_108] : memref<1x128xf32, #tpu.memory_space<vmem>>, vector<1x128xf32>
    %81 = vector.broadcast %80 : vector<1x128xf32> to vector<256x128xf32>
    %82 = arith.addf %79, %81 : vector<256x128xf32>
    %cst_109 = arith.constant 0.000000e+00 : f32
    %83 = vector.broadcast %cst_109 : f32 to vector<256x128xf32>
    %84 = arith.maximumf %82, %83 : vector<256x128xf32>
    %85 = arith.truncf %84 : vector<256x128xf32> to vector<256x128xbf16>
    %c0_110 = arith.constant 0 : index
    %c0_111 = arith.constant 0 : index
    %c0_112 = arith.constant 0 : index
    %86 = vector.load %arg4[%c0_110, %c0_111, %c0_112] : memref<1x256x128xbf16, #tpu.memory_space<vmem>>, vector<1x256x128xbf16>
    %87 = vector.shape_cast %86 : vector<1x256x128xbf16> to vector<256x128xbf16>
    %88 = vector.shape_cast %85 : vector<256x128xbf16> to vector<1x256x128xbf16>
    tpu.vector_store %arg4[%c0_110, %c0_111, %c0_112], %88 {strides = array<i32>} : memref<1x256x128xbf16, #tpu.memory_space<vmem>>, vector<1x256x128xbf16>,
    return
  }
  func.func @transform_0(%arg0: i32) -> (i32, i32, i32, i32, i32) {
    %c0_i32 = arith.constant 0 : i32
    %c0_i32_0 = arith.constant 0 : i32
    %c0_i32_1 = arith.constant 0 : i32
    %c0_i32_2 = arith.constant 0 : i32
    %c0_i32_3 = arith.constant 0 : i32
    return %c0_i32, %arg0, %c0_i32_0, %c0_i32_1, %c0_i32_2 : i32, i32, i32, i32, i32
  }
  func.func @transform_1(%arg0: i32) -> (i32, i32, i32) {
    %c0_i32 = arith.constant 0 : i32
    %c0_i32_0 = arith.constant 0 : i32
    %c0_i32_1 = arith.constant 0 : i32
    %c0_i32_2 = arith.constant 0 : i32
    return %c0_i32, %c0_i32_0, %c0_i32_1 : i32, i32, i32
  }
  func.func @transform_2(%arg0: i32) -> (i32, i32) {
    %c0_i32 = arith.constant 0 : i32
    %c0_i32_0 = arith.constant 0 : i32
    %c0_i32_1 = arith.constant 0 : i32
    return %c0_i32, %c0_i32_0 : i32, i32
  }
  func.func @transform_3(%arg0: i32) -> (i32, i32, i32) {
    %c0_i32 = arith.constant 0 : i32
    %c0_i32_0 = arith.constant 0 : i32
    %c0_i32_1 = arith.constant 0 : i32
    return %arg0, %c0_i32, %c0_i32_0 : i32, i32, i32
  }
}

module attributes {stable_mosaic.version = 11 : i64} {
  func.func @_conv_kernel(%arg0: i32, %arg1: memref<1x1x8x8x128xbf16, #tpu.memory_space<vmem>>, %arg2: memref<1x128x128xbf16, #tpu.memory_space<vmem>>, %arg3: memref<1x128xf32, #tpu.memory_space<vmem>>, %arg4: memref<1x64x128xbf16, #tpu.memory_space<vmem>>, %arg5: memref<64x128xf32, #tpu.memory_space<vmem>>) attributes {dimension_semantics = [#tpu.dimension_semantics<parallel>], iteration_bounds = array<i64: 2>, scalar_prefetch = 0 : i64, scratch_operands = 1 : i64, tpu.core_type = #tpu.core_type<tc>, window_params = [{transform_indices = @transform_0, window_bounds = array<i64: 1, 1, 8, 8, 128>}, {pipeline_mode = #tpu.pipeline_mode<synchronous>, transform_indices = @transform_1, window_bounds = array<i64: 1, 128, 128>}, {pipeline_mode = #tpu.pipeline_mode<synchronous>, transform_indices = @transform_2, window_bounds = array<i64: 1, 128>}, {transform_indices = @transform_3, window_bounds = array<i64: 1, 64, 128>}]} {
    %c0 = arith.constant 0 : index
    %c0_0 = arith.constant 0 : index
    %c0_1 = arith.constant 0 : index
    %c0_2 = arith.constant 0 : index
    %c0_3 = arith.constant 0 : index
    %0 = vector.load %arg1[%c0, %c0_0, %c0_1, %c0_2, %c0_3] : memref<1x1x8x8x128xbf16, #tpu.memory_space<vmem>>, vector<1x1x8x8x128xbf16>
    %1 = vector.shape_cast %0 : vector<1x1x8x8x128xbf16> to vector<8x8x128xbf16>
    %cst = arith.constant 0.000000e+00 : bf16
    %2 = vector.broadcast %cst : bf16 to vector<8x8x128xbf16>
    %3 = arith.maximumf %1, %2 : vector<8x8x128xbf16>
    %4 = vector.shape_cast %3 : vector<8x8x128xbf16> to vector<64x128xbf16>
    %c0_4 = arith.constant 0 : index
    %c0_5 = arith.constant 0 : index
    %c0_6 = arith.constant 0 : index
    %5 = vector.load %arg2[%c0_4, %c0_5, %c0_6] : memref<1x128x128xbf16, #tpu.memory_space<vmem>>, vector<1x128x128xbf16>
    %6 = vector.shape_cast %5 : vector<1x128x128xbf16> to vector<128x128xbf16>
    %cst_7 = arith.constant dense<0.000000e+00> : vector<64x128xf32>
    %7 = tpu.matmul %4, %6, %cst_7 {dimension_numbers = #tpu.dot_dimension_numbers<[1], [0], [0], [1], [0, 0, 1, 1], [], []>} : vector<64x128xbf16>, vector<128x128xbf16>, vector<64x128xf32> -> vector<64x128xf32>
    %c0_8 = arith.constant 0 : index
    %c0_9 = arith.constant 0 : index
    %8 = vector.load %arg5[%c0_8, %c0_9] : memref<64x128xf32, #tpu.memory_space<vmem>>, vector<64x128xf32>
    tpu.vector_store %arg5[%c0_8, %c0_9], %7 {strides = array<i32>} : memref<64x128xf32, #tpu.memory_space<vmem>>, vector<64x128xf32>,
    %c0_10 = arith.constant 0 : index
    %c0_11 = arith.constant 0 : index
    %9 = vector.load %arg5[%c0_10, %c0_11] : memref<64x128xf32, #tpu.memory_space<vmem>>, vector<64x128xf32>
    %c0_12 = arith.constant 0 : index
    %c0_13 = arith.constant 0 : index
    %10 = vector.load %arg3[%c0_12, %c0_13] : memref<1x128xf32, #tpu.memory_space<vmem>>, vector<1x128xf32>
    %11 = vector.broadcast %10 : vector<1x128xf32> to vector<64x128xf32>
    %12 = arith.addf %9, %11 : vector<64x128xf32>
    %13 = arith.truncf %12 : vector<64x128xf32> to vector<64x128xbf16>
    %c0_14 = arith.constant 0 : index
    %c0_15 = arith.constant 0 : index
    %c0_16 = arith.constant 0 : index
    %14 = vector.load %arg4[%c0_14, %c0_15, %c0_16] : memref<1x64x128xbf16, #tpu.memory_space<vmem>>, vector<1x64x128xbf16>
    %15 = vector.shape_cast %14 : vector<1x64x128xbf16> to vector<64x128xbf16>
    %16 = vector.shape_cast %13 : vector<64x128xbf16> to vector<1x64x128xbf16>
    tpu.vector_store %arg4[%c0_14, %c0_15, %c0_16], %16 {strides = array<i32>} : memref<1x64x128xbf16, #tpu.memory_space<vmem>>, vector<1x64x128xbf16>,
    return
  }
  func.func @transform_0(%arg0: i32) -> (i32, i32, i32, i32, i32) {
    %c0_i32 = arith.constant 0 : i32
    %c0_i32_0 = arith.constant 0 : i32
    %c0_i32_1 = arith.constant 0 : i32
    %c0_i32_2 = arith.constant 0 : i32
    %c0_i32_3 = arith.constant 0 : i32
    return %c0_i32, %arg0, %c0_i32_0, %c0_i32_1, %c0_i32_2 : i32, i32, i32, i32, i32
  }
  func.func @transform_1(%arg0: i32) -> (i32, i32, i32) {
    %c0_i32 = arith.constant 0 : i32
    %c0_i32_0 = arith.constant 0 : i32
    %c0_i32_1 = arith.constant 0 : i32
    %c0_i32_2 = arith.constant 0 : i32
    return %c0_i32, %c0_i32_0, %c0_i32_1 : i32, i32, i32
  }
  func.func @transform_2(%arg0: i32) -> (i32, i32) {
    %c0_i32 = arith.constant 0 : i32
    %c0_i32_0 = arith.constant 0 : i32
    %c0_i32_1 = arith.constant 0 : i32
    return %c0_i32, %c0_i32_0 : i32, i32
  }
  func.func @transform_3(%arg0: i32) -> (i32, i32, i32) {
    %c0_i32 = arith.constant 0 : i32
    %c0_i32_0 = arith.constant 0 : i32
    %c0_i32_1 = arith.constant 0 : i32
    return %arg0, %c0_i32, %c0_i32_0 : i32, i32, i32
  }
}

module attributes {stable_mosaic.version = 11 : i64} {
  func.func @_conv_kernel(%arg0: i32, %arg1: memref<4x1x9x9x128xbf16, #tpu.memory_space<vmem>>, %arg2: memref<9x128x128xbf16, #tpu.memory_space<vmem>>, %arg3: memref<1x128xf32, #tpu.memory_space<vmem>>, %arg4: memref<1x64x128xbf16, #tpu.memory_space<vmem>>, %arg5: memref<64x128xf32, #tpu.memory_space<vmem>>) attributes {dimension_semantics = [#tpu.dimension_semantics<parallel>], iteration_bounds = array<i64: 2>, scalar_prefetch = 0 : i64, scratch_operands = 1 : i64, tpu.core_type = #tpu.core_type<tc>, window_params = [{transform_indices = @transform_0, window_bounds = array<i64: 4, 1, 9, 9, 128>}, {pipeline_mode = #tpu.pipeline_mode<synchronous>, transform_indices = @transform_1, window_bounds = array<i64: 9, 128, 128>}, {pipeline_mode = #tpu.pipeline_mode<synchronous>, transform_indices = @transform_2, window_bounds = array<i64: 1, 128>}, {transform_indices = @transform_3, window_bounds = array<i64: 1, 64, 128>}]} {
    %c0 = arith.constant 0 : index
    %c0_0 = arith.constant 0 : index
    %c0_1 = arith.constant 0 : index
    %c0_2 = arith.constant 0 : index
    %c0_3 = arith.constant 0 : index
    %0 = vector.load %arg1[%c0, %c0_0, %c0_1, %c0_2, %c0_3] : memref<4x1x9x9x128xbf16, #tpu.memory_space<vmem>>, vector<1x1x8x8x128xbf16>
    %1 = vector.shape_cast %0 : vector<1x1x8x8x128xbf16> to vector<8x8x128xbf16>
    %2 = vector.shape_cast %1 : vector<8x8x128xbf16> to vector<64x128xbf16>
    %c0_4 = arith.constant 0 : index
    %c0_5 = arith.constant 0 : index
    %c0_6 = arith.constant 0 : index
    %3 = vector.load %arg2[%c0_4, %c0_5, %c0_6] : memref<9x128x128xbf16, #tpu.memory_space<vmem>>, vector<1x128x128xbf16>
    %4 = vector.shape_cast %3 : vector<1x128x128xbf16> to vector<128x128xbf16>
    %cst = arith.constant dense<0.000000e+00> : vector<64x128xf32>
    %5 = tpu.matmul %2, %4, %cst {dimension_numbers = #tpu.dot_dimension_numbers<[1], [0], [0], [1], [0, 0, 1, 1], [], []>} : vector<64x128xbf16>, vector<128x128xbf16>, vector<64x128xf32> -> vector<64x128xf32>
    %c0_7 = arith.constant 0 : index
    %c0_8 = arith.constant 0 : index
    %6 = vector.load %arg5[%c0_7, %c0_8] : memref<64x128xf32, #tpu.memory_space<vmem>>, vector<64x128xf32>
    tpu.vector_store %arg5[%c0_7, %c0_8], %5 {strides = array<i32>} : memref<64x128xf32, #tpu.memory_space<vmem>>, vector<64x128xf32>,
    %c1 = arith.constant 1 : index
    %c0_9 = arith.constant 0 : index
    %c0_10 = arith.constant 0 : index
    %c0_11 = arith.constant 0 : index
    %c0_12 = arith.constant 0 : index
    %7 = vector.load %arg1[%c1, %c0_9, %c0_10, %c0_11, %c0_12] : memref<4x1x9x9x128xbf16, #tpu.memory_space<vmem>>, vector<1x1x8x8x128xbf16>
    %8 = vector.shape_cast %7 : vector<1x1x8x8x128xbf16> to vector<8x8x128xbf16>
    %9 = vector.shape_cast %8 : vector<8x8x128xbf16> to vector<64x128xbf16>
    %c1_13 = arith.constant 1 : index
    %c0_14 = arith.constant 0 : index
    %c0_15 = arith.constant 0 : index
    %10 = vector.load %arg2[%c1_13, %c0_14, %c0_15] : memref<9x128x128xbf16, #tpu.memory_space<vmem>>, vector<1x128x128xbf16>
    %11 = vector.shape_cast %10 : vector<1x128x128xbf16> to vector<128x128xbf16>
    %cst_16 = arith.constant dense<0.000000e+00> : vector<64x128xf32>
    %12 = tpu.matmul %9, %11, %cst_16 {dimension_numbers = #tpu.dot_dimension_numbers<[1], [0], [0], [1], [0, 0, 1, 1], [], []>} : vector<64x128xbf16>, vector<128x128xbf16>, vector<64x128xf32> -> vector<64x128xf32>
    %c0_17 = arith.constant 0 : index
    %c0_18 = arith.constant 0 : index
    %13 = vector.load %arg5[%c0_17, %c0_18] : memref<64x128xf32, #tpu.memory_space<vmem>>, vector<64x128xf32>
    %14 = arith.addf %13, %12 : vector<64x128xf32>
    %c0_19 = arith.constant 0 : index
    %c0_20 = arith.constant 0 : index
    %15 = vector.load %arg5[%c0_19, %c0_20] : memref<64x128xf32, #tpu.memory_space<vmem>>, vector<64x128xf32>
    tpu.vector_store %arg5[%c0_19, %c0_20], %14 {strides = array<i32>} : memref<64x128xf32, #tpu.memory_space<vmem>>, vector<64x128xf32>,
    %c0_21 = arith.constant 0 : index
    %c0_22 = arith.constant 0 : index
    %c0_23 = arith.constant 0 : index
    %c1_24 = arith.constant 1 : index
    %c0_25 = arith.constant 0 : index
    %16 = vector.load %arg1[%c0_21, %c0_22, %c0_23, %c1_24, %c0_25] : memref<4x1x9x9x128xbf16, #tpu.memory_space<vmem>>, vector<1x1x8x8x128xbf16>
    %17 = vector.shape_cast %16 : vector<1x1x8x8x128xbf16> to vector<8x8x128xbf16>
    %18 = vector.shape_cast %17 : vector<8x8x128xbf16> to vector<64x128xbf16>
    %c2 = arith.constant 2 : index
    %c0_26 = arith.constant 0 : index
    %c0_27 = arith.constant 0 : index
    %19 = vector.load %arg2[%c2, %c0_26, %c0_27] : memref<9x128x128xbf16, #tpu.memory_space<vmem>>, vector<1x128x128xbf16>
    %20 = vector.shape_cast %19 : vector<1x128x128xbf16> to vector<128x128xbf16>
    %cst_28 = arith.constant dense<0.000000e+00> : vector<64x128xf32>
    %21 = tpu.matmul %18, %20, %cst_28 {dimension_numbers = #tpu.dot_dimension_numbers<[1], [0], [0], [1], [0, 0, 1, 1], [], []>} : vector<64x128xbf16>, vector<128x128xbf16>, vector<64x128xf32> -> vector<64x128xf32>
    %c0_29 = arith.constant 0 : index
    %c0_30 = arith.constant 0 : index
    %22 = vector.load %arg5[%c0_29, %c0_30] : memref<64x128xf32, #tpu.memory_space<vmem>>, vector<64x128xf32>
    %23 = arith.addf %22, %21 : vector<64x128xf32>
    %c0_31 = arith.constant 0 : index
    %c0_32 = arith.constant 0 : index
    %24 = vector.load %arg5[%c0_31, %c0_32] : memref<64x128xf32, #tpu.memory_space<vmem>>, vector<64x128xf32>
    tpu.vector_store %arg5[%c0_31, %c0_32], %23 {strides = array<i32>} : memref<64x128xf32, #tpu.memory_space<vmem>>, vector<64x128xf32>,
    %c2_33 = arith.constant 2 : index
    %c0_34 = arith.constant 0 : index
    %c0_35 = arith.constant 0 : index
    %c0_36 = arith.constant 0 : index
    %c0_37 = arith.constant 0 : index
    %25 = vector.load %arg1[%c2_33, %c0_34, %c0_35, %c0_36, %c0_37] : memref<4x1x9x9x128xbf16, #tpu.memory_space<vmem>>, vector<1x1x8x8x128xbf16>
    %26 = vector.shape_cast %25 : vector<1x1x8x8x128xbf16> to vector<8x8x128xbf16>
    %27 = vector.shape_cast %26 : vector<8x8x128xbf16> to vector<64x128xbf16>
    %c3 = arith.constant 3 : index
    %c0_38 = arith.constant 0 : index
    %c0_39 = arith.constant 0 : index
    %28 = vector.load %arg2[%c3, %c0_38, %c0_39] : memref<9x128x128xbf16, #tpu.memory_space<vmem>>, vector<1x128x128xbf16>
    %29 = vector.shape_cast %28 : vector<1x128x128xbf16> to vector<128x128xbf16>
    %cst_40 = arith.constant dense<0.000000e+00> : vector<64x128xf32>
    %30 = tpu.matmul %27, %29, %cst_40 {dimension_numbers = #tpu.dot_dimension_numbers<[1], [0], [0], [1], [0, 0, 1, 1], [], []>} : vector<64x128xbf16>, vector<128x128xbf16>, vector<64x128xf32> -> vector<64x128xf32>
    %c0_41 = arith.constant 0 : index
    %c0_42 = arith.constant 0 : index
    %31 = vector.load %arg5[%c0_41, %c0_42] : memref<64x128xf32, #tpu.memory_space<vmem>>, vector<64x128xf32>
    %32 = arith.addf %31, %30 : vector<64x128xf32>
    %c0_43 = arith.constant 0 : index
    %c0_44 = arith.constant 0 : index
    %33 = vector.load %arg5[%c0_43, %c0_44] : memref<64x128xf32, #tpu.memory_space<vmem>>, vector<64x128xf32>
    tpu.vector_store %arg5[%c0_43, %c0_44], %32 {strides = array<i32>} : memref<64x128xf32, #tpu.memory_space<vmem>>, vector<64x128xf32>,
    %c3_45 = arith.constant 3 : index
    %c0_46 = arith.constant 0 : index
    %c0_47 = arith.constant 0 : index
    %c0_48 = arith.constant 0 : index
    %c0_49 = arith.constant 0 : index
    %34 = vector.load %arg1[%c3_45, %c0_46, %c0_47, %c0_48, %c0_49] : memref<4x1x9x9x128xbf16, #tpu.memory_space<vmem>>, vector<1x1x8x8x128xbf16>
    %35 = vector.shape_cast %34 : vector<1x1x8x8x128xbf16> to vector<8x8x128xbf16>
    %36 = vector.shape_cast %35 : vector<8x8x128xbf16> to vector<64x128xbf16>
    %c4 = arith.constant 4 : index
    %c0_50 = arith.constant 0 : index
    %c0_51 = arith.constant 0 : index
    %37 = vector.load %arg2[%c4, %c0_50, %c0_51] : memref<9x128x128xbf16, #tpu.memory_space<vmem>>, vector<1x128x128xbf16>
    %38 = vector.shape_cast %37 : vector<1x128x128xbf16> to vector<128x128xbf16>
    %cst_52 = arith.constant dense<0.000000e+00> : vector<64x128xf32>
    %39 = tpu.matmul %36, %38, %cst_52 {dimension_numbers = #tpu.dot_dimension_numbers<[1], [0], [0], [1], [0, 0, 1, 1], [], []>} : vector<64x128xbf16>, vector<128x128xbf16>, vector<64x128xf32> -> vector<64x128xf32>
    %c0_53 = arith.constant 0 : index
    %c0_54 = arith.constant 0 : index
    %40 = vector.load %arg5[%c0_53, %c0_54] : memref<64x128xf32, #tpu.memory_space<vmem>>, vector<64x128xf32>
    %41 = arith.addf %40, %39 : vector<64x128xf32>
    %c0_55 = arith.constant 0 : index
    %c0_56 = arith.constant 0 : index
    %42 = vector.load %arg5[%c0_55, %c0_56] : memref<64x128xf32, #tpu.memory_space<vmem>>, vector<64x128xf32>
    tpu.vector_store %arg5[%c0_55, %c0_56], %41 {strides = array<i32>} : memref<64x128xf32, #tpu.memory_space<vmem>>, vector<64x128xf32>,
    %c2_57 = arith.constant 2 : index
    %c0_58 = arith.constant 0 : index
    %c0_59 = arith.constant 0 : index
    %c1_60 = arith.constant 1 : index
    %c0_61 = arith.constant 0 : index
    %43 = vector.load %arg1[%c2_57, %c0_58, %c0_59, %c1_60, %c0_61] : memref<4x1x9x9x128xbf16, #tpu.memory_space<vmem>>, vector<1x1x8x8x128xbf16>
    %44 = vector.shape_cast %43 : vector<1x1x8x8x128xbf16> to vector<8x8x128xbf16>
    %45 = vector.shape_cast %44 : vector<8x8x128xbf16> to vector<64x128xbf16>
    %c5 = arith.constant 5 : index
    %c0_62 = arith.constant 0 : index
    %c0_63 = arith.constant 0 : index
    %46 = vector.load %arg2[%c5, %c0_62, %c0_63] : memref<9x128x128xbf16, #tpu.memory_space<vmem>>, vector<1x128x128xbf16>
    %47 = vector.shape_cast %46 : vector<1x128x128xbf16> to vector<128x128xbf16>
    %cst_64 = arith.constant dense<0.000000e+00> : vector<64x128xf32>
    %48 = tpu.matmul %45, %47, %cst_64 {dimension_numbers = #tpu.dot_dimension_numbers<[1], [0], [0], [1], [0, 0, 1, 1], [], []>} : vector<64x128xbf16>, vector<128x128xbf16>, vector<64x128xf32> -> vector<64x128xf32>
    %c0_65 = arith.constant 0 : index
    %c0_66 = arith.constant 0 : index
    %49 = vector.load %arg5[%c0_65, %c0_66] : memref<64x128xf32, #tpu.memory_space<vmem>>, vector<64x128xf32>
    %50 = arith.addf %49, %48 : vector<64x128xf32>
    %c0_67 = arith.constant 0 : index
    %c0_68 = arith.constant 0 : index
    %51 = vector.load %arg5[%c0_67, %c0_68] : memref<64x128xf32, #tpu.memory_space<vmem>>, vector<64x128xf32>
    tpu.vector_store %arg5[%c0_67, %c0_68], %50 {strides = array<i32>} : memref<64x128xf32, #tpu.memory_space<vmem>>, vector<64x128xf32>,
    %c0_69 = arith.constant 0 : index
    %c0_70 = arith.constant 0 : index
    %c1_71 = arith.constant 1 : index
    %c0_72 = arith.constant 0 : index
    %c0_73 = arith.constant 0 : index
    %52 = vector.load %arg1[%c0_69, %c0_70, %c1_71, %c0_72, %c0_73] : memref<4x1x9x9x128xbf16, #tpu.memory_space<vmem>>, vector<1x1x8x8x128xbf16>
    %53 = vector.shape_cast %52 : vector<1x1x8x8x128xbf16> to vector<8x8x128xbf16>
    %54 = vector.shape_cast %53 : vector<8x8x128xbf16> to vector<64x128xbf16>
    %c6 = arith.constant 6 : index
    %c0_74 = arith.constant 0 : index
    %c0_75 = arith.constant 0 : index
    %55 = vector.load %arg2[%c6, %c0_74, %c0_75] : memref<9x128x128xbf16, #tpu.memory_space<vmem>>, vector<1x128x128xbf16>
    %56 = vector.shape_cast %55 : vector<1x128x128xbf16> to vector<128x128xbf16>
    %cst_76 = arith.constant dense<0.000000e+00> : vector<64x128xf32>
    %57 = tpu.matmul %54, %56, %cst_76 {dimension_numbers = #tpu.dot_dimension_numbers<[1], [0], [0], [1], [0, 0, 1, 1], [], []>} : vector<64x128xbf16>, vector<128x128xbf16>, vector<64x128xf32> -> vector<64x128xf32>
    %c0_77 = arith.constant 0 : index
    %c0_78 = arith.constant 0 : index
    %58 = vector.load %arg5[%c0_77, %c0_78] : memref<64x128xf32, #tpu.memory_space<vmem>>, vector<64x128xf32>
    %59 = arith.addf %58, %57 : vector<64x128xf32>
    %c0_79 = arith.constant 0 : index
    %c0_80 = arith.constant 0 : index
    %60 = vector.load %arg5[%c0_79, %c0_80] : memref<64x128xf32, #tpu.memory_space<vmem>>, vector<64x128xf32>
    tpu.vector_store %arg5[%c0_79, %c0_80], %59 {strides = array<i32>} : memref<64x128xf32, #tpu.memory_space<vmem>>, vector<64x128xf32>,
    %c1_81 = arith.constant 1 : index
    %c0_82 = arith.constant 0 : index
    %c1_83 = arith.constant 1 : index
    %c0_84 = arith.constant 0 : index
    %c0_85 = arith.constant 0 : index
    %61 = vector.load %arg1[%c1_81, %c0_82, %c1_83, %c0_84, %c0_85] : memref<4x1x9x9x128xbf16, #tpu.memory_space<vmem>>, vector<1x1x8x8x128xbf16>
    %62 = vector.shape_cast %61 : vector<1x1x8x8x128xbf16> to vector<8x8x128xbf16>
    %63 = vector.shape_cast %62 : vector<8x8x128xbf16> to vector<64x128xbf16>
    %c7 = arith.constant 7 : index
    %c0_86 = arith.constant 0 : index
    %c0_87 = arith.constant 0 : index
    %64 = vector.load %arg2[%c7, %c0_86, %c0_87] : memref<9x128x128xbf16, #tpu.memory_space<vmem>>, vector<1x128x128xbf16>
    %65 = vector.shape_cast %64 : vector<1x128x128xbf16> to vector<128x128xbf16>
    %cst_88 = arith.constant dense<0.000000e+00> : vector<64x128xf32>
    %66 = tpu.matmul %63, %65, %cst_88 {dimension_numbers = #tpu.dot_dimension_numbers<[1], [0], [0], [1], [0, 0, 1, 1], [], []>} : vector<64x128xbf16>, vector<128x128xbf16>, vector<64x128xf32> -> vector<64x128xf32>
    %c0_89 = arith.constant 0 : index
    %c0_90 = arith.constant 0 : index
    %67 = vector.load %arg5[%c0_89, %c0_90] : memref<64x128xf32, #tpu.memory_space<vmem>>, vector<64x128xf32>
    %68 = arith.addf %67, %66 : vector<64x128xf32>
    %c0_91 = arith.constant 0 : index
    %c0_92 = arith.constant 0 : index
    %69 = vector.load %arg5[%c0_91, %c0_92] : memref<64x128xf32, #tpu.memory_space<vmem>>, vector<64x128xf32>
    tpu.vector_store %arg5[%c0_91, %c0_92], %68 {strides = array<i32>} : memref<64x128xf32, #tpu.memory_space<vmem>>, vector<64x128xf32>,
    %c0_93 = arith.constant 0 : index
    %c0_94 = arith.constant 0 : index
    %c1_95 = arith.constant 1 : index
    %c1_96 = arith.constant 1 : index
    %c0_97 = arith.constant 0 : index
    %70 = vector.load %arg1[%c0_93, %c0_94, %c1_95, %c1_96, %c0_97] : memref<4x1x9x9x128xbf16, #tpu.memory_space<vmem>>, vector<1x1x8x8x128xbf16>
    %71 = vector.shape_cast %70 : vector<1x1x8x8x128xbf16> to vector<8x8x128xbf16>
    %72 = vector.shape_cast %71 : vector<8x8x128xbf16> to vector<64x128xbf16>
    %c8 = arith.constant 8 : index
    %c0_98 = arith.constant 0 : index
    %c0_99 = arith.constant 0 : index
    %73 = vector.load %arg2[%c8, %c0_98, %c0_99] : memref<9x128x128xbf16, #tpu.memory_space<vmem>>, vector<1x128x128xbf16>
    %74 = vector.shape_cast %73 : vector<1x128x128xbf16> to vector<128x128xbf16>
    %cst_100 = arith.constant dense<0.000000e+00> : vector<64x128xf32>
    %75 = tpu.matmul %72, %74, %cst_100 {dimension_numbers = #tpu.dot_dimension_numbers<[1], [0], [0], [1], [0, 0, 1, 1], [], []>} : vector<64x128xbf16>, vector<128x128xbf16>, vector<64x128xf32> -> vector<64x128xf32>
    %c0_101 = arith.constant 0 : index
    %c0_102 = arith.constant 0 : index
    %76 = vector.load %arg5[%c0_101, %c0_102] : memref<64x128xf32, #tpu.memory_space<vmem>>, vector<64x128xf32>
    %77 = arith.addf %76, %75 : vector<64x128xf32>
    %c0_103 = arith.constant 0 : index
    %c0_104 = arith.constant 0 : index
    %78 = vector.load %arg5[%c0_103, %c0_104] : memref<64x128xf32, #tpu.memory_space<vmem>>, vector<64x128xf32>
    tpu.vector_store %arg5[%c0_103, %c0_104], %77 {strides = array<i32>} : memref<64x128xf32, #tpu.memory_space<vmem>>, vector<64x128xf32>,
    %c0_105 = arith.constant 0 : index
    %c0_106 = arith.constant 0 : index
    %79 = vector.load %arg5[%c0_105, %c0_106] : memref<64x128xf32, #tpu.memory_space<vmem>>, vector<64x128xf32>
    %c0_107 = arith.constant 0 : index
    %c0_108 = arith.constant 0 : index
    %80 = vector.load %arg3[%c0_107, %c0_108] : memref<1x128xf32, #tpu.memory_space<vmem>>, vector<1x128xf32>
    %81 = vector.broadcast %80 : vector<1x128xf32> to vector<64x128xf32>
    %82 = arith.addf %79, %81 : vector<64x128xf32>
    %cst_109 = arith.constant 0.000000e+00 : f32
    %83 = vector.broadcast %cst_109 : f32 to vector<64x128xf32>
    %84 = arith.maximumf %82, %83 : vector<64x128xf32>
    %85 = arith.truncf %84 : vector<64x128xf32> to vector<64x128xbf16>
    %c0_110 = arith.constant 0 : index
    %c0_111 = arith.constant 0 : index
    %c0_112 = arith.constant 0 : index
    %86 = vector.load %arg4[%c0_110, %c0_111, %c0_112] : memref<1x64x128xbf16, #tpu.memory_space<vmem>>, vector<1x64x128xbf16>
    %87 = vector.shape_cast %86 : vector<1x64x128xbf16> to vector<64x128xbf16>
    %88 = vector.shape_cast %85 : vector<64x128xbf16> to vector<1x64x128xbf16>
    tpu.vector_store %arg4[%c0_110, %c0_111, %c0_112], %88 {strides = array<i32>} : memref<1x64x128xbf16, #tpu.memory_space<vmem>>, vector<1x64x128xbf16>,
    return
  }
  func.func @transform_0(%arg0: i32) -> (i32, i32, i32, i32, i32) {
    %c0_i32 = arith.constant 0 : i32
    %c0_i32_0 = arith.constant 0 : i32
    %c0_i32_1 = arith.constant 0 : i32
    %c0_i32_2 = arith.constant 0 : i32
    %c0_i32_3 = arith.constant 0 : i32
    return %c0_i32, %arg0, %c0_i32_0, %c0_i32_1, %c0_i32_2 : i32, i32, i32, i32, i32
  }
  func.func @transform_1(%arg0: i32) -> (i32, i32, i32) {
    %c0_i32 = arith.constant 0 : i32
    %c0_i32_0 = arith.constant 0 : i32
    %c0_i32_1 = arith.constant 0 : i32
    %c0_i32_2 = arith.constant 0 : i32
    return %c0_i32, %c0_i32_0, %c0_i32_1 : i32, i32, i32
  }
  func.func @transform_2(%arg0: i32) -> (i32, i32) {
    %c0_i32 = arith.constant 0 : i32
    %c0_i32_0 = arith.constant 0 : i32
    %c0_i32_1 = arith.constant 0 : i32
    return %c0_i32, %c0_i32_0 : i32, i32
  }
  func.func @transform_3(%arg0: i32) -> (i32, i32, i32) {
    %c0_i32 = arith.constant 0 : i32
    %c0_i32_0 = arith.constant 0 : i32
    %c0_i32_1 = arith.constant 0 : i32
    return %arg0, %c0_i32, %c0_i32_0 : i32, i32, i32
  }
}

module attributes {stable_mosaic.version = 11 : i64} {
  func.func @_conv_kernel(%arg0: i32, %arg1: memref<1x1x8x8x256xbf16, #tpu.memory_space<vmem>>, %arg2: memref<1x256x128xbf16, #tpu.memory_space<vmem>>, %arg3: memref<1x128xf32, #tpu.memory_space<vmem>>, %arg4: memref<1x64x128xbf16, #tpu.memory_space<vmem>>, %arg5: memref<64x128xf32, #tpu.memory_space<vmem>>) attributes {dimension_semantics = [#tpu.dimension_semantics<parallel>], iteration_bounds = array<i64: 2>, scalar_prefetch = 0 : i64, scratch_operands = 1 : i64, tpu.core_type = #tpu.core_type<tc>, window_params = [{transform_indices = @transform_0, window_bounds = array<i64: 1, 1, 8, 8, 256>}, {pipeline_mode = #tpu.pipeline_mode<synchronous>, transform_indices = @transform_1, window_bounds = array<i64: 1, 256, 128>}, {pipeline_mode = #tpu.pipeline_mode<synchronous>, transform_indices = @transform_2, window_bounds = array<i64: 1, 128>}, {transform_indices = @transform_3, window_bounds = array<i64: 1, 64, 128>}]} {
    %c0 = arith.constant 0 : index
    %c0_0 = arith.constant 0 : index
    %c0_1 = arith.constant 0 : index
    %c0_2 = arith.constant 0 : index
    %c0_3 = arith.constant 0 : index
    %0 = vector.load %arg1[%c0, %c0_0, %c0_1, %c0_2, %c0_3] : memref<1x1x8x8x256xbf16, #tpu.memory_space<vmem>>, vector<1x1x8x8x256xbf16>
    %1 = vector.shape_cast %0 : vector<1x1x8x8x256xbf16> to vector<8x8x256xbf16>
    %cst = arith.constant 0.000000e+00 : bf16
    %2 = vector.broadcast %cst : bf16 to vector<8x8x256xbf16>
    %3 = arith.maximumf %1, %2 : vector<8x8x256xbf16>
    %4 = vector.shape_cast %3 : vector<8x8x256xbf16> to vector<64x256xbf16>
    %c0_4 = arith.constant 0 : index
    %c0_5 = arith.constant 0 : index
    %c0_6 = arith.constant 0 : index
    %5 = vector.load %arg2[%c0_4, %c0_5, %c0_6] : memref<1x256x128xbf16, #tpu.memory_space<vmem>>, vector<1x256x128xbf16>
    %6 = vector.shape_cast %5 : vector<1x256x128xbf16> to vector<256x128xbf16>
    %cst_7 = arith.constant dense<0.000000e+00> : vector<64x128xf32>
    %7 = tpu.matmul %4, %6, %cst_7 {dimension_numbers = #tpu.dot_dimension_numbers<[1], [0], [0], [1], [0, 0, 1, 1], [], []>} : vector<64x256xbf16>, vector<256x128xbf16>, vector<64x128xf32> -> vector<64x128xf32>
    %c0_8 = arith.constant 0 : index
    %c0_9 = arith.constant 0 : index
    %8 = vector.load %arg5[%c0_8, %c0_9] : memref<64x128xf32, #tpu.memory_space<vmem>>, vector<64x128xf32>
    tpu.vector_store %arg5[%c0_8, %c0_9], %7 {strides = array<i32>} : memref<64x128xf32, #tpu.memory_space<vmem>>, vector<64x128xf32>,
    %c0_10 = arith.constant 0 : index
    %c0_11 = arith.constant 0 : index
    %9 = vector.load %arg5[%c0_10, %c0_11] : memref<64x128xf32, #tpu.memory_space<vmem>>, vector<64x128xf32>
    %c0_12 = arith.constant 0 : index
    %c0_13 = arith.constant 0 : index
    %10 = vector.load %arg3[%c0_12, %c0_13] : memref<1x128xf32, #tpu.memory_space<vmem>>, vector<1x128xf32>
    %11 = vector.broadcast %10 : vector<1x128xf32> to vector<64x128xf32>
    %12 = arith.addf %9, %11 : vector<64x128xf32>
    %13 = arith.truncf %12 : vector<64x128xf32> to vector<64x128xbf16>
    %c0_14 = arith.constant 0 : index
    %c0_15 = arith.constant 0 : index
    %c0_16 = arith.constant 0 : index
    %14 = vector.load %arg4[%c0_14, %c0_15, %c0_16] : memref<1x64x128xbf16, #tpu.memory_space<vmem>>, vector<1x64x128xbf16>
    %15 = vector.shape_cast %14 : vector<1x64x128xbf16> to vector<64x128xbf16>
    %16 = vector.shape_cast %13 : vector<64x128xbf16> to vector<1x64x128xbf16>
    tpu.vector_store %arg4[%c0_14, %c0_15, %c0_16], %16 {strides = array<i32>} : memref<1x64x128xbf16, #tpu.memory_space<vmem>>, vector<1x64x128xbf16>,
    return
  }
  func.func @transform_0(%arg0: i32) -> (i32, i32, i32, i32, i32) {
    %c0_i32 = arith.constant 0 : i32
    %c0_i32_0 = arith.constant 0 : i32
    %c0_i32_1 = arith.constant 0 : i32
    %c0_i32_2 = arith.constant 0 : i32
    %c0_i32_3 = arith.constant 0 : i32
    return %c0_i32, %arg0, %c0_i32_0, %c0_i32_1, %c0_i32_2 : i32, i32, i32, i32, i32
  }
  func.func @transform_1(%arg0: i32) -> (i32, i32, i32) {
    %c0_i32 = arith.constant 0 : i32
    %c0_i32_0 = arith.constant 0 : i32
    %c0_i32_1 = arith.constant 0 : i32
    %c0_i32_2 = arith.constant 0 : i32
    return %c0_i32, %c0_i32_0, %c0_i32_1 : i32, i32, i32
  }
  func.func @transform_2(%arg0: i32) -> (i32, i32) {
    %c0_i32 = arith.constant 0 : i32
    %c0_i32_0 = arith.constant 0 : i32
    %c0_i32_1 = arith.constant 0 : i32
    return %c0_i32, %c0_i32_0 : i32, i32
  }
  func.func @transform_3(%arg0: i32) -> (i32, i32, i32) {
    %c0_i32 = arith.constant 0 : i32
    %c0_i32_0 = arith.constant 0 : i32
    %c0_i32_1 = arith.constant 0 : i32
    return %arg0, %c0_i32, %c0_i32_0 : i32, i32, i32
  }
}

</mosaic_0001>

<bundles_post_ra>
// kernel: new_model_forward.14
= control target key start
LH: loop header
LB: loop body
LE: loop exit
PB: predicated region body
PF: predicated region fallthrough
CT: control target
= control target key end

     0   :  { %s630_s12 = smov 0   ;;  %s691_s0 = inlined_call_operand.vmem [shape: bf16[1,2,8,8,128], index: 0, kind: input, shape index: {}]   ;;  %s692_s1 = inlined_call_operand.vmem [shape: bf16[1,128,128], index: 1, kind: input, shape index: {}]   ;;  %s693_s2 = inlined_call_operand.vmem [shape: f32[1,128], index: 2, kind: input, shape index: {}]   ;;  %s694_s3 = inlined_call_operand.vmem [shape: bf16[2,64,128], index: 3, kind: output, shape index: {}]  }
   0x1 LB: > { %s467_s13 = sadd.s32 4294967295, %s607_s12   ;;  %p471_p0 = scmp.ge.s32.totalorder %s607_s12, 1  ;;  %s607_s12 = sphi %s630_s12, %s13_s12  }
   0x2   : > { %p137_p1 = scmp.lt.s32.totalorder %s607_s12, 3 }
   0x4   : > { %p138_p2 = pnand %p471_p0, %p137_p1 }
   0x5   : > { %v593_v0 = vld [vmem:[%s692_s1] sm:$0xff] (!%p138_p2)   ;;  %p161_p3 = scmp.lt.s32.totalorder (!%p138_p2), %s467_s13, 1  ;;  %v594_v1 = vld [vmem:[%s692_s1 + $0x8] sm:$0xff] (!%p138_p2)   ;;  %v595_v2 = vld [vmem:[%s692_s1 + $0x10] sm:$0xff] (!%p138_p2)   ;;  %v609_v7 = vmov (!%p138_p2), 0  }
   0x6   : > { %141 = sbr.rel (%p138_p2) target bundleno = 258 (0x102), region = 32  ;;  %544 = vmatprep.subr.bf16.mxu0 (!%p138_p2), %v593_v0  ;;  %568 = vmatprep.subr.bf16.mxu1 (!%p138_p2), %v593_v0  ;;  %v596_v3 = vld [vmem:[%s692_s1 + $0x18] sm:$0xff] (!%p138_p2)   ;;  %v597_v14 = vld [vmem:[%s692_s1 + $0x20] sm:$0xff] (!%p138_p2)   ;;  %v598_v16 = vld [vmem:[%s692_s1 + $0x28] sm:$0xff] (!%p138_p2)  }
   0x7   : > { %545 = vmatpush3.bf16.msra.mxu0 (!%p138_p2), %v593_v0  ;;  %576 = vmatpush3.bf16.msra.mxu1 (!%p138_p2), %v593_v0  ;;  %v599_v17 = vld [vmem:[%s692_s1 + $0x30] sm:$0xff] (!%p138_p2)   ;;  %v600_v22 = vld [vmem:[%s692_s1 + $0x38] sm:$0xff] (!%p138_p2)   ;;  %v488_v30 = vld [vmem:[%s693_s2] ss:$0 sm:$0xff] (!%p138_p2) }
   0x8   : > { %546 = vmatprep.subr.bf16.mxu0 (!%p138_p2), %v594_v1  ;;  %569 = vmatprep.subr.bf16.mxu1 (!%p138_p2), %v594_v1 }
   0xb   : > { %547 = vmatpush3.bf16.msra.mxu0 (!%p138_p2), %v594_v1  ;;  %577 = vmatpush3.bf16.msra.mxu1 (!%p138_p2), %v594_v1 }
   0xc   : > { %548 = vmatprep.subr.bf16.mxu0 (!%p138_p2), %v595_v2  ;;  %570 = vmatprep.subr.bf16.mxu1 (!%p138_p2), %v595_v2 }
   0xd   : > { %s696_s13 = smov (!%p161_p3, %s467_s13), 1 }
   0xe   : > { %s499_s20 = sshll.u32 %s696_s13, 5 }
   0xf   : > { %s655_s23 = scalar_lea.vmem %s691_s0, %s499_s20  ;;  %549 = vmatpush3.bf16.msra.mxu0 %v595_v2  ;;  %578 = vmatpush3.bf16.msra.mxu1 %v595_v2  ;;  %s170_s11 = scalar_lea.vmem %s694_s3, %s499_s20 }
  0x10   : > { %v172_v4 = vld [vmem:[%s655_s23] sm:$0xf]  ;;  %v173_v5 = vld [vmem:[%s655_s23 + $0x4] sm:$0xf]  ;;  %v176_v6 = vld [vmem:[%s655_s23 + $0x10] sm:$0xf]  ;;  %550 = vmatprep.subr.bf16.mxu0 %v596_v3  ;;  %571 = vmatprep.subr.bf16.mxu1 %v596_v3 }
  0x11   : > { %v180_v8 = vmax.bf16 %v609_v7, %v172_v4  ;;  %v181_v9 = vmax.bf16 %v609_v7, %v173_v5  ;;  %v177_v10 = vld [vmem:[%s655_s23 + $0x14] sm:$0xf]  ;;  %v184_v11 = vmax.bf16 %v609_v7, %v176_v6  ;;  %v174_v18 = vld [vmem:[%s655_s23 + $0x8] sm:$0xf]  ;;  %v175_v19 = vld [vmem:[%s655_s23 + $0xc] sm:$0xf] }
  0x12   : > { %v185_v12 = vmax.bf16 %v609_v7, %v177_v10  ;;  %v178_v20 = vld [vmem:[%s655_s23 + $0x18] sm:$0xf]  ;;  %v179_v21 = vld [vmem:[%s655_s23 + $0x1c] sm:$0xf]  ;;  %v182_v23 = vmax.bf16 %v609_v7, %v174_v18  ;;  %v183_v24 = vmax.bf16 %v609_v7, %v175_v19 }
  0x13   : > { %v476_v13 = vcombine.low %v180_v8, %v181_v9  ;;  %551 = vmatpush3.bf16.msra.mxu0 %v596_v3  ;;  %579 = vmatpush3.bf16.msra.mxu1 %v596_v3  ;;  %v186_v25 = vmax.bf16 %v609_v7, %v178_v20  ;;  %v187_v26 = vmax.bf16 %v609_v7, %v179_v21 }
  0x14   : > { %v478_v15 = vcombine.low %v184_v11, %v185_v12  ;;  %552 = vmatprep.subr.bf16.mxu0 %v597_v14  ;;  %572 = vmatprep.subr.bf16.mxu1 %v597_v14  ;;  %v477_v27 = vcombine.low %v182_v23, %v183_v24 }
  0x15   : > { %560 = vmatprep.mubr.bf16.mxu0 %v476_v13  ;;  %v479_v28 = vcombine.low %v186_v25, %v187_v26 }
  0x16   : > { %564 = vmatprep.mubr.bf16.mxu1 %v478_v15 }
  0x17   : > { %553 = vmatpush3.bf16.msra.mxu0 %v597_v14  ;;  %580 = vmatpush3.bf16.msra.mxu1 %v597_v14 }
  0x18   : > { %554 = vmatprep.subr.bf16.mxu0 %v598_v16  ;;  %573 = vmatprep.subr.bf16.mxu1 %v598_v16 }
  0x1b   : > { %555 = vmatpush3.bf16.msra.mxu0 %v598_v16  ;;  %581 = vmatpush3.bf16.msra.mxu1 %v598_v16 }
  0x1c   : > { %556 = vmatprep.subr.bf16.mxu0 %v599_v17  ;;  %574 = vmatprep.subr.bf16.mxu1 %v599_v17 }
  0x1f   : > { %557 = vmatpush3.bf16.msra.mxu0 %v599_v17  ;;  %582 = vmatpush3.bf16.msra.mxu1 %v599_v17 }
  0x20   : > { %558 = vmatprep.subr.bf16.mxu0 %v600_v22  ;;  %575 = vmatprep.subr.bf16.mxu1 %v600_v22 }
  0x23   : > { %559 = vmatpush3.bf16.msra.mxu0 %v600_v22  ;;  %583 = vmatpush3.bf16.msra.mxu1 %v600_v22 }
  0x26   : > { %561 = vmatmul.mubr.bf16.vlgmr.msra.gmra.mrb[0].mxu0 %v477_v27  ;;  %565 = vmatmul.mubr.bf16.vlgmr.msra.gmra.mrb[0].mxu1 %v479_v28 }
  0xf9   : > { %v562_v29 = vpop.f32.mrb[0].mxu0  ;;  %v566_v31 = vpop.f32.mrb[0].mxu1 }
  0xfa   : > { %v310_v32 = vpop.f32.mrb[1].mxu0  ;;  %v326_v33 = vpop.f32.mrb[1].mxu1  ;;  %v366_v36 = vadd.f32 %v562_v29, %v488_v30  ;;  %v370_v37 = vadd.f32 %v566_v31, %v488_v30 }
  0xfb   : > { %v563_v34 = vpop.f32.mrb[2].mxu0  ;;  %v567_v35 = vpop.f32.mrb[2].mxu1  ;;  %v364_v42 = vadd.f32 %v488_v30, %v310_v32  ;;  %v368_v43 = vadd.f32 %v488_v30, %v326_v33 }
  0xfc   : > { %v367_v38 = vadd.f32 %v563_v34, %v488_v30  ;;  %v371_v39 = vadd.f32 %v567_v35, %v488_v30  ;;  %v313_v40 = vpop.f32.mrb[3].mxu0  ;;  %v329_v41 = vpop.f32.mrb[3].mxu1 }
  0xfd   : > { %v365_v44 = vadd.f32 %v488_v30, %v313_v40  ;;  %v369_v45 = vadd.f32 %v488_v30, %v329_v41 }
  0xfe   : > { %v517_v46 = vpack.c.bf16 %v367_v38, %v366_v36  ;;  %v527_v47 = vpack.c.bf16 %v371_v39, %v370_v37 }
  0xff   : > { %v512_v48 = vpack.c.bf16 %v365_v44, %v364_v42  ;;  %v522_v49 = vpack.c.bf16 %v369_v45, %v368_v43 }
 0x100   : > { %529 = vst [vmem:[%s170_s11 + $0x8] sm:$0xff] %v517_v46   ;;  %531 = vst [vmem:[%s170_s11 + $0x18] sm:$0xff] %v527_v47  }
 0x101   : > { %513 = vst [vmem:[%s170_s11] sm:$0xff] %v512_v48   ;;  %530 = vst [vmem:[%s170_s11 + $0x10] sm:$0xff] %v522_v49  }
 0x102 PF: > { %s13_s12 = sadd.s32 1, %s607_s12  }
 0x103   : > { %p10_p4 = scmp.ge.s32.totalorder %s13_s12, 4  }
 0x105   :  { %12 = sbr.rel (!%p10_p4) target bundleno = 1 (0x1), region = 62 }

// kernel: new_model_forward.17
= control target key start
LH: loop header
LB: loop body
LE: loop exit
PB: predicated region body
PF: predicated region fallthrough
CT: control target
= control target key end

     0   :  { %s734_s12 = smov 0   ;;  %s816_s0 = inlined_call_operand.vmem [shape: bf16[1,2,8,8,256], index: 0, kind: input, shape index: {}]   ;;  %s817_s1 = inlined_call_operand.vmem [shape: bf16[1,256,128], index: 1, kind: input, shape index: {}]   ;;  %s818_s2 = inlined_call_operand.vmem [shape: f32[1,128], index: 2, kind: input, shape index: {}]   ;;  %s819_s3 = inlined_call_operand.vmem [shape: bf16[2,64,128], index: 3, kind: output, shape index: {}]  }
   0x1 LB: > { %s547_s13 = sadd.s32 4294967295, %s711_s12   ;;  %p551_p0 = scmp.ge.s32.totalorder %s711_s12, 1  ;;  %s711_s12 = sphi %s734_s12, %s13_s12  }
   0x2   : > { %p137_p1 = scmp.lt.s32.totalorder %s711_s12, 3 }
   0x4   : > { %p138_p2 = pnand %p551_p0, %p137_p1 }
   0x5   : > { %v689_v0 = vld [vmem:[%s817_s1 + $0x40] sm:$0xff] (!%p138_p2)   ;;  %v691_v2 = vld [vmem:[%s817_s1 + $0x48] sm:$0xff] (!%p138_p2)   ;;  %p161_p3 = scmp.lt.s32.totalorder (!%p138_p2), %s547_s13, 1  ;;  %v693_v4 = vld [vmem:[%s817_s1 + $0x50] sm:$0xff] (!%p138_p2)   ;;  %v713_v14 = vmov (!%p138_p2), 0  }
   0x6   : > { %141 = sbr.rel (%p138_p2) target bundleno = 268 (0x10c), region = 32  ;;  %v690_v1 = vld [vmem:[%s817_s1] sm:$0xff] (!%p138_p2)   ;;  %624 = vmatprep.subr.bf16.mxu0 (!%p138_p2), %v689_v0  ;;  %664 = vmatprep.subr.bf16.mxu1 (!%p138_p2), %v689_v0  ;;  %v692_v3 = vld [vmem:[%s817_s1 + $0x8] sm:$0xff] (!%p138_p2)   ;;  %v694_v5 = vld [vmem:[%s817_s1 + $0x10] sm:$0xff] (!%p138_p2)  }
   0x7   : > { %625 = vmatpush3.bf16.msra.mxu0 (!%p138_p2), %v690_v1  ;;  %672 = vmatpush3.bf16.msra.mxu1 (!%p138_p2), %v690_v1  ;;  %v695_v6 = vld [vmem:[%s817_s1 + $0x58] sm:$0xff] (!%p138_p2)   ;;  %v697_v8 = vld [vmem:[%s817_s1 + $0x60] sm:$0xff] (!%p138_p2)   ;;  %v699_v10 = vld [vmem:[%s817_s1 + $0x68] sm:$0xff] (!%p138_p2)  }
   0x8   : > { %626 = vmatprep.subr.bf16.mxu0 (!%p138_p2), %v691_v2  ;;  %665 = vmatprep.subr.bf16.mxu1 (!%p138_p2), %v691_v2  ;;  %v696_v7 = vld [vmem:[%s817_s1 + $0x18] sm:$0xff] (!%p138_p2)   ;;  %v698_v9 = vld [vmem:[%s817_s1 + $0x20] sm:$0xff] (!%p138_p2)   ;;  %v700_v20 = vld [vmem:[%s817_s1 + $0x28] sm:$0xff] (!%p138_p2)  }
   0x9   : > { %v701_v22 = vld [vmem:[%s817_s1 + $0x70] sm:$0xff] (!%p138_p2)   ;;  %v703_v25 = vld [vmem:[%s817_s1 + $0x78] sm:$0xff] (!%p138_p2)   ;;  %v580_v49 = vld [vmem:[%s818_s2] ss:$0 sm:$0xff] (!%p138_p2) }
   0xa   : > { %v702_v24 = vld [vmem:[%s817_s1 + $0x30] sm:$0xff] (!%p138_p2)   ;;  %v704_v31 = vld [vmem:[%s817_s1 + $0x38] sm:$0xff] (!%p138_p2)  }
   0xb   : > { %627 = vmatpush3.bf16.msra.mxu0 (!%p138_p2), %v692_v3  ;;  %673 = vmatpush3.bf16.msra.mxu1 (!%p138_p2), %v692_v3 }
   0xc   : > { %628 = vmatprep.subr.bf16.mxu0 (!%p138_p2), %v693_v4  ;;  %666 = vmatprep.subr.bf16.mxu1 (!%p138_p2), %v693_v4 }
   0xd   : > { %s821_s13 = smov (!%p161_p3, %s547_s13), 1 }
   0xe   : > { %s591_s28 = sshll.u32 %s821_s13, 6  ;;  %s592_s27 = sshll.u32 %s821_s13, 5 }
   0xf   : > { %629 = vmatpush3.bf16.msra.mxu0 %v694_v5  ;;  %674 = vmatpush3.bf16.msra.mxu1 %v694_v5  ;;  %s775_s8 = scalar_lea.vmem %s816_s0, %s591_s28  ;;  %s170_s30 = scalar_lea.vmem %s819_s3, %s592_s27 }
  0x10   : > { %630 = vmatprep.subr.bf16.mxu0 %v695_v6  ;;  %667 = vmatprep.subr.bf16.mxu1 %v695_v6  ;;  %v172_v11 = vld [vmem:[%s775_s8] sm:$0xff]  ;;  %v173_v12 = vld [vmem:[%s775_s8 + $0x8] sm:$0xff]  ;;  %v174_v26 = vld [vmem:[%s775_s8 + $0x10] sm:$0xff] }
  0x11   : > { %v176_v13 = vld [vmem:[%s775_s8 + $0x20] sm:$0xff]  ;;  %v180_v15 = vmax.bf16 %v713_v14, %v172_v11  ;;  %v181_v16 = vmax.bf16 %v713_v14, %v173_v12  ;;  %v177_v17 = vld [vmem:[%s775_s8 + $0x28] sm:$0xff]  ;;  %v175_v27 = vld [vmem:[%s775_s8 + $0x18] sm:$0xff]  ;;  %v182_v30 = vmax.bf16 %v713_v14, %v174_v26 }
  0x12   : > { %v184_v18 = vmax.bf16 %v713_v14, %v176_v13  ;;  %v185_v19 = vmax.bf16 %v713_v14, %v177_v17  ;;  %v178_v28 = vld [vmem:[%s775_s8 + $0x30] sm:$0xff]  ;;  %v179_v29 = vld [vmem:[%s775_s8 + $0x38] sm:$0xff]  ;;  %v183_v32 = vmax.bf16 %v713_v14, %v175_v27 }
  0x13   : > { %631 = vmatpush3.bf16.msra.mxu0 %v696_v7  ;;  %675 = vmatpush3.bf16.msra.mxu1 %v696_v7  ;;  %v557_v21 = vcombine.high %v180_v15, %v181_v16  ;;  %v186_v33 = vmax.bf16 %v713_v14, %v178_v28  ;;  %v187_v34 = vmax.bf16 %v713_v14, %v179_v29 }
  0x14   : > { %632 = vmatprep.subr.bf16.mxu0 %v697_v8  ;;  %668 = vmatprep.subr.bf16.mxu1 %v697_v8  ;;  %v561_v23 = vcombine.high %v184_v18, %v185_v19  ;;  %v556_v35 = vcombine.low %v180_v15, %v181_v16  ;;  %v560_v36 = vcombine.low %v184_v18, %v185_v19 }
  0x15   : > { %388 = vmatprep.mubr.bf16.mxu0 %v557_v21  ;;  %v559_v37 = vcombine.high %v182_v30, %v183_v32  ;;  %v563_v38 = vcombine.high %v186_v33, %v187_v34  ;;  %v558_v39 = vcombine.low %v182_v30, %v183_v32  ;;  %v562_v40 = vcombine.low %v186_v33, %v187_v34 }
  0x16   : > { %404 = vmatprep.mubr.bf16.mxu1 %v561_v23 }
  0x17   : > { %633 = vmatpush3.bf16.msra.mxu0 %v698_v9  ;;  %676 = vmatpush3.bf16.msra.mxu1 %v698_v9 }
  0x18   : > { %634 = vmatprep.subr.bf16.mxu0 %v699_v10  ;;  %669 = vmatprep.subr.bf16.mxu1 %v699_v10 }
  0x1b   : > { %635 = vmatpush3.bf16.msra.mxu0 %v700_v20  ;;  %677 = vmatpush3.bf16.msra.mxu1 %v700_v20 }
  0x1c   : > { %636 = vmatprep.subr.bf16.mxu0 %v701_v22  ;;  %670 = vmatprep.subr.bf16.mxu1 %v701_v22 }
  0x1f   : > { %637 = vmatpush3.bf16.msra.mxu0 %v702_v24  ;;  %678 = vmatpush3.bf16.msra.mxu1 %v702_v24 }
  0x20   : > { %638 = vmatprep.subr.bf16.mxu0 %v703_v25  ;;  %671 = vmatprep.subr.bf16.mxu1 %v703_v25 }
  0x23   : > { %639 = vmatpush3.bf16.msra.mxu0 %v704_v31  ;;  %679 = vmatpush3.bf16.msra.mxu1 %v704_v31 }
  0x26   : > { %389 = vmatmul.mubr.bf16.vlgmr.msra.gmra.mrb[0].mxu0 %v556_v35  ;;  %405 = vmatmul.mubr.bf16.vlgmr.msra.gmra.mrb[0].mxu1 %v560_v36 }
  0x27   : > { %396 = vmatprep.mubr.bf16.mxu0 %v559_v37  ;;  %412 = vmatprep.mubr.bf16.mxu1 %v563_v38 }
  0x2e   : > { %397 = vmatmul.mubr.bf16.gmra.mrb[4].mxu0 %v558_v39  ;;  %413 = vmatmul.mubr.bf16.gmra.mrb[4].mxu1 %v562_v40 }
  0xf9   : > { %v640_v41 = vpop.f32.mrb[0].mxu0  ;;  %v652_v42 = vpop.f32.mrb[0].mxu1 }
  0xfa   : > { %v641_v43 = vpop.f32.mrb[1].mxu0  ;;  %v653_v44 = vpop.f32.mrb[1].mxu1 }
  0xfb   : > { %v642_v45 = vadd.f32 %v641_v43, %v640_v41  ;;  %v654_v46 = vadd.f32 %v653_v44, %v652_v42  ;;  %v643_v47 = vpop.f32.mrb[2].mxu0  ;;  %v655_v48 = vpop.f32.mrb[2].mxu1 }
  0xfc   : > { %v644_v50 = vpop.f32.mrb[3].mxu0  ;;  %v656_v51 = vpop.f32.mrb[3].mxu1 }
  0xfd   : > { %v645_v52 = vadd.f32 %v644_v50, %v643_v47  ;;  %v657_v53 = vadd.f32 %v656_v51, %v655_v48  ;;  %v444_v54 = vadd.f32 %v642_v45, %v580_v49  ;;  %v448_v55 = vadd.f32 %v654_v46, %v580_v49 }
  0xff   : > { %v445_v56 = vadd.f32 %v645_v52, %v580_v49  ;;  %v449_v57 = vadd.f32 %v657_v53, %v580_v49 }
 0x101   : > { %v604_v58 = vpack.c.bf16 %v445_v56, %v444_v54  ;;  %v614_v59 = vpack.c.bf16 %v449_v57, %v448_v55  ;;  %v646_v60 = vpop.f32.mrb[4].mxu0  ;;  %v658_v61 = vpop.f32.mrb[4].mxu1 }
 0x102   : > { %v647_v62 = vpop.f32.mrb[5].mxu0  ;;  %v659_v63 = vpop.f32.mrb[5].mxu1 }
 0x103   : > { %605 = vst [vmem:[%s170_s30] sm:$0xff] %v604_v58   ;;  %622 = vst [vmem:[%s170_s30 + $0x10] sm:$0xff] %v614_v59   ;;  %v648_v0 = vadd.f32 %v647_v62, %v646_v60  ;;  %v660_v1 = vadd.f32 %v659_v63, %v658_v61  ;;  %v649_v2 = vpop.f32.mrb[6].mxu0  ;;  %v661_v3 = vpop.f32.mrb[6].mxu1 }
 0x104   : > { %v650_v4 = vpop.f32.mrb[7].mxu0  ;;  %v662_v5 = vpop.f32.mrb[7].mxu1 }
 0x105   : > { %v651_v6 = vadd.f32 %v650_v4, %v649_v2  ;;  %v663_v7 = vadd.f32 %v662_v5, %v661_v3  ;;  %v446_v8 = vadd.f32 %v648_v0, %v580_v49  ;;  %v450_v9 = vadd.f32 %v660_v1, %v580_v49 }
 0x107   : > { %v447_v10 = vadd.f32 %v651_v6, %v580_v49  ;;  %v451_v11 = vadd.f32 %v663_v7, %v580_v49 }
 0x109   : > { %v609_v12 = vpack.c.bf16 %v447_v10, %v446_v8  ;;  %v619_v13 = vpack.c.bf16 %v451_v11, %v450_v9 }
 0x10b   : > { %621 = vst [vmem:[%s170_s30 + $0x8] sm:$0xff] %v609_v12   ;;  %623 = vst [vmem:[%s170_s30 + $0x18] sm:$0xff] %v619_v13  }
 0x10c PF: > { %s13_s12 = sadd.s32 1, %s711_s12  }
 0x10d   : > { %p10_p4 = scmp.ge.s32.totalorder %s13_s12, 4  }
 0x10f   :  { %12 = sbr.rel (!%p10_p4) target bundleno = 1 (0x1), region = 62 }

// kernel: new_model_forward.13
= control target key start
LH: loop header
LB: loop body
LE: loop exit
PB: predicated region body
PF: predicated region fallthrough
CT: control target
= control target key end

     0   :  { %s3561_s12 = smov 0   ;;  %s3563_s13 = smov 0   ;;  %s4038_s0 = inlined_call_operand.vmem [shape: bf16[4,2,9,9,128], index: 0, kind: input, shape index: {}]   ;;  %s4039_s1 = inlined_call_operand.vmem [shape: bf16[9,128,128], index: 1, kind: input, shape index: {}]   ;;  %s4040_s2 = inlined_call_operand.vmem [shape: f32[1,128], index: 2, kind: input, shape index: {}]   ;;  %s4041_s3 = inlined_call_operand.vmem [shape: bf16[2,64,128], index: 3, kind: output, shape index: {}]  }
   0x1   :  { %s3565_s14 = smov 0  }
   0x2 LB: > { %s2631_s15 = sadd.s32 4294967295, %s3539_s14   ;;  %s3578_s16 = sadd.s32 1, %s3539_s14   ;;  %s3539_s14 = sphi %s3565_s14, %s4046_s14   ;;  %s3535_s13 = sphi %s3563_s13, %s4045_s13   ;;  %s3531_s12 = sphi %s3561_s12, %s4044_s12  }
   0x3   : > { %s17_s17 = ssub.s32 %s3539_s14, %s3578_s16  ;;  %s20_s18 = sadd.s32 1, %s3535_s13 }
   0x4   : > { %p18_p0 = scmp.eq.s32.totalorder %s17_s17, 0  ;;  %p27_p1 = scmp.ne.s32.totalorder %s3535_s13, %s3531_s12 }
   0x5   : > { %p28_p2 = scmp.eq.s32.totalorder %s3539_s14, 0  ;;  %p2634_p4 = scmp.ge.s32.totalorder %s3539_s14, 2 }
   0x6   : > { %s3587_s19 = scalar_select %p18_p0, %s3535_s13, %s20_s18  }
   0x7   : > { %p29_p3 = por %p28_p2, %p27_p1  ;;  %127 = sbr.rel (%p2634_p4) target bundleno = 37 (0x25), region = 24 }
   0xe   : > { %130 = sbr.rel (!%p29_p3) target bundleno = 37 (0x25), region = 28  ;;  %s132_s20 = sand.u32 (%p29_p3), 1, %s3535_s13  }
   0xf   : > { %s3395_s21 = smul.u32 (%p29_p3), 72, %s3539_s14 }
  0x10   : > { %s3394_s22 = smul.u32 (%p29_p3), 288, %s132_s20 }
  0x11   : > { %s3595_s25 = scalar_lea.vmem (%p29_p3), %s4038_s0, %s3395_s21 }
  0x12   : > { %v153_v0 = vld [vmem:[%s3595_s25] sm:$0xff] (%p29_p3)   ;;  %v157_v1 = vld [vmem:[%s3595_s25 + $0x8] sm:$0xff] (%p29_p3)   ;;  %v161_v2 = vld [vmem:[%s3595_s25 + $0x10] sm:$0xff] (%p29_p3)   ;;  %s3600_s26 = scalar_lea.vmem (%p29_p3), [#allocation3], %s3394_s22 }
  0x13   : > { %154 = vst [vmem:[%s3600_s26] sm:$0xff] (%p29_p3), %v153_v0   ;;  %158 = vst [vmem:[%s3600_s26 + $0x8] sm:$0xff] (%p29_p3), %v157_v1   ;;  %v165_v3 = vld [vmem:[%s3595_s25 + $0x18] sm:$0xff] (%p29_p3)   ;;  %v169_v4 = vld [vmem:[%s3595_s25 + $0x20] sm:$0xff] (%p29_p3)  }
  0x14   : > { %162 = vst [vmem:[%s3600_s26 + $0x10] sm:$0xff] (%p29_p3), %v161_v2   ;;  %v173_v5 = vld [vmem:[%s3595_s25 + $0x28] sm:$0xff] (%p29_p3)   ;;  %166 = vst [vmem:[%s3600_s26 + $0x18] sm:$0xff] (%p29_p3), %v165_v3   ;;  %v177_v6 = vld [vmem:[%s3595_s25 + $0x30] sm:$0xff] (%p29_p3)  }
  0x15   : > { %170 = vst [vmem:[%s3600_s26 + $0x20] sm:$0xff] %v169_v4   ;;  %174 = vst [vmem:[%s3600_s26 + $0x28] sm:$0xff] %v173_v5   ;;  %v181_v7 = vld [vmem:[%s3595_s25 + $0x38] sm:$0xff]   ;;  %v185_v8 = vld [vmem:[%s3595_s25 + $0x40] sm:$0xff]  }
  0x16   : > { %178 = vst [vmem:[%s3600_s26 + $0x30] sm:$0xff] %v177_v6   ;;  %182 = vst [vmem:[%s3600_s26 + $0x38] sm:$0xff] %v181_v7   ;;  %v189_v9 = vld [vmem:[%s3595_s25 + $0x90] sm:$0xff]   ;;  %v193_v10 = vld [vmem:[%s3595_s25 + $0x98] sm:$0xff]  }
  0x17   : > { %186 = vst [vmem:[%s3600_s26 + $0x40] sm:$0xff] %v185_v8   ;;  %v197_v11 = vld [vmem:[%s3595_s25 + $0xa0] sm:$0xff]   ;;  %190 = vst [vmem:[%s3600_s26 + $0x48] sm:$0xff] %v189_v9   ;;  %v201_v12 = vld [vmem:[%s3595_s25 + $0xa8] sm:$0xff]  }
  0x18   : > { %194 = vst [vmem:[%s3600_s26 + $0x50] sm:$0xff] %v193_v10   ;;  %198 = vst [vmem:[%s3600_s26 + $0x58] sm:$0xff] %v197_v11   ;;  %v205_v13 = vld [vmem:[%s3595_s25 + $0xb0] sm:$0xff]   ;;  %v209_v14 = vld [vmem:[%s3595_s25 + $0xb8] sm:$0xff]  }
  0x19   : > { %202 = vst [vmem:[%s3600_s26 + $0x60] sm:$0xff] %v201_v12   ;;  %206 = vst [vmem:[%s3600_s26 + $0x68] sm:$0xff] %v205_v13   ;;  %v213_v15 = vld [vmem:[%s3595_s25 + $0xc0] sm:$0xff]   ;;  %v217_v16 = vld [vmem:[%s3595_s25 + $0xc8] sm:$0xff]  }
  0x1a   : > { %210 = vst [vmem:[%s3600_s26 + $0x70] sm:$0xff] %v209_v14   ;;  %v221_v17 = vld [vmem:[%s3595_s25 + $0xd0] sm:$0xff]   ;;  %214 = vst [vmem:[%s3600_s26 + $0x78] sm:$0xff] %v213_v15   ;;  %v225_v18 = vld [vmem:[%s3595_s25 + $0x120] sm:$0xff]  }
  0x1b   : > { %218 = vst [vmem:[%s3600_s26 + $0x80] sm:$0xff] %v217_v16   ;;  %222 = vst [vmem:[%s3600_s26 + $0x88] sm:$0xff] %v221_v17   ;;  %v229_v19 = vld [vmem:[%s3595_s25 + $0x128] sm:$0xff]   ;;  %v233_v20 = vld [vmem:[%s3595_s25 + $0x130] sm:$0xff]  }
  0x1c   : > { %226 = vst [vmem:[%s3600_s26 + $0x90] sm:$0xff] %v225_v18   ;;  %230 = vst [vmem:[%s3600_s26 + $0x98] sm:$0xff] %v229_v19   ;;  %v237_v21 = vld [vmem:[%s3595_s25 + $0x138] sm:$0xff]   ;;  %v241_v22 = vld [vmem:[%s3595_s25 + $0x140] sm:$0xff]  }
  0x1d   : > { %234 = vst [vmem:[%s3600_s26 + $0xa0] sm:$0xff] %v233_v20   ;;  %v245_v23 = vld [vmem:[%s3595_s25 + $0x148] sm:$0xff]   ;;  %238 = vst [vmem:[%s3600_s26 + $0xa8] sm:$0xff] %v237_v21   ;;  %v249_v24 = vld [vmem:[%s3595_s25 + $0x150] sm:$0xff]  }
  0x1e   : > { %242 = vst [vmem:[%s3600_s26 + $0xb0] sm:$0xff] %v241_v22   ;;  %246 = vst [vmem:[%s3600_s26 + $0xb8] sm:$0xff] %v245_v23   ;;  %v253_v25 = vld [vmem:[%s3595_s25 + $0x158] sm:$0xff]   ;;  %v257_v26 = vld [vmem:[%s3595_s25 + $0x160] sm:$0xff]  }
  0x1f   : > { %250 = vst [vmem:[%s3600_s26 + $0xc0] sm:$0xff] %v249_v24   ;;  %254 = vst [vmem:[%s3600_s26 + $0xc8] sm:$0xff] %v253_v25   ;;  %v261_v27 = vld [vmem:[%s3595_s25 + $0x1b0] sm:$0xff]   ;;  %v265_v28 = vld [vmem:[%s3595_s25 + $0x1b8] sm:$0xff]  }
  0x20   : > { %258 = vst [vmem:[%s3600_s26 + $0xd0] sm:$0xff] %v257_v26   ;;  %v269_v29 = vld [vmem:[%s3595_s25 + $0x1c0] sm:$0xff]   ;;  %262 = vst [vmem:[%s3600_s26 + $0xd8] sm:$0xff] %v261_v27   ;;  %v273_v30 = vld [vmem:[%s3595_s25 + $0x1c8] sm:$0xff]  }
  0x21   : > { %266 = vst [vmem:[%s3600_s26 + $0xe0] sm:$0xff] %v265_v28   ;;  %270 = vst [vmem:[%s3600_s26 + $0xe8] sm:$0xff] %v269_v29   ;;  %v277_v31 = vld [vmem:[%s3595_s25 + $0x1d0] sm:$0xff]   ;;  %v281_v32 = vld [vmem:[%s3595_s25 + $0x1d8] sm:$0xff]  }
  0x22   : > { %274 = vst [vmem:[%s3600_s26 + $0xf0] sm:$0xff] %v273_v30   ;;  %278 = vst [vmem:[%s3600_s26 + $0xf8] sm:$0xff] %v277_v31   ;;  %v285_v33 = vld [vmem:[%s3595_s25 + $0x1e0] sm:$0xff]   ;;  %v289_v34 = vld [vmem:[%s3595_s25 + $0x1e8] sm:$0xff]  }
  0x23   : > { %282 = vst [vmem:[%s3600_s26 + $0x100] sm:$0xff] %v281_v32   ;;  %v293_v35 = vld [vmem:[%s3595_s25 + $0x1f0] sm:$0xff]   ;;  %286 = vst [vmem:[%s3600_s26 + $0x108] sm:$0xff] %v285_v33  }
  0x24   : > { %290 = vst [vmem:[%s3600_s26 + $0x110] sm:$0xff] %v289_v34   ;;  %294 = vst [vmem:[%s3600_s26 + $0x118] sm:$0xff] %v293_v35  }
  0x25 PF: > { %p2636_p5 = scmp.ge.s32.totalorder %s3539_s14, 1  ;;  %p462_p6 = scmp.lt.s32.totalorder %s3539_s14, 3 }
  0x27   : > { %p463_p7 = pnand %p2636_p5, %p462_p6 }
  0x28   : > { %v3421_v36 = vld [vmem:[%s4039_s1] sm:$0xff] (!%p463_p7)   ;;  %v3423_v38 = vld [vmem:[%s4039_s1 + $0x8] sm:$0xff] (!%p463_p7)   ;;  %v3425_v40 = vld [vmem:[%s4039_s1 + $0x10] sm:$0xff] (!%p463_p7)   ;;  %s469_s17 = sand.u32 (!%p463_p7), 1, %s3531_s12   ;;  %vm870_vm0 = vsmask.f32 (!%p463_p7), 3328 }
  0x29   : > { %466 = sbr.rel (%p463_p7) target bundleno = 426 (0x1aa), region = 69  ;;  %v3422_v37 = vld [vmem:[%s4039_s1 + $0x100] sm:$0xff] (!%p463_p7)   ;;  %3098 = vmatprep.subr.bf16.mxu1 (!%p463_p7), %v3421_v36  ;;  %v3424_v39 = vld [vmem:[%s4039_s1 + $0x108] sm:$0xff] (!%p463_p7)   ;;  %v3426_v41 = vld [vmem:[%s4039_s1 + $0x110] sm:$0xff] (!%p463_p7)   ;;  %vm871_vm1 = vsmask.f32 (!%p463_p7), 7440 }
  0x2a   : > { %3194 = vmatprep.subr.bf16.mxu0 (!%p463_p7), %v3422_v37  ;;  %3099 = vmatpush3.bf16.msra.mxu1 (!%p463_p7), %v3421_v36  ;;  %v3427_v42 = vld [vmem:[%s4039_s1 + $0x18] sm:$0xff] (!%p463_p7)   ;;  %s3396_s23 = smul.u32 (!%p463_p7), 288, %s469_s17  ;;  %v3429_v44 = vld [vmem:[%s4039_s1 + $0x20] sm:$0xff] (!%p463_p7)   ;;  %v3431_v46 = vld [vmem:[%s4039_s1 + $0x28] sm:$0xff] (!%p463_p7)   ;;  %p492_p8 = scmp.lt.s32.totalorder (!%p463_p7), %s2631_s15, 1 }
  0x2b   : > { %3195 = vmatpush3.bf16.msra.mxu0 (!%p463_p7), %v3422_v37  ;;  %3100 = vmatprep.subr.bf16.mxu1 (!%p463_p7), %v3423_v38  ;;  %v3428_v43 = vld [vmem:[%s4039_s1 + $0x118] sm:$0xff] (!%p463_p7)   ;;  %v3430_v45 = vld [vmem:[%s4039_s1 + $0x120] sm:$0xff] (!%p463_p7)   ;;  %v3432_v48 = vld [vmem:[%s4039_s1 + $0x128] sm:$0xff] (!%p463_p7)  }
  0x2c   : > { %3196 = vmatprep.subr.bf16.mxu0 (!%p463_p7), %v3424_v39  ;;  %s3707_s29 = scalar_lea.vmem (!%p463_p7), [#allocation3], %s3396_s23  ;;  %v3433_v50 = vld [vmem:[%s4039_s1 + $0x30] sm:$0xff] (!%p463_p7)   ;;  %v3435_v52 = vld [vmem:[%s4039_s1 + $0x38] sm:$0xff] (!%p463_p7)   ;;  %v3438_v54 = vld [vmem:[%s4039_s1 + $0x40] sm:$0xff] (!%p463_p7)  }
  0x2d   : > { %v3437_v47 = vld [vmem:[%s3707_s29] ss:$8 sps:$4 sm:$0xff] (!%p463_p7)   ;;  %v3434_v51 = vld [vmem:[%s4039_s1 + $0x130] sm:$0xff] (!%p463_p7)   ;;  %v3436_v53 = vld [vmem:[%s4039_s1 + $0x138] sm:$0xff] (!%p463_p7)  }
  0x2e   : > { %3101 = vmatpush3.bf16.msra.mxu1 (!%p463_p7), %v3423_v38  ;;  %3114 = vmatprep.mubr.bf16.mxu1 (!%p463_p7), %v3437_v47  ;;  %v3439_v49 = vld [vmem:[%s3707_s29 + $0xd8] ss:$8 sps:$4 sm:$0xff] (!%p463_p7)   ;;  %v3442_v57 = vld [vmem:[%s3707_s29 + $0xe8] ss:$8 sps:$4 sm:$0xff] (!%p463_p7)   ;;  %v2788_v6 = vld [vmem:[%s3707_s29 + $0x94] sm:$0x1] (!%p463_p7) }
  0x2f   : > { %3197 = vmatpush3.bf16.msra.mxu0 (!%p463_p7), %v3424_v39  ;;  %3102 = vmatprep.subr.bf16.mxu1 (!%p463_p7), %v3425_v40  ;;  %v3440_v55 = vld [vmem:[%s4039_s1 + $0x140] sm:$0xff] (!%p463_p7)   ;;  %v3441_v56 = vld [vmem:[%s3707_s29 + $0x10] ss:$8 sps:$4 sm:$0xff] (!%p463_p7)   ;;  %v3443_v58 = vld [vmem:[%s4039_s1 + $0x48] sm:$0xff] (!%p463_p7)   ;;  %v1555_v12 = vshll.u32 (!%p463_p7), %v2788_v6, 16 }
  0x30   : > { %3198 = vmatprep.subr.bf16.mxu0 %v3426_v41  ;;  %3210 = vmatprep.mubr.bf16.mxu0 %v3439_v49  ;;  %v3444_v59 = vld [vmem:[%s4039_s1 + $0x148] sm:$0xff]   ;;  %v3455_v61 = vld [vmem:[%s3707_s29 + $0xf8] ss:$8 sps:$4 sm:$0xff]   ;;  %v3445_v62 = vld [vmem:[%s4039_s1 + $0x50] sm:$0xff]   ;;  %s4048_s15 = smov (!%p492_p8, %s2631_s15), 1 }
  0x31   : > { %v3453_v60 = vld [vmem:[%s3707_s29 + $0x20] ss:$8 sps:$4 sm:$0xff]   ;;  %v3446_v63 = vld [vmem:[%s4039_s1 + $0x150] sm:$0xff]   ;;  %v3447_v0 = vld [vmem:[%s4039_s1 + $0x58] sm:$0xff]   ;;  %v1557_v24 = vrot.slane %v1555_v12, 5  ;;  %s2958_s26 = sshll.u32 %s4048_s15, 5 }
  0x32   : > { %3103 = vmatpush3.bf16.msra.mxu1 %v3425_v40  ;;  %v3457_v1 = vld [vmem:[%s3707_s29 + $0x30] ss:$8 sps:$4 sm:$0xff]   ;;  %v3449_v10 = vld [vmem:[%s4039_s1 + $0x60] sm:$0xff]   ;;  %v2790_v11 = vld [vmem:[%s3707_s29 + $0x9c] sm:$0x1]  ;;  %s496_s28 = scalar_lea.vmem %s4041_s3, %s2958_s26 }
  0x33   : > { %3199 = vmatpush3.bf16.msra.mxu0 %v3426_v41  ;;  %3104 = vmatprep.subr.bf16.mxu1 %v3427_v42  ;;  %v3458_v2 = vld [vmem:[%s3707_s29 + $0x108] ss:$8 sps:$4 sm:$0xff]   ;;  %v3448_v3 = vld [vmem:[%s4039_s1 + $0x158] sm:$0xff]   ;;  %v3450_v15 = vld [vmem:[%s4039_s1 + $0x160] sm:$0xff]   ;;  %v1569_v18 = vshll.u32 %v2790_v11, 16 }
  0x34   : > { %3200 = vmatprep.subr.bf16.mxu0 %v3428_v43  ;;  %v3461_v4 = vld [vmem:[%s3707_s29 + $0x48] ss:$8 sps:$4 sm:$0xff]   ;;  %v2789_v7 = vld [vmem:[%s3707_s29 + $0x98] sm:$0xf]  ;;  %vm3775_vm2 = vmor %vm870_vm0, %vm871_vm1 }
  0x35   : > { %v2787_v5 = vld [vmem:[%s3707_s29 + $0x90] sm:$0xf]  ;;  %v1560_v13 = vshrl.u32 %v2789_v7, 16  ;;  %v1563_v14 = vshll.u32 %v2789_v7, 16  ;;  %v3451_v19 = vld [vmem:[%s4039_s1 + $0x68] sm:$0xff]   ;;  %v1571_v27 = vrot.slane %v1569_v18, 5 }
  0x36   : > { %3105 = vmatpush3.bf16.msra.mxu1 %v3427_v42  ;;  %v1546_v8 = vshrl.u32 %v2787_v5, 16  ;;  %v1549_v9 = vshll.u32 %v2787_v5, 16  ;;  %v3452_v22 = vld [vmem:[%s4039_s1 + $0x168] sm:$0xff]   ;;  %v2791_v28 = vld [vmem:[%s3707_s29 + $0xa0] sm:$0xf]  ;;  %v3454_v38 = vld [vmem:[%s4039_s1 + $0x70] sm:$0xff]  }
  0x37   : > { %3201 = vmatpush3.bf16.msra.mxu0 %v3428_v43  ;;  %3106 = vmatprep.subr.bf16.mxu1 %v3429_v44  ;;  %v1562_v20 = vrot.slane %v1560_v13, 4  ;;  %v1565_v21 = vrot.slane %v1563_v14, 5  ;;  %v2792_v29 = vld [vmem:[%s3707_s29 + $0xa4] sm:$0x1]  ;;  %v2793_v31 = vld [vmem:[%s3707_s29 + $0xa8] sm:$0xf] }
  0x38   : > { %3202 = vmatprep.subr.bf16.mxu0 %v3430_v45  ;;  %v1548_v16 = vrot.slane %v1546_v8, 4  ;;  %v1551_v17 = vrot.slane %v1549_v9, 5  ;;  %v2794_v32 = vld [vmem:[%s3707_s29 + $0xac] sm:$0x1]  ;;  %v1574_v33 = vshrl.u32 %v2791_v28, 16  ;;  %v1577_v35 = vshll.u32 %v2791_v28, 16 }
  0x39   : > { %v1566_v26 = vor.u32 %v1565_v21, %v1562_v20  ;;  %v1583_v36 = vshll.u32 %v2792_v29, 16  ;;  %v1588_v37 = vshrl.u32 %v2793_v31, 16  ;;  %v1591_v41 = vshll.u32 %v2793_v31, 16  ;;  %v3456_v42 = vld [vmem:[%s4039_s1 + $0x170] sm:$0xff]   ;;  %v3478_v20 = vld [vmem:[%s3707_s29 + $0x78] ss:$8 sps:$4 sm:$0xff]  }
  0x3a   : > { %3107 = vmatpush3.bf16.msra.mxu1 %v3429_v44  ;;  %v1552_v23 = vor.u32 %v1551_v17, %v1548_v16  ;;  %v1576_v40 = vrot.slane %v1574_v33, 4  ;;  %v1579_v44 = vrot.slane %v1577_v35, 5  ;;  %v3475_v9 = vld [vmem:[%s3707_s29 + $0x68] ss:$8 sps:$4 sm:$0xff]   ;;  %v2799_v21 = vld [vmem:[%s3707_s29 + $0xc0] sm:$0xf] }
  0x3b   : > { %3203 = vmatpush3.bf16.msra.mxu0 %v3430_v45  ;;  %3108 = vmatprep.subr.bf16.mxu1 %v3431_v46  ;;  %v1567_v34 = vrot.slane %v1566_v26, 4  ;;  %v1590_v45 = vrot.slane %v1588_v37, 4  ;;  %v1593_v49 = vrot.slane %v1591_v41, 5  ;;  %v1630_v28 = vshrl.u32 %v2799_v21, 16  ;;  %v3469_v31 = vld [vmem:[%s4039_s1 + $0x98] sm:$0xff]  }
  0x3c   : > { %3204 = vmatprep.subr.bf16.mxu0 %v3432_v48  ;;  %v1553_v30 = vrot.slane %v1552_v23, 4  ;;  %v2801_v23 = vld [vmem:[%s3707_s29 + $0xc8] sm:$0xf]  ;;  %v1633_v29 = vshll.u32 %v2799_v21, 16 }
  0x3d   : > { %v1572_v43 = vsel %vm3775_vm2, %v1567_v34, %v1571_v27  ;;  %v2802_v27 = vld [vmem:[%s3707_s29 + $0xcc] sm:$0x1]  ;;  %v1644_v33 = vshrl.u32 %v2801_v23, 16  ;;  %v1647_v34 = vshll.u32 %v2801_v23, 16  ;;  %v1632_v37 = vrot.slane %v1630_v28, 4 }
  0x3e   : > { %3109 = vmatpush3.bf16.msra.mxu1 %v3431_v46  ;;  %v1558_v39 = vsel %vm3775_vm2, %v1553_v30, %v1557_v24  ;;  %v1597_v46 = vshll.u32 %v2794_v32, 16  ;;  %v3468_v24 = vld [vmem:[%s4039_s1 + $0x190] sm:$0xff]   ;;  %v1653_v35 = vshll.u32 %v2802_v27, 16 }
  0x3f   : > { %3205 = vmatpush3.bf16.msra.mxu0 %v3432_v48  ;;  %3110 = vmatprep.subr.bf16.mxu1 %v3433_v50  ;;  %v2819_v47 = vcombine.low %v1558_v39, %v1572_v43  ;;  %v1585_v48 = vrot.slane %v1583_v36, 5  ;;  %v1649_v43 = vrot.slane %v1647_v34, 5 }
  0x40   : > { %3206 = vmatprep.subr.bf16.mxu0 %v3434_v51 }
  0x42   : > { %3111 = vmatpush3.bf16.msra.mxu1 %v3433_v50  ;;  %v3459_v50 = vld [vmem:[%s4039_s1 + $0x78] sm:$0xff]  }
  0x43   : > { %3207 = vmatpush3.bf16.msra.mxu0 %v3434_v51  ;;  %3112 = vmatprep.subr.bf16.mxu1 %v3435_v52  ;;  %v1580_v51 = vor.u32 %v1579_v44, %v1576_v40  ;;  %v3470_v40 = vld [vmem:[%s4039_s1 + $0x198] sm:$0xff]   ;;  %v1655_v44 = vrot.slane %v1653_v35, 5 }
  0x44   : > { %3208 = vmatprep.subr.bf16.mxu0 %v3436_v53 }
  0x46   : > { %3113 = vmatpush3.bf16.msra.mxu1 %v3435_v52  ;;  %v1594_v52 = vor.u32 %v1593_v49, %v1590_v45  ;;  %v3471_v49 = vld [vmem:[%s4039_s1 + $0xa0] sm:$0xff]  }
  0x47   : > { %3209 = vmatpush3.bf16.msra.mxu0 %v3436_v53  ;;  %3122 = vmatprep.subr.bf16.mxu1 %v3438_v54  ;;  %v1581_v53 = vrot.slane %v1580_v51, 4 }
  0x48   : > { %3218 = vmatprep.subr.bf16.mxu0 %v3440_v55 }
  0x49   : > { %3115 = vmatmul.mubr.bf16.vlgmr.msra.gmra.mrb[0].mxu1 %v3441_v56  ;;  %v1595_v56 = vrot.slane %v1594_v52, 4  ;;  %v856_v52 = vld [vmem:[%s3707_s29 + $0x8] sm:$0xf] }
  0x4a   : > { %3123 = vmatpush3.bf16.msra.mxu1 %v3438_v54  ;;  %3211 = vmatmul.mubr.bf16.vlgmr.msra.gmra.mrb[0].mxu0 %v3442_v57  ;;  %v1599_v54 = vrot.slane %v1597_v46, 5  ;;  %v3462_v57 = vld [vmem:[%s4039_s1 + $0x80] sm:$0xff]  }
  0x4b   : > { %3219 = vmatpush3.bf16.msra.mxu0 %v3440_v55  ;;  %3124 = vmatprep.subr.bf16.mxu1 %v3443_v58  ;;  %v3460_v55 = vld [vmem:[%s4039_s1 + $0x178] sm:$0xff]  }
  0x4c   : > { %3220 = vmatprep.subr.bf16.mxu0 %v3444_v59  ;;  %3118 = vmatprep.mubr.bf16.mxu1 %v3453_v60  ;;  %v3463_v60 = vld [vmem:[%s4039_s1 + $0x180] sm:$0xff]  }
  0x4d   : > { %3214 = vmatprep.mubr.bf16.mxu0 %v3455_v61  ;;  %v3464_v61 = vld [vmem:[%s3707_s29 + $0x58] ss:$8 sps:$4 sm:$0xff]  }
  0x4e   : > { %3125 = vmatpush3.bf16.msra.mxu1 %v3443_v58  ;;  %v1586_v58 = vsel %vm3775_vm2, %v1581_v53, %v1585_v48  ;;  %v855_v48 = vld [vmem:[%s3707_s29 + $0x4] sm:$0x1]  ;;  %v857_v53 = vld [vmem:[%s3707_s29 + $0xc] sm:$0x1] }
  0x4f   : > { %3221 = vmatpush3.bf16.msra.mxu0 %v3444_v59  ;;  %3126 = vmatprep.subr.bf16.mxu1 %v3445_v62  ;;  %v1600_v59 = vsel %vm3775_vm2, %v1595_v56, %v1599_v54 }
  0x50   : > { %3222 = vmatprep.subr.bf16.mxu0 %v3446_v63 }
  0x51   : > { %3119 = vmatmul.mubr.bf16.gmra.mrb[4].mxu1 %v3457_v1  ;;  %v3466_v1 = vld [vmem:[%s4039_s1 + $0x188] sm:$0xff]  }
  0x52   : > { %3127 = vmatpush3.bf16.msra.mxu1 %v3445_v62  ;;  %3215 = vmatmul.mubr.bf16.gmra.mrb[4].mxu0 %v3458_v2  ;;  %v3465_v62 = vld [vmem:[%s4039_s1 + $0x88] sm:$0xff]   ;;  %v2796_v2 = vld [vmem:[%s3707_s29 + $0xb4] sm:$0x1] }
  0x53   : > { %3223 = vmatpush3.bf16.msra.mxu0 %v3446_v63  ;;  %3128 = vmatprep.subr.bf16.mxu1 %v3447_v0  ;;  %v2795_v63 = vld [vmem:[%s3707_s29 + $0xb0] sm:$0xf]  ;;  %v1611_v7 = vshll.u32 %v2796_v2, 16 }
  0x54   : > { %3224 = vmatprep.subr.bf16.mxu0 %v3448_v3  ;;  %3138 = vmatprep.mubr.bf16.mxu1 %v3461_v4  ;;  %v2798_v4 = vld [vmem:[%s3707_s29 + $0xbc] sm:$0x1]  ;;  %v1602_v5 = vshrl.u32 %v2795_v63, 16  ;;  %v1605_v6 = vshll.u32 %v2795_v63, 16  ;;  %v897_v63 = vshll.u32 %v857_v53, 16 }
  0x55   : > { %3234 = vmatprep.mubr.bf16.mxu0 %v2819_v47  ;;  %v1625_v11 = vshll.u32 %v2798_v4, 16  ;;  %v1613_v16 = vrot.slane %v1611_v7, 5  ;;  %v854_v47 = vld [vmem:[%s3707_s29] sm:$0xf]  ;;  %v3473_v4 = vld [vmem:[%s4039_s1 + $0xa8] sm:$0xff]  }
  0x56   : > { %3129 = vmatpush3.bf16.msra.mxu1 %v3447_v0  ;;  %v2820_v0 = vcombine.low %v1586_v58, %v1600_v59  ;;  %v1604_v12 = vrot.slane %v1602_v5, 4  ;;  %v1607_v13 = vrot.slane %v1605_v6, 5  ;;  %v874_v54 = vshrl.u32 %v854_v47, 16  ;;  %v865_v53 = vld [vmem:[%s3707_s29 + $0x2c] sm:$0x1] }
  0x57   : > { %3225 = vmatpush3.bf16.msra.mxu0 %v3448_v3  ;;  %3130 = vmatprep.subr.bf16.mxu1 %v3449_v10  ;;  %v2797_v3 = vld [vmem:[%s3707_s29 + $0xb8] sm:$0xf]  ;;  %v1627_v18 = vrot.slane %v1625_v11, 5  ;;  %v888_v58 = vshrl.u32 %v856_v52, 16  ;;  %v891_v59 = vshll.u32 %v856_v52, 16 }
  0x58   : > { %3226 = vmatprep.subr.bf16.mxu0 %v3450_v15  ;;  %v1616_v8 = vshrl.u32 %v2797_v3, 16  ;;  %v864_v52 = vld [vmem:[%s3707_s29 + $0x28] sm:$0xf] }
  0x59   : > { %v890_v2 = vrot.slane %v888_v58, 4  ;;  %v944_v58 = vshrl.u32 %v864_v52, 16 }
  0x5a   : > { %3131 = vmatpush3.bf16.msra.mxu1 %v3449_v10  ;;  %v1619_v10 = vshll.u32 %v2797_v3, 16  ;;  %v1618_v14 = vrot.slane %v1616_v8, 4  ;;  %v893_v3 = vrot.slane %v891_v59, 5  ;;  %v899_v8 = vrot.slane %v897_v63, 5 }
  0x5b   : > { %3227 = vmatpush3.bf16.msra.mxu0 %v3450_v15  ;;  %3132 = vmatprep.subr.bf16.mxu1 %v3451_v19  ;;  %v3467_v15 = vld [vmem:[%s4039_s1 + $0x90] sm:$0xff]   ;;  %v947_v59 = vshll.u32 %v864_v52, 16  ;;  %v2904_v52 = vld [vmem:[%s3707_s29 + $0xc] sm:$0x1] }
  0x5c   : > { %3228 = vmatprep.subr.bf16.mxu0 %v3452_v22  ;;  %v1621_v17 = vrot.slane %v1619_v10, 5  ;;  %v3474_v10 = vld [vmem:[%s4039_s1 + $0x1a8] sm:$0xff]  }
  0x5e   : > { %3133 = vmatpush3.bf16.msra.mxu1 %v3451_v19  ;;  %v1608_v19 = vor.u32 %v1607_v13, %v1604_v12  ;;  %v1622_v26 = vor.u32 %v1621_v17, %v1618_v14  ;;  %v894_v12 = vor.u32 %v893_v3, %v890_v2  ;;  %v858_v13 = vld [vmem:[%s3707_s29 + $0x10] sm:$0xf]  ;;  %v949_v3 = vrot.slane %v947_v59, 5 }
  0x5f   : > { %3229 = vmatpush3.bf16.msra.mxu0 %v3452_v22  ;;  %3134 = vmatprep.subr.bf16.mxu1 %v3454_v38  ;;  %v2800_v22 = vld [vmem:[%s3707_s29 + $0xc4] sm:$0x1]  ;;  %v902_v17 = vshrl.u32 %v858_v13, 16  ;;  %v866_v2 = vld [vmem:[%s3707_s29 + $0x30] sm:$0xf] }
  0x60   : > { %3230 = vmatprep.subr.bf16.mxu0 %v3456_v42  ;;  %v1639_v30 = vshll.u32 %v2800_v22, 16  ;;  %v1609_v32 = vrot.slane %v1608_v19, 4  ;;  %v1623_v36 = vrot.slane %v1622_v26, 4  ;;  %v861_v19 = vld [vmem:[%s3707_s29 + $0x1c] sm:$0x1] }
  0x62   : > { %3135 = vmatpush3.bf16.msra.mxu1 %v3454_v38  ;;  %v1635_v38 = vrot.slane %v1633_v29, 5  ;;  %v1641_v39 = vrot.slane %v1639_v30, 5  ;;  %v1614_v41 = vsel %vm3775_vm2, %v1609_v32, %v1613_v16  ;;  %v1628_v45 = vsel %vm3775_vm2, %v1623_v36, %v1627_v18  ;;  %v860_v16 = vld [vmem:[%s3707_s29 + $0x18] sm:$0xf]  ;;  %v3477_v32 = vld [vmem:[%s4039_s1 + $0x1b0] sm:$0xff]  }
  0x63   : > { %3231 = vmatpush3.bf16.msra.mxu0 %v3456_v42  ;;  %3136 = vmatprep.subr.bf16.mxu1 %v3459_v50  ;;  %v1646_v42 = vrot.slane %v1644_v33, 4  ;;  %v895_v18 = vrot.slane %v894_v12, 4  ;;  %v916_v22 = vshrl.u32 %v860_v16, 16  ;;  %v919_v26 = vshll.u32 %v860_v16, 16 }
  0x64   : > { %3232 = vmatprep.subr.bf16.mxu0 %v3460_v55  ;;  %v1636_v46 = vor.u32 %v1635_v38, %v1632_v37  ;;  %v925_v30 = vshll.u32 %v861_v19, 16 }
  0x65   : > { %v1650_v51 = vor.u32 %v1649_v43, %v1646_v42  ;;  %v900_v27 = vsel %vm3775_vm2, %v895_v18, %v899_v8  ;;  %v918_v29 = vrot.slane %v916_v22, 4  ;;  %v921_v35 = vrot.slane %v919_v26, 5  ;;  %v3480_v42 = vld [vmem:[%s4039_s1 + $0x1b8] sm:$0xff]   ;;  %v3481_v43 = vld [vmem:[%s4039_s1 + $0xc0] sm:$0xff]  }
  0x66   : > { %3137 = vmatpush3.bf16.msra.mxu1 %v3459_v50  ;;  %v2821_v50 = vcombine.low %v1614_v41, %v1628_v45  ;;  %v1637_v56 = vrot.slane %v1636_v46, 4  ;;  %v3483_v46 = vld [vmem:[%s4039_s1 + $0x1c0] sm:$0xff]   ;;  %v3489_v22 = vld [vmem:[%s4039_s1 + $0xd8] sm:$0xff]  }
  0x67   : > { %3233 = vmatpush3.bf16.msra.mxu0 %v3460_v55  ;;  %3146 = vmatprep.subr.bf16.mxu1 %v3462_v57  ;;  %v877_v55 = vshll.u32 %v854_v47, 16  ;;  %v922_v37 = vor.u32 %v921_v35, %v918_v29  ;;  %v3484_v47 = vld [vmem:[%s3707_s29 + $0x18] ss:$8 sps:$4 sm:$0xff]  }
  0x68   : > { %3242 = vmatprep.subr.bf16.mxu0 %v3463_v60 }
  0x69   : > { %3139 = vmatmul.mubr.bf16.vlgmr.msra.gmra.mrb[0].mxu1 %v3464_v61  ;;  %v876_v61 = vrot.slane %v874_v54, 4  ;;  %v923_v41 = vrot.slane %v922_v37, 4  ;;  %v3486_v54 = vld [vmem:[%s4039_s1 + $0x1c8] sm:$0xff]   ;;  %v3491_v37 = vld [vmem:[%s4039_s1 + $0xe0] sm:$0xff]  }
  0x6a   : > { %3147 = vmatpush3.bf16.msra.mxu1 %v3462_v57  ;;  %3235 = vmatmul.mubr.bf16.vlgmr.msra.gmra.mrb[0].mxu0 %v2820_v0  ;;  %v883_v57 = vshll.u32 %v855_v48, 16  ;;  %v3472_v0 = vld [vmem:[%s4039_s1 + $0x1a0] sm:$0xff]  }
  0x6b   : > { %3243 = vmatpush3.bf16.msra.mxu0 %v3463_v60  ;;  %3148 = vmatprep.subr.bf16.mxu1 %v3465_v62  ;;  %v1651_v60 = vrot.slane %v1650_v51, 4  ;;  %v862_v48 = vld [vmem:[%s3707_s29 + $0x20] sm:$0xf]  ;;  %v863_v51 = vld [vmem:[%s3707_s29 + $0x24] sm:$0x1] }
  0x6c   : > { %3244 = vmatprep.subr.bf16.mxu0 %v3466_v1  ;;  %3142 = vmatprep.mubr.bf16.mxu1 %v3475_v9  ;;  %v885_v7 = vrot.slane %v883_v57, 5  ;;  %v3482_v9 = vld [vmem:[%s3707_s29 + $0x8] ss:$8 sps:$4 sm:$0xff]   ;;  %v939_v57 = vshll.u32 %v863_v51, 16 }
  0x6d   : > { %3238 = vmatprep.mubr.bf16.mxu0 %v2821_v50  ;;  %v1656_v5 = vsel %vm3775_vm2, %v1651_v60, %v1655_v44  ;;  %v3485_v50 = vld [vmem:[%s4039_s1 + $0xc8] sm:$0xff]   ;;  %v953_v60 = vshll.u32 %v865_v53, 16  ;;  %v2905_v53 = vld [vmem:[%s3707_s29 + $0x10] sm:$0xf] }
  0x6e   : > { %3149 = vmatpush3.bf16.msra.mxu1 %v3465_v62  ;;  %v879_v62 = vrot.slane %v877_v55, 5  ;;  %v930_v55 = vshrl.u32 %v862_v48, 16  ;;  %v2903_v51 = vld [vmem:[%s3707_s29 + $0x8] sm:$0xf]  ;;  %v2235_v59 = vshll.u32 %v2905_v53, 16 }
  0x6f   : > { %3245 = vmatpush3.bf16.msra.mxu0 %v3466_v1  ;;  %3150 = vmatprep.subr.bf16.mxu1 %v3467_v15  ;;  %v1642_v1 = vsel %vm3775_vm2, %v1637_v56, %v1641_v39  ;;  %v927_v39 = vrot.slane %v925_v30, 5  ;;  %v933_v56 = vshll.u32 %v862_v48, 16  ;;  %v3497_v30 = vld [vmem:[%s3707_s29 + $0x38] ss:$8 sps:$4 sm:$0xff]  }
  0x70   : > { %3246 = vmatprep.subr.bf16.mxu0 %v3468_v24  ;;  %v880_v6 = vor.u32 %v879_v62, %v876_v61  ;;  %v2822_v11 = vcombine.low %v1642_v1, %v1656_v5  ;;  %v3495_v61 = vld [vmem:[%s3707_s29 + $0x28] ss:$8 sps:$4 sm:$0xff]   ;;  %v932_v62 = vrot.slane %v930_v55, 4  ;;  %v946_v1 = vrot.slane %v944_v58, 4  ;;  %v867_v5 = vld [vmem:[%s3707_s29 + $0x34] sm:$0x1] }
  0x71   : > { %3143 = vmatmul.mubr.bf16.gmra.mrb[4].mxu1 %v3478_v20  ;;  %v905_v20 = vshll.u32 %v858_v13, 16  ;;  %v928_v45 = vsel %vm3775_vm2, %v923_v41, %v927_v39  ;;  %v935_v63 = vrot.slane %v933_v56, 5  ;;  %v967_v12 = vshll.u32 %v867_v5, 16  ;;  %v3488_v13 = vld [vmem:[%s4039_s1 + $0x1d0] sm:$0xff]   ;;  %v3492_v41 = vld [vmem:[%s4039_s1 + $0x1e0] sm:$0xff]   ;;  %v3499_v48 = vld [vmem:[%s4039_s1 + $0xf8] sm:$0xff]  }
  0x72   : > { %3151 = vmatpush3.bf16.msra.mxu1 %v3467_v15  ;;  %v881_v14 = vrot.slane %v880_v6, 4  ;;  %v859_v15 = vld [vmem:[%s3707_s29 + $0x14] sm:$0x1]  ;;  %3239 = vmatmul.mubr.bf16.gmra.mrb[4].mxu0 %v2822_v11  ;;  %v868_v6 = vld [vmem:[%s3707_s29 + $0x38] sm:$0xf]  ;;  %v961_v11 = vshll.u32 %v866_v2, 16 }
  0x73   : > { %3247 = vmatpush3.bf16.msra.mxu0 %v3468_v24  ;;  %3152 = vmatprep.subr.bf16.mxu1 %v3469_v31  ;;  %v911_v21 = vshll.u32 %v859_v15, 16  ;;  %v904_v24 = vrot.slane %v902_v17, 4  ;;  %v907_v28 = vrot.slane %v905_v20, 5  ;;  %v936_v8 = vor.u32 %v935_v63, %v932_v62  ;;  %v2914_v5 = vld [vmem:[%s3707_s29 + $0x34] sm:$0x1] }
  0x74   : > { %3248 = vmatprep.subr.bf16.mxu0 %v3470_v40  ;;  %v886_v23 = vsel %vm3775_vm2, %v881_v14, %v885_v7  ;;  %3258 = vmatprep.mubr.bf16.mxu0 %v3482_v9  ;;  %v3487_v7 = vld [vmem:[%s4039_s1 + $0xd0] sm:$0xff]   ;;  %v869_v9 = vld [vmem:[%s3707_s29 + $0x3c] sm:$0x1]  ;;  %v950_v14 = vor.u32 %v949_v3, %v946_v1  ;;  %v972_v15 = vshrl.u32 %v868_v6, 16  ;;  %v975_v16 = vshll.u32 %v868_v6, 16 }
  0x75   : > { %v2703_v33 = vcombine.low %v886_v23, %v900_v27  ;;  %v913_v34 = vrot.slane %v911_v21, 5  ;;  %v908_v36 = vor.u32 %v907_v28, %v904_v24  ;;  %v981_v17 = vshll.u32 %v869_v9, 16  ;;  %v2913_v1 = vld [vmem:[%s3707_s29 + $0x30] sm:$0xf]  ;;  %v3504_v6 = vld [vmem:[%s3707_s29 + $0x60] ss:$8 sps:$4 sm:$0xff]  }
  0x76   : > { %3153 = vmatpush3.bf16.msra.mxu1 %v3469_v31  ;;  %v3476_v31 = vld [vmem:[%s4039_s1 + $0xb0] sm:$0xff]   ;;  %v937_v18 = vrot.slane %v936_v8, 4  ;;  %v963_v20 = vrot.slane %v961_v11, 5  ;;  %v969_v21 = vrot.slane %v967_v12, 5  ;;  %v951_v23 = vrot.slane %v950_v14, 4  ;;  %v3506_v11 = vld [vmem:[%s4039_s1 + $0x208] sm:$0xff]  }
  0x77   : > { %3249 = vmatpush3.bf16.msra.mxu0 %v3470_v40  ;;  %3154 = vmatprep.subr.bf16.mxu1 %v3471_v49  ;;  %v909_v38 = vrot.slane %v908_v36, 4  ;;  %v3479_v40 = vld [vmem:[%s4039_s1 + $0xb8] sm:$0xff]   ;;  %v974_v24 = vrot.slane %v972_v15, 4  ;;  %v977_v26 = vrot.slane %v975_v16, 5  ;;  %v983_v27 = vrot.slane %v981_v17, 5 }
  0x78   : > { %3250 = vmatprep.subr.bf16.mxu0 %v3472_v0  ;;  %3162 = vmatprep.mubr.bf16.mxu1 %v2703_v33  ;;  %v3490_v33 = vld [vmem:[%s4039_s1 + $0x1d8] sm:$0xff]   ;;  %v2218_v55 = vshrl.u32 %v2903_v51, 16  ;;  %v2221_v56 = vshll.u32 %v2903_v51, 16  ;;  %v2232_v58 = vshrl.u32 %v2905_v53, 16  ;;  %v2291_v14 = vshll.u32 %v2913_v1, 16  ;;  %v3513_v51 = vld [vmem:[%s4039_s1 + $0x220] sm:$0xff]  }
  0x79   : > { %v914_v44 = vsel %vm3775_vm2, %v909_v38, %v913_v34  ;;  %v2297_v15 = vshll.u32 %v2914_v5, 16  ;;  %v3507_v16 = vld [vmem:[%s3707_s29 + $0xb0] ss:$8 sps:$4 sm:$0xff]  }
  0x7a   : > { %3155 = vmatpush3.bf16.msra.mxu1 %v3471_v49  ;;  %v2704_v49 = vcombine.low %v914_v44, %v928_v45  ;;  %v3493_v44 = vld [vmem:[%s4039_s1 + $0xe8] sm:$0xff]   ;;  %v2220_v62 = vrot.slane %v2218_v55, 4  ;;  %v2223_v63 = vrot.slane %v2221_v56, 5  ;;  %v2234_v3 = vrot.slane %v2232_v58, 4 }
  0x7b   : > { %3251 = vmatpush3.bf16.msra.mxu0 %v3472_v0  ;;  %3156 = vmatprep.subr.bf16.mxu1 %v3473_v4  ;;  %v941_v0 = vrot.slane %v939_v57, 5  ;;  %v3494_v45 = vld [vmem:[%s4039_s1 + $0x1e8] sm:$0xff]   ;;  %v2227_v57 = vshll.u32 %v2904_v52, 16 }
  0x7c   : > { %3252 = vmatprep.subr.bf16.mxu0 %v3474_v10  ;;  %v3514_v56 = vld [vmem:[%s4039_s1 + $0x228] sm:$0xff]  }
  0x7d   : > { %v942_v28 = vsel %vm3775_vm2, %v937_v18, %v941_v0  ;;  %v2912_v0 = vld [vmem:[%s3707_s29 + $0x2c] sm:$0x1]  ;;  %v2229_v17 = vrot.slane %v2227_v57, 5  ;;  %v2916_v57 = vld [vmem:[%s3707_s29 + $0x3c] sm:$0x1] }
  0x7e   : > { %3157 = vmatpush3.bf16.msra.mxu1 %v3473_v4  ;;  %v955_v4 = vrot.slane %v953_v60, 5 }
  0x7f   : > { %3253 = vmatpush3.bf16.msra.mxu0 %v3474_v10  ;;  %3158 = vmatprep.subr.bf16.mxu1 %v3476_v31  ;;  %v958_v10 = vshrl.u32 %v866_v2, 16  ;;  %v3503_v2 = vld [vmem:[%s3707_s29 + $0xa0] ss:$8 sps:$4 sm:$0xff]  }
  0x80   : > { %3254 = vmatprep.subr.bf16.mxu0 %v3477_v32 }
  0x81   : > { %v960_v19 = vrot.slane %v958_v10, 4  ;;  %v2283_v10 = vshll.u32 %v2912_v0, 16 }
  0x82   : > { %3159 = vmatpush3.bf16.msra.mxu1 %v3476_v31  ;;  %v956_v31 = vsel %vm3775_vm2, %v951_v23, %v955_v4  ;;  %v2237_v4 = vrot.slane %v2235_v59, 5 }
  0x83   : > { %3255 = vmatpush3.bf16.msra.mxu0 %v3477_v32  ;;  %3160 = vmatprep.subr.bf16.mxu1 %v3479_v40  ;;  %v964_v29 = vor.u32 %v963_v20, %v960_v19  ;;  %v978_v32 = vor.u32 %v977_v26, %v974_v24  ;;  %v2705_v34 = vcombine.low %v942_v28, %v956_v31  ;;  %v2293_v26 = vrot.slane %v2291_v14, 5 }
  0x84   : > { %3256 = vmatprep.subr.bf16.mxu0 %v3480_v42  ;;  %v2238_v12 = vor.u32 %v2237_v4, %v2234_v3  ;;  %v2285_v28 = vrot.slane %v2283_v10, 5  ;;  %v2299_v31 = vrot.slane %v2297_v15, 5  ;;  %v2908_v3 = vld [vmem:[%s3707_s29 + $0x1c] sm:$0x1]  ;;  %v2910_v4 = vld [vmem:[%s3707_s29 + $0x24] sm:$0x1] }
  0x85   : > { %v965_v35 = vrot.slane %v964_v29, 4  ;;  %v979_v36 = vrot.slane %v978_v32, 4  ;;  %v3511_v29 = vld [vmem:[%s4039_s1 + $0x210] sm:$0xff]  }
  0x86   : > { %3161 = vmatpush3.bf16.msra.mxu1 %v3479_v40  ;;  %v3502_v40 = vld [vmem:[%s3707_s29 + $0x50] ss:$8 sps:$4 sm:$0xff]   ;;  %v2239_v23 = vrot.slane %v2238_v12, 4 }
  0x87   : > { %3257 = vmatpush3.bf16.msra.mxu0 %v3480_v42  ;;  %3170 = vmatprep.subr.bf16.mxu1 %v3481_v43  ;;  %v970_v38 = vsel %vm3775_vm2, %v965_v35, %v969_v21  ;;  %v984_v39 = vsel %vm3775_vm2, %v979_v36, %v983_v27  ;;  %v3508_v21 = vld [vmem:[%s3707_s29 + $0x70] ss:$8 sps:$4 sm:$0xff]  }
  0x88   : > { %3266 = vmatprep.subr.bf16.mxu0 %v3483_v46  ;;  %v2706_v42 = vcombine.low %v970_v38, %v984_v39  ;;  %v3512_v39 = vld [vmem:[%s4039_s1 + $0x218] sm:$0xff]  }
  0x89   : > { %3163 = vmatmul.mubr.bf16.vlgmr.msra.gmra.mrb[0].mxu1 %v2704_v49  ;;  %v3500_v49 = vld [vmem:[%s4039_s1 + $0x1f8] sm:$0xff]  }
  0x8a   : > { %3171 = vmatpush3.bf16.msra.mxu1 %v3481_v43  ;;  %3259 = vmatmul.mubr.bf16.vlgmr.msra.gmra.mrb[0].mxu0 %v3484_v47  ;;  %v3501_v43 = vld [vmem:[%s3707_s29 + $0x90] ss:$8 sps:$4 sm:$0xff]  }
  0x8b   : > { %3267 = vmatpush3.bf16.msra.mxu0 %v3483_v46  ;;  %3172 = vmatprep.subr.bf16.mxu1 %v3485_v50  ;;  %v3496_v46 = vld [vmem:[%s4039_s1 + $0xf0] sm:$0xff]  }
  0x8c   : > { %3268 = vmatprep.subr.bf16.mxu0 %v3486_v54  ;;  %3262 = vmatprep.mubr.bf16.mxu0 %v3495_v61  ;;  %v3498_v47 = vld [vmem:[%s4039_s1 + $0x1f0] sm:$0xff]   ;;  %v2911_v61 = vld [vmem:[%s3707_s29 + $0x28] sm:$0xf] }
  0x8d   : > { %3166 = vmatprep.mubr.bf16.mxu1 %v2705_v34  ;;  %v2274_v8 = vshrl.u32 %v2911_v61, 16  ;;  %v2277_v9 = vshll.u32 %v2911_v61, 16 }
  0x8e   : > { %3173 = vmatpush3.bf16.msra.mxu1 %v3485_v50  ;;  %v3505_v50 = vld [vmem:[%s4039_s1 + $0x200] sm:$0xff]  }
  0x8f   : > { %3269 = vmatpush3.bf16.msra.mxu0 %v3486_v54  ;;  %3174 = vmatprep.subr.bf16.mxu1 %v3487_v7  ;;  %v2906_v54 = vld [vmem:[%s3707_s29 + $0x14] sm:$0x1]  ;;  %v2276_v19 = vrot.slane %v2274_v8, 4  ;;  %v2279_v20 = vrot.slane %v2277_v9, 5 }
  0x90   : > { %3270 = vmatprep.subr.bf16.mxu0 %v3488_v13  ;;  %v2241_v60 = vshll.u32 %v2906_v54, 16  ;;  %v3515_v9 = vld [vmem:[%s4039_s1 + $0x230] sm:$0xff]  }
  0x91   : > { %3167 = vmatmul.mubr.bf16.gmra.mrb[4].mxu1 %v2706_v42  ;;  %v2280_v27 = vor.u32 %v2279_v20, %v2276_v19  ;;  %v2917_v42 = vld [vmem:[%s3707_s29 + $0x40] sm:$0xf] }
  0x92   : > { %3175 = vmatpush3.bf16.msra.mxu1 %v3487_v7  ;;  %3263 = vmatmul.mubr.bf16.gmra.mrb[4].mxu0 %v3497_v30  ;;  %v2224_v7 = vor.u32 %v2223_v63, %v2220_v62  ;;  %v2243_v18 = vrot.slane %v2241_v60, 5 }
  0x93   : > { %3271 = vmatpush3.bf16.msra.mxu0 %v3488_v13  ;;  %3176 = vmatprep.subr.bf16.mxu1 %v3489_v22  ;;  %v2288_v13 = vshrl.u32 %v2913_v1, 16  ;;  %v2281_v32 = vrot.slane %v2280_v27, 4 }
  0x94   : > { %3272 = vmatprep.subr.bf16.mxu0 %v3490_v33  ;;  %3282 = vmatprep.mubr.bf16.mxu0 %v3502_v40  ;;  %v2244_v35 = vsel %vm3775_vm2, %v2239_v23, %v2243_v18  ;;  %v3516_v18 = vld [vmem:[%s4039_s1 + $0x238] sm:$0xff]  }
  0x95   : > { %3186 = vmatprep.mubr.bf16.mxu1 %v3501_v43  ;;  %v2290_v24 = vrot.slane %v2288_v13, 4  ;;  %v2286_v38 = vsel %vm3775_vm2, %v2281_v32, %v2285_v28  ;;  %v2269_v13 = vshll.u32 %v2910_v4, 16 }
  0x96   : > { %3177 = vmatpush3.bf16.msra.mxu1 %v3489_v22  ;;  %v2225_v22 = vrot.slane %v2224_v7, 4 }
  0x97   : > { %3273 = vmatpush3.bf16.msra.mxu0 %v3490_v33  ;;  %3178 = vmatprep.subr.bf16.mxu1 %v3491_v37  ;;  %v2294_v30 = vor.u32 %v2293_v26, %v2290_v24  ;;  %v3509_v33 = vld [vmem:[%s3707_s29 + $0xc0] ss:$8 sps:$4 sm:$0xff]  }
  0x98   : > { %3274 = vmatprep.subr.bf16.mxu0 %v3492_v41  ;;  %v2230_v34 = vsel %vm3775_vm2, %v2225_v22, %v2229_v17  ;;  %v2271_v22 = vrot.slane %v2269_v13, 5 }
  0x99   : > { %v2295_v36 = vrot.slane %v2294_v30, 4  ;;  %v2935_v43 = vcombine.low %v2230_v34, %v2244_v35 }
  0x9a   : > { %3179 = vmatpush3.bf16.msra.mxu1 %v3491_v37  ;;  %v3510_v37 = vld [vmem:[%s3707_s29 + $0x80] ss:$8 sps:$4 sm:$0xff]  }
  0x9b   : > { %3275 = vmatpush3.bf16.msra.mxu0 %v3492_v41  ;;  %3180 = vmatprep.subr.bf16.mxu1 %v3493_v44  ;;  %v2300_v40 = vsel %vm3775_vm2, %v2295_v36, %v2299_v31  ;;  %v2915_v41 = vld [vmem:[%s3707_s29 + $0x38] sm:$0xf] }
  0x9c   : > { %3276 = vmatprep.subr.bf16.mxu0 %v3494_v45 }
  0x9e   : > { %3181 = vmatpush3.bf16.msra.mxu1 %v3493_v44  ;;  %v2907_v44 = vld [vmem:[%s3707_s29 + $0x18] sm:$0xf] }
  0x9f   : > { %3277 = vmatpush3.bf16.msra.mxu0 %v3494_v45  ;;  %3182 = vmatprep.subr.bf16.mxu1 %v3496_v46  ;;  %v2909_v45 = vld [vmem:[%s3707_s29 + $0x20] sm:$0xf]  ;;  %v2246_v52 = vshrl.u32 %v2907_v44, 16  ;;  %v2249_v53 = vshll.u32 %v2907_v44, 16 }
  0xa0   : > { %3278 = vmatprep.subr.bf16.mxu0 %v3498_v47  ;;  %v2260_v54 = vshrl.u32 %v2909_v45, 16  ;;  %v2263_v55 = vshll.u32 %v2909_v45, 16  ;;  %v2947_v45 = vld [vmem:[%s4040_s2] ss:$0 sm:$0xff] }
  0xa1   : > { %v2248_v62 = vrot.slane %v2246_v52, 4  ;;  %v2251_v63 = vrot.slane %v2249_v53, 5 }
  0xa2   : > { %3183 = vmatpush3.bf16.msra.mxu1 %v3496_v46  ;;  %v2937_v46 = vcombine.low %v2286_v38, %v2300_v40  ;;  %v2262_v0 = vrot.slane %v2260_v54, 4  ;;  %v2265_v1 = vrot.slane %v2263_v55, 5 }
  0xa3   : > { %3279 = vmatpush3.bf16.msra.mxu0 %v3498_v47  ;;  %3184 = vmatprep.subr.bf16.mxu1 %v3499_v48  ;;  %v2302_v47 = vshrl.u32 %v2915_v41, 16  ;;  %v2252_v10 = vor.u32 %v2251_v63, %v2248_v62 }
  0xa4   : > { %3280 = vmatprep.subr.bf16.mxu0 %v3500_v49  ;;  %v2266_v12 = vor.u32 %v2265_v1, %v2262_v0 }
  0xa5   : > { %v2304_v58 = vrot.slane %v2302_v47, 4  ;;  %v2253_v19 = vrot.slane %v2252_v10, 4 }
  0xa6   : > { %3185 = vmatpush3.bf16.msra.mxu1 %v3499_v48  ;;  %v2305_v48 = vshll.u32 %v2915_v41, 16 }
  0xa7   : > { %3281 = vmatpush3.bf16.msra.mxu0 %v3500_v49  ;;  %3314 = vmatprep.subr.bf16.mxu1 %v3505_v50  ;;  %v2316_v49 = vshrl.u32 %v2917_v42, 16 }
  0xa8   : > { %3290 = vmatprep.subr.bf16.mxu0 %v3505_v50  ;;  %v2307_v59 = vrot.slane %v2305_v48, 5 }
  0xa9   : > { %3187 = vmatmul.mubr.bf16.vlgmr.msra.gmra.mrb[0].mxu1 %v3503_v2  ;;  %v2318_v60 = vrot.slane %v2316_v49, 4  ;;  %v2918_v2 = vld [vmem:[%s3707_s29 + $0x44] sm:$0x1] }
  0xaa   : > { %3283 = vmatmul.mubr.bf16.vlgmr.msra.gmra.mrb[0].mxu0 %v3504_v6  ;;  %3322 = vmatpush3.bf16.msra.mxu1 %v3505_v50  ;;  %v2308_v5 = vor.u32 %v2307_v59, %v2304_v58  ;;  %v2311_v6 = vshll.u32 %v2916_v57, 16  ;;  %v2325_v8 = vshll.u32 %v2918_v2, 16 }
  0xab   : > { %3291 = vmatpush3.bf16.msra.mxu0 %v3505_v50  ;;  %3315 = vmatprep.subr.bf16.mxu1 %v3506_v11  ;;  %v2319_v50 = vshll.u32 %v2917_v42, 16 }
  0xac   : > { %3292 = vmatprep.subr.bf16.mxu0 %v3506_v11  ;;  %3190 = vmatprep.mubr.bf16.mxu1 %v3507_v16  ;;  %v2309_v14 = vrot.slane %v2308_v5, 4  ;;  %v2313_v15 = vrot.slane %v2311_v6, 5  ;;  %v2327_v17 = vrot.slane %v2325_v8, 5 }
  0xad   : > { %3286 = vmatprep.mubr.bf16.mxu0 %v3508_v21  ;;  %v2321_v61 = vrot.slane %v2319_v50, 5  ;;  %v2267_v21 = vrot.slane %v2266_v12, 4 }
  0xae   : > { %3323 = vmatpush3.bf16.msra.mxu1 %v3506_v11  ;;  %v2314_v23 = vsel %vm3775_vm2, %v2309_v14, %v2313_v15 }
  0xaf   : > { %3293 = vmatpush3.bf16.msra.mxu0 %v3506_v11  ;;  %3316 = vmatprep.subr.bf16.mxu1 %v3511_v29  ;;  %v2322_v7 = vor.u32 %v2321_v61, %v2318_v60  ;;  %v2255_v11 = vshll.u32 %v2908_v3, 16  ;;  %v2272_v27 = vsel %vm3775_vm2, %v2267_v21, %v2271_v22 }
  0xb0   : > { %3294 = vmatprep.subr.bf16.mxu0 %v3511_v29 }
  0xb1   : > { %3191 = vmatmul.mubr.bf16.gmra.mrb[4].mxu1 %v3509_v33  ;;  %v2323_v16 = vrot.slane %v2322_v7, 4  ;;  %v2257_v20 = vrot.slane %v2255_v11, 5 }
  0xb2   : > { %3287 = vmatmul.mubr.bf16.gmra.mrb[4].mxu0 %v3510_v37  ;;  %3324 = vmatpush3.bf16.msra.mxu1 %v3511_v29 }
  0xb3   : > { %3295 = vmatpush3.bf16.msra.mxu0 %v3511_v29  ;;  %3317 = vmatprep.subr.bf16.mxu1 %v3512_v39  ;;  %v2328_v24 = vsel %vm3775_vm2, %v2323_v16, %v2327_v17  ;;  %v2258_v26 = vsel %vm3775_vm2, %v2253_v19, %v2257_v20 }
  0xb4   : > { %3296 = vmatprep.subr.bf16.mxu0 %v3512_v39  ;;  %3306 = vmatprep.mubr.bf16.mxu0 %v2935_v43  ;;  %v2938_v28 = vcombine.low %v2314_v23, %v2328_v24  ;;  %v2936_v29 = vcombine.low %v2258_v26, %v2272_v27 }
  0xb5   : > { %3310 = vmatprep.mubr.bf16.mxu1 %v2937_v46 }
  0xb6   : > { %3325 = vmatpush3.bf16.msra.mxu1 %v3512_v39 }
  0xb7   : > { %3297 = vmatpush3.bf16.msra.mxu0 %v3512_v39  ;;  %3318 = vmatprep.subr.bf16.mxu1 %v3513_v51 }
  0xb8   : > { %3298 = vmatprep.subr.bf16.mxu0 %v3513_v51 }
  0xba   : > { %3326 = vmatpush3.bf16.msra.mxu1 %v3513_v51 }
  0xbb   : > { %3299 = vmatpush3.bf16.msra.mxu0 %v3513_v51  ;;  %3319 = vmatprep.subr.bf16.mxu1 %v3514_v56 }
  0xbc   : > { %3300 = vmatprep.subr.bf16.mxu0 %v3514_v56 }
  0xbe   : > { %3327 = vmatpush3.bf16.msra.mxu1 %v3514_v56 }
  0xbf   : > { %3301 = vmatpush3.bf16.msra.mxu0 %v3514_v56  ;;  %3320 = vmatprep.subr.bf16.mxu1 %v3515_v9 }
  0xc0   : > { %3302 = vmatprep.subr.bf16.mxu0 %v3515_v9 }
  0xc2   : > { %3328 = vmatpush3.bf16.msra.mxu1 %v3515_v9 }
  0xc3   : > { %3303 = vmatpush3.bf16.msra.mxu0 %v3515_v9  ;;  %3321 = vmatprep.subr.bf16.mxu1 %v3516_v18 }
  0xc4   : > { %3304 = vmatprep.subr.bf16.mxu0 %v3516_v18 }
  0xc6   : > { %3329 = vmatpush3.bf16.msra.mxu1 %v3516_v18 }
  0xc7   : > { %3305 = vmatpush3.bf16.msra.mxu0 %v3516_v18 }
  0xc9   : > { %3311 = vmatmul.mubr.bf16.vlgmr.msra.gmra.mrb[8].mxu1 %v2938_v28 }
  0xca   : > { %3307 = vmatmul.mubr.bf16.vlgmr.msra.gmra.mrb[0].mxu0 %v2936_v29 }
 0x17c   : > { %v3188_v30 = vpop.f32.mrb[0].mxu1 }
 0x17d   : > { %v1287_v31 = vpop.f32.mrb[1].mxu1 }
 0x17e   : > { %v3189_v32 = vpop.f32.mrb[2].mxu1 }
 0x17f   : > { %v1290_v33 = vpop.f32.mrb[3].mxu1 }
 0x184   : > { %v3192_v34 = vpop.f32.mrb[4].mxu1 }
 0x185   : > { %v3288_v35 = vpop.f32.mrb[4].mxu0  ;;  %v1303_v36 = vpop.f32.mrb[5].mxu1 }
 0x186   : > { %v3334_v37 = vadd.f32 %v3288_v35, %v3192_v34  ;;  %v2162_v38 = vpop.f32.mrb[5].mxu0  ;;  %v3193_v25 = vpop.f32.mrb[6].mxu1 }
 0x187   : > { %v3336_v39 = vadd.f32 %v2162_v38, %v1303_v36  ;;  %v3289_v40 = vpop.f32.mrb[6].mxu0  ;;  %v1306_v41 = vpop.f32.mrb[7].mxu1 }
 0x188   : > { %v3338_v42 = vadd.f32 %v3289_v40, %v3193_v25  ;;  %v2165_v43 = vpop.f32.mrb[7].mxu0 }
 0x189   : > { %v3340_v44 = vadd.f32 %v2165_v43, %v1306_v41 }
 0x19c   : > { %v3312_v46 = vpop.f32.mrb[8].mxu1 }
 0x19d   : > { %v3308_v47 = vpop.f32.mrb[0].mxu0  ;;  %v3335_v48 = vadd.f32 %v3334_v37, %v3312_v46  ;;  %v2460_v49 = vpop.f32.mrb[9].mxu1 }
 0x19e   : > { %v3330_v50 = vadd.f32 %v3308_v47, %v3188_v30  ;;  %v2444_v51 = vpop.f32.mrb[1].mxu0  ;;  %v3337_v52 = vadd.f32 %v3336_v39, %v2460_v49  ;;  %v3313_v53 = vpop.f32.mrb[10].mxu1 }
 0x19f   : > { %v2520_v54 = vadd.f32 %v3335_v48, %v2947_v45  ;;  %v3331_v55 = vadd.f32 %v2444_v51, %v1287_v31  ;;  %v3309_v56 = vpop.f32.mrb[2].mxu0  ;;  %v3339_v57 = vadd.f32 %v3338_v42, %v3313_v53  ;;  %v2463_v58 = vpop.f32.mrb[11].mxu1 }
 0x1a0   : > { %v2516_v59 = vadd.f32 %v3330_v50, %v2947_v45  ;;  %v2518_v60 = vadd.f32 %v3337_v52, %v2947_v45  ;;  %v3332_v61 = vadd.f32 %v3309_v56, %v3189_v32  ;;  %v2447_v62 = vpop.f32.mrb[3].mxu0  ;;  %v3341_v63 = vadd.f32 %v3340_v44, %v2463_v58 }
 0x1a1   : > { %v2514_v0 = vadd.f32 %v3331_v55, %v2947_v45  ;;  %v2521_v1 = vadd.f32 %v3339_v57, %v2947_v45  ;;  %v3333_v2 = vadd.f32 %v2447_v62, %v1290_v33  ;;  %v2528_v5 = vmax.f32 %v2520_v54, 0.0 }
 0x1a2   : > { %v2517_v3 = vadd.f32 %v3332_v61, %v2947_v45  ;;  %v2519_v4 = vadd.f32 %v3341_v63, %v2947_v45  ;;  %v2524_v8 = vmax.f32 %v2516_v59, 0.0  ;;  %v2526_v9 = vmax.f32 %v2518_v60, 0.0 }
 0x1a3   : > { %v2529_v6 = vmax.f32 %v2521_v1, 0.0  ;;  %v2515_v7 = vadd.f32 %v3333_v2, %v2947_v45  ;;  %v2522_v12 = vmax.f32 %v2514_v0, 0.0 }
 0x1a4   : > { %v2525_v10 = vmax.f32 %v2517_v3, 0.0  ;;  %v2527_v11 = vmax.f32 %v2519_v4, 0.0 }
 0x1a5   : > { %v2985_v13 = vpack.c.bf16 %v2529_v6, %v2528_v5  ;;  %v2523_v14 = vmax.f32 %v2515_v7, 0.0 }
 0x1a6   : > { %v2975_v15 = vpack.c.bf16 %v2525_v10, %v2524_v8  ;;  %v2980_v16 = vpack.c.bf16 %v2527_v11, %v2526_v9 }
 0x1a7   : > { %2989 = vst [vmem:[%s496_s28 + $0x18] sm:$0xff] %v2985_v13   ;;  %v2970_v17 = vpack.c.bf16 %v2523_v14, %v2522_v12 }
 0x1a8   : > { %2987 = vst [vmem:[%s496_s28 + $0x8] sm:$0xff] %v2975_v15   ;;  %2988 = vst [vmem:[%s496_s28 + $0x10] sm:$0xff] %v2980_v16  }
 0x1a9   : > { %2971 = vst [vmem:[%s496_s28] sm:$0xff] %v2970_v17  }
 0x1aa PF: > { %p10_p9 = scmp.ge.s32.totalorder %s3578_s16, 4   ;;  %s4044_s12 = smov %s3535_s13 }
 0x1ab   : > { %s4045_s13 = smov %s3587_s19  ;;  %s4046_s14 = smov %s3578_s16 }
 0x1ac   :  { %12 = sbr.rel (!%p10_p9) target bundleno = 2 (0x2), region = 121 }

// kernel: new_model_forward.11
= control target key start
LH: loop header
LB: loop body
LE: loop exit
PB: predicated region body
PF: predicated region fallthrough
CT: control target
= control target key end

     0   :  { %s8385_s12 = smov 0   ;;  %s8387_s13 = smov 0   ;;  %s9417_s0 = inlined_call_operand.vmem [shape: bf16[4,2,17,17,128], index: 0, kind: input, shape index: {}]   ;;  %s9418_s1 = inlined_call_operand.vmem [shape: bf16[9,128,128], index: 1, kind: input, shape index: {}]   ;;  %s9419_s2 = inlined_call_operand.vmem [shape: f32[1,128], index: 2, kind: input, shape index: {}]   ;;  %s9420_s3 = inlined_call_operand.vmem [shape: bf16[2,256,128], index: 3, kind: output, shape index: {}]  }
   0x1   :  { %s8389_s14 = smov 0  }
   0x2 LB: > { %s6447_s15 = sadd.s32 4294967295, %s8363_s14   ;;  %s8402_s16 = sadd.s32 1, %s8363_s14   ;;  %s8363_s14 = sphi %s8389_s14, %s9425_s14   ;;  %s8359_s13 = sphi %s8387_s13, %s9424_s13   ;;  %s8355_s12 = sphi %s8385_s12, %s9423_s12  }
   0x3   : > { %s17_s17 = ssub.s32 %s8363_s14, %s8402_s16  ;;  %s20_s18 = sadd.s32 1, %s8359_s13 }
   0x4   : > { %p18_p0 = scmp.eq.s32.totalorder %s17_s17, 0  ;;  %p27_p1 = scmp.ne.s32.totalorder %s8359_s13, %s8355_s12 }
   0x5   : > { %p28_p2 = scmp.eq.s32.totalorder %s8363_s14, 0  ;;  %p6450_p4 = scmp.ge.s32.totalorder %s8363_s14, 2 }
   0x6   : > { %s8411_s19 = scalar_select %p18_p0, %s8359_s13, %s20_s18  }
   0x7   : > { %p29_p3 = por %p28_p2, %p27_p1  ;;  %127 = sbr.rel (%p6450_p4) target bundleno = 71 (0x47), region = 24 }
   0xe   : > { %130 = sbr.rel (!%p29_p3) target bundleno = 71 (0x47), region = 28  ;;  %s132_s20 = sand.u32 (%p29_p3), 1, %s8359_s13  }
   0xf   : > { %s8139_s21 = smul.u32 (%p29_p3), 204, %s8363_s14 }
  0x10   : > { %s8138_s22 = smul.u32 (%p29_p3), 816, %s132_s20 }
  0x11   : > { %s8419_s25 = scalar_lea.vmem (%p29_p3), %s9417_s0, %s8139_s21 }
  0x12   : > { %v153_v0 = vld [vmem:[%s8419_s25] sm:$0xff] (%p29_p3)   ;;  %v157_v1 = vld [vmem:[%s8419_s25 + $0x8] sm:$0xff] (%p29_p3)   ;;  %v161_v2 = vld [vmem:[%s8419_s25 + $0x10] sm:$0xff] (%p29_p3)   ;;  %s8424_s26 = scalar_lea.vmem (%p29_p3), [#allocation3], %s8138_s22 }
  0x13   : > { %154 = vst [vmem:[%s8424_s26] sm:$0xff] (%p29_p3), %v153_v0   ;;  %158 = vst [vmem:[%s8424_s26 + $0x8] sm:$0xff] (%p29_p3), %v157_v1   ;;  %v165_v3 = vld [vmem:[%s8419_s25 + $0x18] sm:$0xff] (%p29_p3)   ;;  %v169_v4 = vld [vmem:[%s8419_s25 + $0x20] sm:$0xff] (%p29_p3)  }
  0x14   : > { %162 = vst [vmem:[%s8424_s26 + $0x10] sm:$0xff] (%p29_p3), %v161_v2   ;;  %v173_v5 = vld [vmem:[%s8419_s25 + $0x28] sm:$0xff] (%p29_p3)   ;;  %166 = vst [vmem:[%s8424_s26 + $0x18] sm:$0xff] (%p29_p3), %v165_v3   ;;  %v177_v6 = vld [vmem:[%s8419_s25 + $0x30] sm:$0xff] (%p29_p3)  }
  0x15   : > { %170 = vst [vmem:[%s8424_s26 + $0x20] sm:$0xff] %v169_v4   ;;  %174 = vst [vmem:[%s8424_s26 + $0x28] sm:$0xff] %v173_v5   ;;  %v181_v7 = vld [vmem:[%s8419_s25 + $0x38] sm:$0xff]   ;;  %v185_v8 = vld [vmem:[%s8419_s25 + $0x40] sm:$0xff]  }
  0x16   : > { %178 = vst [vmem:[%s8424_s26 + $0x30] sm:$0xff] %v177_v6   ;;  %182 = vst [vmem:[%s8424_s26 + $0x38] sm:$0xff] %v181_v7   ;;  %v189_v9 = vld [vmem:[%s8419_s25 + $0x48] sm:$0xff]   ;;  %v193_v10 = vld [vmem:[%s8419_s25 + $0x50] sm:$0xff]  }
  0x17   : > { %186 = vst [vmem:[%s8424_s26 + $0x40] sm:$0xff] %v185_v8   ;;  %v197_v11 = vld [vmem:[%s8419_s25 + $0x58] sm:$0xff]   ;;  %190 = vst [vmem:[%s8424_s26 + $0x48] sm:$0xff] %v189_v9   ;;  %v201_v12 = vld [vmem:[%s8419_s25 + $0x60] sm:$0xff]  }
  0x18   : > { %194 = vst [vmem:[%s8424_s26 + $0x50] sm:$0xff] %v193_v10   ;;  %198 = vst [vmem:[%s8424_s26 + $0x58] sm:$0xff] %v197_v11   ;;  %v205_v13 = vld [vmem:[%s8419_s25 + $0x68] sm:$0xff]   ;;  %v209_v14 = vld [vmem:[%s8419_s25 + $0x70] sm:$0xff]  }
  0x19   : > { %202 = vst [vmem:[%s8424_s26 + $0x60] sm:$0xff] %v201_v12   ;;  %206 = vst [vmem:[%s8424_s26 + $0x68] sm:$0xff] %v205_v13   ;;  %v213_v15 = vld [vmem:[%s8419_s25 + $0x78] sm:$0xff]   ;;  %v217_v16 = vld [vmem:[%s8419_s25 + $0x80] sm:$0xff]  }
  0x1a   : > { %210 = vst [vmem:[%s8424_s26 + $0x70] sm:$0xff] %v209_v14   ;;  %v221_v17 = vld [vmem:[%s8419_s25 + $0x88] sm:$0xff]   ;;  %214 = vst [vmem:[%s8424_s26 + $0x78] sm:$0xff] %v213_v15   ;;  %v225_v18 = vld [vmem:[%s8419_s25 + $0x90] sm:$0xff]  }
  0x1b   : > { %218 = vst [vmem:[%s8424_s26 + $0x80] sm:$0xff] %v217_v16   ;;  %222 = vst [vmem:[%s8424_s26 + $0x88] sm:$0xff] %v221_v17   ;;  %v229_v19 = vld [vmem:[%s8419_s25 + $0x98] sm:$0xff]   ;;  %v233_v20 = vld [vmem:[%s8419_s25 + $0xa0] sm:$0xff]  }
  0x1c   : > { %226 = vst [vmem:[%s8424_s26 + $0x90] sm:$0xff] %v225_v18   ;;  %230 = vst [vmem:[%s8424_s26 + $0x98] sm:$0xff] %v229_v19   ;;  %v237_v21 = vld [vmem:[%s8419_s25 + $0xa8] sm:$0xff]   ;;  %v241_v22 = vld [vmem:[%s8419_s25 + $0xb0] sm:$0xff]  }
  0x1d   : > { %234 = vst [vmem:[%s8424_s26 + $0xa0] sm:$0xff] %v233_v20   ;;  %v245_v23 = vld [vmem:[%s8419_s25 + $0xb8] sm:$0xff]   ;;  %238 = vst [vmem:[%s8424_s26 + $0xa8] sm:$0xff] %v237_v21   ;;  %v249_v24 = vld [vmem:[%s8419_s25 + $0xc0] sm:$0xff]  }
  0x1e   : > { %242 = vst [vmem:[%s8424_s26 + $0xb0] sm:$0xff] %v241_v22   ;;  %246 = vst [vmem:[%s8424_s26 + $0xb8] sm:$0xff] %v245_v23   ;;  %v253_v25 = vld [vmem:[%s8419_s25 + $0xc8] sm:$0xf]  ;;  %v255_v26 = vld [vmem:[%s8419_s25 + $0x198] sm:$0xff]  }
  0x1f   : > { %250 = vst [vmem:[%s8424_s26 + $0xc0] sm:$0xff] %v249_v24   ;;  %254 = vst [vmem:[%s8424_s26 + $0xc8] sm:$0xf] %v253_v25  ;;  %v259_v27 = vld [vmem:[%s8419_s25 + $0x1a0] sm:$0xff]   ;;  %v263_v28 = vld [vmem:[%s8419_s25 + $0x1a8] sm:$0xff]  }
  0x20   : > { %256 = vst [vmem:[%s8424_s26 + $0xcc] sm:$0xff] %v255_v26   ;;  %v267_v29 = vld [vmem:[%s8419_s25 + $0x1b0] sm:$0xff]   ;;  %260 = vst [vmem:[%s8424_s26 + $0xd4] sm:$0xff] %v259_v27   ;;  %v271_v30 = vld [vmem:[%s8419_s25 + $0x1b8] sm:$0xff]  }
  0x21   : > { %264 = vst [vmem:[%s8424_s26 + $0xdc] sm:$0xff] %v263_v28   ;;  %268 = vst [vmem:[%s8424_s26 + $0xe4] sm:$0xff] %v267_v29   ;;  %v275_v31 = vld [vmem:[%s8419_s25 + $0x1c0] sm:$0xff]   ;;  %v279_v32 = vld [vmem:[%s8419_s25 + $0x1c8] sm:$0xff]  }
  0x22   : > { %272 = vst [vmem:[%s8424_s26 + $0xec] sm:$0xff] %v271_v30   ;;  %276 = vst [vmem:[%s8424_s26 + $0xf4] sm:$0xff] %v275_v31   ;;  %v283_v33 = vld [vmem:[%s8419_s25 + $0x1d0] sm:$0xff]   ;;  %v287_v34 = vld [vmem:[%s8419_s25 + $0x1d8] sm:$0xff]  }
  0x23   : > { %280 = vst [vmem:[%s8424_s26 + $0xfc] sm:$0xff] %v279_v32   ;;  %v291_v35 = vld [vmem:[%s8419_s25 + $0x1e0] sm:$0xff]   ;;  %284 = vst [vmem:[%s8424_s26 + $0x104] sm:$0xff] %v283_v33   ;;  %v295_v36 = vld [vmem:[%s8419_s25 + $0x1e8] sm:$0xff]  }
  0x24   : > { %288 = vst [vmem:[%s8424_s26 + $0x10c] sm:$0xff] %v287_v34   ;;  %292 = vst [vmem:[%s8424_s26 + $0x114] sm:$0xff] %v291_v35   ;;  %v299_v37 = vld [vmem:[%s8419_s25 + $0x1f0] sm:$0xff]   ;;  %v303_v38 = vld [vmem:[%s8419_s25 + $0x1f8] sm:$0xff]  }
  0x25   : > { %296 = vst [vmem:[%s8424_s26 + $0x11c] sm:$0xff] %v295_v36   ;;  %300 = vst [vmem:[%s8424_s26 + $0x124] sm:$0xff] %v299_v37   ;;  %v307_v39 = vld [vmem:[%s8419_s25 + $0x200] sm:$0xff]   ;;  %v311_v40 = vld [vmem:[%s8419_s25 + $0x208] sm:$0xff]  }
  0x26   : > { %304 = vst [vmem:[%s8424_s26 + $0x12c] sm:$0xff] %v303_v38   ;;  %v315_v41 = vld [vmem:[%s8419_s25 + $0x210] sm:$0xff]   ;;  %308 = vst [vmem:[%s8424_s26 + $0x134] sm:$0xff] %v307_v39   ;;  %v319_v42 = vld [vmem:[%s8419_s25 + $0x218] sm:$0xff]  }
  0x27   : > { %312 = vst [vmem:[%s8424_s26 + $0x13c] sm:$0xff] %v311_v40   ;;  %316 = vst [vmem:[%s8424_s26 + $0x144] sm:$0xff] %v315_v41   ;;  %v323_v43 = vld [vmem:[%s8419_s25 + $0x220] sm:$0xff]   ;;  %v327_v44 = vld [vmem:[%s8419_s25 + $0x228] sm:$0xff]  }
  0x28   : > { %320 = vst [vmem:[%s8424_s26 + $0x14c] sm:$0xff] %v319_v42   ;;  %324 = vst [vmem:[%s8424_s26 + $0x154] sm:$0xff] %v323_v43   ;;  %v331_v45 = vld [vmem:[%s8419_s25 + $0x230] sm:$0xff]   ;;  %v335_v46 = vld [vmem:[%s8419_s25 + $0x238] sm:$0xff]  }
  0x29   : > { %328 = vst [vmem:[%s8424_s26 + $0x15c] sm:$0xff] %v327_v44   ;;  %v339_v47 = vld [vmem:[%s8419_s25 + $0x240] sm:$0xff]   ;;  %332 = vst [vmem:[%s8424_s26 + $0x164] sm:$0xff] %v331_v45   ;;  %v343_v48 = vld [vmem:[%s8419_s25 + $0x248] sm:$0xff]  }
  0x2a   : > { %336 = vst [vmem:[%s8424_s26 + $0x16c] sm:$0xff] %v335_v46   ;;  %340 = vst [vmem:[%s8424_s26 + $0x174] sm:$0xff] %v339_v47   ;;  %v347_v49 = vld [vmem:[%s8419_s25 + $0x250] sm:$0xff]   ;;  %v351_v50 = vld [vmem:[%s8419_s25 + $0x258] sm:$0xff]  }
  0x2b   : > { %344 = vst [vmem:[%s8424_s26 + $0x17c] sm:$0xff] %v343_v48   ;;  %348 = vst [vmem:[%s8424_s26 + $0x184] sm:$0xff] %v347_v49   ;;  %v355_v51 = vld [vmem:[%s8419_s25 + $0x260] sm:$0xf]  ;;  %v357_v52 = vld [vmem:[%s8419_s25 + $0x330] sm:$0xff]  }
  0x2c   : > { %352 = vst [vmem:[%s8424_s26 + $0x18c] sm:$0xff] %v351_v50   ;;  %v361_v53 = vld [vmem:[%s8419_s25 + $0x338] sm:$0xff]   ;;  %356 = vst [vmem:[%s8424_s26 + $0x194] sm:$0xf] %v355_v51  ;;  %v365_v54 = vld [vmem:[%s8419_s25 + $0x340] sm:$0xff]  }
  0x2d   : > { %358 = vst [vmem:[%s8424_s26 + $0x198] sm:$0xff] %v357_v52   ;;  %362 = vst [vmem:[%s8424_s26 + $0x1a0] sm:$0xff] %v361_v53   ;;  %v369_v55 = vld [vmem:[%s8419_s25 + $0x348] sm:$0xff]   ;;  %v373_v56 = vld [vmem:[%s8419_s25 + $0x350] sm:$0xff]  }
  0x2e   : > { %366 = vst [vmem:[%s8424_s26 + $0x1a8] sm:$0xff] %v365_v54   ;;  %370 = vst [vmem:[%s8424_s26 + $0x1b0] sm:$0xff] %v369_v55   ;;  %v377_v57 = vld [vmem:[%s8419_s25 + $0x358] sm:$0xff]   ;;  %v381_v58 = vld [vmem:[%s8419_s25 + $0x360] sm:$0xff]  }
  0x2f   : > { %374 = vst [vmem:[%s8424_s26 + $0x1b8] sm:$0xff] %v373_v56   ;;  %v385_v59 = vld [vmem:[%s8419_s25 + $0x368] sm:$0xff]   ;;  %378 = vst [vmem:[%s8424_s26 + $0x1c0] sm:$0xff] %v377_v57   ;;  %v389_v60 = vld [vmem:[%s8419_s25 + $0x370] sm:$0xff]  }
  0x30   : > { %382 = vst [vmem:[%s8424_s26 + $0x1c8] sm:$0xff] %v381_v58   ;;  %386 = vst [vmem:[%s8424_s26 + $0x1d0] sm:$0xff] %v385_v59   ;;  %v393_v61 = vld [vmem:[%s8419_s25 + $0x378] sm:$0xff]   ;;  %v397_v62 = vld [vmem:[%s8419_s25 + $0x380] sm:$0xff]  }
  0x31   : > { %390 = vst [vmem:[%s8424_s26 + $0x1d8] sm:$0xff] %v389_v60   ;;  %394 = vst [vmem:[%s8424_s26 + $0x1e0] sm:$0xff] %v393_v61   ;;  %v401_v63 = vld [vmem:[%s8419_s25 + $0x388] sm:$0xff]   ;;  %v405_v0 = vld [vmem:[%s8419_s25 + $0x390] sm:$0xff]  }
  0x32   : > { %398 = vst [vmem:[%s8424_s26 + $0x1e8] sm:$0xff] %v397_v62   ;;  %v409_v1 = vld [vmem:[%s8419_s25 + $0x398] sm:$0xff]   ;;  %402 = vst [vmem:[%s8424_s26 + $0x1f0] sm:$0xff] %v401_v63   ;;  %v413_v2 = vld [vmem:[%s8419_s25 + $0x3a0] sm:$0xff]  }
  0x33   : > { %406 = vst [vmem:[%s8424_s26 + $0x1f8] sm:$0xff] %v405_v0   ;;  %410 = vst [vmem:[%s8424_s26 + $0x200] sm:$0xff] %v409_v1   ;;  %v417_v3 = vld [vmem:[%s8419_s25 + $0x3a8] sm:$0xff]   ;;  %v421_v4 = vld [vmem:[%s8419_s25 + $0x3b0] sm:$0xff]  }
  0x34   : > { %414 = vst [vmem:[%s8424_s26 + $0x208] sm:$0xff] %v413_v2   ;;  %418 = vst [vmem:[%s8424_s26 + $0x210] sm:$0xff] %v417_v3   ;;  %v425_v5 = vld [vmem:[%s8419_s25 + $0x3b8] sm:$0xff]   ;;  %v429_v6 = vld [vmem:[%s8419_s25 + $0x3c0] sm:$0xff]  }
  0x35   : > { %422 = vst [vmem:[%s8424_s26 + $0x218] sm:$0xff] %v421_v4   ;;  %v433_v7 = vld [vmem:[%s8419_s25 + $0x3c8] sm:$0xff]   ;;  %426 = vst [vmem:[%s8424_s26 + $0x220] sm:$0xff] %v425_v5   ;;  %v437_v8 = vld [vmem:[%s8419_s25 + $0x3d0] sm:$0xff]  }
  0x36   : > { %430 = vst [vmem:[%s8424_s26 + $0x228] sm:$0xff] %v429_v6   ;;  %434 = vst [vmem:[%s8424_s26 + $0x230] sm:$0xff] %v433_v7   ;;  %v441_v9 = vld [vmem:[%s8419_s25 + $0x3d8] sm:$0xff]   ;;  %v445_v10 = vld [vmem:[%s8419_s25 + $0x3e0] sm:$0xff]  }
  0x37   : > { %438 = vst [vmem:[%s8424_s26 + $0x238] sm:$0xff] %v437_v8   ;;  %442 = vst [vmem:[%s8424_s26 + $0x240] sm:$0xff] %v441_v9   ;;  %v449_v11 = vld [vmem:[%s8419_s25 + $0x3e8] sm:$0xff]   ;;  %v453_v12 = vld [vmem:[%s8419_s25 + $0x3f0] sm:$0xff]  }
  0x38   : > { %446 = vst [vmem:[%s8424_s26 + $0x248] sm:$0xff] %v445_v10   ;;  %v457_v13 = vld [vmem:[%s8419_s25 + $0x3f8] sm:$0xf]  ;;  %450 = vst [vmem:[%s8424_s26 + $0x250] sm:$0xff] %v449_v11   ;;  %v459_v14 = vld [vmem:[%s8419_s25 + $0x4c8] sm:$0xff]  }
  0x39   : > { %454 = vst [vmem:[%s8424_s26 + $0x258] sm:$0xff] %v453_v12   ;;  %458 = vst [vmem:[%s8424_s26 + $0x260] sm:$0xf] %v457_v13  ;;  %v463_v15 = vld [vmem:[%s8419_s25 + $0x4d0] sm:$0xff]   ;;  %v467_v16 = vld [vmem:[%s8419_s25 + $0x4d8] sm:$0xff]  }
  0x3a   : > { %460 = vst [vmem:[%s8424_s26 + $0x264] sm:$0xff] %v459_v14   ;;  %464 = vst [vmem:[%s8424_s26 + $0x26c] sm:$0xff] %v463_v15   ;;  %v471_v17 = vld [vmem:[%s8419_s25 + $0x4e0] sm:$0xff]   ;;  %v475_v18 = vld [vmem:[%s8419_s25 + $0x4e8] sm:$0xff]  }
  0x3b   : > { %468 = vst [vmem:[%s8424_s26 + $0x274] sm:$0xff] %v467_v16   ;;  %v479_v19 = vld [vmem:[%s8419_s25 + $0x4f0] sm:$0xff]   ;;  %472 = vst [vmem:[%s8424_s26 + $0x27c] sm:$0xff] %v471_v17   ;;  %v483_v20 = vld [vmem:[%s8419_s25 + $0x4f8] sm:$0xff]  }
  0x3c   : > { %476 = vst [vmem:[%s8424_s26 + $0x284] sm:$0xff] %v475_v18   ;;  %480 = vst [vmem:[%s8424_s26 + $0x28c] sm:$0xff] %v479_v19   ;;  %v487_v21 = vld [vmem:[%s8419_s25 + $0x500] sm:$0xff]   ;;  %v491_v22 = vld [vmem:[%s8419_s25 + $0x508] sm:$0xff]  }
  0x3d   : > { %484 = vst [vmem:[%s8424_s26 + $0x294] sm:$0xff] %v483_v20   ;;  %488 = vst [vmem:[%s8424_s26 + $0x29c] sm:$0xff] %v487_v21   ;;  %v495_v23 = vld [vmem:[%s8419_s25 + $0x510] sm:$0xff]   ;;  %v499_v24 = vld [vmem:[%s8419_s25 + $0x518] sm:$0xff]  }
  0x3e   : > { %492 = vst [vmem:[%s8424_s26 + $0x2a4] sm:$0xff] %v491_v22   ;;  %v503_v25 = vld [vmem:[%s8419_s25 + $0x520] sm:$0xff]   ;;  %496 = vst [vmem:[%s8424_s26 + $0x2ac] sm:$0xff] %v495_v23   ;;  %v507_v26 = vld [vmem:[%s8419_s25 + $0x528] sm:$0xff]  }
  0x3f   : > { %500 = vst [vmem:[%s8424_s26 + $0x2b4] sm:$0xff] %v499_v24   ;;  %504 = vst [vmem:[%s8424_s26 + $0x2bc] sm:$0xff] %v503_v25   ;;  %v511_v27 = vld [vmem:[%s8419_s25 + $0x530] sm:$0xff]   ;;  %v515_v28 = vld [vmem:[%s8419_s25 + $0x538] sm:$0xff]  }
  0x40   : > { %508 = vst [vmem:[%s8424_s26 + $0x2c4] sm:$0xff] %v507_v26   ;;  %512 = vst [vmem:[%s8424_s26 + $0x2cc] sm:$0xff] %v511_v27   ;;  %v519_v29 = vld [vmem:[%s8419_s25 + $0x540] sm:$0xff]   ;;  %v523_v30 = vld [vmem:[%s8419_s25 + $0x548] sm:$0xff]  }
  0x41   : > { %516 = vst [vmem:[%s8424_s26 + $0x2d4] sm:$0xff] %v515_v28   ;;  %v527_v31 = vld [vmem:[%s8419_s25 + $0x550] sm:$0xff]   ;;  %520 = vst [vmem:[%s8424_s26 + $0x2dc] sm:$0xff] %v519_v29   ;;  %v531_v32 = vld [vmem:[%s8419_s25 + $0x558] sm:$0xff]  }
  0x42   : > { %524 = vst [vmem:[%s8424_s26 + $0x2e4] sm:$0xff] %v523_v30   ;;  %528 = vst [vmem:[%s8424_s26 + $0x2ec] sm:$0xff] %v527_v31   ;;  %v535_v33 = vld [vmem:[%s8419_s25 + $0x560] sm:$0xff]   ;;  %v539_v34 = vld [vmem:[%s8419_s25 + $0x568] sm:$0xff]  }
  0x43   : > { %532 = vst [vmem:[%s8424_s26 + $0x2f4] sm:$0xff] %v531_v32   ;;  %536 = vst [vmem:[%s8424_s26 + $0x2fc] sm:$0xff] %v535_v33   ;;  %v543_v35 = vld [vmem:[%s8419_s25 + $0x570] sm:$0xff]   ;;  %v547_v36 = vld [vmem:[%s8419_s25 + $0x578] sm:$0xff]  }
  0x44   : > { %540 = vst [vmem:[%s8424_s26 + $0x304] sm:$0xff] %v539_v34   ;;  %v551_v37 = vld [vmem:[%s8419_s25 + $0x580] sm:$0xff]   ;;  %544 = vst [vmem:[%s8424_s26 + $0x30c] sm:$0xff] %v543_v35   ;;  %v555_v38 = vld [vmem:[%s8419_s25 + $0x588] sm:$0xff]  }
  0x45   : > { %548 = vst [vmem:[%s8424_s26 + $0x314] sm:$0xff] %v547_v36   ;;  %552 = vst [vmem:[%s8424_s26 + $0x31c] sm:$0xff] %v551_v37   ;;  %v559_v39 = vld [vmem:[%s8419_s25 + $0x590] sm:$0xf] }
  0x46   : > { %556 = vst [vmem:[%s8424_s26 + $0x324] sm:$0xff] %v555_v38   ;;  %560 = vst [vmem:[%s8424_s26 + $0x32c] sm:$0xf] %v559_v39 }
  0x47 PF: > { %p6452_p5 = scmp.ge.s32.totalorder %s8363_s14, 1  ;;  %p990_p6 = scmp.lt.s32.totalorder %s8363_s14, 3 }
  0x49   : > { %p991_p7 = pnand %p6452_p5, %p990_p6 }
  0x4a   : > { %v8165_v40 = vld [vmem:[%s9418_s1] sm:$0xff] (!%p991_p7)   ;;  %v8167_v42 = vld [vmem:[%s9418_s1 + $0x8] sm:$0xff] (!%p991_p7)   ;;  %v8169_v44 = vld [vmem:[%s9418_s1 + $0x10] sm:$0xff] (!%p991_p7)   ;;  %s997_s17 = sand.u32 (!%p991_p7), 1, %s8355_s12   ;;  %vm1910_vm0 = vsmask.f32 (!%p991_p7), 3328 }
  0x4b   : > { %994 = sbr.rel (%p991_p7) target bundleno = 613 (0x265), region = 69  ;;  %v8166_v41 = vld [vmem:[%s9418_s1 + $0x100] sm:$0xff] (!%p991_p7)   ;;  %7434 = vmatprep.subr.bf16.mxu1 (!%p991_p7), %v8165_v40  ;;  %v8168_v43 = vld [vmem:[%s9418_s1 + $0x108] sm:$0xff] (!%p991_p7)   ;;  %v8170_v45 = vld [vmem:[%s9418_s1 + $0x110] sm:$0xff] (!%p991_p7)   ;;  %vm1911_vm1 = vsmask.f32 (!%p991_p7), 7440 }
  0x4c   : > { %7626 = vmatprep.subr.bf16.mxu0 (!%p991_p7), %v8166_v41  ;;  %7435 = vmatpush3.bf16.msra.mxu1 (!%p991_p7), %v8165_v40  ;;  %v8171_v46 = vld [vmem:[%s9418_s1 + $0x18] sm:$0xff] (!%p991_p7)   ;;  %s8140_s23 = smul.u32 (!%p991_p7), 816, %s997_s17  ;;  %v8173_v48 = vld [vmem:[%s9418_s1 + $0x20] sm:$0xff] (!%p991_p7)   ;;  %v8175_v50 = vld [vmem:[%s9418_s1 + $0x28] sm:$0xff] (!%p991_p7)   ;;  %p1020_p8 = scmp.lt.s32.totalorder (!%p991_p7), %s6447_s15, 1 }
  0x4d   : > { %7627 = vmatpush3.bf16.msra.mxu0 (!%p991_p7), %v8166_v41  ;;  %7436 = vmatprep.subr.bf16.mxu1 (!%p991_p7), %v8167_v42  ;;  %v8172_v47 = vld [vmem:[%s9418_s1 + $0x118] sm:$0xff] (!%p991_p7)   ;;  %v8174_v49 = vld [vmem:[%s9418_s1 + $0x120] sm:$0xff] (!%p991_p7)   ;;  %v8176_v51 = vld [vmem:[%s9418_s1 + $0x128] sm:$0xff] (!%p991_p7)  }
  0x4e   : > { %7628 = vmatprep.subr.bf16.mxu0 (!%p991_p7), %v8168_v43  ;;  %s8670_s4 = scalar_lea.vmem (!%p991_p7), [#allocation3], %s8140_s23  ;;  %v8177_v54 = vld [vmem:[%s9418_s1 + $0x30] sm:$0xff] (!%p991_p7)   ;;  %v8179_v56 = vld [vmem:[%s9418_s1 + $0x38] sm:$0xff] (!%p991_p7)   ;;  %v8184_v59 = vld [vmem:[%s9418_s1 + $0x40] sm:$0xff] (!%p991_p7)  }
  0x4f   : > { %v8181_v52 = vld [vmem:[%s8670_s4] sm:$0xff] (!%p991_p7)   ;;  %v8180_v57 = vld [vmem:[%s9418_s1 + $0x138] sm:$0xff] (!%p991_p7)   ;;  %v8185_v61 = vld [vmem:[%s8670_s4 + $0x270] sm:$0xff] (!%p991_p7)  }
  0x50   : > { %7437 = vmatpush3.bf16.msra.mxu1 (!%p991_p7), %v8167_v42  ;;  %v8182_v53 = vld [vmem:[%s8670_s4 + $0x264] sm:$0xff] (!%p991_p7)   ;;  %7450 = vmatprep.mubr.bf16.mxu1 (!%p991_p7), %v8181_v52  ;;  %v8183_v58 = vld [vmem:[%s8670_s4 + $0xc] sm:$0xff] (!%p991_p7)   ;;  %v8188_v63 = vld [vmem:[%s8670_s4 + $0x18] sm:$0xff] (!%p991_p7)  }
  0x51   : > { %7629 = vmatpush3.bf16.msra.mxu0 (!%p991_p7), %v8168_v43  ;;  %7438 = vmatprep.subr.bf16.mxu1 (!%p991_p7), %v8169_v44  ;;  %v8178_v55 = vld [vmem:[%s9418_s1 + $0x130] sm:$0xff] (!%p991_p7)   ;;  %v8186_v60 = vld [vmem:[%s9418_s1 + $0x140] sm:$0xff] (!%p991_p7)   ;;  %v8187_v62 = vld [vmem:[%s9418_s1 + $0x148] sm:$0xff] (!%p991_p7)  }
  0x52   : > { %7630 = vmatprep.subr.bf16.mxu0 %v8170_v45  ;;  %7642 = vmatprep.mubr.bf16.mxu0 %v8182_v53  ;;  %v8189_v0 = vld [vmem:[%s8670_s4 + $0x27c] sm:$0xff]   ;;  %v8190_v2 = vld [vmem:[%s8670_s4 + $0x24] sm:$0xff]   ;;  %v8195_v6 = vld [vmem:[%s8670_s4 + $0x30] sm:$0xff]   ;;  %s9427_s15 = smov (!%p1020_p8, %s6447_s15), 1 }
  0x53   : > { %v8191_v1 = vld [vmem:[%s9418_s1 + $0x48] sm:$0xff]   ;;  %v8198_v3 = vld [vmem:[%s9418_s1 + $0x50] sm:$0xff]   ;;  %v8194_v8 = vld [vmem:[%s9418_s1 + $0x158] sm:$0xff]   ;;  %s7090_s22 = sshll.u32 %s9427_s15, 7 }
  0x54   : > { %7439 = vmatpush3.bf16.msra.mxu1 %v8169_v44  ;;  %v8193_v4 = vld [vmem:[%s9418_s1 + $0x150] sm:$0xff]   ;;  %v8192_v5 = vld [vmem:[%s8670_s4 + $0x288] sm:$0xff]   ;;  %v8200_v11 = vld [vmem:[%s9418_s1 + $0x160] sm:$0xff]   ;;  %s9357_s24 = scalar_lea.vmem %s9420_s3, %s7090_s22 }
  0x55   : > { %7631 = vmatpush3.bf16.msra.mxu0 %v8170_v45  ;;  %7440 = vmatprep.subr.bf16.mxu1 %v8171_v46  ;;  %v8196_v7 = vld [vmem:[%s8670_s4 + $0x294] sm:$0xff]   ;;  %v8197_v10 = vld [vmem:[%s8670_s4 + $0x3c] sm:$0xff]   ;;  %v8202_v13 = vld [vmem:[%s8670_s4 + $0x48] sm:$0xff]  }
  0x56   : > { %7632 = vmatprep.subr.bf16.mxu0 %v8172_v47  ;;  %v8205_v9 = vld [vmem:[%s9418_s1 + $0x58] sm:$0xff]   ;;  %v8199_v12 = vld [vmem:[%s8670_s4 + $0x2a0] sm:$0xff]   ;;  %v8201_v19 = vld [vmem:[%s9418_s1 + $0x168] sm:$0xff]  }
  0x57   : > { %v6735_v14 = vld [vmem:[%s8670_s4 + $0x198] sm:$0xf]  ;;  %v6736_v15 = vld [vmem:[%s8670_s4 + $0x19c] sm:$0xf]  ;;  %v6737_v16 = vld [vmem:[%s8670_s4 + $0x1a0] sm:$0x1] }
  0x58   : > { %7441 = vmatpush3.bf16.msra.mxu1 %v8171_v46  ;;  %v3634_v17 = vshrl.u32 %v6735_v14, 16  ;;  %v3637_v18 = vshll.u32 %v6735_v14, 16  ;;  %v8203_v20 = vld [vmem:[%s8670_s4 + $0x2ac] sm:$0xff]   ;;  %v3643_v21 = vshll.u32 %v6736_v15, 16  ;;  %v3647_v22 = vshrl.u32 %v6736_v15, 16  ;;  %vm8739_vm2 = vmor %vm1910_vm0, %vm1911_vm1  ;;  %v8204_v39 = vld [vmem:[%s8670_s4 + $0x54] sm:$0xff]  }
  0x59   : > { %7633 = vmatpush3.bf16.msra.mxu0 %v8172_v47  ;;  %7442 = vmatprep.subr.bf16.mxu1 %v8173_v48  ;;  %v3653_v23 = vshll.u32 %v6737_v16, 16  ;;  %v8211_v29 = vld [vmem:[%s9418_s1 + $0x60] sm:$0xff]   ;;  %v6739_v32 = vld [vmem:[%s8670_s4 + $0x1a8] sm:$0xf]  ;;  %v6740_v33 = vld [vmem:[%s8670_s4 + $0x1ac] sm:$0x1] }
  0x5a   : > { %7634 = vmatprep.subr.bf16.mxu0 %v8174_v49  ;;  %v3636_v24 = vrot.slane %v3634_v17, 4  ;;  %v3639_v25 = vrot.slane %v3637_v18, 5  ;;  %v3645_v26 = vrot.slane %v3643_v21, 5  ;;  %v3649_v27 = vrot.slane %v3647_v22, 4  ;;  %v6738_v31 = vld [vmem:[%s8670_s4 + $0x1a4] sm:$0xf] }
  0x5b   : > { %v3655_v28 = vrot.slane %v3653_v23, 5  ;;  %v3658_v36 = vshrl.u32 %v6738_v31, 16  ;;  %v3661_v37 = vshll.u32 %v6738_v31, 16  ;;  %v3667_v38 = vshll.u32 %v6739_v32, 16  ;;  %v8207_v40 = vld [vmem:[%s9418_s1 + $0x170] sm:$0xff]   ;;  %v8206_v44 = vld [vmem:[%s8670_s4 + $0x2b8] sm:$0xff]  }
  0x5c   : > { %7443 = vmatpush3.bf16.msra.mxu1 %v8173_v48  ;;  %v3640_v30 = vor.u32 %v3639_v25, %v3636_v24  ;;  %v3650_v35 = vor.u32 %v3649_v27, %v3645_v26  ;;  %v3671_v42 = vshrl.u32 %v6739_v32, 16  ;;  %v3677_v43 = vshll.u32 %v6740_v33, 16  ;;  %v8209_v45 = vld [vmem:[%s8670_s4 + $0x60] sm:$0xff]   ;;  %v6741_v53 = vld [vmem:[%s8670_s4 + $0x1b0] sm:$0xf]  ;;  %v8213_v21 = vld [vmem:[%s8670_s4 + $0x78] sm:$0xff]  }
  0x5d   : > { %7635 = vmatpush3.bf16.msra.mxu0 %v8174_v49  ;;  %7444 = vmatprep.subr.bf16.mxu1 %v8175_v50  ;;  %v3660_v47 = vrot.slane %v3658_v36, 4  ;;  %v3663_v48 = vrot.slane %v3661_v37, 5  ;;  %v3669_v49 = vrot.slane %v3667_v38, 5  ;;  %v8210_v14 = vld [vmem:[%s8670_s4 + $0x6c] sm:$0xff]   ;;  %v6745_v17 = vld [vmem:[%s8670_s4 + $0x1c0] sm:$0xf] }
  0x5e   : > { %7636 = vmatprep.subr.bf16.mxu0 %v8176_v51  ;;  %v3641_v41 = vrot.slane %v3640_v30, 4  ;;  %v3651_v46 = vrot.slane %v3650_v35, 4  ;;  %v3679_v52 = vrot.slane %v3677_v43, 5  ;;  %v6746_v18 = vld [vmem:[%s8670_s4 + $0x1c4] sm:$0x1]  ;;  %v3715_v23 = vshll.u32 %v6745_v17, 16 }
  0x5f   : > { %v3719_v24 = vshrl.u32 %v6745_v17, 16  ;;  %v8216_v33 = vld [vmem:[%s9418_s1 + $0x188] sm:$0xff]   ;;  %v6749_v43 = vld [vmem:[%s8670_s4 + $0x1d0] sm:$0x1]  ;;  %v8223_v17 = vld [vmem:[%s9418_s1 + $0x78] sm:$0xff]  }
  0x60   : > { %7445 = vmatpush3.bf16.msra.mxu1 %v8175_v50  ;;  %v3646_v50 = vsel %vm8739_vm2, %v3641_v41, %v3645_v26  ;;  %v3717_v31 = vrot.slane %v3715_v23, 5  ;;  %v6747_v38 = vld [vmem:[%s8670_s4 + $0x1c8] sm:$0xf] }
  0x61   : > { %7637 = vmatpush3.bf16.msra.mxu0 %v8176_v51  ;;  %7446 = vmatprep.subr.bf16.mxu1 %v8177_v54  ;;  %v3673_v51 = vrot.slane %v3671_v42, 4  ;;  %v3721_v32 = vrot.slane %v3719_v24, 4 }
  0x62   : > { %7638 = vmatprep.subr.bf16.mxu0 %v8178_v55 }
  0x63   : > { %v3722_v42 = vor.u32 %v3721_v32, %v3717_v31 }
  0x64   : > { %7447 = vmatpush3.bf16.msra.mxu1 %v8177_v54  ;;  %v3656_v54 = vsel %vm8739_vm2, %v3651_v46, %v3655_v28  ;;  %v3725_v28 = vshll.u32 %v6746_v18, 16 }
  0x65   : > { %7639 = vmatpush3.bf16.msra.mxu0 %v8178_v55  ;;  %7448 = vmatprep.subr.bf16.mxu1 %v8179_v56  ;;  %v3664_v55 = vor.u32 %v3663_v48, %v3660_v47 }
  0x66   : > { %7640 = vmatprep.subr.bf16.mxu0 %v8180_v57  ;;  %v3727_v37 = vrot.slane %v3725_v28, 5  ;;  %v8218_v28 = vld [vmem:[%s8670_s4 + $0x9c] sm:$0xff]  }
  0x68   : > { %7449 = vmatpush3.bf16.msra.mxu1 %v8179_v56  ;;  %v6742_v56 = vld [vmem:[%s8670_s4 + $0x1b4] sm:$0xf] }
  0x69   : > { %7641 = vmatpush3.bf16.msra.mxu0 %v8180_v57  ;;  %7482 = vmatprep.subr.bf16.mxu1 %v8184_v59  ;;  %v6743_v57 = vld [vmem:[%s8670_s4 + $0x1b8] sm:$0x1] }
  0x6a   : > { %7674 = vmatprep.subr.bf16.mxu0 %v8186_v60 }
  0x6b   : > { %7451 = vmatmul.mubr.bf16.vlgmr.msra.gmra.mrb[0].mxu1 %v8183_v58  ;;  %v3682_v58 = vshrl.u32 %v6741_v53, 16 }
  0x6c   : > { %7643 = vmatmul.mubr.bf16.vlgmr.msra.gmra.mrb[0].mxu0 %v8185_v61  ;;  %7483 = vmatpush3.bf16.msra.mxu1 %v8184_v59  ;;  %v3685_v59 = vshll.u32 %v6741_v53, 16  ;;  %v3674_v61 = vor.u32 %v3673_v51, %v3669_v49  ;;  %v8214_v53 = vld [vmem:[%s8670_s4 + $0x84] sm:$0xff]  }
  0x6d   : > { %7675 = vmatpush3.bf16.msra.mxu0 %v8186_v60  ;;  %7454 = vmatprep.mubr.bf16.mxu1 %v8188_v63  ;;  %v6799_v60 = vcombine.low %v3646_v50, %v3656_v54  ;;  %v3695_v63 = vshrl.u32 %v6742_v56, 16  ;;  %v3723_v50 = vrot.slane %v3722_v42, 4  ;;  %v6756_v42 = vld [vmem:[%s8670_s4 + $0x1ec] sm:$0xf] }
  0x6e   : > { %7676 = vmatprep.subr.bf16.mxu0 %v8187_v62  ;;  %7646 = vmatprep.mubr.bf16.mxu0 %v8189_v0  ;;  %v8208_v0 = vld [vmem:[%s9418_s1 + $0x178] sm:$0xff]  }
  0x6f   : > { %7484 = vmatprep.subr.bf16.mxu1 %v8191_v1 }
  0x70   : > { %7485 = vmatpush3.bf16.msra.mxu1 %v8191_v1  ;;  %v3665_v1 = vrot.slane %v3664_v55, 4 }
  0x71   : > { %7677 = vmatpush3.bf16.msra.mxu0 %v8187_v62  ;;  %7486 = vmatprep.subr.bf16.mxu1 %v8198_v3  ;;  %v3691_v62 = vshll.u32 %v6742_v56, 16 }
  0x72   : > { %7678 = vmatprep.subr.bf16.mxu0 %v8193_v4 }
  0x73   : > { %7455 = vmatmul.mubr.bf16.gmra.mrb[4].mxu1 %v8190_v2  ;;  %v3684_v2 = vrot.slane %v3682_v58, 4  ;;  %v8220_v58 = vld [vmem:[%s9418_s1 + $0x190] sm:$0xff]  }
  0x74   : > { %7647 = vmatmul.mubr.bf16.gmra.mrb[4].mxu0 %v8192_v5  ;;  %7458 = vmatprep.mubr.bf16.mxu1 %v8195_v6  ;;  %v8215_v5 = vld [vmem:[%s9418_s1 + $0x68] sm:$0xff]   ;;  %v3675_v6 = vrot.slane %v3674_v61, 4 }
  0x75   : > { %7679 = vmatpush3.bf16.msra.mxu0 %v8193_v4  ;;  %7650 = vmatprep.mubr.bf16.mxu0 %v8196_v7  ;;  %v3701_v4 = vshll.u32 %v6743_v57, 16  ;;  %v3693_v7 = vrot.slane %v3691_v62, 5  ;;  %v6750_v62 = vld [vmem:[%s8670_s4 + $0x1d4] sm:$0xf] }
  0x76   : > { %7680 = vmatprep.subr.bf16.mxu0 %v8194_v8  ;;  %7487 = vmatpush3.bf16.msra.mxu1 %v8198_v3  ;;  %v3687_v3 = vrot.slane %v3685_v59, 5  ;;  %v3680_v15 = vsel %vm8739_vm2, %v3675_v6, %v3679_v52  ;;  %v3728_v59 = vsel %vm8739_vm2, %v3723_v50, %v3727_v37  ;;  %v8224_v37 = vld [vmem:[%s9418_s1 + $0x198] sm:$0xff]  }
  0x77   : > { %7488 = vmatprep.subr.bf16.mxu1 %v8205_v9 }
  0x79   : > { %7681 = vmatpush3.bf16.msra.mxu0 %v8194_v8  ;;  %v3697_v8 = vrot.slane %v3695_v63, 4  ;;  %v6751_v63 = vld [vmem:[%s8670_s4 + $0x1d8] sm:$0xf] }
  0x7a   : > { %7682 = vmatprep.subr.bf16.mxu0 %v8200_v11  ;;  %7489 = vmatpush3.bf16.msra.mxu1 %v8205_v9  ;;  %v3670_v9 = vsel %vm8739_vm2, %v3665_v1, %v3669_v49  ;;  %v3749_v49 = vshll.u32 %v6749_v43, 16  ;;  %v3763_v6 = vshll.u32 %v6751_v63, 16  ;;  %v6757_v43 = vld [vmem:[%s8670_s4 + $0x1f0] sm:$0xf] }
  0x7b   : > { %7459 = vmatmul.mubr.bf16.gmra.mrb[8].mxu1 %v8197_v10  ;;  %7490 = vmatprep.subr.bf16.mxu1 %v8211_v29  ;;  %v8212_v10 = vld [vmem:[%s9418_s1 + $0x180] sm:$0xff]   ;;  %v3698_v16 = vor.u32 %v3697_v8, %v3693_v7 }
  0x7c   : > { %7651 = vmatmul.mubr.bf16.gmra.mrb[8].mxu0 %v8199_v12  ;;  %7462 = vmatprep.mubr.bf16.mxu1 %v8202_v13  ;;  %v3703_v12 = vrot.slane %v3701_v4, 5  ;;  %v6744_v13 = vld [vmem:[%s8670_s4 + $0x1bc] sm:$0xf]  ;;  %v3751_v57 = vrot.slane %v3749_v49, 5  ;;  %v3757_v4 = vshll.u32 %v6750_v62, 16 }
  0x7d   : > { %7683 = vmatpush3.bf16.msra.mxu0 %v8200_v11  ;;  %7654 = vmatprep.mubr.bf16.mxu0 %v8203_v20  ;;  %v3688_v11 = vor.u32 %v3687_v3, %v3684_v2  ;;  %v3709_v20 = vshll.u32 %v6744_v13, 16  ;;  %v3699_v25 = vrot.slane %v3698_v16, 4  ;;  %v3754_v3 = vshrl.u32 %v6750_v62, 16  ;;  %v6753_v16 = vld [vmem:[%s8670_s4 + $0x1e0] sm:$0xf] }
  0x7e   : > { %7684 = vmatprep.subr.bf16.mxu0 %v8201_v19  ;;  %7491 = vmatpush3.bf16.msra.mxu1 %v8211_v29  ;;  %v6800_v29 = vcombine.low %v3670_v9, %v3680_v15  ;;  %v3781_v23 = vshll.u32 %v6753_v16, 16 }
  0x7f   : > { %v3689_v22 = vrot.slane %v3688_v11, 4  ;;  %7492 = vmatprep.subr.bf16.mxu1 %v8215_v5  ;;  %v3711_v27 = vrot.slane %v3709_v20, 5  ;;  %v3704_v35 = vsel %vm8739_vm2, %v3699_v25, %v3703_v12  ;;  %v3759_v11 = vrot.slane %v3757_v4, 5  ;;  %v6754_v20 = vld [vmem:[%s8670_s4 + $0x1e4] sm:$0xf]  ;;  %v8222_v4 = vld [vmem:[%s8670_s4 + $0xb4] sm:$0xff]  }
  0x81   : > { %7685 = vmatpush3.bf16.msra.mxu0 %v8201_v19  ;;  %v3706_v19 = vshrl.u32 %v6744_v13, 16  ;;  %v3694_v30 = vsel %vm8739_vm2, %v3689_v22, %v3693_v7  ;;  %v3767_v7 = vshrl.u32 %v6751_v63, 16  ;;  %v3765_v13 = vrot.slane %v3763_v6, 5 }
  0x82   : > { %7686 = vmatprep.subr.bf16.mxu0 %v8207_v40  ;;  %7493 = vmatpush3.bf16.msra.mxu1 %v8215_v5  ;;  %v6801_v41 = vcombine.low %v3694_v30, %v3704_v35  ;;  %v3778_v22 = vshrl.u32 %v6753_v16, 16  ;;  %v8833_v16 = vld [vmem:[%s9418_s1 + $0x80] sm:$0xff]  }
  0x83   : > { %7463 = vmatmul.mubr.bf16.gmra.mrb[12].mxu1 %v8204_v39  ;;  %v3708_v26 = vrot.slane %v3706_v19, 4  ;;  %v6748_v39 = vld [vmem:[%s8670_s4 + $0x1cc] sm:$0xf] }
  0x84   : > { %7655 = vmatmul.mubr.bf16.gmra.mrb[12].mxu0 %v8206_v44  ;;  %7466 = vmatprep.mubr.bf16.mxu1 %v8209_v45  ;;  %v3730_v44 = vshrl.u32 %v6747_v38, 16  ;;  %v3733_v45 = vshll.u32 %v6747_v38, 16  ;;  %v3739_v47 = vshll.u32 %v6748_v39, 16  ;;  %v3743_v48 = vshrl.u32 %v6748_v39, 16  ;;  %v8221_v39 = vld [vmem:[%s8670_s4 + $0xa8] sm:$0xff]  }
  0x85   : > { %7687 = vmatpush3.bf16.msra.mxu0 %v8207_v40  ;;  %7690 = vmatprep.mubr.bf16.mxu0 %v6799_v60  ;;  %v3712_v36 = vor.u32 %v3711_v27, %v3708_v26  ;;  %v8219_v40 = vld [vmem:[%s9418_s1 + $0x70] sm:$0xff]   ;;  %v3787_v26 = vshll.u32 %v6754_v20, 16  ;;  %v3791_v27 = vshrl.u32 %v6754_v20, 16  ;;  %v3780_v30 = vrot.slane %v3778_v22, 4 }
  0x86   : > { %7688 = vmatprep.subr.bf16.mxu0 %v8208_v0  ;;  %7494 = vmatprep.subr.bf16.mxu1 %v8219_v40  ;;  %v3732_v51 = vrot.slane %v3730_v44, 4  ;;  %v3735_v52 = vrot.slane %v3733_v45, 5  ;;  %v3741_v55 = vrot.slane %v3739_v47, 5  ;;  %v3745_v56 = vrot.slane %v3743_v48, 4  ;;  %v8217_v60 = vld [vmem:[%s8670_s4 + $0x90] sm:$0xff]  }
  0x87   : > { %v3713_v46 = vrot.slane %v3712_v36, 4  ;;  %7495 = vmatpush3.bf16.msra.mxu1 %v8219_v40  ;;  %v3789_v35 = vrot.slane %v3787_v26, 5  ;;  %v3793_v36 = vrot.slane %v3791_v27, 4  ;;  %v3802_v47 = vshrl.u32 %v6756_v42, 16  ;;  %v6762_v20 = vld [vmem:[%s8670_s4 + $0x204] sm:$0xf] }
  0x88   : > { %v3736_v61 = vor.u32 %v3735_v52, %v3732_v51  ;;  %v3746_v2 = vor.u32 %v3745_v56, %v3741_v55  ;;  %7496 = vmatprep.subr.bf16.mxu1 %v8223_v17  ;;  %v3805_v48 = vshll.u32 %v6756_v42, 16  ;;  %v3811_v51 = vshll.u32 %v6757_v43, 16 }
  0x89   : > { %7689 = vmatpush3.bf16.msra.mxu0 %v8208_v0  ;;  %v3718_v54 = vsel %vm8739_vm2, %v3713_v46, %v3717_v31  ;;  %v6752_v0 = vld [vmem:[%s8670_s4 + $0x1dc] sm:$0x1]  ;;  %v3783_v31 = vrot.slane %v3781_v23, 5  ;;  %v3794_v45 = vor.u32 %v3793_v36, %v3789_v35  ;;  %v6758_v46 = vld [vmem:[%s8670_s4 + $0x1f4] sm:$0x1]  ;;  %v3815_v52 = vshrl.u32 %v6757_v43, 16 }
  0x8a   : > { %7722 = vmatprep.subr.bf16.mxu0 %v8212_v10  ;;  %v6802_v1 = vcombine.low %v3718_v54, %v3728_v59  ;;  %v3737_v5 = vrot.slane %v3736_v61, 4  ;;  %v3773_v8 = vshll.u32 %v6752_v0, 16  ;;  %v3747_v9 = vrot.slane %v3746_v2, 4  ;;  %v6760_v0 = vld [vmem:[%s8670_s4 + $0x1fc] sm:$0xf] }
  0x8b   : > { %7467 = vmatmul.mubr.bf16.gmra.mrb[16].mxu1 %v8210_v14  ;;  %v3769_v14 = vrot.slane %v3767_v7, 4  ;;  %v3784_v40 = vor.u32 %v3783_v31, %v3780_v30  ;;  %v3804_v54 = vrot.slane %v3802_v47, 4  ;;  %v3821_v56 = vshll.u32 %v6758_v46, 16  ;;  %v8228_v31 = vld [vmem:[%s9418_s1 + $0x1a0] sm:$0xff]  }
  0x8c   : > { %7691 = vmatmul.mubr.bf16.vlgmr.msra.gmra.mrb[0].mxu0 %v6800_v29  ;;  %7470 = vmatprep.mubr.bf16.mxu1 %v8213_v21  ;;  %v3742_v12 = vsel %vm8739_vm2, %v3737_v5, %v3741_v55  ;;  %v3775_v15 = vrot.slane %v3773_v8, 5  ;;  %v3752_v18 = vsel %vm8739_vm2, %v3747_v9, %v3751_v57  ;;  %v6755_v21 = vld [vmem:[%s8670_s4 + $0x1e8] sm:$0x1]  ;;  %v3807_v55 = vrot.slane %v3805_v48, 5  ;;  %v8225_v9 = vld [vmem:[%s8670_s4 + $0xcc] sm:$0xff]  }
  0x8d   : > { %7723 = vmatpush3.bf16.msra.mxu0 %v8212_v10  ;;  %7694 = vmatprep.mubr.bf16.mxu0 %v6801_v41  ;;  %v3756_v10 = vrot.slane %v3754_v3, 4  ;;  %v6803_v24 = vcombine.low %v3742_v12, %v3752_v18  ;;  %v3770_v25 = vor.u32 %v3769_v14, %v3765_v13  ;;  %v3797_v32 = vshll.u32 %v6755_v21, 16  ;;  %v6763_v21 = vld [vmem:[%s8670_s4 + $0x208] sm:$0xf] }
  0x8e   : > { %7724 = vmatprep.subr.bf16.mxu0 %v8216_v33  ;;  %7497 = vmatpush3.bf16.msra.mxu1 %v8223_v17  ;;  %v3785_v50 = vrot.slane %v3784_v40, 4  ;;  %v3817_v59 = vrot.slane %v3815_v52, 4  ;;  %v3808_v62 = vor.u32 %v3807_v55, %v3804_v54  ;;  %v3823_v63 = vrot.slane %v3821_v56, 5  ;;  %v8229_v48 = vld [vmem:[%s8670_s4 + $0xe4] sm:$0xff]  }
  0x8f   : > { %v3760_v19 = vor.u32 %v3759_v11, %v3756_v10  ;;  %v3799_v41 = vrot.slane %v3797_v32, 5  ;;  %v3835_v7 = vshll.u32 %v6760_v0, 16  ;;  %v3839_v11 = vshrl.u32 %v6760_v0, 16  ;;  %7530 = vmatprep.subr.bf16.mxu1 %v8833_v16  ;;  %v8231_v56 = vld [vmem:[%s9418_s1 + $0x88] sm:$0xff]  }
  0x90   : > { %v3790_v57 = vsel %vm8739_vm2, %v3785_v50, %v3789_v35  ;;  %v3809_v8 = vrot.slane %v3808_v62, 4  ;;  %v3853_v26 = vshll.u32 %v6762_v20, 16  ;;  %v3863_v30 = vshrl.u32 %v6763_v21, 16 }
  0x91   : > { %7725 = vmatpush3.bf16.msra.mxu0 %v8216_v33  ;;  %v3761_v29 = vrot.slane %v3760_v19, 4  ;;  %v3771_v33 = vrot.slane %v3770_v25, 4  ;;  %v3841_v18 = vrot.slane %v3839_v11, 4  ;;  %v3850_v25 = vshrl.u32 %v6762_v20, 16 }
  0x92   : > { %7726 = vmatprep.subr.bf16.mxu0 %v8220_v58  ;;  %v3855_v35 = vrot.slane %v3853_v26, 5 }
  0x93   : > { %7471 = vmatmul.mubr.bf16.gmra.mrb[20].mxu1 %v8214_v53  ;;  %v3766_v38 = vsel %vm8739_vm2, %v3761_v29, %v3765_v13  ;;  %v3776_v44 = vsel %vm8739_vm2, %v3771_v33, %v3775_v15  ;;  %v3795_v53 = vrot.slane %v3794_v45, 4  ;;  %v3837_v15 = vrot.slane %v3835_v7, 5  ;;  %v6766_v45 = vld [vmem:[%s8670_s4 + $0x214] sm:$0xf] }
  0x94   : > { %7695 = vmatmul.mubr.bf16.gmra.mrb[4].mxu0 %v6802_v1  ;;  %7474 = vmatprep.mubr.bf16.mxu1 %v8217_v60  ;;  %v6804_v49 = vcombine.low %v3766_v38, %v3776_v44  ;;  %v6759_v60 = vld [vmem:[%s8670_s4 + $0x1f8] sm:$0xf]  ;;  %v6761_v1 = vld [vmem:[%s8670_s4 + $0x200] sm:$0x1]  ;;  %v3859_v29 = vshll.u32 %v6763_v21, 16  ;;  %v3852_v33 = vrot.slane %v3850_v25, 4 }
  0x95   : > { %7727 = vmatpush3.bf16.msra.mxu0 %v8220_v58  ;;  %7698 = vmatprep.mubr.bf16.mxu0 %v6803_v24  ;;  %v3813_v58 = vrot.slane %v3811_v51, 5  ;;  %v3800_v61 = vsel %vm8739_vm2, %v3795_v53, %v3799_v41  ;;  %v3826_v2 = vshrl.u32 %v6759_v60, 16  ;;  %v3829_v6 = vshll.u32 %v6759_v60, 16  ;;  %v6764_v24 = vld [vmem:[%s8670_s4 + $0x20c] sm:$0x1]  ;;  %v8226_v41 = vld [vmem:[%s8670_s4 + $0xd8] sm:$0xff]  }
  0x96   : > { %7728 = vmatprep.subr.bf16.mxu0 %v8224_v37  ;;  %v6805_v3 = vcombine.low %v3790_v57, %v3800_v61  ;;  %v3845_v12 = vshll.u32 %v6761_v1, 16  ;;  %v3869_v36 = vshll.u32 %v6764_v24, 16  ;;  %v3861_v38 = vrot.slane %v3859_v29, 5  ;;  %v6765_v44 = vld [vmem:[%s8670_s4 + $0x210] sm:$0xf]  ;;  %v8232_v57 = vld [vmem:[%s9418_s1 + $0x1a8] sm:$0xff]  }
  0x97   : > { %v3818_v5 = vor.u32 %v3817_v59, %v3813_v58  ;;  %v3828_v10 = vrot.slane %v3826_v2, 4  ;;  %v3831_v14 = vrot.slane %v3829_v6, 5  ;;  %v3814_v17 = vsel %vm8739_vm2, %v3809_v8, %v3813_v58  ;;  %v6768_v1 = vld [vmem:[%s8670_s4 + $0x21c] sm:$0xf]  ;;  %v6770_v6 = vld [vmem:[%s8670_s4 + $0x224] sm:$0x1] }
  0x98   : > { %v3847_v19 = vrot.slane %v3845_v12, 5  ;;  %v3856_v42 = vor.u32 %v3855_v35, %v3852_v33  ;;  %v3871_v43 = vrot.slane %v3869_v36, 5  ;;  %v3874_v50 = vshrl.u32 %v6765_v44, 16  ;;  %v6772_v24 = vld [vmem:[%s8670_s4 + $0x22c] sm:$0xf]  ;;  %v8235_v36 = vld [vmem:[%s9418_s1 + $0x90] sm:$0xff]  }
  0x99   : > { %7729 = vmatpush3.bf16.msra.mxu0 %v8224_v37  ;;  %v3819_v13 = vrot.slane %v3818_v5, 4  ;;  %v3832_v23 = vor.u32 %v3831_v14, %v3828_v10  ;;  %v3877_v51 = vshll.u32 %v6765_v44, 16  ;;  %v3883_v54 = vshll.u32 %v6766_v45, 16  ;;  %v6769_v5 = vld [vmem:[%s8670_s4 + $0x220] sm:$0xf] }
  0x9a   : > { %7730 = vmatprep.subr.bf16.mxu0 %v8228_v31  ;;  %v3857_v53 = vrot.slane %v3856_v42, 4  ;;  %v3887_v55 = vshrl.u32 %v6766_v45, 16  ;;  %v3876_v59 = vrot.slane %v3874_v50, 4  ;;  %v3898_v7 = vshrl.u32 %v6768_v1, 16  ;;  %v8236_v44 = vld [vmem:[%s9418_s1 + $0x1b0] sm:$0xff]  }
  0x9b   : > { %7475 = vmatmul.mubr.bf16.gmra.mrb[24].mxu1 %v8218_v28  ;;  %v3824_v22 = vsel %vm8739_vm2, %v3819_v13, %v3823_v63  ;;  %v3842_v28 = vor.u32 %v3841_v18, %v3837_v15  ;;  %v3833_v32 = vrot.slane %v3832_v23, 4  ;;  %v3879_v60 = vrot.slane %v3877_v51, 5  ;;  %v8230_v18 = vld [vmem:[%s8670_s4 + $0xf0] sm:$0xff]  }
  0x9c   : > { %7699 = vmatmul.mubr.bf16.gmra.mrb[8].mxu0 %v6804_v49  ;;  %7478 = vmatprep.mubr.bf16.mxu1 %v8221_v39  ;;  %v6806_v27 = vcombine.low %v3814_v17, %v3824_v22  ;;  %v3865_v39 = vrot.slane %v3863_v30, 4  ;;  %v6767_v49 = vld [vmem:[%s8670_s4 + $0x218] sm:$0x1]  ;;  %v3862_v62 = vsel %vm8739_vm2, %v3857_v53, %v3861_v38  ;;  %v3885_v63 = vrot.slane %v3883_v54, 5 }
  0x9d   : > { %7702 = vmatprep.mubr.bf16.mxu0 %v6805_v3  ;;  %v3843_v37 = vrot.slane %v3842_v28, 4  ;;  %v3838_v40 = vsel %vm8739_vm2, %v3833_v32, %v3837_v15  ;;  %7731 = vmatpush3.bf16.msra.mxu0 %v8228_v31  ;;  %v3893_v61 = vshll.u32 %v6767_v49, 16  ;;  %v3889_v0 = vrot.slane %v3887_v55, 4  ;;  %v8233_v32 = vld [vmem:[%s8670_s4 + $0xfc] sm:$0xff]   ;;  %v6775_v49 = vld [vmem:[%s8670_s4 + $0x238] sm:$0xf] }
  0x9e   : > { %v3866_v47 = vor.u32 %v3865_v39, %v3861_v38  ;;  %7732 = vmatprep.subr.bf16.mxu0 %v8232_v57  ;;  %v3880_v3 = vor.u32 %v3879_v60, %v3876_v59  ;;  %v3901_v10 = vshll.u32 %v6768_v1, 16  ;;  %v3907_v11 = vshll.u32 %v6769_v5, 16 }
  0x9f   : > { %v3848_v46 = vsel %vm8739_vm2, %v3843_v37, %v3847_v19  ;;  %v3900_v13 = vrot.slane %v3898_v7, 4  ;;  %v3911_v14 = vshrl.u32 %v6769_v5, 16  ;;  %v3917_v15 = vshll.u32 %v6770_v6, 16 }
  0xa0   : > { %v6807_v52 = vcombine.low %v3838_v40, %v3848_v46  ;;  %v3867_v58 = vrot.slane %v3866_v47, 4  ;;  %v3881_v12 = vrot.slane %v3880_v3, 4  ;;  %v3903_v19 = vrot.slane %v3901_v10, 5 }
  0xa1   : > { %7733 = vmatpush3.bf16.msra.mxu0 %v8232_v57  ;;  %v3909_v20 = vrot.slane %v3907_v11, 5  ;;  %v3913_v22 = vrot.slane %v3911_v14, 4  ;;  %v3919_v23 = vrot.slane %v3917_v15, 5  ;;  %v3931_v33 = vshll.u32 %v6772_v24, 16  ;;  %v8234_v57 = vld [vmem:[%s8670_s4 + $0x108] sm:$0xff]  }
  0xa2   : > { %v3872_v2 = vsel %vm8739_vm2, %v3867_v58, %v3871_v43  ;;  %v3886_v21 = vsel %vm8739_vm2, %v3881_v12, %v3885_v63  ;;  %v3904_v26 = vor.u32 %v3903_v19, %v3900_v13  ;;  %v3935_v35 = vshrl.u32 %v6772_v24, 16  ;;  %7734 = vmatprep.subr.bf16.mxu0 %v8236_v44 }
  0xa3   : > { %7479 = vmatmul.mubr.bf16.gmra.mrb[28].mxu1 %v8222_v4  ;;  %v3895_v4 = vrot.slane %v3893_v61, 5  ;;  %v6808_v8 = vcombine.low %v3862_v62, %v3872_v2  ;;  %v3914_v31 = vor.u32 %v3913_v22, %v3909_v20  ;;  %v3933_v42 = vrot.slane %v3931_v33, 5 }
  0xa4   : > { %7703 = vmatmul.mubr.bf16.gmra.mrb[12].mxu0 %v6806_v27  ;;  %7498 = vmatprep.mubr.bf16.mxu1 %v8225_v9  ;;  %v3890_v9 = vor.u32 %v3889_v0, %v3885_v63  ;;  %v6773_v27 = vld [vmem:[%s8670_s4 + $0x230] sm:$0x1]  ;;  %v3905_v37 = vrot.slane %v3904_v26, 4  ;;  %v3937_v43 = vrot.slane %v3935_v35, 4  ;;  %v3955_v58 = vshll.u32 %v6775_v49, 16  ;;  %v8237_v0 = vld [vmem:[%s8670_s4 + $0x114] sm:$0xff]  }
  0xa5   : > { %7706 = vmatprep.mubr.bf16.mxu0 %v6807_v52  ;;  %v3941_v40 = vshll.u32 %v6773_v27, 16  ;;  %v6776_v52 = vld [vmem:[%s8670_s4 + $0x23c] sm:$0x1]  ;;  %v3959_v59 = vshrl.u32 %v6775_v49, 16  ;;  %7735 = vmatpush3.bf16.msra.mxu0 %v8236_v44  ;;  %v6780_v26 = vld [vmem:[%s8670_s4 + $0x24c] sm:$0xf] }
  0xa6   : > { %v3891_v17 = vrot.slane %v3890_v9, 4  ;;  %v3910_v45 = vsel %vm8739_vm2, %v3905_v37, %v3909_v20  ;;  %v3938_v51 = vor.u32 %v3937_v43, %v3933_v42  ;;  %v3965_v63 = vshll.u32 %v6776_v52, 16  ;;  %v6779_v9 = vld [vmem:[%s8670_s4 + $0x248] sm:$0x1]  ;;  %v6781_v27 = vld [vmem:[%s8670_s4 + $0x250] sm:$0xf] }
  0xa7   : > { %v3943_v47 = vrot.slane %v3941_v40, 5  ;;  %v3957_v2 = vrot.slane %v3955_v58, 5  ;;  %v3961_v3 = vrot.slane %v3959_v59, 4  ;;  %v3989_v19 = vshll.u32 %v6779_v9, 16  ;;  %v8246_v58 = vld [vmem:[%s9418_s1 + $0x1c0] sm:$0xff]  }
  0xa8   : > { %v3896_v25 = vsel %vm8739_vm2, %v3891_v17, %v3895_v4  ;;  %v3939_v60 = vrot.slane %v3938_v51, 4  ;;  %v6777_v4 = vld [vmem:[%s8670_s4 + $0x240] sm:$0xf]  ;;  %v3967_v7 = vrot.slane %v3965_v63, 5  ;;  %v4003_v37 = vshll.u32 %v6781_v27, 16  ;;  %v8247_v63 = vld [vmem:[%s8670_s4 + $0x144] sm:$0xff]  }
  0xa9   : > { %v6809_v30 = vcombine.low %v3886_v21, %v3896_v25  ;;  %v3970_v10 = vshrl.u32 %v6777_v4, 16  ;;  %v3962_v12 = vor.u32 %v3961_v3, %v3957_v2  ;;  %v3973_v13 = vshll.u32 %v6777_v4, 16  ;;  %v8249_v3 = vld [vmem:[%s8670_s4 + $0x150] sm:$0xff]   ;;  %v8252_v4 = vld [vmem:[%s9418_s1 + $0x1c8] sm:$0xff]  }
  0xaa   : > { %v3944_v5 = vsel %vm8739_vm2, %v3939_v60, %v3943_v47  ;;  %v3991_v25 = vrot.slane %v3989_v19, 5  ;;  %v8241_v47 = vld [vmem:[%s8670_s4 + $0x12c] sm:$0xff]   ;;  %v8254_v9 = vld [vmem:[%s8670_s4 + $0x3c] sm:$0xff]  }
  0xab   : > { %7499 = vmatmul.mubr.bf16.vlgmr.msra.gmra.mrb[0].mxu1 %v8226_v41  ;;  %v3915_v41 = vrot.slane %v3914_v31, 4  ;;  %v3972_v17 = vrot.slane %v3970_v10, 4  ;;  %v3963_v20 = vrot.slane %v3962_v12, 4  ;;  %v3975_v21 = vrot.slane %v3973_v13, 5  ;;  %v8242_v60 = vld [vmem:[%s8670_s4 + $0xc] sm:$0xff]   ;;  %v8259_v12 = vld [vmem:[%s8670_s4 + $0x174] sm:$0xff]  }
  0xac   : > { %7531 = vmatpush3.bf16.msra.mxu1 %v8833_v16  ;;  %7502 = vmatprep.mubr.bf16.mxu1 %v8229_v48  ;;  %v6771_v16 = vld [vmem:[%s8670_s4 + $0x228] sm:$0xf]  ;;  %v6774_v48 = vld [vmem:[%s8670_s4 + $0x234] sm:$0xf]  ;;  %v3994_v31 = vshrl.u32 %v6780_v26, 16 }
  0xad   : > { %7707 = vmatmul.mubr.bf16.gmra.mrb[16].mxu0 %v6808_v8  ;;  %7532 = vmatprep.subr.bf16.mxu1 %v8231_v56  ;;  %v3922_v28 = vshrl.u32 %v6771_v16, 16  ;;  %v3925_v29 = vshll.u32 %v6771_v16, 16  ;;  %v3920_v50 = vsel %vm8739_vm2, %v3915_v41, %v3919_v23  ;;  %v3946_v53 = vshrl.u32 %v6774_v48, 16  ;;  %v6778_v8 = vld [vmem:[%s8670_s4 + $0x244] sm:$0xf]  ;;  %v8239_v23 = vld [vmem:[%s9418_s1 + $0x98] sm:$0xff]  }
  0xae   : > { %7710 = vmatprep.mubr.bf16.mxu0 %v6809_v30  ;;  %v3949_v54 = vshll.u32 %v6774_v48, 16  ;;  %v6810_v55 = vcombine.low %v3910_v45, %v3920_v50  ;;  %v3979_v14 = vshll.u32 %v6778_v8, 16  ;;  %v6782_v30 = vld [vmem:[%s8670_s4 + $0x254] sm:$0x1]  ;;  %v3996_v41 = vrot.slane %v3994_v31, 4  ;;  %v8255_v10 = vld [vmem:[%s8670_s4 + $0x168] sm:$0xff]  }
  0xaf   : > { %v3924_v38 = vrot.slane %v3922_v28, 4  ;;  %v3927_v39 = vrot.slane %v3925_v29, 5  ;;  %v3948_v61 = vrot.slane %v3946_v53, 4  ;;  %v3968_v28 = vsel %vm8739_vm2, %v3963_v20, %v3967_v7  ;;  %v8251_v7 = vld [vmem:[%s8670_s4 + $0x30] sm:$0xff]   ;;  %v8264_v13 = vld [vmem:[%s9418_s1 + $0x1d8] sm:$0xff]  }
  0xb0   : > { %7533 = vmatpush3.bf16.msra.mxu1 %v8231_v56  ;;  %v3951_v62 = vrot.slane %v3949_v54, 5  ;;  %v3981_v22 = vrot.slane %v3979_v14, 5  ;;  %v3976_v29 = vor.u32 %v3975_v21, %v3972_v17  ;;  %v4013_v43 = vshll.u32 %v6782_v30, 16  ;;  %v1862_v14 = vld [vmem:[%s8670_s4] sm:$0xf]  ;;  %v8260_v31 = vld [vmem:[%s8670_s4 + $0x54] sm:$0xff]  }
  0xb1   : > { %7534 = vmatprep.subr.bf16.mxu1 %v8235_v36  ;;  %v3928_v46 = vor.u32 %v3927_v39, %v3924_v38  ;;  %v4007_v38 = vshrl.u32 %v6781_v27, 16  ;;  %v8240_v39 = vld [vmem:[%s9418_s1 + $0x1b8] sm:$0xff]   ;;  %v4005_v45 = vrot.slane %v4003_v37, 5  ;;  %v1917_v19 = vshll.u32 %v1862_v14, 16 }
  0xb2   : > { %v3952_v6 = vor.u32 %v3951_v62, %v3948_v61  ;;  %v3977_v40 = vrot.slane %v3976_v29, 4  ;;  %7736 = vmatprep.subr.bf16.mxu0 %v8240_v39  ;;  %v4015_v50 = vrot.slane %v4013_v43, 5  ;;  %v8243_v62 = vld [vmem:[%s8670_s4 + $0x138] sm:$0xff]   ;;  %v1864_v17 = vld [vmem:[%s8670_s4 + $0x8] sm:$0x1] }
  0xb3   : > { %7503 = vmatmul.mubr.bf16.gmra.mrb[4].mxu1 %v8230_v18  ;;  %v3929_v56 = vrot.slane %v3928_v46, 4  ;;  %v3983_v18 = vshrl.u32 %v6778_v8, 16  ;;  %v4009_v46 = vrot.slane %v4007_v38, 4  ;;  %7737 = vmatpush3.bf16.msra.mxu0 %v8240_v39  ;;  %v8258_v8 = vld [vmem:[%s9418_s1 + $0x1d0] sm:$0xff]   ;;  %v8969_v38 = vld [vmem:[%s9418_s1 + $0xc0] sm:$0xff]  }
  0xb4   : > { %7506 = vmatprep.mubr.bf16.mxu1 %v8233_v32  ;;  %7535 = vmatpush3.bf16.msra.mxu1 %v8235_v36  ;;  %v3953_v15 = vrot.slane %v3952_v6, 4  ;;  %v3997_v32 = vshll.u32 %v6780_v26, 16  ;;  %v8238_v36 = vld [vmem:[%s8670_s4 + $0x120] sm:$0xff]   ;;  %v3982_v48 = vsel %vm8739_vm2, %v3977_v40, %v3981_v22  ;;  %v1866_v29 = vld [vmem:[%s8670_s4 + $0x10] sm:$0xf] }
  0xb5   : > { %7711 = vmatmul.mubr.bf16.gmra.mrb[20].mxu0 %v6810_v55  ;;  %v3934_v1 = vsel %vm8739_vm2, %v3929_v56, %v3933_v42  ;;  %v3985_v24 = vrot.slane %v3983_v18, 4  ;;  %7536 = vmatprep.subr.bf16.mxu1 %v8239_v23  ;;  %v4010_v52 = vor.u32 %v4009_v46, %v4005_v45  ;;  %v8244_v55 = vld [vmem:[%s9418_s1 + $0xa0] sm:$0xff]   ;;  %v1914_v18 = vshrl.u32 %v1862_v14, 16 }
  0xb6   : > { %v6811_v11 = vcombine.low %v3934_v1, %v3944_v5  ;;  %v3958_v16 = vsel %vm8739_vm2, %v3953_v15, %v3957_v2  ;;  %v3999_v42 = vrot.slane %v3997_v32, 5  ;;  %7770 = vmatprep.subr.bf16.mxu0 %v8246_v58  ;;  %v8245_v1 = vld [vmem:[%s8670_s4 + $0x18] sm:$0xff]   ;;  %v8248_v2 = vld [vmem:[%s8670_s4 + $0x24] sm:$0xff]   ;;  %v1951_v37 = vshrl.u32 %v1866_v29, 16 }
  0xb7   : > { %v6812_v33 = vcombine.low %v3958_v16, %v3968_v28  ;;  %v3986_v35 = vor.u32 %v3985_v24, %v3981_v22  ;;  %v4011_v56 = vrot.slane %v4010_v52, 4  ;;  %v8256_v5 = vld [vmem:[%s9418_s1 + $0xb0] sm:$0xff]   ;;  %v1933_v22 = vshll.u32 %v1864_v17, 16  ;;  %v1865_v24 = vld [vmem:[%s8670_s4 + $0xc] sm:$0xf] }
  0xb8   : > { %7714 = vmatprep.mubr.bf16.mxu0 %v6811_v11  ;;  %7537 = vmatpush3.bf16.msra.mxu1 %v8239_v23  ;;  %v4000_v49 = vor.u32 %v3999_v42, %v3996_v41  ;;  %v8253_v6 = vld [vmem:[%s8670_s4 + $0x15c] sm:$0xff]   ;;  %v1863_v15 = vld [vmem:[%s8670_s4 + $0x4] sm:$0xf]  ;;  %v1916_v23 = vrot.slane %v1914_v18, 4  ;;  %v1919_v16 = vrot.slane %v1917_v19, 5  ;;  %v1938_v30 = vshrl.u32 %v1865_v24, 16 }
  0xb9   : > { %v3987_v44 = vrot.slane %v3986_v35, 4  ;;  %7538 = vmatprep.subr.bf16.mxu1 %v8244_v55  ;;  %v4016_v59 = vsel %vm8739_vm2, %v4011_v56, %v4015_v50  ;;  %v8262_v11 = vld [vmem:[%s9418_s1 + $0xb8] sm:$0xff]   ;;  %v1923_v20 = vshll.u32 %v1863_v15, 16  ;;  %v1927_v21 = vshrl.u32 %v1863_v15, 16  ;;  %v8261_v46 = vld [vmem:[%s8670_s4 + $0x180] sm:$0xff]  }
  0xba   : > { %v4001_v54 = vrot.slane %v4000_v49, 4  ;;  %v1935_v28 = vrot.slane %v1933_v22, 5  ;;  %v1920_v32 = vor.u32 %v1919_v16, %v1916_v23  ;;  %v1941_v35 = vshll.u32 %v1865_v24, 16  ;;  %v8268_v49 = vld [vmem:[%s9418_s1 + $0x1e0] sm:$0xff]  }
  0xbb   : > { %7507 = vmatmul.mubr.bf16.gmra.mrb[8].mxu1 %v8234_v57  ;;  %v3992_v51 = vsel %vm8739_vm2, %v3987_v44, %v3991_v25  ;;  %v8257_v25 = vld [vmem:[%s8670_s4 + $0x48] sm:$0xff]   ;;  %v1925_v26 = vrot.slane %v1923_v20, 5  ;;  %v1929_v27 = vrot.slane %v1927_v21, 4  ;;  %v1940_v40 = vrot.slane %v1938_v30, 4  ;;  %v1870_v56 = vld [vmem:[%s8670_s4 + $0x20] sm:$0x1] }
  0xbc   : > { %7510 = vmatprep.mubr.bf16.mxu1 %v8237_v0  ;;  %v6813_v53 = vcombine.low %v3982_v48, %v3992_v51  ;;  %v4006_v57 = vsel %vm8739_vm2, %v4001_v54, %v4005_v45  ;;  %7539 = vmatpush3.bf16.msra.mxu1 %v8244_v55  ;;  %v8250_v0 = vld [vmem:[%s9418_s1 + $0xa8] sm:$0xff]   ;;  %v1921_v42 = vrot.slane %v1920_v32, 4  ;;  %v1943_v43 = vrot.slane %v1941_v35, 5  ;;  %v1875_v35 = vld [vmem:[%s8670_s4 + $0x34] sm:$0xf] }
  0xbd   : > { %7715 = vmatmul.mubr.bf16.gmra.mrb[24].mxu0 %v6812_v33  ;;  %v6814_v61 = vcombine.low %v4006_v57, %v4016_v59  ;;  %7540 = vmatprep.subr.bf16.mxu1 %v8250_v0  ;;  %v1867_v33 = vld [vmem:[%s8670_s4 + $0x14] sm:$0x1]  ;;  %v1930_v39 = vor.u32 %v1929_v27, %v1925_v26  ;;  %v1953_v45 = vrot.slane %v1951_v37, 4  ;;  %v1869_v55 = vld [vmem:[%s8670_s4 + $0x1c] sm:$0xf] }
  0xbe   : > { %7718 = vmatprep.mubr.bf16.mxu0 %v6813_v53  ;;  %v1957_v41 = vshll.u32 %v1867_v33, 16  ;;  %v1926_v50 = vsel %vm8739_vm2, %v1921_v42, %v1925_v26  ;;  %v1944_v51 = vor.u32 %v1943_v43, %v1940_v40  ;;  %v1868_v53 = vld [vmem:[%s8670_s4 + $0x18] sm:$0xf]  ;;  %v1874_v33 = vld [vmem:[%s8670_s4 + $0x30] sm:$0xf]  ;;  %v2019_v42 = vshll.u32 %v1875_v35, 16 }
  0xbf   : > { %v1962_v57 = vshrl.u32 %v1868_v53, 16  ;;  %v8270_v26 = vld [vmem:[%s9418_s1 + $0xc8] sm:$0xff]   ;;  %v2010_v40 = vshrl.u32 %v1874_v33, 16 }
  0xc0   : > { %7541 = vmatpush3.bf16.msra.mxu1 %v8250_v0  ;;  %v1959_v48 = vrot.slane %v1957_v41, 5  ;;  %v8272_v27 = vld [vmem:[%s9418_s1 + $0x1e8] sm:$0xff]   ;;  %v2013_v41 = vshll.u32 %v1874_v33, 16 }
  0xc1   : > { %7542 = vmatprep.subr.bf16.mxu1 %v8256_v5  ;;  %v1964_v0 = vrot.slane %v1962_v57, 4  ;;  %v8267_v37 = vld [vmem:[%s8670_s4 + $0x78] sm:$0xff]   ;;  %v1879_v57 = vld [vmem:[%s8670_s4 + $0x44] sm:$0x1] }
  0xc3   : > { %7511 = vmatmul.mubr.bf16.gmra.mrb[12].mxu1 %v8238_v36  ;;  %v1947_v36 = vshll.u32 %v1866_v29, 16 }
  0xc4   : > { %7514 = vmatprep.mubr.bf16.mxu1 %v8241_v47  ;;  %7543 = vmatpush3.bf16.msra.mxu1 %v8256_v5  ;;  %v1931_v47 = vrot.slane %v1930_v39, 4 }
  0xc5   : > { %7719 = vmatmul.mubr.bf16.gmra.mrb[28].mxu0 %v6814_v61  ;;  %7544 = vmatprep.subr.bf16.mxu1 %v8262_v11  ;;  %v1949_v44 = vrot.slane %v1947_v36, 5  ;;  %v1876_v36 = vld [vmem:[%s8670_s4 + $0x38] sm:$0x1] }
  0xc6   : > { %7738 = vmatprep.mubr.bf16.mxu0 %v8242_v60  ;;  %v1936_v54 = vsel %vm8739_vm2, %v1931_v47, %v1935_v28  ;;  %v1945_v60 = vrot.slane %v1944_v51, 4  ;;  %v2023_v47 = vshrl.u32 %v1875_v35, 16  ;;  %v2021_v51 = vrot.slane %v2019_v42, 5  ;;  %v1883_v35 = vld [vmem:[%s8670_s4 + $0x54] sm:$0xf] }
  0xc7   : > { %v1954_v52 = vor.u32 %v1953_v45, %v1949_v44  ;;  %v6567_v59 = vcombine.low %v1926_v50, %v1936_v54  ;;  %v2015_v50 = vrot.slane %v2013_v41, 5  ;;  %v1885_v41 = vld [vmem:[%s8670_s4 + $0x5c] sm:$0x1]  ;;  %v2082_v42 = vshrl.u32 %v1883_v35, 16 }
  0xc8   : > { %7545 = vmatpush3.bf16.msra.mxu1 %v8262_v11  ;;  %v1950_v5 = vsel %vm8739_vm2, %v1945_v60, %v1949_v44  ;;  %v8269_v44 = vld [vmem:[%s8670_s4 + $0x84] sm:$0xff]  }
  0xc9   : > { %7578 = vmatprep.subr.bf16.mxu1 %v8969_v38  ;;  %v1955_v61 = vrot.slane %v1954_v52, 4  ;;  %v2029_v52 = vshll.u32 %v1876_v36, 16  ;;  %v1884_v36 = vld [vmem:[%s8670_s4 + $0x58] sm:$0xf] }
  0xcb   : > { %7515 = vmatmul.mubr.bf16.gmra.mrb[16].mxu1 %v8243_v62  ;;  %v1971_v62 = vshll.u32 %v1869_v55, 16 }
  0xcc   : > { %7518 = vmatprep.mubr.bf16.mxu1 %v8247_v63  ;;  %v8263_v63 = vld [vmem:[%s8670_s4 + $0x60] sm:$0xff]  }
  0xcd   : > { %7739 = vmatmul.mubr.bf16.vlgmr.msra.gmra.mrb[0].mxu0 %v8245_v1 }
  0xce   : > { %7771 = vmatpush3.bf16.msra.mxu0 %v8246_v58  ;;  %7742 = vmatprep.mubr.bf16.mxu0 %v8248_v2  ;;  %v1965_v58 = vshll.u32 %v1868_v53, 16  ;;  %v1975_v2 = vshrl.u32 %v1869_v55, 16  ;;  %v1877_v53 = vld [vmem:[%s8670_s4 + $0x3c] sm:$0xf]  ;;  %v2025_v55 = vrot.slane %v2023_v47, 4 }
  0xcf   : > { %7772 = vmatprep.subr.bf16.mxu0 %v8252_v4 }
  0xd0   : > { %v1967_v1 = vrot.slane %v1965_v58, 5  ;;  %v1977_v11 = vrot.slane %v1975_v2, 4  ;;  %v2034_v58 = vshrl.u32 %v1877_v53, 16 }
  0xd2   : > { %7773 = vmatpush3.bf16.msra.mxu0 %v8252_v4  ;;  %v8265_v4 = vld [vmem:[%s8670_s4 + $0x6c] sm:$0xff]  }
  0xd3   : > { %7519 = vmatmul.mubr.bf16.gmra.mrb[20].mxu1 %v8249_v3  ;;  %7774 = vmatprep.subr.bf16.mxu0 %v8258_v8  ;;  %v1981_v3 = vshll.u32 %v1870_v56, 16  ;;  %v1878_v56 = vld [vmem:[%s8670_s4 + $0x40] sm:$0xf] }
  0xd4   : > { %7522 = vmatprep.mubr.bf16.mxu1 %v8253_v6  ;;  %v1960_v6 = vsel %vm8739_vm2, %v1955_v61, %v1959_v48  ;;  %v8274_v48 = vld [vmem:[%s9418_s1 + $0xd0] sm:$0xff]   ;;  %v2031_v61 = vrot.slane %v2029_v52, 5  ;;  %v2047_v2 = vshrl.u32 %v1878_v56, 16 }
  0xd5   : > { %7743 = vmatmul.mubr.bf16.gmra.mrb[4].mxu0 %v8251_v7  ;;  %v1973_v7 = vrot.slane %v1971_v62, 5  ;;  %v6568_v19 = vcombine.low %v1950_v5, %v1960_v6  ;;  %v2037_v62 = vshll.u32 %v1877_v53, 16  ;;  %v2053_v5 = vshll.u32 %v1879_v57, 16  ;;  %v8276_v6 = vld [vmem:[%s9418_s1 + $0x1f0] sm:$0xff]  }
  0xd6   : > { %7746 = vmatprep.mubr.bf16.mxu0 %v8254_v9  ;;  %7775 = vmatpush3.bf16.msra.mxu0 %v8258_v8  ;;  %v1871_v8 = vld [vmem:[%s8670_s4 + $0x24] sm:$0xf]  ;;  %v1872_v9 = vld [vmem:[%s8670_s4 + $0x28] sm:$0xf] }
  0xd7   : > { %7776 = vmatprep.subr.bf16.mxu0 %v8264_v13  ;;  %v1986_v14 = vshrl.u32 %v1871_v8, 16  ;;  %v1989_v15 = vshll.u32 %v1871_v8, 16  ;;  %v1995_v17 = vshll.u32 %v1872_v9, 16  ;;  %v1999_v18 = vshrl.u32 %v1872_v9, 16 }
  0xd8   : > { %v1978_v21 = vor.u32 %v1977_v11, %v1973_v7  ;;  %v2049_v9 = vrot.slane %v2047_v2, 4 }
  0xd9   : > { %v1988_v23 = vrot.slane %v1986_v14, 4  ;;  %v1991_v16 = vrot.slane %v1989_v15, 5  ;;  %v1997_v24 = vrot.slane %v1995_v17, 5  ;;  %v1880_v14 = vld [vmem:[%s8670_s4 + $0x48] sm:$0xf] }
  0xda   : > { %7777 = vmatpush3.bf16.msra.mxu0 %v8264_v13  ;;  %v1873_v13 = vld [vmem:[%s8670_s4 + $0x2c] sm:$0x1]  ;;  %v1979_v29 = vrot.slane %v1978_v21, 4  ;;  %v2058_v21 = vshrl.u32 %v1880_v14, 16 }
  0xdb   : > { %7523 = vmatmul.mubr.bf16.gmra.mrb[24].mxu1 %v8255_v10  ;;  %7778 = vmatprep.subr.bf16.mxu0 %v8268_v49  ;;  %v1968_v10 = vor.u32 %v1967_v1, %v1964_v0  ;;  %v2005_v22 = vshll.u32 %v1873_v13, 16  ;;  %v2036_v0 = vrot.slane %v2034_v58, 4  ;;  %v2043_v1 = vshll.u32 %v1878_v56, 16  ;;  %v8278_v15 = vld [vmem:[%s9418_s1 + $0xd8] sm:$0xff]  }
  0xdc   : > { %7526 = vmatprep.mubr.bf16.mxu1 %v8259_v12  ;;  %v1983_v12 = vrot.slane %v1981_v3, 5  ;;  %v2055_v13 = vrot.slane %v2053_v5, 5  ;;  %v8277_v56 = vld [vmem:[%s8670_s4 + $0xb4] sm:$0xff]  }
  0xdd   : > { %7747 = vmatmul.mubr.bf16.gmra.mrb[8].mxu0 %v8257_v25  ;;  %v1969_v20 = vrot.slane %v1968_v10, 4  ;;  %v2001_v25 = vrot.slane %v1999_v18, 4  ;;  %v2007_v30 = vrot.slane %v2005_v22, 5  ;;  %v2045_v8 = vrot.slane %v2043_v1, 5  ;;  %v8271_v10 = vld [vmem:[%s8670_s4 + $0x90] sm:$0xff]  }
  0xde   : > { %7750 = vmatprep.mubr.bf16.mxu0 %v8260_v31  ;;  %7779 = vmatpush3.bf16.msra.mxu0 %v8268_v49  ;;  %v1992_v31 = vor.u32 %v1991_v16, %v1988_v23  ;;  %v1984_v39 = vsel %vm8739_vm2, %v1979_v29, %v1983_v12  ;;  %v2012_v49 = vrot.slane %v2010_v40, 4  ;;  %v2061_v22 = vshll.u32 %v1880_v14, 16  ;;  %v8273_v16 = vld [vmem:[%s8670_s4 + $0x9c] sm:$0xff]   ;;  %v1889_v14 = vld [vmem:[%s8670_s4 + $0x6c] sm:$0xf] }
  0xdf   : > { %v1974_v28 = vsel %vm8739_vm2, %v1969_v20, %v1973_v7  ;;  %v2002_v32 = vor.u32 %v2001_v25, %v1997_v24  ;;  %7780 = vmatprep.subr.bf16.mxu0 %v8272_v27  ;;  %v2050_v18 = vor.u32 %v2049_v9, %v2045_v8  ;;  %v1882_v20 = vld [vmem:[%s8670_s4 + $0x50] sm:$0x1] }
  0xe0   : > { %v6569_v43 = vcombine.low %v1974_v28, %v1984_v39  ;;  %v1993_v45 = vrot.slane %v1992_v31, 4  ;;  %v2016_v60 = vor.u32 %v2015_v50, %v2012_v49  ;;  %v2060_v28 = vrot.slane %v2058_v21, 4 }
  0xe1   : > { %v2063_v29 = vrot.slane %v2061_v22, 5  ;;  %v2095_v49 = vshrl.u32 %v1884_v36, 16  ;;  %v2101_v50 = vshll.u32 %v1885_v41, 16  ;;  %v2130_v21 = vshrl.u32 %v1889_v14, 16 }
  0xe2   : > { %7781 = vmatpush3.bf16.msra.mxu0 %v8272_v27  ;;  %v2017_v3 = vrot.slane %v2016_v60, 4  ;;  %v2051_v27 = vrot.slane %v2050_v18, 4 }
  0xe3   : > { %7527 = vmatmul.mubr.bf16.gmra.mrb[28].mxu1 %v8261_v46  ;;  %v2003_v46 = vrot.slane %v2002_v32, 4  ;;  %7782 = vmatprep.subr.bf16.mxu0 %v8276_v6  ;;  %v2064_v39 = vor.u32 %v2063_v29, %v2060_v28  ;;  %v2097_v57 = vrot.slane %v2095_v49, 4  ;;  %v2103_v58 = vrot.slane %v2101_v50, 5 }
  0xe4   : > { %7546 = vmatprep.mubr.bf16.mxu1 %v6567_v59  ;;  %v2022_v11 = vsel %vm8739_vm2, %v2017_v3, %v2021_v51  ;;  %v2132_v28 = vrot.slane %v2130_v21, 4 }
  0xe5   : > { %7751 = vmatmul.mubr.bf16.gmra.mrb[12].mxu0 %v8263_v63  ;;  %v2008_v54 = vsel %vm8739_vm2, %v2003_v46, %v2007_v30  ;;  %v2026_v63 = vor.u32 %v2025_v55, %v2021_v51  ;;  %v2077_v30 = vshll.u32 %v1882_v20, 16  ;;  %v2091_v46 = vshll.u32 %v1884_v36, 16  ;;  %v8275_v51 = vld [vmem:[%s8670_s4 + $0xa8] sm:$0xff]   ;;  %v1891_v20 = vld [vmem:[%s8670_s4 + $0x74] sm:$0x1] }
  0xe6   : > { %7754 = vmatprep.mubr.bf16.mxu0 %v8265_v4  ;;  %v2039_v4 = vrot.slane %v2037_v62, 5  ;;  %7783 = vmatpush3.bf16.msra.mxu0 %v8276_v6  ;;  %v2065_v47 = vrot.slane %v2064_v39, 4  ;;  %v1887_v62 = vld [vmem:[%s8670_s4 + $0x64] sm:$0xf] }
  0xe7   : > { %v2027_v7 = vrot.slane %v2026_v63, 4  ;;  %v2079_v40 = vrot.slane %v2077_v30, 5  ;;  %v1888_v63 = vld [vmem:[%s8670_s4 + $0x68] sm:$0x1]  ;;  %v2119_v5 = vshrl.u32 %v1887_v62, 16  ;;  %v9066_v30 = vld [vmem:[%s9418_s1 + $0x200] sm:$0xff]  }
  0xe8   : > { %v2040_v12 = vor.u32 %v2039_v4, %v2036_v0  ;;  %v2115_v4 = vshll.u32 %v1887_v62, 16  ;;  %v2125_v9 = vshll.u32 %v1888_v63, 16  ;;  %v1896_v62 = vld [vmem:[%s8670_s4 + $0x88] sm:$0xf] }
  0xe9   : > { %v2032_v17 = vsel %vm8739_vm2, %v2027_v7, %v2031_v61 }
  0xea   : > { %v6571_v23 = vcombine.low %v2022_v11, %v2032_v17  ;;  %v2127_v18 = vrot.slane %v2125_v9, 5  ;;  %v2191_v9 = vshrl.u32 %v1896_v62, 16 }
  0xeb   : > { %7547 = vmatmul.mubr.bf16.vlgmr.msra.gmra.mrb[0].mxu1 %v6568_v19  ;;  %v1881_v19 = vld [vmem:[%s8670_s4 + $0x4c] sm:$0xf] }
  0xec   : > { %7579 = vmatpush3.bf16.msra.mxu1 %v8969_v38  ;;  %7550 = vmatprep.mubr.bf16.mxu1 %v6569_v43  ;;  %v1998_v38 = vsel %vm8739_vm2, %v1993_v45, %v1997_v24  ;;  %v2041_v24 = vrot.slane %v2040_v12, 4  ;;  %v2067_v25 = vshll.u32 %v1881_v19, 16  ;;  %v2085_v45 = vshll.u32 %v1883_v35, 16 }
  0xed   : > { %7580 = vmatprep.subr.bf16.mxu1 %v8270_v26  ;;  %v6570_v59 = vcombine.low %v1998_v38, %v2008_v54  ;;  %7755 = vmatmul.mubr.bf16.gmra.mrb[16].mxu0 %v8267_v37  ;;  %v2056_v37 = vsel %vm8739_vm2, %v2051_v27, %v2055_v13  ;;  %v2093_v38 = vrot.slane %v2091_v46, 5  ;;  %v8280_v54 = vld [vmem:[%s9418_s1 + $0x1f8] sm:$0xff]   ;;  %v2117_v12 = vrot.slane %v2115_v4, 5 }
  0xee   : > { %7758 = vmatprep.mubr.bf16.mxu0 %v8269_v44  ;;  %v2046_v31 = vsel %vm8739_vm2, %v2041_v24, %v2045_v8  ;;  %v2069_v32 = vrot.slane %v2067_v25, 5  ;;  %v2087_v53 = vrot.slane %v2085_v45, 5  ;;  %7784 = vmatprep.subr.bf16.mxu0 %v8280_v54  ;;  %v2121_v13 = vrot.slane %v2119_v5, 4  ;;  %v8286_v45 = vld [vmem:[%s9418_s1 + $0xe8] sm:$0xff]  }
  0xef   : > { %v6572_v43 = vcombine.low %v2046_v31, %v2056_v37  ;;  %v2098_v3 = vor.u32 %v2097_v57, %v2093_v38  ;;  %7785 = vmatpush3.bf16.msra.mxu0 %v8280_v54  ;;  %v2149_v35 = vshll.u32 %v1891_v20, 16  ;;  %v8281_v37 = vld [vmem:[%s8670_s4 + $0xd8] sm:$0xff]   ;;  %v1895_v57 = vld [vmem:[%s8670_s4 + $0x84] sm:$0xf] }
  0xf0   : > { %7581 = vmatpush3.bf16.msra.mxu1 %v8270_v26  ;;  %v2071_v26 = vshrl.u32 %v1881_v19, 16  ;;  %v2070_v55 = vsel %vm8739_vm2, %v2065_v47, %v2069_v32  ;;  %v1890_v19 = vld [vmem:[%s8670_s4 + $0x70] sm:$0xf]  ;;  %7818 = vmatprep.subr.bf16.mxu0 %v9066_v30  ;;  %v2181_v4 = vshll.u32 %v1895_v57, 16 }
  0xf1   : > { %7582 = vmatprep.subr.bf16.mxu1 %v8274_v48  ;;  %v2099_v11 = vrot.slane %v2098_v3, 4  ;;  %v2139_v24 = vshll.u32 %v1890_v19, 16  ;;  %v2143_v29 = vshrl.u32 %v1890_v19, 16  ;;  %v2178_v3 = vshrl.u32 %v1895_v57, 16 }
  0xf2   : > { %v2073_v33 = vrot.slane %v2071_v26, 4  ;;  %v8279_v26 = vld [vmem:[%s8670_s4 + $0xc0] sm:$0xff]  }
  0xf3   : > { %7551 = vmatmul.mubr.bf16.gmra.mrb[4].mxu1 %v6570_v59  ;;  %v1886_v59 = vld [vmem:[%s8670_s4 + $0x60] sm:$0xf]  ;;  %v2104_v22 = vsel %vm8739_vm2, %v2099_v11, %v2103_v58  ;;  %v2145_v39 = vrot.slane %v2143_v29, 4  ;;  %v2180_v11 = vrot.slane %v2178_v3, 4 }
  0xf4   : > { %7583 = vmatpush3.bf16.msra.mxu1 %v8274_v48  ;;  %7554 = vmatprep.mubr.bf16.mxu1 %v6571_v23  ;;  %v2074_v44 = vor.u32 %v2073_v33, %v2069_v32  ;;  %v2084_v48 = vrot.slane %v2082_v42, 4  ;;  %v2106_v0 = vshrl.u32 %v1886_v59, 16  ;;  %v2109_v1 = vshll.u32 %v1886_v59, 16 }
  0xf5   : > { %7584 = vmatprep.subr.bf16.mxu1 %v8278_v15  ;;  %7759 = vmatmul.mubr.bf16.gmra.mrb[20].mxu0 %v8271_v10  ;;  %v8282_v10 = vld [vmem:[%s9418_s1 + $0xe0] sm:$0xff]   ;;  %v2122_v23 = vor.u32 %v2121_v13, %v2117_v12  ;;  %v2141_v33 = vrot.slane %v2139_v24, 5  ;;  %v2151_v42 = vrot.slane %v2149_v35, 5 }
  0xf6   : > { %7762 = vmatprep.mubr.bf16.mxu0 %v8273_v16  ;;  %v2075_v52 = vrot.slane %v2074_v44, 4  ;;  %v2088_v61 = vor.u32 %v2087_v53, %v2084_v48  ;;  %v2108_v7 = vrot.slane %v2106_v0, 4  ;;  %v2111_v8 = vrot.slane %v2109_v1, 5  ;;  %v1893_v44 = vld [vmem:[%s8670_s4 + $0x7c] sm:$0xf]  ;;  %v8283_v0 = vld [vmem:[%s8670_s4 + $0xe4] sm:$0xff]  }
  0xf7   : > { %v2133_v16 = vshll.u32 %v1889_v14, 16  ;;  %v2123_v31 = vrot.slane %v2122_v23, 4  ;;  %v2146_v47 = vor.u32 %v2145_v39, %v2141_v33  ;;  %v1894_v48 = vld [vmem:[%s8670_s4 + $0x80] sm:$0x1]  ;;  %v2167_v53 = vshrl.u32 %v1893_v44, 16 }
  0xf8   : > { %7585 = vmatpush3.bf16.msra.mxu1 %v8278_v15  ;;  %v2080_v60 = vsel %vm8739_vm2, %v2075_v52, %v2079_v40  ;;  %v2089_v6 = vrot.slane %v2088_v61, 4  ;;  %v2112_v17 = vor.u32 %v2111_v8, %v2108_v7  ;;  %v2163_v52 = vshll.u32 %v1893_v44, 16  ;;  %v8285_v7 = vld [vmem:[%s8670_s4 + $0xf0] sm:$0xff]   ;;  %v1901_v44 = vld [vmem:[%s8670_s4 + $0x9c] sm:$0xf] }
  0xf9   : > { %v6573_v2 = vcombine.low %v2070_v55, %v2080_v60  ;;  %7586 = vmatprep.subr.bf16.mxu1 %v8282_v10  ;;  %v2135_v32 = vrot.slane %v2133_v16, 5  ;;  %v2128_v40 = vsel %vm8739_vm2, %v2123_v31, %v2127_v18  ;;  %v2147_v54 = vrot.slane %v2146_v47, 4  ;;  %v8288_v18 = vld [vmem:[%s9418_s1 + $0x208] sm:$0xff]   ;;  %v8290_v23 = vld [vmem:[%s9418_s1 + $0xf0] sm:$0xff]  }
  0xfa   : > { %v2094_v15 = vsel %vm8739_vm2, %v2089_v6, %v2093_v38  ;;  %v2113_v27 = vrot.slane %v2112_v17, 4  ;;  %v2173_v38 = vshll.u32 %v1894_v48, 16  ;;  %v2165_v59 = vrot.slane %v2163_v52, 5  ;;  %v8289_v48 = vld [vmem:[%s8670_s4 + $0x108] sm:$0xff]  }
  0xfb   : > { %7555 = vmatmul.mubr.bf16.gmra.mrb[8].mxu1 %v6572_v43  ;;  %v6574_v25 = vcombine.low %v2094_v15, %v2104_v22  ;;  %v2136_v41 = vor.u32 %v2135_v32, %v2132_v28  ;;  %v1892_v43 = vld [vmem:[%s8670_s4 + $0x78] sm:$0xf]  ;;  %v2169_v60 = vrot.slane %v2167_v53, 4  ;;  %v2152_v63 = vsel %vm8739_vm2, %v2147_v54, %v2151_v42  ;;  %v1898_v22 = vld [vmem:[%s8670_s4 + $0x90] sm:$0xf] }
  0xfc   : > { %7558 = vmatprep.mubr.bf16.mxu1 %v6573_v2  ;;  %7587 = vmatpush3.bf16.msra.mxu1 %v8282_v10  ;;  %v2118_v36 = vsel %vm8739_vm2, %v2113_v27, %v2117_v12  ;;  %v2154_v49 = vshrl.u32 %v1892_v43, 16  ;;  %v2157_v50 = vshll.u32 %v1892_v43, 16  ;;  %v2175_v61 = vrot.slane %v2173_v38, 5  ;;  %v1897_v2 = vld [vmem:[%s8670_s4 + $0x8c] sm:$0x1] }
  0xfd   : > { %7763 = vmatmul.mubr.bf16.gmra.mrb[24].mxu0 %v8275_v51  ;;  %v6575_v46 = vcombine.low %v2118_v36, %v2128_v40  ;;  %v2137_v51 = vrot.slane %v2136_v41, 4  ;;  %7588 = vmatprep.subr.bf16.mxu1 %v8286_v45  ;;  %v2170_v6 = vor.u32 %v2169_v60, %v2165_v59  ;;  %v2187_v8 = vshll.u32 %v1896_v62, 16  ;;  %v8287_v41 = vld [vmem:[%s8670_s4 + $0xfc] sm:$0xff]  }
  0xfe   : > { %7766 = vmatprep.mubr.bf16.mxu0 %v8277_v56  ;;  %v2156_v55 = vrot.slane %v2154_v49, 4  ;;  %v2159_v56 = vrot.slane %v2157_v50, 5  ;;  %v2183_v12 = vrot.slane %v2181_v4, 5  ;;  %v2197_v13 = vshll.u32 %v1897_v2, 16  ;;  %v1903_v49 = vld [vmem:[%s8670_s4 + $0xa4] sm:$0x1] }
  0xff   : > { %v2142_v58 = vsel %vm8739_vm2, %v2137_v51, %v2141_v33  ;;  %v2171_v14 = vrot.slane %v2170_v6, 4  ;;  %v2189_v15 = vrot.slane %v2187_v8, 5  ;;  %v2193_v17 = vrot.slane %v2191_v9, 4  ;;  %v1905_v4 = vld [vmem:[%s8670_s4 + $0xac] sm:$0xf] }
 0x100   : > { %7589 = vmatpush3.bf16.msra.mxu1 %v8286_v45  ;;  %v2160_v1 = vor.u32 %v2159_v56, %v2156_v55  ;;  %v6576_v5 = vcombine.low %v2142_v58, %v2152_v63  ;;  %v2184_v20 = vor.u32 %v2183_v12, %v2180_v11  ;;  %v2199_v21 = vrot.slane %v2197_v13, 5  ;;  %v1902_v45 = vld [vmem:[%s8670_s4 + $0xa0] sm:$0xf]  ;;  %v8291_v13 = vld [vmem:[%s8670_s4 + $0x114] sm:$0xff]  }
 0x101   : > { %v2176_v16 = vsel %vm8739_vm2, %v2171_v14, %v2175_v61  ;;  %v2194_v24 = vor.u32 %v2193_v17, %v2189_v15  ;;  %v2202_v27 = vshrl.u32 %v1898_v22, 16  ;;  %v2205_v28 = vshll.u32 %v1898_v22, 16  ;;  %7590 = vmatprep.subr.bf16.mxu1 %v8290_v23  ;;  %v8292_v61 = vld [vmem:[%s9418_s1 + $0x210] sm:$0xff]  }
 0x102   : > { %v2161_v10 = vrot.slane %v2160_v1, 4  ;;  %v2185_v31 = vrot.slane %v2184_v20, 4  ;;  %v2226_v50 = vshrl.u32 %v1901_v44, 16  ;;  %v2229_v53 = vshll.u32 %v1901_v44, 16  ;;  %v1904_v1 = vld [vmem:[%s8670_s4 + $0xa8] sm:$0xf] }
 0x103   : > { %7559 = vmatmul.mubr.bf16.gmra.mrb[12].mxu1 %v6574_v25  ;;  %v1899_v25 = vld [vmem:[%s8670_s4 + $0x94] sm:$0xf]  ;;  %v2195_v35 = vrot.slane %v2194_v24, 4  ;;  %v2204_v36 = vrot.slane %v2202_v27, 4  ;;  %v2235_v38 = vshll.u32 %v1902_v45, 16  ;;  %v2239_v56 = vshrl.u32 %v1902_v45, 16 }
 0x104   : > { %7562 = vmatprep.mubr.bf16.mxu1 %v6575_v46  ;;  %v2166_v19 = vsel %vm8739_vm2, %v2161_v10, %v2165_v59  ;;  %v2211_v32 = vshll.u32 %v1899_v25, 16  ;;  %v2215_v33 = vshrl.u32 %v1899_v25, 16  ;;  %v2190_v40 = vsel %vm8739_vm2, %v2185_v31, %v2189_v15  ;;  %7591 = vmatpush3.bf16.msra.mxu1 %v8290_v23  ;;  %v8293_v22 = vld [vmem:[%s8670_s4 + $0x120] sm:$0xff]   ;;  %v1907_v23 = vld [vmem:[%s8670_s4 + $0xb4] sm:$0xf] }
 0x105   : > { %7767 = vmatmul.mubr.bf16.gmra.mrb[28].mxu0 %v8279_v26  ;;  %v1900_v26 = vld [vmem:[%s8670_s4 + $0x98] sm:$0x1]  ;;  %v6577_v29 = vcombine.low %v2166_v19, %v2176_v16  ;;  %v2228_v55 = vrot.slane %v2226_v50, 4  ;;  %v2245_v57 = vshll.u32 %v1903_v49, 16  ;;  %v2231_v59 = vrot.slane %v2229_v53, 5  ;;  %v8295_v53 = vld [vmem:[%s8670_s4 + $0x12c] sm:$0xff]  }
 0x106   : > { %7786 = vmatprep.mubr.bf16.mxu0 %v8281_v37  ;;  %v2207_v37 = vrot.slane %v2205_v28, 5  ;;  %v2221_v39 = vshll.u32 %v1900_v26, 16  ;;  %v2213_v42 = vrot.slane %v2211_v32, 5  ;;  %v2217_v43 = vrot.slane %v2215_v33, 4  ;;  %v1908_v26 = vld [vmem:[%s8670_s4 + $0xb8] sm:$0xf] }
 0x107   : > { %v2237_v60 = vrot.slane %v2235_v38, 5  ;;  %v2241_v63 = vrot.slane %v2239_v56, 4  ;;  %v2232_v3 = vor.u32 %v2231_v59, %v2228_v55  ;;  %v2250_v6 = vshrl.u32 %v1904_v1, 16  ;;  %v1909_v27 = vld [vmem:[%s8670_s4 + $0xbc] sm:$0x1]  ;;  %v8301_v56 = vld [vmem:[%s9418_s1 + $0x220] sm:$0xff]  }
 0x108   : > { %v2208_v46 = vor.u32 %v2207_v37, %v2204_v36  ;;  %v2223_v47 = vrot.slane %v2221_v39, 5  ;;  %v2218_v52 = vor.u32 %v2217_v43, %v2213_v42  ;;  %v2259_v10 = vshll.u32 %v1905_v4, 16 }
 0x109   : > { %v2242_v9 = vor.u32 %v2241_v63, %v2237_v60  ;;  %v2263_v11 = vshrl.u32 %v1905_v4, 16  ;;  %v2233_v12 = vrot.slane %v2232_v3, 4  ;;  %v2252_v14 = vrot.slane %v2250_v6, 4  ;;  %v8303_v63 = vld [vmem:[%s8670_s4 + $0x150] sm:$0xff]   ;;  %v8334_v3 = vld [vmem:[%s9418_s1 + $0x108] sm:$0xff]   ;;  %v8316_v6 = vld [vmem:[%s9418_s1 + $0x238] sm:$0xff]  }
 0x10a   : > { %v2209_v54 = vrot.slane %v2208_v46, 4  ;;  %v2219_v58 = vrot.slane %v2218_v52, 4  ;;  %v2261_v20 = vrot.slane %v2259_v10, 5  ;;  %v2274_v28 = vshrl.u32 %v1907_v23, 16  ;;  %v8305_v4 = vld [vmem:[%s8670_s4 + $0x15c] sm:$0xff]  }
 0x10b   : > { %7563 = vmatmul.mubr.bf16.gmra.mrb[16].mxu1 %v6576_v5  ;;  %v1906_v5 = vld [vmem:[%s8670_s4 + $0xb0] sm:$0x1]  ;;  %v2243_v19 = vrot.slane %v2242_v9, 4  ;;  %v2238_v16 = vsel %vm8739_vm2, %v2233_v12, %v2237_v60  ;;  %v2277_v32 = vshll.u32 %v1907_v23, 16  ;;  %v2283_v33 = vshll.u32 %v1908_v26, 16  ;;  %v8306_v60 = vld [vmem:[%s9418_s1 + $0x228] sm:$0xff]  }
 0x10c   : > { %7566 = vmatprep.mubr.bf16.mxu1 %v6577_v29  ;;  %v2214_v62 = vsel %vm8739_vm2, %v2209_v54, %v2213_v42  ;;  %v2224_v2 = vsel %vm8739_vm2, %v2219_v58, %v2223_v47  ;;  %v2269_v17 = vshll.u32 %v1906_v5, 16  ;;  %v2276_v37 = vrot.slane %v2274_v28, 4  ;;  %v8298_v54 = vld [vmem:[%s8670_s4 + $0x138] sm:$0xff]   ;;  %v8307_v5 = vld [vmem:[%s8670_s4 + $0x1c8] sm:$0xff]   ;;  %v6968_v9 = vld [vmem:[%s8670_s4 + $0x10] sm:$0xf] }
 0x10d   : > { %7787 = vmatmul.mubr.bf16.vlgmr.msra.gmra.mrb[0].mxu0 %v8283_v0  ;;  %v2247_v0 = vrot.slane %v2245_v57, 5  ;;  %v6579_v8 = vcombine.low %v2214_v62, %v2224_v2  ;;  %v2287_v39 = vshrl.u32 %v1908_v26, 16  ;;  %v2279_v43 = vrot.slane %v2277_v32, 5  ;;  %v8297_v58 = vld [vmem:[%s8670_s4 + $0x198] sm:$0xff]   ;;  %v8300_v62 = vld [vmem:[%s8670_s4 + $0x144] sm:$0xff]  }
 0x10e   : > { %7819 = vmatpush3.bf16.msra.mxu0 %v9066_v30  ;;  %7790 = vmatprep.mubr.bf16.mxu0 %v8285_v7  ;;  %v2200_v30 = vsel %vm8739_vm2, %v2195_v35, %v2199_v21  ;;  %v2253_v7 = vshll.u32 %v1904_v1, 16  ;;  %v2265_v21 = vrot.slane %v2263_v11, 4  ;;  %v2271_v25 = vrot.slane %v2269_v17, 5  ;;  %v8311_v1 = vld [vmem:[%s9418_s1 + $0x230] sm:$0xff]  }
 0x10f   : > { %7820 = vmatprep.subr.bf16.mxu0 %v8288_v18  ;;  %v6578_v51 = vcombine.low %v2190_v40, %v2200_v30  ;;  %v2248_v29 = vsel %vm8739_vm2, %v2243_v19, %v2247_v0  ;;  %v8296_v40 = vld [vmem:[%s9418_s1 + $0x218] sm:$0xff]   ;;  %v2285_v44 = vrot.slane %v2283_v33, 5  ;;  %v2293_v45 = vshll.u32 %v1909_v27, 16  ;;  %v8302_v0 = vld [vmem:[%s8670_s4 + $0x1b0] sm:$0xff]   ;;  %v6972_v27 = vld [vmem:[%s8670_s4 + $0x20] sm:$0x1] }
 0x110   : > { %v2255_v15 = vrot.slane %v2253_v7, 5  ;;  %v2266_v31 = vor.u32 %v2265_v21, %v2261_v20  ;;  %v6580_v35 = vcombine.low %v2238_v16, %v2248_v29  ;;  %v2289_v46 = vrot.slane %v2287_v39, 4  ;;  %v8304_v2 = vld [vmem:[%s8670_s4 + $0x1bc] sm:$0xff]   ;;  %v8308_v7 = vld [vmem:[%s8670_s4 + $0x168] sm:$0xff]   ;;  %v6969_v10 = vld [vmem:[%s8670_s4 + $0x14] sm:$0x1] }
 0x111   : > { %v2295_v49 = vrot.slane %v2293_v45, 5  ;;  %v5373_v17 = vshll.u32 %v6969_v10, 16  ;;  %v6971_v16 = vld [vmem:[%s8670_s4 + $0x1c] sm:$0xf]  ;;  %v8309_v32 = vld [vmem:[%s8670_s4 + $0x1d4] sm:$0xff]   ;;  %v8313_v33 = vld [vmem:[%s8670_s4 + $0x180] sm:$0xff]  }
 0x112   : > { %7821 = vmatpush3.bf16.msra.mxu0 %v8288_v18  ;;  %v8294_v18 = vld [vmem:[%s9418_s1 + $0xf8] sm:$0xff]   ;;  %v2256_v24 = vor.u32 %v2255_v15, %v2252_v14  ;;  %v2267_v42 = vrot.slane %v2266_v31, 4  ;;  %v5363_v14 = vshll.u32 %v6968_v9, 16  ;;  %v5367_v15 = vshrl.u32 %v6968_v9, 16 }
 0x113   : > { %7567 = vmatmul.mubr.bf16.gmra.mrb[20].mxu1 %v6578_v51  ;;  %7822 = vmatprep.subr.bf16.mxu0 %v8292_v61  ;;  %v2290_v51 = vor.u32 %v2289_v46, %v2285_v44  ;;  %v5375_v23 = vrot.slane %v5373_v17, 5  ;;  %v5387_v29 = vshll.u32 %v6971_v16, 16  ;;  %v5391_v31 = vshrl.u32 %v6971_v16, 16  ;;  %v6974_v46 = vld [vmem:[%s8670_s4 + $0x28] sm:$0xf]  ;;  %v8315_v9 = vld [vmem:[%s8670_s4 + $0x18c] sm:$0xff]  }
 0x114   : > { %7570 = vmatprep.mubr.bf16.mxu1 %v6579_v8  ;;  %7592 = vmatprep.subr.bf16.mxu1 %v8294_v18  ;;  %v2257_v36 = vrot.slane %v2256_v24, 4  ;;  %v2272_v47 = vsel %vm8739_vm2, %v2267_v42, %v2271_v25  ;;  %v6967_v8 = vld [vmem:[%s8670_s4 + $0xc] sm:$0xf]  ;;  %v5365_v21 = vrot.slane %v5363_v14, 5  ;;  %v8310_v25 = vld [vmem:[%s8670_s4 + $0x174] sm:$0xff]   ;;  %v5397_v39 = vshll.u32 %v6972_v27, 16 }
 0x115   : > { %7791 = vmatmul.mubr.bf16.gmra.mrb[4].mxu0 %v8287_v41  ;;  %7593 = vmatpush3.bf16.msra.mxu1 %v8294_v18  ;;  %v8333_v41 = vld [vmem:[%s9418_s1 + $0x100] sm:$0xff]   ;;  %v2291_v38 = vrot.slane %v2290_v51, 4  ;;  %v5354_v11 = vshrl.u32 %v6967_v8, 16  ;;  %v5357_v12 = vshll.u32 %v6967_v8, 16  ;;  %v5389_v42 = vrot.slane %v5387_v29, 5  ;;  %v8338_v14 = vld [vmem:[%s9418_s1 + $0x128] sm:$0xff]  }
 0x116   : > { %7794 = vmatprep.mubr.bf16.mxu0 %v8289_v48  ;;  %7823 = vmatpush3.bf16.msra.mxu0 %v8292_v61  ;;  %v2262_v30 = vsel %vm8739_vm2, %v2257_v36, %v2261_v20  ;;  %v2280_v48 = vor.u32 %v2279_v43, %v2276_v37  ;;  %v8299_v61 = vld [vmem:[%s8670_s4 + $0x1a4] sm:$0xff]   ;;  %v6970_v20 = vld [vmem:[%s8670_s4 + $0x18] sm:$0xf]  ;;  %v5393_v43 = vrot.slane %v5391_v31, 4  ;;  %v8314_v8 = vld [vmem:[%s8670_s4 + $0x1ec] sm:$0xff]  }
 0x117   : > { %7866 = vmatprep.subr.bf16.mxu1 %v8333_v41  ;;  %7824 = vmatprep.subr.bf16.mxu0 %v8296_v40  ;;  %v6581_v50 = vcombine.low %v2262_v30, %v2272_v47  ;;  %v2296_v57 = vsel %vm8739_vm2, %v2291_v38, %v2295_v49  ;;  %v5356_v18 = vrot.slane %v5354_v11, 4  ;;  %v5359_v19 = vrot.slane %v5357_v12, 5  ;;  %v6975_v47 = vld [vmem:[%s8670_s4 + $0x2c] sm:$0x1]  ;;  %v8337_v38 = vld [vmem:[%s9418_s1 + $0x120] sm:$0xff]  }
 0x118   : > { %v2281_v52 = vrot.slane %v2280_v48, 4  ;;  %v5378_v24 = vshrl.u32 %v6970_v20, 16  ;;  %v5381_v28 = vshll.u32 %v6970_v20, 16  ;;  %v5399_v30 = vrot.slane %v5397_v39, 5  ;;  %v8312_v48 = vld [vmem:[%s8670_s4 + $0x1e0] sm:$0xff]  }
 0x119   : > { %v5360_v26 = vor.u32 %v5359_v19, %v5356_v18  ;;  %v5394_v51 = vor.u32 %v5393_v43, %v5389_v42  ;;  %v6982_v39 = vld [vmem:[%s8670_s4 + $0x48] sm:$0xf] }
 0x11a   : > { %7825 = vmatpush3.bf16.msra.mxu0 %v8296_v40  ;;  %v2286_v55 = vsel %vm8739_vm2, %v2281_v52, %v2285_v44  ;;  %v5380_v37 = vrot.slane %v5378_v24, 4  ;;  %v6973_v44 = vld [vmem:[%s8670_s4 + $0x24] sm:$0xf] }
 0x11b   : > { %7571 = vmatmul.mubr.bf16.gmra.mrb[24].mxu1 %v6580_v35  ;;  %v6582_v59 = vcombine.low %v2286_v55, %v2296_v57  ;;  %7826 = vmatprep.subr.bf16.mxu0 %v8301_v56  ;;  %v8336_v35 = vld [vmem:[%s9418_s1 + $0x118] sm:$0xff]   ;;  %v5361_v40 = vrot.slane %v5360_v26, 4  ;;  %v5402_v52 = vshrl.u32 %v6973_v44, 16  ;;  %v5411_v55 = vshll.u32 %v6974_v46, 16  ;;  %v6976_v57 = vld [vmem:[%s8670_s4 + $0x30] sm:$0xf] }
 0x11c   : > { %7574 = vmatprep.mubr.bf16.mxu1 %v6581_v50  ;;  %v8317_v26 = vld [vmem:[%s8670_s4 + $0x1f8] sm:$0xff]  }
 0x11d   : > { %7795 = vmatmul.mubr.bf16.gmra.mrb[8].mxu0 %v8291_v13  ;;  %v8335_v13 = vld [vmem:[%s9418_s1 + $0x110] sm:$0xff]   ;;  %v5366_v49 = vsel %vm8739_vm2, %v5361_v40, %v5365_v21 }
 0x11e   : > { %7798 = vmatprep.mubr.bf16.mxu0 %v8293_v22  ;;  %7827 = vmatpush3.bf16.msra.mxu0 %v8301_v56  ;;  %v5369_v22 = vrot.slane %v5367_v15, 4  ;;  %v5415_v56 = vshrl.u32 %v6974_v46, 16  ;;  %v6979_v15 = vld [vmem:[%s8670_s4 + $0x3c] sm:$0xf] }
 0x11f   : > { %7828 = vmatprep.subr.bf16.mxu0 %v8306_v60  ;;  %v5453_v31 = vshll.u32 %v6979_v15, 16 }
 0x120   : > { %v5370_v36 = vor.u32 %v5369_v22, %v5365_v21  ;;  %v6980_v21 = vld [vmem:[%s8670_s4 + $0x40] sm:$0xf]  ;;  %v6981_v22 = vld [vmem:[%s8670_s4 + $0x44] sm:$0x1] }
 0x121   : > { %v5455_v43 = vrot.slane %v5453_v31, 5  ;;  %v5469_v46 = vshll.u32 %v6981_v22, 16 }
 0x122   : > { %7829 = vmatpush3.bf16.msra.mxu0 %v8306_v60  ;;  %v5371_v45 = vrot.slane %v5370_v36, 4  ;;  %v5395_v60 = vrot.slane %v5394_v51, 4  ;;  %v6984_v51 = vld [vmem:[%s8670_s4 + $0x50] sm:$0x1] }
 0x123   : > { %7575 = vmatmul.mubr.bf16.gmra.mrb[28].mxu1 %v6582_v59  ;;  %7830 = vmatprep.subr.bf16.mxu0 %v8311_v1 }
 0x124   : > { %7594 = vmatprep.mubr.bf16.mxu1 %v8297_v58 }
 0x125   : > { %7799 = vmatmul.mubr.bf16.gmra.mrb[12].mxu0 %v8295_v53  ;;  %v5376_v53 = vsel %vm8739_vm2, %v5371_v45, %v5375_v23  ;;  %v5459_v45 = vshll.u32 %v6980_v21, 16 }
 0x126   : > { %7802 = vmatprep.mubr.bf16.mxu0 %v8298_v54  ;;  %7831 = vmatpush3.bf16.msra.mxu0 %v8311_v1  ;;  %v5405_v54 = vshll.u32 %v6973_v44, 16  ;;  %v7031_v58 = vcombine.low %v5366_v49, %v5376_v53  ;;  %v5417_v1 = vrot.slane %v5415_v56, 4  ;;  %v6983_v44 = vld [vmem:[%s8670_s4 + $0x4c] sm:$0xf]  ;;  %v8318_v53 = vld [vmem:[%s8670_s4 + $0x204] sm:$0xff]  }
 0x127   : > { %7832 = vmatprep.subr.bf16.mxu0 %v8316_v6 }
 0x12a   : > { %7833 = vmatpush3.bf16.msra.mxu0 %v8316_v6  ;;  %v5426_v6 = vshrl.u32 %v6976_v57, 16 }
 0x12b   : > { %7595 = vmatmul.mubr.bf16.vlgmr.msra.gmra.mrb[0].mxu1 %v8299_v61  ;;  %v5404_v61 = vrot.slane %v5402_v52, 4  ;;  %v5477_v52 = vshll.u32 %v6982_v39, 16 }
 0x12c   : > { %7874 = vmatpush3.bf16.msra.mxu1 %v8333_v41  ;;  %7598 = vmatprep.mubr.bf16.mxu1 %v8302_v0  ;;  %v5383_v41 = vrot.slane %v5381_v28, 5  ;;  %v5413_v0 = vrot.slane %v5411_v55, 5  ;;  %v5428_v17 = vrot.slane %v5426_v6, 4  ;;  %v5471_v55 = vrot.slane %v5469_v46, 5  ;;  %v8321_v46 = vld [vmem:[%s8670_s4 + $0x228] sm:$0xff]  }
 0x12d   : > { %7803 = vmatmul.mubr.bf16.gmra.mrb[16].mxu0 %v8300_v62  ;;  %7867 = vmatprep.subr.bf16.mxu1 %v8334_v3  ;;  %v6977_v62 = vld [vmem:[%s8670_s4 + $0x34] sm:$0xf] }
 0x12e   : > { %7806 = vmatprep.mubr.bf16.mxu0 %v8303_v63  ;;  %v5384_v50 = vor.u32 %v5383_v41, %v5380_v37  ;;  %v5407_v63 = vrot.slane %v5405_v54, 5  ;;  %v5418_v12 = vor.u32 %v5417_v1, %v5413_v0  ;;  %v5435_v19 = vshll.u32 %v6977_v62, 16  ;;  %v8339_v37 = vld [vmem:[%s9418_s1 + $0x130] sm:$0xff]  }
 0x12f   : > { %v5439_v20 = vshrl.u32 %v6977_v62, 16  ;;  %v5479_v62 = vrot.slane %v5477_v52, 5 }
 0x130   : > { %7875 = vmatpush3.bf16.msra.mxu1 %v8334_v3  ;;  %v5385_v59 = vrot.slane %v5384_v50, 4  ;;  %v6978_v3 = vld [vmem:[%s8670_s4 + $0x38] sm:$0x1]  ;;  %v5408_v11 = vor.u32 %v5407_v63, %v5404_v61  ;;  %v5419_v16 = vrot.slane %v5418_v12, 4  ;;  %v5437_v28 = vrot.slane %v5435_v19, 5 }
 0x131   : > { %7868 = vmatprep.subr.bf16.mxu1 %v8335_v13  ;;  %v5445_v24 = vshll.u32 %v6978_v3, 16  ;;  %v5441_v29 = vrot.slane %v5439_v20, 4  ;;  %v5483_v63 = vshll.u32 %v6983_v44, 16  ;;  %v5493_v3 = vshll.u32 %v6984_v51, 16 }
 0x132   : > { %v5409_v23 = vrot.slane %v5408_v11, 4  ;;  %v6988_v11 = vld [vmem:[%s8670_s4 + $0x60] sm:$0xf] }
 0x133   : > { %7599 = vmatmul.mubr.bf16.gmra.mrb[4].mxu1 %v8304_v2  ;;  %v5421_v2 = vshll.u32 %v6975_v47, 16  ;;  %v5474_v47 = vshrl.u32 %v6982_v39, 16 }
 0x134   : > { %7602 = vmatprep.mubr.bf16.mxu1 %v8307_v5  ;;  %7876 = vmatpush3.bf16.msra.mxu1 %v8335_v13  ;;  %v5400_v5 = vsel %vm8739_vm2, %v5395_v60, %v5399_v30  ;;  %v5463_v30 = vshrl.u32 %v6980_v21, 16 }
 0x135   : > { %7807 = vmatmul.mubr.bf16.gmra.mrb[20].mxu0 %v8305_v4  ;;  %7869 = vmatprep.subr.bf16.mxu1 %v8336_v35  ;;  %v5390_v4 = vsel %vm8739_vm2, %v5385_v59, %v5389_v42  ;;  %v5423_v13 = vrot.slane %v5421_v2, 5  ;;  %v5442_v42 = vor.u32 %v5441_v29, %v5437_v28  ;;  %v5476_v56 = vrot.slane %v5474_v47, 4  ;;  %v8319_v59 = vld [vmem:[%s8670_s4 + $0x210] sm:$0xff]  }
 0x136   : > { %7810 = vmatprep.mubr.bf16.mxu0 %v8308_v7  ;;  %v5429_v7 = vshll.u32 %v6976_v57, 16  ;;  %v9209_v10 = vcombine.low %v5390_v4, %v5400_v5  ;;  %v5465_v54 = vrot.slane %v5463_v30, 4  ;;  %v6985_v57 = vld [vmem:[%s8670_s4 + $0x54] sm:$0xf]  ;;  %v5487_v2 = vshrl.u32 %v6983_v44, 16 }
 0x137   : > { %v5443_v49 = vrot.slane %v5442_v42, 4  ;;  %v6986_v4 = vld [vmem:[%s8670_s4 + $0x58] sm:$0xf]  ;;  %v5480_v6 = vor.u32 %v5479_v62, %v5476_v56  ;;  %v6992_v30 = vld [vmem:[%s8670_s4 + $0x70] sm:$0xf] }
 0x138   : > { %7877 = vmatpush3.bf16.msra.mxu1 %v8336_v35  ;;  %v5431_v18 = vrot.slane %v5429_v7, 5  ;;  %v5447_v35 = vrot.slane %v5445_v24, 5  ;;  %v5485_v7 = vrot.slane %v5483_v63, 5  ;;  %v5507_v19 = vshll.u32 %v6986_v4, 16  ;;  %v6989_v24 = vld [vmem:[%s8670_s4 + $0x64] sm:$0xf] }
 0x139   : > { %7870 = vmatprep.subr.bf16.mxu1 %v8337_v38  ;;  %v5511_v20 = vshrl.u32 %v6986_v4, 16  ;;  %v5535_v39 = vshrl.u32 %v6989_v24, 16  ;;  %v5559_v62 = vshrl.u32 %v6992_v30, 16  ;;  %v6995_v63 = vld [vmem:[%s8670_s4 + $0x7c] sm:$0xf] }
 0x13a   : > { %v5432_v27 = vor.u32 %v5431_v18, %v5428_v17  ;;  %v5448_v60 = vsel %vm8739_vm2, %v5443_v49, %v5447_v35  ;;  %v5481_v17 = vrot.slane %v5480_v6, 4  ;;  %v6996_v4 = vld [vmem:[%s8670_s4 + $0x80] sm:$0x1] }
 0x13b   : > { %7603 = vmatmul.mubr.bf16.gmra.mrb[8].mxu1 %v8309_v32  ;;  %v5414_v32 = vsel %vm8739_vm2, %v5409_v23, %v5413_v0  ;;  %v5561_v6 = vrot.slane %v5559_v62, 4 }
 0x13c   : > { %7606 = vmatprep.mubr.bf16.mxu1 %v8312_v48  ;;  %7878 = vmatpush3.bf16.msra.mxu1 %v8337_v38  ;;  %v5433_v41 = vrot.slane %v5432_v27, 4  ;;  %v5461_v38 = vrot.slane %v5459_v45, 5  ;;  %v5513_v27 = vrot.slane %v5511_v20, 4 }
 0x13d   : > { %7811 = vmatmul.mubr.bf16.gmra.mrb[24].mxu0 %v8310_v25  ;;  %7871 = vmatprep.subr.bf16.mxu1 %v8338_v14  ;;  %v5450_v25 = vshrl.u32 %v6979_v15, 16  ;;  %v5501_v15 = vshll.u32 %v6985_v57, 16 }
 0x13e   : > { %7814 = vmatprep.mubr.bf16.mxu0 %v8313_v33  ;;  %v5424_v33 = vsel %vm8739_vm2, %v5419_v16, %v5423_v13  ;;  %v5438_v48 = vsel %vm8739_vm2, %v5433_v41, %v5437_v28  ;;  %v5466_v1 = vor.u32 %v5465_v54, %v5461_v38  ;;  %v5489_v13 = vrot.slane %v5487_v2, 4  ;;  %v6990_v28 = vld [vmem:[%s8670_s4 + $0x68] sm:$0x1]  ;;  %v8320_v41 = vld [vmem:[%s8670_s4 + $0x21c] sm:$0xff]   ;;  %v6994_v54 = vld [vmem:[%s8670_s4 + $0x78] sm:$0xf] }
 0x13f   : > { %v5452_v36 = vrot.slane %v5450_v25, 4  ;;  %v7033_v40 = vcombine.low %v5414_v32, %v5424_v33  ;;  %v7034_v0 = vcombine.low %v5438_v48, %v5448_v60  ;;  %v5503_v23 = vrot.slane %v5501_v15, 5  ;;  %v6998_v15 = vld [vmem:[%s8670_s4 + $0x88] sm:$0xf] }
 0x140   : > { %7879 = vmatpush3.bf16.msra.mxu1 %v8338_v14  ;;  %v5467_v12 = vrot.slane %v5466_v1, 4  ;;  %v5495_v14 = vrot.slane %v5493_v3, 5  ;;  %v5490_v22 = vor.u32 %v5489_v13, %v5485_v7  ;;  %v5522_v33 = vshrl.u32 %v6988_v11, 16 }
 0x141   : > { %7872 = vmatprep.subr.bf16.mxu1 %v8339_v37  ;;  %v5456_v50 = vor.u32 %v5455_v43, %v5452_v36  ;;  %v5525_v36 = vshll.u32 %v6988_v11, 16  ;;  %v5541_v45 = vshll.u32 %v6990_v28, 16  ;;  %v5579_v13 = vshll.u32 %v6995_v63, 16  ;;  %v6999_v28 = vld [vmem:[%s8670_s4 + $0x8c] sm:$0x1] }
 0x142   : > { %v5472_v21 = vsel %vm8739_vm2, %v5467_v12, %v5471_v55  ;;  %v5491_v29 = vrot.slane %v5490_v22, 4  ;;  %v5524_v44 = vrot.slane %v5522_v33, 4  ;;  %v8323_v22 = vld [vmem:[%s8670_s4 + $0x240] sm:$0xff]  }
 0x143   : > { %7607 = vmatmul.mubr.bf16.gmra.mrb[12].mxu1 %v8314_v8  ;;  %v5457_v61 = vrot.slane %v5456_v50, 4  ;;  %v6987_v8 = vld [vmem:[%s8670_s4 + $0x5c] sm:$0x1]  ;;  %v5527_v48 = vrot.slane %v5525_v36, 5  ;;  %v6993_v50 = vld [vmem:[%s8670_s4 + $0x74] sm:$0x1] }
 0x144   : > { %7610 = vmatprep.mubr.bf16.mxu1 %v8317_v26  ;;  %7880 = vmatpush3.bf16.msra.mxu1 %v8339_v37  ;;  %v5517_v16 = vshll.u32 %v6987_v8, 16  ;;  %v5509_v26 = vrot.slane %v5507_v19, 5  ;;  %v5531_v37 = vshll.u32 %v6989_v24, 16  ;;  %v5496_v42 = vsel %vm8739_vm2, %v5491_v29, %v5495_v14  ;;  %v6997_v14 = vld [vmem:[%s8670_s4 + $0x84] sm:$0xf] }
 0x145   : > { %7815 = vmatmul.mubr.bf16.gmra.mrb[28].mxu0 %v8315_v9  ;;  %v5462_v5 = vsel %vm8739_vm2, %v5457_v61, %v5461_v38  ;;  %v5498_v9 = vshrl.u32 %v6985_v57, 16  ;;  %v5528_v55 = vor.u32 %v5527_v48, %v5524_v44  ;;  %v5543_v56 = vrot.slane %v5541_v45, 5  ;;  %v7000_v36 = vld [vmem:[%s8670_s4 + $0x90] sm:$0xf] }
 0x146   : > { %7834 = vmatprep.mubr.bf16.mxu0 %v7031_v58  ;;  %v8340_v58 = vld [vmem:[%s9418_s1 + $0x138] sm:$0xff]   ;;  %v7035_v25 = vcombine.low %v5462_v5, %v5472_v21  ;;  %v5519_v32 = vrot.slane %v5517_v16, 5  ;;  %v5514_v35 = vor.u32 %v5513_v27, %v5509_v26  ;;  %v5533_v49 = vrot.slane %v5531_v37, 5 }
 0x147   : > { %7873 = vmatprep.subr.bf16.mxu1 %v8340_v58  ;;  %v5500_v18 = vrot.slane %v5498_v9, 4  ;;  %v5529_v1 = vrot.slane %v5528_v55, 4  ;;  %v5565_v3 = vshll.u32 %v6993_v50, 16  ;;  %v5573_v8 = vshll.u32 %v6994_v54, 16  ;;  %v7003_v55 = vld [vmem:[%s8670_s4 + $0x9c] sm:$0xf] }
 0x148   : > { %7881 = vmatpush3.bf16.msra.mxu1 %v8340_v58  ;;  %v5515_v47 = vrot.slane %v5514_v35, 4  ;;  %v5555_v58 = vshll.u32 %v6992_v30, 16  ;;  %v9272_v24 = vrot.slane %v5579_v13, 5  ;;  %v5589_v27 = vshll.u32 %v6996_v4, 16 }
 0x149   : > { %v5504_v31 = vor.u32 %v5503_v23, %v5500_v18  ;;  %v5534_v11 = vsel %vm8739_vm2, %v5529_v1, %v5533_v49  ;;  %v5567_v19 = vrot.slane %v5565_v3, 5  ;;  %v5575_v21 = vrot.slane %v5573_v8, 5  ;;  %v7005_v8 = vld [vmem:[%s8670_s4 + $0xa4] sm:$0x1] }
 0x14a   : > { %v5557_v2 = vrot.slane %v5555_v58, 5  ;;  %v5594_v29 = vshrl.u32 %v6997_v14, 16  ;;  %v5597_v33 = vshll.u32 %v6997_v14, 16  ;;  %v5603_v35 = vshll.u32 %v6998_v15, 16 }
 0x14b   : > { %7611 = vmatmul.mubr.bf16.gmra.mrb[16].mxu1 %v8318_v53  ;;  %v5505_v43 = vrot.slane %v5504_v31, 4  ;;  %v5537_v53 = vrot.slane %v5535_v39, 4  ;;  %v5591_v45 = vrot.slane %v5589_v27, 5  ;;  %v5613_v48 = vshll.u32 %v6999_v28, 16 }
 0x14c   : > { %7614 = vmatprep.mubr.bf16.mxu1 %v8319_v59  ;;  %v5520_v59 = vsel %vm8739_vm2, %v5515_v47, %v5519_v32  ;;  %v5562_v18 = vor.u32 %v5561_v6, %v5557_v2  ;;  %v5599_v30 = vrot.slane %v5597_v33, 5  ;;  %v5607_v47 = vshrl.u32 %v6998_v15, 16 }
 0x14d   : > { %7835 = vmatmul.mubr.bf16.vlgmr.msra.gmra.mrb[0].mxu0 %v9209_v10  ;;  %v5486_v10 = vsel %vm8739_vm2, %v5481_v17, %v5485_v7  ;;  %v5510_v52 = vsel %vm8739_vm2, %v5505_v43, %v5509_v26  ;;  %v5538_v60 = vor.u32 %v5537_v53, %v5533_v49  ;;  %v5570_v7 = vshrl.u32 %v6994_v54, 16  ;;  %v8322_v17 = vld [vmem:[%s8670_s4 + $0x234] sm:$0xff]  }
 0x14e   : > { %7838 = vmatprep.mubr.bf16.mxu0 %v7033_v40  ;;  %v6991_v40 = vld [vmem:[%s8670_s4 + $0x6c] sm:$0xf]  ;;  %v7036_v51 = vcombine.low %v5486_v10, %v5496_v42  ;;  %v7037_v9 = vcombine.low %v5510_v52, %v5520_v59  ;;  %v5563_v10 = vrot.slane %v5562_v18, 4  ;;  %v7001_v42 = vld [vmem:[%s8670_s4 + $0x94] sm:$0xf]  ;;  %v5618_v50 = vshrl.u32 %v7000_v36, 16 }
 0x14f   : > { %v5546_v38 = vshrl.u32 %v6991_v40, 16  ;;  %v5549_v57 = vshll.u32 %v6991_v40, 16  ;;  %v5539_v5 = vrot.slane %v5538_v60, 4  ;;  %v5572_v20 = vrot.slane %v5570_v7, 4  ;;  %v7002_v49 = vld [vmem:[%s8670_s4 + $0x98] sm:$0x1] }
 0x150   : > { %v5568_v39 = vsel %vm8739_vm2, %v5563_v10, %v5567_v19  ;;  %v5627_v54 = vshll.u32 %v7001_v42, 16  ;;  %v5609_v58 = vrot.slane %v5607_v47, 4  ;;  %v5620_v59 = vrot.slane %v5618_v50, 4  ;;  %v7010_v47 = vld [vmem:[%s8670_s4 + $0xb8] sm:$0xf] }
 0x151   : > { %v5548_v61 = vrot.slane %v5546_v38, 4  ;;  %v5544_v23 = vsel %vm8739_vm2, %v5539_v5, %v5543_v56  ;;  %v5576_v26 = vor.u32 %v5575_v21, %v5572_v20  ;;  %v5621_v38 = vshll.u32 %v7000_v36, 16  ;;  %v8325_v56 = vld [vmem:[%s8670_s4 + $0x2c4] sm:$0xff]  }
 0x152   : > { %v7038_v37 = vcombine.low %v5534_v11, %v5544_v23  ;;  %v5631_v60 = vshrl.u32 %v7001_v42, 16  ;;  %v5637_v5 = vshll.u32 %v7002_v49, 16  ;;  %v5645_v11 = vshll.u32 %v7003_v55, 16 }
 0x153   : > { %7615 = vmatmul.mubr.bf16.gmra.mrb[20].mxu1 %v8320_v41  ;;  %v5577_v40 = vrot.slane %v5576_v26, 4  ;;  %v5596_v41 = vrot.slane %v5594_v29, 4  ;;  %v5623_v1 = vrot.slane %v5621_v38, 5  ;;  %v7008_v29 = vld [vmem:[%s8670_s4 + $0xb0] sm:$0x1] }
 0x154   : > { %7618 = vmatprep.mubr.bf16.mxu1 %v8321_v46  ;;  %v5605_v46 = vrot.slane %v5603_v35, 5  ;;  %v5633_v4 = vrot.slane %v5631_v60, 4  ;;  %v5639_v15 = vrot.slane %v5637_v5, 5  ;;  %v5647_v20 = vrot.slane %v5645_v11, 5 }
 0x155   : > { %7839 = vmatmul.mubr.bf16.gmra.mrb[4].mxu0 %v7034_v0  ;;  %v5551_v0 = vrot.slane %v5549_v57, 5  ;;  %v5600_v53 = vor.u32 %v5599_v30, %v5596_v41  ;;  %v5582_v57 = vsel %vm8739_vm2, %v5577_v40, %v9272_v24  ;;  %v5624_v7 = vor.u32 %v5623_v1, %v5620_v59 }
 0x156   : > { %7842 = vmatprep.mubr.bf16.mxu0 %v7035_v25  ;;  %v5583_v25 = vshrl.u32 %v6995_v63, 16  ;;  %v5615_v63 = vrot.slane %v5613_v48, 5  ;;  %v5610_v3 = vor.u32 %v5609_v58, %v5605_v46  ;;  %v5699_v59 = vshll.u32 %v7010_v47, 16 }
 0x157   : > { %v5552_v12 = vor.u32 %v5551_v0, %v5548_v61  ;;  %v7004_v61 = vld [vmem:[%s8670_s4 + $0xa0] sm:$0xf]  ;;  %v5601_v62 = vrot.slane %v5600_v53, 4  ;;  %v5629_v0 = vrot.slane %v5627_v54, 5  ;;  %v5625_v18 = vrot.slane %v5624_v7, 4 }
 0x158   : > { %v5585_v32 = vrot.slane %v5583_v25, 4  ;;  %v5611_v13 = vrot.slane %v5610_v3, 4  ;;  %v5655_v21 = vshrl.u32 %v7004_v61, 16  ;;  %v7007_v25 = vld [vmem:[%s8670_s4 + $0xac] sm:$0xf]  ;;  %v5703_v60 = vshrl.u32 %v7010_v47, 16 }
 0x159   : > { %v5553_v16 = vrot.slane %v5552_v12, 4  ;;  %v5606_v6 = vsel %vm8739_vm2, %v5601_v62, %v5605_v46  ;;  %v7006_v12 = vld [vmem:[%s8670_s4 + $0xa8] sm:$0xf]  ;;  %v5634_v14 = vor.u32 %v5633_v4, %v5629_v0  ;;  %v5679_v30 = vshrl.u32 %v7007_v25, 16  ;;  %v7011_v54 = vld [vmem:[%s8670_s4 + $0xbc] sm:$0x1] }
 0x15a   : > { %v5586_v44 = vor.u32 %v5585_v32, %v9272_v24  ;;  %v5661_v24 = vshll.u32 %v7005_v8, 16  ;;  %v5657_v28 = vrot.slane %v5655_v21, 4  ;;  %v5630_v32 = vsel %vm8739_vm2, %v5625_v18, %v5629_v0  ;;  %v7013_v0 = vld [vmem:[%s8670_s4 + $0xc4] sm:$0xf] }
 0x15b   : > { %v5558_v31 = vsel %vm8739_vm2, %v5553_v16, %v5557_v2  ;;  %7619 = vmatmul.mubr.bf16.gmra.mrb[24].mxu1 %v8322_v17  ;;  %v5651_v17 = vshll.u32 %v7004_v61, 16  ;;  %v5635_v23 = vrot.slane %v5634_v14, 4  ;;  %v5666_v35 = vshrl.u32 %v7006_v12, 16 }
 0x15c   : > { %7622 = vmatprep.mubr.bf16.mxu1 %v8323_v22  ;;  %v7039_v43 = vcombine.low %v5558_v31, %v5568_v39  ;;  %v5587_v52 = vrot.slane %v5586_v44, 4  ;;  %v5616_v22 = vsel %vm8739_vm2, %v5611_v13, %v5615_v63  ;;  %v8326_v31 = vld [vmem:[%s8670_s4 + $0x2d0] sm:$0xff]   ;;  %v5669_v36 = vshll.u32 %v7006_v12, 16  ;;  %v8327_v39 = vld [vmem:[%s8670_s4 + $0x2dc] sm:$0xff]  }
 0x15d   : > { %7843 = vmatmul.mubr.bf16.gmra.mrb[8].mxu0 %v7036_v51  ;;  %v8324_v51 = vld [vmem:[%s8670_s4 + $0x24c] sm:$0xff]   ;;  %v5653_v16 = vrot.slane %v5651_v17, 5  ;;  %v7041_v26 = vcombine.low %v5606_v6, %v5616_v22  ;;  %v5640_v33 = vsel %vm8739_vm2, %v5635_v23, %v5639_v15  ;;  %v5663_v42 = vrot.slane %v5661_v24, 5  ;;  %v8329_v12 = vld [vmem:[%s8670_s4 + $0x2f4] sm:$0xff]   ;;  %v7014_v15 = vld [vmem:[%s8670_s4 + $0xc8] sm:$0x1] }
 0x15e   : > { %7846 = vmatprep.mubr.bf16.mxu0 %v7037_v9  ;;  %v5592_v2 = vsel %vm8739_vm2, %v5587_v52, %v5591_v45  ;;  %v5642_v9 = vshrl.u32 %v7003_v55, 16  ;;  %v5668_v44 = vrot.slane %v5666_v35, 4  ;;  %v5671_v45 = vrot.slane %v5669_v36, 5  ;;  %v8328_v6 = vld [vmem:[%s8670_s4 + $0x2e8] sm:$0xff]  }
 0x15f   : > { %v7040_v10 = vcombine.low %v5582_v57, %v5592_v2  ;;  %v5658_v41 = vor.u32 %v5657_v28, %v5653_v16  ;;  %v5685_v46 = vshll.u32 %v7008_v29, 16  ;;  %v7042_v48 = vcombine.low %v5630_v32, %v5640_v33  ;;  %v8330_v32 = vld [vmem:[%s8670_s4 + $0x300] sm:$0xff]  }
 0x160   : > { %v5644_v19 = vrot.slane %v5642_v9, 4  ;;  %v5672_v53 = vor.u32 %v5671_v45, %v5668_v44  ;;  %v5681_v38 = vrot.slane %v5679_v30, 4  ;;  %v5701_v2 = vrot.slane %v5699_v59, 5 }
 0x161   : > { %v5659_v49 = vrot.slane %v5658_v41, 4  ;;  %v5687_v63 = vrot.slane %v5685_v46, 5  ;;  %v5705_v3 = vrot.slane %v5703_v60, 4  ;;  %v5709_v4 = vshll.u32 %v7011_v54, 16 }
 0x162   : > { %v5648_v27 = vor.u32 %v5647_v20, %v5644_v19  ;;  %v5673_v61 = vrot.slane %v5672_v53, 4  ;;  %v5723_v18 = vshll.u32 %v7013_v0, 16  ;;  %v5727_v21 = vshrl.u32 %v7013_v0, 16 }
 0x163   : > { %7623 = vmatmul.mubr.bf16.gmra.mrb[28].mxu1 %v8324_v51  ;;  %v5664_v57 = vsel %vm8739_vm2, %v5659_v49, %v5663_v42  ;;  %v5706_v13 = vor.u32 %v5705_v3, %v5701_v2  ;;  %v5711_v14 = vrot.slane %v5709_v4, 5 }
 0x164   : > { %7658 = vmatprep.mubr.bf16.mxu1 %v8325_v56  ;;  %v5649_v40 = vrot.slane %v5648_v27, 4  ;;  %v7012_v56 = vld [vmem:[%s8670_s4 + $0xc0] sm:$0xf] }
 0x165   : > { %7847 = vmatmul.mubr.bf16.gmra.mrb[12].mxu0 %v7038_v37  ;;  %v7009_v37 = vld [vmem:[%s8670_s4 + $0xb4] sm:$0xf]  ;;  %v5714_v5 = vshrl.u32 %v7012_v56, 16  ;;  %v5717_v11 = vshll.u32 %v7012_v56, 16  ;;  %v5707_v23 = vrot.slane %v5706_v13, 4 }
 0x166   : > { %7850 = vmatprep.mubr.bf16.mxu0 %v7039_v43  ;;  %v5675_v43 = vshll.u32 %v7007_v25, 16  ;;  %v5690_v51 = vshrl.u32 %v7009_v37, 16  ;;  %v5654_v52 = vsel %vm8739_vm2, %v5649_v40, %v5653_v16  ;;  %v5693_v55 = vshll.u32 %v7009_v37, 16 }
 0x167   : > { %v7043_v7 = vcombine.low %v5654_v52, %v5664_v57  ;;  %v5716_v17 = vrot.slane %v5714_v5, 4  ;;  %v5719_v20 = vrot.slane %v5717_v11, 5  ;;  %v5725_v16 = vrot.slane %v5723_v18, 5 }
 0x168   : > { %v5677_v50 = vrot.slane %v5675_v43, 5  ;;  %v5692_v58 = vrot.slane %v5690_v51, 4  ;;  %v5695_v1 = vrot.slane %v5693_v55, 5  ;;  %v5712_v28 = vsel %vm8739_vm2, %v5707_v23, %v5711_v14  ;;  %v8332_v43 = vld [vmem:[%s8670_s4 + $0x318] sm:$0xff]  }
 0x169   : > { %v5720_v25 = vor.u32 %v5719_v20, %v5716_v17 }
 0x16a   : > { %v5682_v62 = vor.u32 %v5681_v38, %v5677_v50  ;;  %v5696_v9 = vor.u32 %v5695_v1, %v5692_v58  ;;  %v5678_v22 = vsel %vm8739_vm2, %v5673_v61, %v5677_v50  ;;  %v9346_v58 = vld [vmem:[%s9419_s2] ss:$0 sm:$0xff] }
 0x16b   : > { %7659 = vmatmul.mubr.bf16.vlgmr.msra.gmra.mrb[16].mxu1 %v8326_v31  ;;  %v5721_v35 = vrot.slane %v5720_v25, 4 }
 0x16c   : > { %7662 = vmatprep.mubr.bf16.mxu1 %v8327_v39  ;;  %v5683_v8 = vrot.slane %v5682_v62, 4  ;;  %v5697_v19 = vrot.slane %v5696_v9, 4  ;;  %v8331_v39 = vld [vmem:[%s8670_s4 + $0x30c] sm:$0xff]  }
 0x16d   : > { %7851 = vmatmul.mubr.bf16.gmra.mrb[16].mxu0 %v7040_v10  ;;  %v5729_v10 = vrot.slane %v5727_v21, 4  ;;  %v5726_v40 = vsel %vm8739_vm2, %v5721_v35, %v5725_v16 }
 0x16e   : > { %7854 = vmatprep.mubr.bf16.mxu0 %v7041_v26  ;;  %v5688_v24 = vsel %vm8739_vm2, %v5683_v8, %v5687_v63  ;;  %v5733_v26 = vshll.u32 %v7014_v15, 16  ;;  %v5702_v27 = vsel %vm8739_vm2, %v5697_v19, %v5701_v2 }
 0x16f   : > { %v5730_v29 = vor.u32 %v5729_v10, %v5725_v16  ;;  %v7044_v31 = vcombine.low %v5678_v22, %v5688_v24  ;;  %v7045_v33 = vcombine.low %v5702_v27, %v5712_v28 }
 0x170   : > { %v5735_v37 = vrot.slane %v5733_v26, 5 }
 0x171   : > { %v5731_v36 = vrot.slane %v5730_v29, 4 }
 0x173   : > { %7663 = vmatmul.mubr.bf16.gmra.mrb[20].mxu1 %v8328_v6  ;;  %v5736_v41 = vsel %vm8739_vm2, %v5731_v36, %v5735_v37 }
 0x174   : > { %7666 = vmatprep.mubr.bf16.mxu1 %v8329_v12  ;;  %v7046_v42 = vcombine.low %v5726_v40, %v5736_v41 }
 0x175   : > { %7855 = vmatmul.mubr.bf16.gmra.mrb[20].mxu0 %v7042_v48 }
 0x176   : > { %7858 = vmatprep.mubr.bf16.mxu0 %v7043_v7 }
 0x17b   : > { %7667 = vmatmul.mubr.bf16.gmra.mrb[24].mxu1 %v8330_v32 }
 0x17c   : > { %7670 = vmatprep.mubr.bf16.mxu1 %v8331_v39 }
 0x17d   : > { %7859 = vmatmul.mubr.bf16.gmra.mrb[24].mxu0 %v7044_v31 }
 0x17e   : > { %7862 = vmatprep.mubr.bf16.mxu0 %v7045_v33 }
 0x183   : > { %7671 = vmatmul.mubr.bf16.gmra.mrb[28].mxu1 %v8332_v43 }
 0x185   : > { %7863 = vmatmul.mubr.bf16.gmra.mrb[28].mxu0 %v7046_v42 }
 0x1fe   : > { %v7596_v44 = vpop.f32.mrb[0].mxu1 }
 0x1ff   : > { %v2911_v45 = vpop.f32.mrb[1].mxu1 }
 0x200   : > { %v7597_v30 = vpop.f32.mrb[2].mxu1 }
 0x201   : > { %v2914_v46 = vpop.f32.mrb[3].mxu1 }
 0x206   : > { %v7600_v47 = vpop.f32.mrb[4].mxu1 }
 0x207   : > { %v2927_v48 = vpop.f32.mrb[5].mxu1 }
 0x208   : > { %v7601_v49 = vpop.f32.mrb[6].mxu1 }
 0x209   : > { %v2930_v50 = vpop.f32.mrb[7].mxu1 }
 0x20e   : > { %v7604_v51 = vpop.f32.mrb[8].mxu1 }
 0x20f   : > { %v2943_v52 = vpop.f32.mrb[9].mxu1 }
 0x210   : > { %v7605_v53 = vpop.f32.mrb[10].mxu1 }
 0x211   : > { %v2946_v34 = vpop.f32.mrb[11].mxu1 }
 0x216   : > { %v9333_v38 = vpop.f32.mrb[12].mxu1 }
 0x217   : > { %v9335_v54 = vpop.f32.mrb[13].mxu1 }
 0x218   : > { %v9337_v55 = vpop.f32.mrb[14].mxu1 }
 0x219   : > { %v9339_v56 = vpop.f32.mrb[15].mxu1 }
 0x220   : > { %v7836_v57 = vpop.f32.mrb[0].mxu0 }
 0x221   : > { %v7882_v59 = vadd.f32 %v7836_v57, %v7596_v44  ;;  %v5900_v60 = vpop.f32.mrb[1].mxu0 }
 0x222   : > { %v7883_v61 = vadd.f32 %v5900_v60, %v2911_v45  ;;  %v7837_v62 = vpop.f32.mrb[2].mxu0 }
 0x223   : > { %v6164_v63 = vadd.f32 %v7882_v59, %v9346_v58  ;;  %v7884_v1 = vadd.f32 %v7837_v62, %v7597_v30  ;;  %v5903_v0 = vpop.f32.mrb[3].mxu0 }
 0x224   : > { %v6162_v2 = vadd.f32 %v7883_v61, %v9346_v58  ;;  %v7885_v3 = vadd.f32 %v5903_v0, %v2914_v46 }
 0x225   : > { %v6165_v4 = vadd.f32 %v7884_v1, %v9346_v58  ;;  %v6196_v6 = vmax.f32 %v6164_v63, 0.0 }
 0x226   : > { %v6163_v5 = vadd.f32 %v7885_v3, %v9346_v58  ;;  %v6194_v8 = vmax.f32 %v6162_v2, 0.0 }
 0x227   : > { %v6197_v7 = vmax.f32 %v6165_v4, 0.0 }
 0x228   : > { %v6195_v9 = vmax.f32 %v6163_v5, 0.0  ;;  %v7840_v11 = vpop.f32.mrb[4].mxu0 }
 0x229   : > { %v7131_v12 = vpack.c.bf16 %v6197_v7, %v6196_v6  ;;  %v7886_v13 = vadd.f32 %v7840_v11, %v7600_v47  ;;  %v5916_v14 = vpop.f32.mrb[5].mxu0 }
 0x22a   : > { %v7126_v15 = vpack.c.bf16 %v6195_v9, %v6194_v8  ;;  %v7887_v17 = vadd.f32 %v5916_v14, %v2927_v48  ;;  %v7841_v18 = vpop.f32.mrb[6].mxu0 }
 0x22b   : > { %7203 = vst [vmem:[%s9357_s24 + $0x8] sm:$0xff] %v7131_v12   ;;  %v6168_v19 = vadd.f32 %v7886_v13, %v9346_v58  ;;  %v7888_v20 = vadd.f32 %v7841_v18, %v7601_v49  ;;  %v5919_v21 = vpop.f32.mrb[7].mxu0 }
 0x22c   : > { %7127 = vst [vmem:[%s9357_s24] sm:$0xff] %v7126_v15   ;;  %v6166_v22 = vadd.f32 %v7887_v17, %v9346_v58  ;;  %v7889_v23 = vadd.f32 %v5919_v21, %v2930_v50 }
 0x22d   : > { %v6169_v16 = vadd.f32 %v7888_v20, %v9346_v58  ;;  %v6200_v25 = vmax.f32 %v6168_v19, 0.0 }
 0x22e   : > { %v6167_v24 = vadd.f32 %v7889_v23, %v9346_v58  ;;  %v6198_v26 = vmax.f32 %v6166_v22, 0.0 }
 0x22f   : > { %v6201_v10 = vmax.f32 %v6169_v16, 0.0 }
 0x230   : > { %v6199_v27 = vmax.f32 %v6167_v24, 0.0  ;;  %v7844_v28 = vpop.f32.mrb[8].mxu0 }
 0x231   : > { %v7141_v29 = vpack.c.bf16 %v6201_v10, %v6200_v25  ;;  %v7890_v31 = vadd.f32 %v7844_v28, %v7604_v51  ;;  %v5932_v32 = vpop.f32.mrb[9].mxu0 }
 0x232   : > { %v7136_v33 = vpack.c.bf16 %v6199_v27, %v6198_v26  ;;  %v7891_v35 = vadd.f32 %v5932_v32, %v2943_v52  ;;  %v7845_v36 = vpop.f32.mrb[10].mxu0 }
 0x233   : > { %7205 = vst [vmem:[%s9357_s24 + $0x18] sm:$0xff] %v7141_v29   ;;  %v6172_v37 = vadd.f32 %v7890_v31, %v9346_v58  ;;  %v7892_v39 = vadd.f32 %v7845_v36, %v7605_v53  ;;  %v5935_v40 = vpop.f32.mrb[11].mxu0 }
 0x234   : > { %7204 = vst [vmem:[%s9357_s24 + $0x10] sm:$0xff] %v7136_v33   ;;  %v6170_v41 = vadd.f32 %v7891_v35, %v9346_v58  ;;  %v7893_v42 = vadd.f32 %v5935_v40, %v2946_v34 }
 0x235   : > { %v6173_v43 = vadd.f32 %v7892_v39, %v9346_v58  ;;  %v6204_v45 = vmax.f32 %v6172_v37, 0.0 }
 0x236   : > { %v6171_v44 = vadd.f32 %v7893_v42, %v9346_v58  ;;  %v6202_v46 = vmax.f32 %v6170_v41, 0.0 }
 0x237   : > { %v6205_v30 = vmax.f32 %v6173_v43, 0.0 }
 0x238   : > { %v6203_v47 = vmax.f32 %v6171_v44, 0.0  ;;  %v7848_v48 = vpop.f32.mrb[12].mxu0 }
 0x239   : > { %v7151_v49 = vpack.c.bf16 %v6205_v30, %v6204_v45  ;;  %v7894_v50 = vadd.f32 %v7848_v48, %v9333_v38  ;;  %v5948_v51 = vpop.f32.mrb[13].mxu0 }
 0x23a   : > { %v7146_v52 = vpack.c.bf16 %v6203_v47, %v6202_v46  ;;  %v7895_v53 = vadd.f32 %v5948_v51, %v9335_v54  ;;  %v7849_v57 = vpop.f32.mrb[14].mxu0 }
 0x23b   : > { %7207 = vst [vmem:[%s9357_s24 + $0x28] sm:$0xff] %v7151_v49   ;;  %v6176_v34 = vadd.f32 %v7894_v50, %v9346_v58  ;;  %v7896_v59 = vadd.f32 %v7849_v57, %v9337_v55  ;;  %v5951_v60 = vpop.f32.mrb[15].mxu0 }
 0x23c   : > { %7206 = vst [vmem:[%s9357_s24 + $0x20] sm:$0xff] %v7146_v52   ;;  %v6174_v61 = vadd.f32 %v7895_v53, %v9346_v58  ;;  %v7897_v62 = vadd.f32 %v5951_v60, %v9339_v56 }
 0x23d   : > { %v6177_v63 = vadd.f32 %v7896_v59, %v9346_v58  ;;  %v6208_v1 = vmax.f32 %v6176_v34, 0.0 }
 0x23e   : > { %v6175_v38 = vadd.f32 %v7897_v62, %v9346_v58  ;;  %v6206_v0 = vmax.f32 %v6174_v61, 0.0  ;;  %v7660_v5 = vpop.f32.mrb[16].mxu1 }
 0x23f   : > { %v6209_v54 = vmax.f32 %v6177_v63, 0.0  ;;  %v3426_v8 = vpop.f32.mrb[17].mxu1 }
 0x240   : > { %v6207_v2 = vmax.f32 %v6175_v38, 0.0  ;;  %v7852_v3 = vpop.f32.mrb[16].mxu0  ;;  %v7661_v56 = vpop.f32.mrb[18].mxu1 }
 0x241   : > { %v7161_v4 = vpack.c.bf16 %v6209_v54, %v6208_v1  ;;  %v5964_v55 = vpop.f32.mrb[17].mxu0  ;;  %v7898_v7 = vadd.f32 %v7852_v3, %v7660_v5  ;;  %v3429_v15 = vpop.f32.mrb[19].mxu1 }
 0x242   : > { %v7156_v6 = vpack.c.bf16 %v6207_v2, %v6206_v0  ;;  %v7853_v9 = vpop.f32.mrb[18].mxu0  ;;  %v7899_v11 = vadd.f32 %v5964_v55, %v3426_v8 }
 0x243   : > { %7209 = vst [vmem:[%s9357_s24 + $0x38] sm:$0xff] %v7161_v4   ;;  %v5967_v12 = vpop.f32.mrb[19].mxu0  ;;  %v6180_v13 = vadd.f32 %v7898_v7, %v9346_v58  ;;  %v7900_v14 = vadd.f32 %v7853_v9, %v7661_v56 }
 0x244   : > { %7208 = vst [vmem:[%s9357_s24 + $0x30] sm:$0xff] %v7156_v6   ;;  %v6178_v17 = vadd.f32 %v7899_v11, %v9346_v58  ;;  %v7901_v18 = vadd.f32 %v5967_v12, %v3429_v15 }
 0x245   : > { %v6181_v19 = vadd.f32 %v7900_v14, %v9346_v58  ;;  %v6212_v21 = vmax.f32 %v6180_v13, 0.0 }
 0x246   : > { %v6179_v20 = vadd.f32 %v7901_v18, %v9346_v58  ;;  %v6210_v16 = vmax.f32 %v6178_v17, 0.0  ;;  %v7664_v25 = vpop.f32.mrb[20].mxu1 }
 0x247   : > { %v6213_v22 = vmax.f32 %v6181_v19, 0.0  ;;  %v3442_v28 = vpop.f32.mrb[21].mxu1 }
 0x248   : > { %v7856_v23 = vpop.f32.mrb[20].mxu0  ;;  %v6211_v24 = vmax.f32 %v6179_v20, 0.0  ;;  %v7665_v33 = vpop.f32.mrb[22].mxu1 }
 0x249   : > { %v5980_v10 = vpop.f32.mrb[21].mxu0  ;;  %v7171_v26 = vpack.c.bf16 %v6213_v22, %v6212_v21  ;;  %v7902_v27 = vadd.f32 %v7856_v23, %v7664_v25  ;;  %v3445_v39 = vpop.f32.mrb[23].mxu1 }
 0x24a   : > { %v7857_v29 = vpop.f32.mrb[22].mxu0  ;;  %v7166_v31 = vpack.c.bf16 %v6211_v24, %v6210_v16  ;;  %v7903_v32 = vadd.f32 %v5980_v10, %v3442_v28 }
 0x24b   : > { %v5983_v35 = vpop.f32.mrb[23].mxu0  ;;  %7211 = vst [vmem:[%s9357_s24 + $0x48] sm:$0xff] %v7171_v26   ;;  %v6184_v36 = vadd.f32 %v7902_v27, %v9346_v58  ;;  %v7904_v37 = vadd.f32 %v7857_v29, %v7665_v33 }
 0x24c   : > { %7210 = vst [vmem:[%s9357_s24 + $0x40] sm:$0xff] %v7166_v31   ;;  %v6182_v40 = vadd.f32 %v7903_v32, %v9346_v58  ;;  %v7905_v41 = vadd.f32 %v5983_v35, %v3445_v39 }
 0x24d   : > { %v6185_v42 = vadd.f32 %v7904_v37, %v9346_v58  ;;  %v6216_v44 = vmax.f32 %v6184_v36, 0.0 }
 0x24e   : > { %v6183_v43 = vadd.f32 %v7905_v41, %v9346_v58  ;;  %v6214_v46 = vmax.f32 %v6182_v40, 0.0  ;;  %v7668_v48 = vpop.f32.mrb[24].mxu1 }
 0x24f   : > { %v6217_v45 = vmax.f32 %v6185_v42, 0.0  ;;  %v3458_v52 = vpop.f32.mrb[25].mxu1 }
 0x250   : > { %v7860_v30 = vpop.f32.mrb[24].mxu0  ;;  %v6215_v47 = vmax.f32 %v6183_v43, 0.0  ;;  %v7669_v59 = vpop.f32.mrb[26].mxu1 }
 0x251   : > { %v5996_v49 = vpop.f32.mrb[25].mxu0  ;;  %v7181_v50 = vpack.c.bf16 %v6217_v45, %v6216_v44  ;;  %v7906_v51 = vadd.f32 %v7860_v30, %v7668_v48  ;;  %v3461_v63 = vpop.f32.mrb[27].mxu1 }
 0x252   : > { %v7861_v53 = vpop.f32.mrb[26].mxu0  ;;  %v7176_v57 = vpack.c.bf16 %v6215_v47, %v6214_v46  ;;  %v7907_v34 = vadd.f32 %v5996_v49, %v3458_v52 }
 0x253   : > { %v5999_v60 = vpop.f32.mrb[27].mxu0  ;;  %7213 = vst [vmem:[%s9357_s24 + $0x58] sm:$0xff] %v7181_v50   ;;  %v6188_v61 = vadd.f32 %v7906_v51, %v9346_v58  ;;  %v7908_v62 = vadd.f32 %v7861_v53, %v7669_v59 }
 0x254   : > { %7212 = vst [vmem:[%s9357_s24 + $0x50] sm:$0xff] %v7176_v57   ;;  %v6186_v38 = vadd.f32 %v7907_v34, %v9346_v58  ;;  %v7909_v1 = vadd.f32 %v5999_v60, %v3461_v63 }
 0x255   : > { %v6189_v54 = vadd.f32 %v7908_v62, %v9346_v58  ;;  %v6220_v2 = vmax.f32 %v6188_v61, 0.0 }
 0x256   : > { %v6187_v0 = vadd.f32 %v7909_v1, %v9346_v58  ;;  %v6218_v5 = vmax.f32 %v6186_v38, 0.0  ;;  %v7672_v6 = vpop.f32.mrb[28].mxu1 }
 0x257   : > { %v6221_v3 = vmax.f32 %v6189_v54, 0.0  ;;  %v3474_v11 = vpop.f32.mrb[29].mxu1 }
 0x258   : > { %v7864_v4 = vpop.f32.mrb[28].mxu0  ;;  %v6219_v55 = vmax.f32 %v6187_v0, 0.0  ;;  %v7673_v14 = vpop.f32.mrb[30].mxu1 }
 0x259   : > { %v6012_v7 = vpop.f32.mrb[29].mxu0  ;;  %v7191_v8 = vpack.c.bf16 %v6221_v3, %v6220_v2  ;;  %v7910_v9 = vadd.f32 %v7864_v4, %v7672_v6  ;;  %v3477_v19 = vpop.f32.mrb[31].mxu1 }
 0x25a   : > { %v7865_v56 = vpop.f32.mrb[30].mxu0  ;;  %v7186_v12 = vpack.c.bf16 %v6219_v55, %v6218_v5  ;;  %v7911_v13 = vadd.f32 %v6012_v7, %v3474_v11 }
 0x25b   : > { %v6015_v15 = vpop.f32.mrb[31].mxu0  ;;  %7215 = vst [vmem:[%s9357_s24 + $0x68] sm:$0xff] %v7191_v8   ;;  %v6192_v17 = vadd.f32 %v7910_v9, %v9346_v58  ;;  %v7912_v18 = vadd.f32 %v7865_v56, %v7673_v14 }
 0x25c   : > { %7214 = vst [vmem:[%s9357_s24 + $0x60] sm:$0xff] %v7186_v12   ;;  %v6190_v20 = vadd.f32 %v7911_v13, %v9346_v58  ;;  %v7913_v21 = vadd.f32 %v6015_v15, %v3477_v19 }
 0x25d   : > { %v6193_v22 = vadd.f32 %v7912_v18, %v9346_v58  ;;  %v6224_v16 = vmax.f32 %v6192_v17, 0.0 }
 0x25e   : > { %v6191_v23 = vadd.f32 %v7913_v21, %v9346_v58  ;;  %v6222_v25 = vmax.f32 %v6190_v20, 0.0 }
 0x25f   : > { %v6225_v24 = vmax.f32 %v6193_v22, 0.0 }
 0x260   : > { %v6223_v10 = vmax.f32 %v6191_v23, 0.0 }
 0x261   : > { %v7201_v26 = vpack.c.bf16 %v6225_v24, %v6224_v16 }
 0x262   : > { %v7196_v27 = vpack.c.bf16 %v6223_v10, %v6222_v25 }
 0x263   : > { %7217 = vst [vmem:[%s9357_s24 + $0x78] sm:$0xff] %v7201_v26  }
 0x264   : > { %7216 = vst [vmem:[%s9357_s24 + $0x70] sm:$0xff] %v7196_v27  }
 0x265 PF: > { %p10_p9 = scmp.ge.s32.totalorder %s8402_s16, 4   ;;  %s9423_s12 = smov %s8359_s13 }
 0x266   : > { %s9424_s13 = smov %s8411_s19  ;;  %s9425_s14 = smov %s8402_s16 }
 0x267   :  { %12 = sbr.rel (!%p10_p9) target bundleno = 2 (0x2), region = 121 }

// kernel: new_model_forward.12
= control target key start
LH: loop header
LB: loop body
LE: loop exit
PB: predicated region body
PF: predicated region fallthrough
CT: control target
= control target key end

     0   :  { %s7923_s12 = smov 0   ;;  %s9086_s0 = inlined_call_operand.vmem [shape: bf16[1,2,18,18,128], index: 0, kind: input, shape index: {}]   ;;  %s9087_s1 = inlined_call_operand.vmem [shape: bf16[9,128,128], index: 1, kind: input, shape index: {}]   ;;  %s9088_s2 = inlined_call_operand.vmem [shape: f32[1,128], index: 2, kind: input, shape index: {}]   ;;  %s9089_s3 = inlined_call_operand.vmem [shape: bf16[2,256,128], index: 3, kind: output, shape index: {}]  }
   0x1 LB: > { %s6019_s13 = sadd.s32 4294967295, %s7901_s12   ;;  %p6023_p0 = scmp.ge.s32.totalorder %s7901_s12, 1  ;;  %s7901_s12 = sphi %s7923_s12, %s13_s12  }
   0x2   : > { %p137_p1 = scmp.lt.s32.totalorder %s7901_s12, 3 }
   0x4   : > { %p138_p2 = pnand %p6023_p0, %p137_p1 }
   0x5   : > { %v7767_v0 = vld [vmem:[%s9087_s1] sm:$0xff] (!%p138_p2)   ;;  %v7769_v2 = vld [vmem:[%s9087_s1 + $0x8] sm:$0xff] (!%p138_p2)   ;;  %p161_p3 = scmp.lt.s32.totalorder (!%p138_p2), %s6019_s13, 1  ;;  %v7771_v4 = vld [vmem:[%s9087_s1 + $0x10] sm:$0xff] (!%p138_p2)   ;;  %vm605_vm0 = vsmask.f32 (!%p138_p2), 3328 }
   0x6   : > { %141 = sbr.rel (%p138_p2) target bundleno = 557 (0x22d), region = 32  ;;  %v7768_v1 = vld [vmem:[%s9087_s1 + $0x100] sm:$0xff] (!%p138_p2)   ;;  %7054 = vmatprep.subr.bf16.mxu1 (!%p138_p2), %v7767_v0  ;;  %v7770_v3 = vld [vmem:[%s9087_s1 + $0x108] sm:$0xff] (!%p138_p2)   ;;  %v7772_v5 = vld [vmem:[%s9087_s1 + $0x110] sm:$0xff] (!%p138_p2)   ;;  %vm606_vm1 = vsmask.f32 (!%p138_p2), 7440 }
   0x7   : > { %7246 = vmatprep.subr.bf16.mxu0 (!%p138_p2), %v7768_v1  ;;  %7055 = vmatpush3.bf16.msra.mxu1 (!%p138_p2), %v7767_v0  ;;  %v7773_v6 = vld [vmem:[%s9087_s1 + $0x18] sm:$0xff] (!%p138_p2)   ;;  %v7775_v8 = vld [vmem:[%s9087_s1 + $0x20] sm:$0xff] (!%p138_p2)   ;;  %v7777_v10 = vld [vmem:[%s9087_s1 + $0x28] sm:$0xff] (!%p138_p2)   ;;  %vm1474_vm3 = vcmask (!%p138_p2), 1042432   ;;  %vm1475_vm4 = vcmask (!%p138_p2), 1046532  }
   0x8   : > { %7247 = vmatpush3.bf16.msra.mxu0 (!%p138_p2), %v7768_v1  ;;  %7056 = vmatprep.subr.bf16.mxu1 (!%p138_p2), %v7769_v2  ;;  %v7774_v7 = vld [vmem:[%s9087_s1 + $0x118] sm:$0xff] (!%p138_p2)   ;;  %v7776_v9 = vld [vmem:[%s9087_s1 + $0x120] sm:$0xff] (!%p138_p2)   ;;  %v7778_v11 = vld [vmem:[%s9087_s1 + $0x128] sm:$0xff] (!%p138_p2)  }
   0x9   : > { %7248 = vmatprep.subr.bf16.mxu0 (!%p138_p2), %v7770_v3  ;;  %v7779_v18 = vld [vmem:[%s9087_s1 + $0x30] sm:$0xff] (!%p138_p2)   ;;  %v7781_v32 = vld [vmem:[%s9087_s1 + $0x38] sm:$0xff] (!%p138_p2)   ;;  %vm7993_vm2 = vmor (!%p138_p2), %vm605_vm0, %vm606_vm1 }
   0xa   : > { %v7780_v24 = vld [vmem:[%s9087_s1 + $0x130] sm:$0xff] (!%p138_p2)   ;;  %v7782_v38 = vld [vmem:[%s9087_s1 + $0x138] sm:$0xff] (!%p138_p2)   ;;  %v7785_v47 = vld [vmem:[%s9087_s1 + $0x40] sm:$0xff] (!%p138_p2)  }
   0xb   : > { %7057 = vmatpush3.bf16.msra.mxu1 (!%p138_p2), %v7769_v2  ;;  %v7786_v52 = vld [vmem:[%s9087_s1 + $0x140] sm:$0xff] (!%p138_p2)   ;;  %vm8093_vm5 = vmor (!%p138_p2), %vm1474_vm3, %vm1475_vm4 }
   0xc   : > { %7249 = vmatpush3.bf16.msra.mxu0 (!%p138_p2), %v7770_v3  ;;  %7058 = vmatprep.subr.bf16.mxu1 (!%p138_p2), %v7771_v4 }
   0xd   : > { %s9095_s13 = smov (!%p161_p3, %s6019_s13), 1  ;;  %7250 = vmatprep.subr.bf16.mxu0 %v7772_v5 }
   0xe   : > { %s7758_s30 = smul.u32 216, %s9095_s13  ;;  %s6710_s7 = sshll.u32 %s9095_s13, 7 }
   0xf   : > { %7059 = vmatpush3.bf16.msra.mxu1 %v7771_v4  ;;  %s9033_s10 = scalar_lea.vmem %s9089_s3, %s6710_s7 }
  0x10   : > { %7251 = vmatpush3.bf16.msra.mxu0 %v7772_v5  ;;  %7060 = vmatprep.subr.bf16.mxu1 %v7773_v6  ;;  %s7970_s14 = scalar_lea.vmem %s9086_s0, %s7758_s30 }
  0x11   : > { %7252 = vmatprep.subr.bf16.mxu0 %v7774_v7  ;;  %v7783_v12 = vld [vmem:[%s7970_s14] sm:$0xff]   ;;  %v6219_v13 = vld [vmem:[%s7970_s14 + $0xc] sm:$0xf]  ;;  %v6220_v14 = vld [vmem:[%s7970_s14 + $0x10] sm:$0xf] }
  0x12   : > { %7070 = vmatprep.mubr.bf16.mxu1 %v7783_v12  ;;  %v6221_v15 = vld [vmem:[%s7970_s14 + $0x14] sm:$0x1]  ;;  %v2475_v16 = vshrl.u32 %v6219_v13, 16  ;;  %v2478_v17 = vshll.u32 %v6219_v13, 16  ;;  %v2484_v19 = vshll.u32 %v6220_v14, 16  ;;  %v2488_v20 = vshrl.u32 %v6220_v14, 16 }
  0x13   : > { %7061 = vmatpush3.bf16.msra.mxu1 %v7773_v6  ;;  %v2494_v21 = vshll.u32 %v6221_v15, 16  ;;  %v6222_v29 = vld [vmem:[%s7970_s14 + $0x18] sm:$0xf]  ;;  %v6223_v30 = vld [vmem:[%s7970_s14 + $0x1c] sm:$0xf]  ;;  %v7784_v55 = vld [vmem:[%s7970_s14 + $0xc] sm:$0xff]  }
  0x14   : > { %7253 = vmatpush3.bf16.msra.mxu0 %v7774_v7  ;;  %7062 = vmatprep.subr.bf16.mxu1 %v7775_v8  ;;  %v2477_v22 = vrot.slane %v2475_v16, 4  ;;  %v2480_v23 = vrot.slane %v2478_v17, 5  ;;  %v2486_v25 = vrot.slane %v2484_v19, 5  ;;  %v2490_v26 = vrot.slane %v2488_v20, 4  ;;  %v6224_v31 = vld [vmem:[%s7970_s14 + $0x20] sm:$0x1] }
  0x15   : > { %7254 = vmatprep.subr.bf16.mxu0 %v7776_v9  ;;  %v2496_v27 = vrot.slane %v2494_v21, 5  ;;  %v2499_v35 = vshrl.u32 %v6222_v29, 16  ;;  %v2502_v36 = vshll.u32 %v6222_v29, 16  ;;  %v2508_v37 = vshll.u32 %v6223_v30, 16  ;;  %v6225_v53 = vld [vmem:[%s7970_s14 + $0x24] sm:$0xf] }
  0x16   : > { %v2481_v28 = vor.u32 %v2480_v23, %v2477_v22  ;;  %v2491_v34 = vor.u32 %v2490_v26, %v2486_v25  ;;  %v2512_v40 = vshrl.u32 %v6223_v30, 16  ;;  %v2518_v41 = vshll.u32 %v6224_v31, 16  ;;  %v6226_v57 = vld [vmem:[%s7970_s14 + $0x28] sm:$0xf]  ;;  %v6227_v58 = vld [vmem:[%s7970_s14 + $0x2c] sm:$0x1] }
  0x17   : > { %7063 = vmatpush3.bf16.msra.mxu1 %v7775_v8  ;;  %v2501_v43 = vrot.slane %v2499_v35, 4  ;;  %v2504_v44 = vrot.slane %v2502_v36, 5  ;;  %v2510_v45 = vrot.slane %v2508_v37, 5  ;;  %v2523_v59 = vshrl.u32 %v6225_v53, 16  ;;  %v7788_v2 = vld [vmem:[%s7970_s14 + $0x18] sm:$0xff]   ;;  %v7787_v6 = vld [vmem:[%s9087_s1 + $0x148] sm:$0xff]  }
  0x18   : > { %7255 = vmatpush3.bf16.msra.mxu0 %v7776_v9  ;;  %7064 = vmatprep.subr.bf16.mxu1 %v7777_v10  ;;  %v2482_v39 = vrot.slane %v2481_v28, 4  ;;  %v2492_v42 = vrot.slane %v2491_v34, 4  ;;  %v2514_v48 = vrot.slane %v2512_v40, 4  ;;  %v2520_v51 = vrot.slane %v2518_v41, 5  ;;  %v6228_v13 = vld [vmem:[%s7970_s14 + $0x30] sm:$0xf] }
  0x19   : > { %7256 = vmatprep.subr.bf16.mxu0 %v7778_v11  ;;  %v2505_v50 = vor.u32 %v2504_v44, %v2501_v43  ;;  %v2526_v60 = vshll.u32 %v6225_v53, 16  ;;  %v2532_v62 = vshll.u32 %v6226_v57, 16  ;;  %v2536_v63 = vshrl.u32 %v6226_v57, 16  ;;  %v6229_v14 = vld [vmem:[%s7970_s14 + $0x34] sm:$0xf]  ;;  %v7789_v28 = vld [vmem:[%s7970_s14 + $0x24] sm:$0xff]  }
  0x1a   : > { %v2487_v46 = vsel %vm7993_vm2, %v2482_v39, %v2486_v25  ;;  %v2497_v49 = vsel %vm7993_vm2, %v2492_v42, %v2496_v27  ;;  %v2515_v56 = vor.u32 %v2514_v48, %v2510_v45  ;;  %v2542_v0 = vshll.u32 %v6227_v58, 16  ;;  %v6230_v17 = vld [vmem:[%s7970_s14 + $0x38] sm:$0x1]  ;;  %v7791_v31 = vld [vmem:[%s9087_s1 + $0x150] sm:$0xff]   ;;  %v6231_v39 = vld [vmem:[%s7970_s14 + $0x3c] sm:$0xf] }
  0x1b   : > { %7065 = vmatpush3.bf16.msra.mxu1 %v7777_v10  ;;  %v6283_v54 = vcombine.low %v2487_v46, %v2497_v49  ;;  %v2506_v61 = vrot.slane %v2505_v50, 4  ;;  %v2525_v3 = vrot.slane %v2523_v59, 4  ;;  %v2528_v4 = vrot.slane %v2526_v60, 5  ;;  %v7790_v10 = vld [vmem:[%s9087_s1 + $0x48] sm:$0xff]   ;;  %v7793_v36 = vld [vmem:[%s7970_s14 + $0x30] sm:$0xff]  }
  0x1c   : > { %7257 = vmatpush3.bf16.msra.mxu0 %v7778_v11  ;;  %7066 = vmatprep.subr.bf16.mxu1 %v7779_v18  ;;  %v2516_v1 = vrot.slane %v2515_v56, 4  ;;  %v2534_v7 = vrot.slane %v2532_v62, 5  ;;  %v2538_v8 = vrot.slane %v2536_v63, 4  ;;  %v2544_v9 = vrot.slane %v2542_v0, 5  ;;  %v6232_v40 = vld [vmem:[%s7970_s14 + $0x40] sm:$0xf] }
  0x1d   : > { %7258 = vmatprep.subr.bf16.mxu0 %v7780_v24  ;;  %7262 = vmatprep.mubr.bf16.mxu0 %v6283_v54  ;;  %v2511_v5 = vsel %vm7993_vm2, %v2506_v61, %v2510_v45  ;;  %v2529_v12 = vor.u32 %v2528_v4, %v2525_v3  ;;  %v2550_v19 = vshll.u32 %v6228_v13, 16  ;;  %v2556_v21 = vshll.u32 %v6229_v14, 16  ;;  %v6233_v41 = vld [vmem:[%s7970_s14 + $0x44] sm:$0x1]  ;;  %v7795_v54 = vld [vmem:[%s9087_s1 + $0x50] sm:$0xff]  }
  0x1e   : > { %v2521_v11 = vsel %vm7993_vm2, %v2516_v1, %v2520_v51  ;;  %v2539_v16 = vor.u32 %v2538_v8, %v2534_v7  ;;  %v2560_v22 = vshrl.u32 %v6229_v14, 16  ;;  %v2566_v23 = vshll.u32 %v6230_v17, 16  ;;  %v6234_v58 = vld [vmem:[%s7970_s14 + $0x48] sm:$0xf]  ;;  %v6235_v61 = vld [vmem:[%s7970_s14 + $0x4c] sm:$0xf] }
  0x1f   : > { %7067 = vmatpush3.bf16.msra.mxu1 %v7779_v18  ;;  %v6284_v15 = vcombine.low %v2511_v5, %v2521_v11  ;;  %v2547_v18 = vshrl.u32 %v6228_v13, 16  ;;  %v2530_v20 = vrot.slane %v2529_v12, 4  ;;  %v2552_v26 = vrot.slane %v2550_v19, 5  ;;  %v6236_v62 = vld [vmem:[%s7970_s14 + $0x50] sm:$0x1]  ;;  %v7796_v8 = vld [vmem:[%s9087_s1 + $0x160] sm:$0xff]  }
  0x20   : > { %7259 = vmatpush3.bf16.msra.mxu0 %v7780_v24  ;;  %7068 = vmatprep.subr.bf16.mxu1 %v7781_v32  ;;  %v2540_v24 = vrot.slane %v2539_v16, 4  ;;  %v2558_v29 = vrot.slane %v2556_v21, 5  ;;  %v2562_v30 = vrot.slane %v2560_v22, 4  ;;  %v2568_v35 = vrot.slane %v2566_v23, 5  ;;  %v6237_v19 = vld [vmem:[%s7970_s14 + $0x54] sm:$0xf] }
  0x21   : > { %7260 = vmatprep.subr.bf16.mxu0 %v7782_v38  ;;  %v2549_v25 = vrot.slane %v2547_v18, 4  ;;  %v2535_v27 = vsel %vm7993_vm2, %v2530_v20, %v2534_v7  ;;  %v2571_v43 = vshrl.u32 %v6231_v39, 16  ;;  %v2574_v44 = vshll.u32 %v6231_v39, 16  ;;  %v7798_v18 = vld [vmem:[%s7970_s14 + $0x48] sm:$0xff]   ;;  %v6238_v20 = vld [vmem:[%s7970_s14 + $0x58] sm:$0xf] }
  0x22   : > { %v2580_v45 = vshll.u32 %v6232_v40, 16  ;;  %v2584_v48 = vshrl.u32 %v6232_v40, 16  ;;  %v2590_v49 = vshll.u32 %v6233_v41, 16  ;;  %v2595_v63 = vshrl.u32 %v6234_v58, 16  ;;  %v7797_v23 = vld [vmem:[%s9087_s1 + $0x168] sm:$0xff]   ;;  %v7799_v39 = vld [vmem:[%s7970_s14 + $0x54] sm:$0xff]  }
  0x23   : > { %7069 = vmatpush3.bf16.msra.mxu1 %v7781_v32  ;;  %v2545_v32 = vsel %vm7993_vm2, %v2540_v24, %v2544_v9  ;;  %v2553_v34 = vor.u32 %v2552_v26, %v2549_v25  ;;  %v2573_v51 = vrot.slane %v2571_v43, 4  ;;  %v2598_v0 = vshll.u32 %v6234_v58, 16  ;;  %v6239_v24 = vld [vmem:[%s7970_s14 + $0x5c] sm:$0x1]  ;;  %v6240_v43 = vld [vmem:[%s7970_s14 + $0x60] sm:$0xf] }
  0x24   : > { %7261 = vmatpush3.bf16.msra.mxu0 %v7782_v38  ;;  %7102 = vmatprep.subr.bf16.mxu1 %v7785_v47  ;;  %v6285_v37 = vcombine.low %v2535_v27, %v2545_v32  ;;  %v2563_v38 = vor.u32 %v2562_v30, %v2558_v29  ;;  %v2582_v53 = vrot.slane %v2580_v45, 5  ;;  %v2586_v56 = vrot.slane %v2584_v48, 4  ;;  %v7800_v40 = vld [vmem:[%s9087_s1 + $0x58] sm:$0xff]   ;;  %v6242_v45 = vld [vmem:[%s7970_s14 + $0x68] sm:$0x1] }
  0x25   : > { %7294 = vmatprep.subr.bf16.mxu0 %v7786_v52  ;;  %v2554_v42 = vrot.slane %v2553_v34, 4  ;;  %v2592_v57 = vrot.slane %v2590_v49, 5  ;;  %v2608_v3 = vshrl.u32 %v6235_v61, 16  ;;  %v2614_v4 = vshll.u32 %v6236_v62, 16 }
  0x26   : > { %7071 = vmatmul.mubr.bf16.vlgmr.msra.gmra.mrb[0].mxu1 %v7784_v55  ;;  %v2564_v46 = vrot.slane %v2563_v38, 4  ;;  %v2587_v1 = vor.u32 %v2586_v56, %v2582_v53  ;;  %v2600_v7 = vrot.slane %v2598_v0, 5  ;;  %v2619_v25 = vshrl.u32 %v6237_v19, 16  ;;  %v6307_v0 = vld [vmem:[%s7970_s14 + $0xc] sm:$0xe] }
  0x27   : > { %7263 = vmatmul.mubr.bf16.vlgmr.msra.gmra.mrb[0].mxu0 %v6284_v15  ;;  %7103 = vmatpush3.bf16.msra.mxu1 %v7785_v47  ;;  %v7792_v47 = vld [vmem:[%s9087_s1 + $0x158] sm:$0xff]   ;;  %v2559_v50 = vsel %vm7993_vm2, %v2554_v42, %v2558_v29  ;;  %v2610_v12 = vrot.slane %v2608_v3, 4  ;;  %v2616_v17 = vrot.slane %v2614_v4, 5  ;;  %v2622_v26 = vshll.u32 %v6237_v19, 16 }
  0x28   : > { %7295 = vmatpush3.bf16.msra.mxu0 %v7786_v52  ;;  %7074 = vmatprep.mubr.bf16.mxu1 %v7788_v2  ;;  %v2576_v52 = vrot.slane %v2574_v44, 5  ;;  %v2569_v55 = vsel %vm7993_vm2, %v2564_v46, %v2568_v35  ;;  %v2604_v2 = vshll.u32 %v6235_v61, 16  ;;  %v2588_v9 = vrot.slane %v2587_v1, 4  ;;  %v6241_v44 = vld [vmem:[%s7970_s14 + $0x64] sm:$0xf] }
  0x29   : > { %7296 = vmatprep.subr.bf16.mxu0 %v7787_v6  ;;  %7104 = vmatprep.subr.bf16.mxu1 %v7790_v10  ;;  %v6286_v59 = vcombine.low %v2559_v50, %v2569_v55  ;;  %v2632_v29 = vshrl.u32 %v6238_v20, 16  ;;  %v2638_v30 = vshll.u32 %v6239_v24, 16  ;;  %v2621_v32 = vrot.slane %v2619_v25, 4  ;;  %v7801_v50 = vld [vmem:[%s9087_s1 + $0x170] sm:$0xff]  }
  0x2a   : > { %7266 = vmatprep.mubr.bf16.mxu0 %v6285_v37  ;;  %v2577_v60 = vor.u32 %v2576_v52, %v2573_v51  ;;  %v2606_v11 = vrot.slane %v2604_v2, 5  ;;  %v2593_v15 = vsel %vm7993_vm2, %v2588_v9, %v2592_v57  ;;  %v2624_v34 = vrot.slane %v2622_v26, 5 }
  0x2b   : > { %7105 = vmatpush3.bf16.msra.mxu1 %v7790_v10  ;;  %v7794_v10 = vld [vmem:[%s7970_s14 + $0x3c] sm:$0xff]   ;;  %v2634_v37 = vrot.slane %v2632_v29, 4  ;;  %v2640_v38 = vrot.slane %v2638_v30, 5  ;;  %v2646_v48 = vshll.u32 %v6240_v43, 16  ;;  %v2652_v49 = vshll.u32 %v6241_v44, 16 }
  0x2c   : > { %7297 = vmatpush3.bf16.msra.mxu0 %v7787_v6  ;;  %7106 = vmatprep.subr.bf16.mxu1 %v7795_v54  ;;  %v2578_v5 = vrot.slane %v2577_v60, 4  ;;  %v2597_v6 = vrot.slane %v2595_v63, 4  ;;  %v2611_v16 = vor.u32 %v2610_v12, %v2606_v11  ;;  %v2625_v42 = vor.u32 %v2624_v34, %v2621_v32  ;;  %v7802_v60 = vld [vmem:[%s9087_s1 + $0x178] sm:$0xff]   ;;  %v7803_v63 = vld [vmem:[%s7970_s14 + $0x60] sm:$0xff]   ;;  %v6315_v32 = vld [vmem:[%s7970_s14 + $0x2c] sm:$0x1] }
  0x2d   : > { %7298 = vmatprep.subr.bf16.mxu0 %v7791_v31  ;;  %v2656_v52 = vshrl.u32 %v6241_v44, 16  ;;  %v2648_v56 = vrot.slane %v2646_v48, 5  ;;  %v2654_v57 = vrot.slane %v2652_v49, 5  ;;  %v6313_v29 = vld [vmem:[%s7970_s14 + $0x24] sm:$0xe]  ;;  %v7810_v48 = vld [vmem:[%s9087_s1 + $0x188] sm:$0xff]  }
  0x2e   : > { %7075 = vmatmul.mubr.bf16.gmra.mrb[4].mxu1 %v7789_v28  ;;  %v2583_v13 = vsel %vm7993_vm2, %v2578_v5, %v2582_v53  ;;  %v2601_v14 = vor.u32 %v2600_v7, %v2597_v6  ;;  %v2612_v27 = vrot.slane %v2611_v16, 4  ;;  %v2628_v28 = vshll.u32 %v6238_v20, 16  ;;  %v6308_v5 = vld [vmem:[%s7970_s14 + $0x10] sm:$0xf]  ;;  %v6309_v6 = vld [vmem:[%s7970_s14 + $0x14] sm:$0x1] }
  0x2f   : > { %7078 = vmatprep.mubr.bf16.mxu1 %v7793_v36  ;;  %7107 = vmatpush3.bf16.msra.mxu1 %v7795_v54  ;;  %v6287_v21 = vcombine.low %v2583_v13, %v2593_v15  ;;  %v2626_v51 = vrot.slane %v2625_v42, 4  ;;  %v2662_v53 = vshll.u32 %v6242_v45, 16  ;;  %v6355_v7 = vrot.slane %v6307_v0, 9  ;;  %v7806_v13 = vld [vmem:[%s9087_s1 + $0x180] sm:$0xff]   ;;  %v6311_v20 = vld [vmem:[%s7970_s14 + $0x1c] sm:$0xf] }
  0x30   : > { %7299 = vmatpush3.bf16.msra.mxu0 %v7791_v31  ;;  %v2602_v22 = vrot.slane %v2601_v14, 4  ;;  %v2617_v35 = vsel %vm7993_vm2, %v2612_v27, %v2616_v17  ;;  %v2630_v36 = vrot.slane %v2628_v28, 5  ;;  %7108 = vmatprep.subr.bf16.mxu1 %v7800_v40  ;;  %v3342_v9 = vrot.slane %v6308_v5, 5  ;;  %v7804_v17 = vld [vmem:[%s7970_s14 + $0x6c] sm:$0xff]   ;;  %v7808_v42 = vld [vmem:[%s7970_s14 + $0x84] sm:$0xff]  }
  0x31   : > { %7267 = vmatmul.mubr.bf16.gmra.mrb[4].mxu0 %v6286_v59  ;;  %7300 = vmatprep.subr.bf16.mxu0 %v7792_v47  ;;  %v2658_v59 = vrot.slane %v2656_v52, 4  ;;  %v2664_v3 = vrot.slane %v2662_v53, 5  ;;  %v3349_v26 = vrot.slane %v6311_v20, 5  ;;  %v6357_v34 = vrot.slane %v6313_v29, 9  ;;  %v6317_v44 = vld [vmem:[%s7970_s14 + $0x34] sm:$0xf] }
  0x32   : > { %7270 = vmatprep.mubr.bf16.mxu0 %v6287_v21  ;;  %v2607_v31 = vsel %vm7993_vm2, %v2602_v22, %v2606_v11  ;;  %v2635_v46 = vor.u32 %v2634_v37, %v2630_v36  ;;  %v2631_v58 = vsel %vm7993_vm2, %v2626_v51, %v2630_v36  ;;  %v7805_v11 = vld [vmem:[%s9087_s1 + $0x60] sm:$0xff]   ;;  %v3343_v15 = vsel %vm8093_vm5, %v6355_v7, %v3342_v9  ;;  %v6322_v0 = vld [vmem:[%s7970_s14 + $0x48] sm:$0xe]  ;;  %v6323_v5 = vld [vmem:[%s7970_s14 + $0x4c] sm:$0xf] }
  0x33   : > { %v6288_v41 = vcombine.low %v2607_v31, %v2617_v35  ;;  %7109 = vmatpush3.bf16.msra.mxu1 %v7800_v40  ;;  %v2659_v2 = vor.u32 %v2658_v59, %v2654_v57  ;;  %v3344_v16 = vrot.slane %v3342_v9, 4  ;;  %v6312_v21 = vld [vmem:[%s7970_s14 + $0x20] sm:$0x1]  ;;  %v3351_v30 = vrot.slane %v3349_v26, 4  ;;  %v6314_v31 = vld [vmem:[%s7970_s14 + $0x28] sm:$0xf] }
  0x34   : > { %7301 = vmatpush3.bf16.msra.mxu0 %v7792_v47  ;;  %v2643_v47 = vshrl.u32 %v6240_v43, 16  ;;  %v2636_v54 = vrot.slane %v2635_v46, 4  ;;  %7110 = vmatprep.subr.bf16.mxu1 %v7805_v11  ;;  %v3352_v27 = vrot.slane %v6312_v21, 5  ;;  %v3356_v36 = vrot.slane %v6314_v31, 5  ;;  %v6316_v43 = vld [vmem:[%s7970_s14 + $0x30] sm:$0xe] }
  0x35   : > { %7302 = vmatprep.subr.bf16.mxu0 %v7796_v8  ;;  %v2660_v12 = vrot.slane %v2659_v2, 4  ;;  %v3359_v37 = vrot.slane %v6315_v32, 5  ;;  %v6318_v46 = vld [vmem:[%s7970_s14 + $0x38] sm:$0x1]  ;;  %v7813_v59 = vld [vmem:[%s9087_s1 + $0x70] sm:$0xff]   ;;  %v6360_v7 = vrot.slane %v6322_v0, 9 }
  0x36   : > { %7079 = vmatmul.mubr.bf16.gmra.mrb[8].mxu1 %v7794_v10  ;;  %v2645_v55 = vrot.slane %v2643_v47, 4  ;;  %v2641_v61 = vsel %vm7993_vm2, %v2636_v54, %v2640_v38  ;;  %v3345_v10 = vrot.slane %v6309_v6, 5  ;;  %v3353_v38 = vsel %vm8093_vm5, %v3351_v30, %v3352_v27  ;;  %v7811_v54 = vld [vmem:[%s7970_s14 + $0x90] sm:$0xff]   ;;  %v6328_v27 = vld [vmem:[%s7970_s14 + $0x60] sm:$0xe]  ;;  %v7818_v31 = vld [vmem:[%s9087_s1 + $0x198] sm:$0xff]  }
  0x37   : > { %7082 = vmatprep.mubr.bf16.mxu1 %v7798_v18  ;;  %v6289_v1 = vcombine.low %v2631_v58, %v2641_v61  ;;  %v6310_v18 = vld [vmem:[%s7970_s14 + $0x18] sm:$0xe]  ;;  %v2665_v19 = vsel %vm7993_vm2, %v2660_v12, %v2664_v3  ;;  %7111 = vmatpush3.bf16.msra.mxu1 %v7805_v11  ;;  %v3357_v40 = vsel %vm8093_vm5, %v6357_v34, %v3356_v36  ;;  %v3363_v47 = vrot.slane %v6317_v44, 5  ;;  %v7812_v3 = vld [vmem:[%s7970_s14 + $0x9c] sm:$0xff]   ;;  %v6324_v6 = vld [vmem:[%s7970_s14 + $0x50] sm:$0x1] }
  0x38   : > { %7303 = vmatpush3.bf16.msra.mxu0 %v7796_v8  ;;  %v2649_v62 = vor.u32 %v2648_v56, %v2645_v55  ;;  %v6356_v22 = vrot.slane %v6310_v18, 9  ;;  %v3346_v25 = vsel %vm8093_vm5, %v3344_v16, %v3345_v10  ;;  %v3366_v51 = vrot.slane %v6318_v46, 5  ;;  %v6319_v55 = vld [vmem:[%s7970_s14 + $0x3c] sm:$0xe]  ;;  %v6320_v56 = vld [vmem:[%s7970_s14 + $0x40] sm:$0xf] }
  0x39   : > { %7304 = vmatprep.subr.bf16.mxu0 %v7797_v23  ;;  %7271 = vmatmul.mubr.bf16.gmra.mrb[8].mxu0 %v6288_v41  ;;  %v6387_v28 = vcombine.low %v3343_v15, %v3346_v25  ;;  %v3358_v41 = vrot.slane %v3356_v36, 4  ;;  %v3365_v53 = vrot.slane %v3363_v47, 4  ;;  %v6359_v58 = vrot.slane %v6319_v55, 9  ;;  %v7814_v12 = vld [vmem:[%s9087_s1 + $0x190] sm:$0xff]   ;;  %v7815_v15 = vld [vmem:[%s7970_s14 + $0xa8] sm:$0xff]  }
  0x3a   : > { %v2650_v8 = vrot.slane %v2649_v62, 4  ;;  %7274 = vmatprep.mubr.bf16.mxu0 %v6289_v1  ;;  %v3350_v35 = vsel %vm8093_vm5, %v6356_v22, %v3349_v26  ;;  %v3380_v11 = vrot.slane %v6324_v6, 5  ;;  %v6325_v16 = vld [vmem:[%s7970_s14 + $0x54] sm:$0xe]  ;;  %v6327_v18 = vld [vmem:[%s7970_s14 + $0x5c] sm:$0x1] }
  0x3b   : > { %v6388_v45 = vcombine.low %v3350_v35, %v3353_v38  ;;  %v3360_v49 = vsel %vm8093_vm5, %v3358_v41, %v3359_v37  ;;  %v3387_v21 = vrot.slane %v6327_v18, 5  ;;  %v7817_v26 = vld [vmem:[%s9087_s1 + $0x78] sm:$0xff]   ;;  %v6330_v29 = vld [vmem:[%s7970_s14 + $0x68] sm:$0x1]  ;;  %v6362_v30 = vrot.slane %v6328_v27, 9 }
  0x3c   : > { %7305 = vmatpush3.bf16.msra.mxu0 %v7797_v23  ;;  %v2655_v14 = vsel %vm7993_vm2, %v2650_v8, %v2654_v57  ;;  %v7807_v23 = vld [vmem:[%s7970_s14 + $0x78] sm:$0xff]   ;;  %v6389_v52 = vcombine.low %v3357_v40, %v3360_v49  ;;  %v6321_v57 = vld [vmem:[%s7970_s14 + $0x44] sm:$0x1]  ;;  %v3377_v8 = vrot.slane %v6323_v5, 5  ;;  %v3394_v36 = vrot.slane %v6330_v29, 5 }
  0x3d   : > { %7306 = vmatprep.subr.bf16.mxu0 %v7801_v50  ;;  %v6290_v24 = vcombine.low %v2655_v14, %v2665_v19  ;;  %v3373_v61 = vrot.slane %v6321_v57, 5  ;;  %v6361_v19 = vrot.slane %v6325_v16, 9  ;;  %v7816_v34 = vld [vmem:[%s7970_s14 + $0xb4] sm:$0xff]   ;;  %v558_v40 = vld [vmem:[%s7970_s14 + $0x4] sm:$0xf] }
  0x3e   : > { %7083 = vmatmul.mubr.bf16.gmra.mrb[12].mxu1 %v7799_v39  ;;  %v7809_v39 = vld [vmem:[%s9087_s1 + $0x68] sm:$0xff]   ;;  %v3379_v14 = vrot.slane %v3377_v8, 4  ;;  %v3378_v22 = vsel %vm8093_vm5, %v6360_v7, %v3377_v8  ;;  %v622_v49 = vshrl.u32 %v558_v40, 16  ;;  %v561_v5 = vld [vmem:[%s7970_s14 + $0x10] sm:$0xf] }
  0x3f   : > { %7086 = vmatprep.mubr.bf16.mxu1 %v7803_v63  ;;  %7112 = vmatprep.subr.bf16.mxu1 %v7809_v39  ;;  %v3367_v63 = vsel %vm8093_vm5, %v3365_v53, %v3366_v51  ;;  %v559_v41 = vld [vmem:[%s7970_s14 + $0x8] sm:$0x1]  ;;  %v6331_v46 = vld [vmem:[%s7970_s14 + $0x6c] sm:$0xe]  ;;  %v6332_v51 = vld [vmem:[%s7970_s14 + $0x70] sm:$0xf] }
  0x40   : > { %7307 = vmatpush3.bf16.msra.mxu0 %v7801_v50  ;;  %v6358_v50 = vrot.slane %v6316_v43, 9  ;;  %7113 = vmatpush3.bf16.msra.mxu1 %v7809_v39  ;;  %v557_v39 = vld [vmem:[%s7970_s14] sm:$0xf]  ;;  %v3398_v57 = vrot.slane %v6332_v51, 5  ;;  %v562_v6 = vld [vmem:[%s7970_s14 + $0x14] sm:$0x1] }
  0x41   : > { %7308 = vmatprep.subr.bf16.mxu0 %v7802_v60  ;;  %7275 = vmatmul.mubr.bf16.gmra.mrb[12].mxu0 %v6290_v24  ;;  %v609_v44 = vshrl.u32 %v557_v39, 16  ;;  %v6336_v29 = vld [vmem:[%s7970_s14 + $0x80] sm:$0x1] }
  0x42   : > { %7310 = vmatprep.mubr.bf16.mxu0 %v6387_v28  ;;  %v3364_v62 = vsel %vm8093_vm5, %v6358_v50, %v3363_v47  ;;  %7114 = vmatprep.subr.bf16.mxu1 %v7813_v59  ;;  %v6329_v28 = vld [vmem:[%s7970_s14 + $0x64] sm:$0xf]  ;;  %v628_v50 = vshll.u32 %v559_v41, 16  ;;  %v564_v41 = vld [vmem:[%s7970_s14 + $0x1c] sm:$0xf] }
  0x43   : > { %v6390_v9 = vcombine.low %v3364_v62, %v3367_v63  ;;  %v3391_v35 = vrot.slane %v6329_v28, 5  ;;  %v8194_v47 = vld [vmem:[%s9087_s1 + $0x80] sm:$0xff]   ;;  %v560_v63 = vld [vmem:[%s7970_s14 + $0xc] sm:$0xf]  ;;  %v670_v51 = vshrl.u32 %v564_v41, 16 }
  0x44   : > { %7309 = vmatpush3.bf16.msra.mxu0 %v7802_v60  ;;  %v3370_v60 = vrot.slane %v6320_v56, 5  ;;  %7115 = vmatpush3.bf16.msra.mxu1 %v7813_v59  ;;  %v6333_v56 = vld [vmem:[%s7970_s14 + $0x74] sm:$0x1]  ;;  %v630_v62 = vrot.slane %v628_v50, 5  ;;  %v633_v8 = vshrl.u32 %v560_v63, 16 }
  0x45   : > { %7342 = vmatprep.subr.bf16.mxu0 %v7806_v13  ;;  %7116 = vmatprep.subr.bf16.mxu1 %v7817_v26  ;;  %v3393_v43 = vrot.slane %v3391_v35, 4 }
  0x46   : > { %7087 = vmatmul.mubr.bf16.gmra.mrb[16].mxu1 %v7804_v17  ;;  %v3371_v1 = vsel %vm8093_vm5, %v6359_v58, %v3370_v60  ;;  %v3372_v2 = vrot.slane %v3370_v60, 4  ;;  %v6326_v17 = vld [vmem:[%s7970_s14 + $0x58] sm:$0xf]  ;;  %v7820_v58 = vld [vmem:[%s9087_s1 + $0x1a0] sm:$0xff]   ;;  %v635_v18 = vrot.slane %v633_v8, 4 }
  0x47   : > { %7090 = vmatprep.mubr.bf16.mxu1 %v7807_v23  ;;  %v3384_v20 = vrot.slane %v6326_v17, 5  ;;  %v3381_v23 = vsel %vm8093_vm5, %v3379_v14, %v3380_v11  ;;  %v3395_v53 = vsel %vm8093_vm5, %v3393_v43, %v3394_v36  ;;  %v7822_v11 = vld [vmem:[%s9087_s1 + $0x1a8] sm:$0xff]   ;;  %v646_v14 = vshrl.u32 %v561_v5, 16  ;;  %v563_v36 = vld [vmem:[%s7970_s14 + $0x18] sm:$0xf] }
  0x48   : > { %v3374_v10 = vsel %vm8093_vm5, %v3372_v2, %v3373_v61  ;;  %v6392_v37 = vcombine.low %v3378_v22, %v3381_v23  ;;  %7117 = vmatpush3.bf16.msra.mxu1 %v7817_v26  ;;  %v624_v61 = vrot.slane %v622_v49, 4  ;;  %v3400_v2 = vrot.slane %v3398_v57, 4  ;;  %v6335_v26 = vld [vmem:[%s7970_s14 + $0x7c] sm:$0xf] }
  0x49   : > { %7311 = vmatmul.mubr.bf16.vlgmr.msra.gmra.mrb[0].mxu0 %v6388_v45  ;;  %v3385_v24 = vsel %vm8093_vm5, %v6361_v19, %v3384_v20  ;;  %v3386_v25 = vrot.slane %v3384_v20, 4  ;;  %v612_v45 = vshll.u32 %v557_v39, 16  ;;  %7150 = vmatprep.subr.bf16.mxu1 %v8194_v47  ;;  %v6334_v20 = vld [vmem:[%s7970_s14 + $0x78] sm:$0xe] }
  0x4a   : > { %7343 = vmatpush3.bf16.msra.mxu0 %v7806_v13  ;;  %7314 = vmatprep.mubr.bf16.mxu0 %v6389_v52  ;;  %v6391_v13 = vcombine.low %v3371_v1, %v3374_v10  ;;  %v6363_v52 = vrot.slane %v6331_v46, 9  ;;  %v642_v10 = vshll.u32 %v561_v5, 16  ;;  %v666_v46 = vshll.u32 %v564_v41, 16 }
  0x4b   : > { %7344 = vmatprep.subr.bf16.mxu0 %v7810_v48  ;;  %v3388_v32 = vsel %vm8093_vm5, %v3386_v25, %v3387_v21  ;;  %v614_v55 = vrot.slane %v612_v45, 5  ;;  %v7824_v21 = vld [vmem:[%s9087_s1 + $0x1b0] sm:$0xff]   ;;  %v660_v45 = vshll.u32 %v563_v36, 16 }
  0x4c   : > { %v6393_v38 = vcombine.low %v3385_v24, %v3388_v32  ;;  %v3399_v1 = vsel %vm8093_vm5, %v6363_v52, %v3398_v57  ;;  %v644_v23 = vrot.slane %v642_v10, 5  ;;  %v648_v24 = vrot.slane %v646_v14, 4 }
  0x4e   : > { %7091 = vmatmul.mubr.bf16.gmra.mrb[20].mxu1 %v7808_v42  ;;  %7345 = vmatpush3.bf16.msra.mxu0 %v7810_v48  ;;  %v8188_v42 = vsel %vm8093_vm5, %v6362_v30, %v3391_v35  ;;  %v618_v48 = vshll.u32 %v558_v40, 16  ;;  %v6364_v30 = vrot.slane %v6334_v20, 9  ;;  %v3408_v35 = vrot.slane %v6336_v29, 5 }
  0x4f   : > { %7094 = vmatprep.mubr.bf16.mxu1 %v7811_v54  ;;  %7346 = vmatprep.subr.bf16.mxu0 %v7814_v12  ;;  %v611_v54 = vrot.slane %v609_v44, 4  ;;  %v6394_v59 = vcombine.low %v8188_v42, %v3395_v53  ;;  %v565_v42 = vld [vmem:[%s7970_s14 + $0x20] sm:$0x1]  ;;  %v657_v44 = vshrl.u32 %v563_v36, 16  ;;  %v6338_v53 = vld [vmem:[%s7970_s14 + $0x88] sm:$0xf] }
  0x50   : > { %v620_v60 = vrot.slane %v618_v48, 5  ;;  %v6337_v48 = vld [vmem:[%s7970_s14 + $0x84] sm:$0xe]  ;;  %v676_v52 = vshll.u32 %v565_v42, 16 }
  0x51   : > { %7315 = vmatmul.mubr.bf16.gmra.mrb[4].mxu0 %v6390_v9  ;;  %v615_v0 = vor.u32 %v614_v55, %v611_v54  ;;  %v636_v9 = vshll.u32 %v560_v63, 16  ;;  %v6339_v54 = vld [vmem:[%s7970_s14 + $0x8c] sm:$0x1]  ;;  %v659_v57 = vrot.slane %v657_v44, 4  ;;  %v672_v63 = vrot.slane %v670_v51, 4 }
  0x52   : > { %7318 = vmatprep.mubr.bf16.mxu0 %v6391_v13  ;;  %7347 = vmatpush3.bf16.msra.mxu0 %v7814_v12  ;;  %v625_v7 = vor.u32 %v624_v61, %v620_v60  ;;  %v6365_v5 = vrot.slane %v6337_v48, 9  ;;  %v6344_v51 = vld [vmem:[%s7970_s14 + $0xa0] sm:$0xf] }
  0x53   : > { %7348 = vmatprep.subr.bf16.mxu0 %v7818_v31  ;;  %v616_v12 = vrot.slane %v615_v0, 4  ;;  %v638_v19 = vrot.slane %v636_v9, 5  ;;  %v678_v0 = vrot.slane %v676_v52, 5 }
  0x54   : > { %v626_v16 = vrot.slane %v625_v7, 4  ;;  %v3415_v7 = vrot.slane %v6339_v54, 5 }
  0x55   : > { %v621_v22 = vsel %vm7993_vm2, %v616_v12, %v620_v60  ;;  %v639_v28 = vor.u32 %v638_v19, %v635_v18  ;;  %v567_v60 = vld [vmem:[%s7970_s14 + $0x28] sm:$0xf]  ;;  %v7823_v12 = vld [vmem:[%s9087_s1 + $0x90] sm:$0xff]   ;;  %v8258_v18 = vld [vmem:[%s9087_s1 + $0x1c0] sm:$0xff]  }
  0x56   : > { %7095 = vmatmul.mubr.bf16.gmra.mrb[24].mxu1 %v7812_v3  ;;  %7349 = vmatpush3.bf16.msra.mxu0 %v7818_v31  ;;  %v3401_v3 = vrot.slane %v6333_v56, 5  ;;  %v631_v27 = vsel %vm7993_vm2, %v626_v16, %v630_v62  ;;  %v3405_v31 = vrot.slane %v6335_v26, 5  ;;  %v668_v62 = vrot.slane %v666_v46, 5 }
  0x57   : > { %7098 = vmatprep.mubr.bf16.mxu1 %v7815_v15  ;;  %7350 = vmatprep.subr.bf16.mxu0 %v7820_v58  ;;  %v652_v15 = vshll.u32 %v562_v6, 16  ;;  %v6067_v32 = vcombine.low %v621_v22, %v631_v27  ;;  %v3412_v6 = vrot.slane %v6338_v53, 5  ;;  %v694_v16 = vshrl.u32 %v567_v60, 16  ;;  %v6342_v27 = vld [vmem:[%s7970_s14 + $0x98] sm:$0x1] }
  0x58   : > { %v3402_v13 = vsel %vm8093_vm5, %v3400_v2, %v3401_v3  ;;  %v3406_v39 = vsel %vm8093_vm5, %v6364_v30, %v3405_v31  ;;  %v3407_v40 = vrot.slane %v3405_v31, 4  ;;  %v7821_v2 = vld [vmem:[%s9087_s1 + $0x88] sm:$0xff]   ;;  %v673_v8 = vor.u32 %v672_v63, %v668_v62 }
  0x59   : > { %7319 = vmatmul.mubr.bf16.gmra.mrb[8].mxu0 %v6392_v37  ;;  %v6395_v17 = vcombine.low %v3399_v1, %v3402_v13  ;;  %v654_v25 = vrot.slane %v652_v15, 5  ;;  %v7826_v37 = vld [vmem:[%s9087_s1 + $0x1b8] sm:$0xff]   ;;  %v568_v1 = vld [vmem:[%s7970_s14 + $0x2c] sm:$0x1]  ;;  %v3413_v14 = vsel %vm8093_vm5, %v6365_v5, %v3412_v6  ;;  %v3414_v15 = vrot.slane %v3412_v6, 4  ;;  %v7828_v5 = vld [vmem:[%s9087_s1 + $0xa0] sm:$0xff]  }
  0x5a   : > { %7322 = vmatprep.mubr.bf16.mxu0 %v6393_v38  ;;  %7351 = vmatpush3.bf16.msra.mxu0 %v7820_v58  ;;  %v640_v38 = vrot.slane %v639_v28, 4  ;;  %v3409_v50 = vsel %vm8093_vm5, %v3407_v40, %v3408_v35  ;;  %v662_v58 = vrot.slane %v660_v45, 5  ;;  %v674_v19 = vrot.slane %v673_v8, 4  ;;  %v571_v40 = vld [vmem:[%s7970_s14 + $0x38] sm:$0x1] }
  0x5b   : > { %7352 = vmatprep.subr.bf16.mxu0 %v7822_v11  ;;  %v6396_v56 = vcombine.low %v3406_v39, %v3409_v50  ;;  %v700_v26 = vshll.u32 %v568_v1, 16  ;;  %v570_v39 = vld [vmem:[%s7970_s14 + $0x34] sm:$0xf]  ;;  %v3422_v42 = vrot.slane %v6342_v27, 5  ;;  %v6343_v45 = vld [vmem:[%s7970_s14 + $0x9c] sm:$0xe] }
  0x5c   : > { %v645_v49 = vsel %vm7993_vm2, %v640_v38, %v644_v23  ;;  %v663_v3 = vor.u32 %v662_v58, %v659_v57  ;;  %v679_v28 = vsel %vm7993_vm2, %v674_v19, %v678_v0  ;;  %v714_v50 = vshll.u32 %v570_v39, 16 }
  0x5d   : > { %v3426_v8 = vrot.slane %v6344_v51, 5 }
  0x5e   : > { %7099 = vmatmul.mubr.bf16.gmra.mrb[28].mxu1 %v7816_v34  ;;  %v649_v34 = vor.u32 %v648_v24, %v644_v23  ;;  %7353 = vmatpush3.bf16.msra.mxu0 %v7822_v11  ;;  %v690_v11 = vshll.u32 %v567_v60, 16  ;;  %v664_v13 = vrot.slane %v663_v3, 4  ;;  %v3416_v24 = vsel %vm8093_vm5, %v3414_v15, %v3415_v7  ;;  %v574_v3 = vld [vmem:[%s7970_s14 + $0x44] sm:$0x1] }
  0x5f   : > { %7354 = vmatprep.subr.bf16.mxu0 %v7824_v21  ;;  %7118 = vmatprep.mubr.bf16.mxu1 %v6067_v32  ;;  %v6397_v29 = vcombine.low %v3413_v14, %v3416_v24  ;;  %v569_v32 = vld [vmem:[%s7970_s14 + $0x30] sm:$0xf]  ;;  %v724_v60 = vshll.u32 %v571_v40, 16  ;;  %v6367_v7 = vrot.slane %v6343_v45, 9  ;;  %v6346_v14 = vld [vmem:[%s7970_s14 + $0xa8] sm:$0xe] }
  0x60   : > { %v650_v43 = vrot.slane %v649_v34, 4  ;;  %v692_v22 = vrot.slane %v690_v11, 5  ;;  %v669_v23 = vsel %vm7993_vm2, %v664_v13, %v668_v62  ;;  %v7825_v34 = vld [vmem:[%s9087_s1 + $0x98] sm:$0xff]   ;;  %v708_v44 = vshll.u32 %v569_v32, 16  ;;  %v573_v62 = vld [vmem:[%s7970_s14 + $0x40] sm:$0xf] }
  0x61   : > { %7323 = vmatmul.mubr.bf16.gmra.mrb[12].mxu0 %v6394_v59  ;;  %v566_v59 = vld [vmem:[%s7970_s14 + $0x24] sm:$0xf]  ;;  %v6069_v35 = vcombine.low %v669_v23, %v679_v28  ;;  %v726_v6 = vrot.slane %v724_v60, 5  ;;  %v3427_v15 = vsel %vm8093_vm5, %v6367_v7, %v3426_v8  ;;  %v742_v19 = vshrl.u32 %v573_v62, 16  ;;  %v6348_v24 = vld [vmem:[%s7970_s14 + $0xb0] sm:$0x1] }
  0x62   : > { %7326 = vmatprep.mubr.bf16.mxu0 %v6395_v17  ;;  %v655_v55 = vsel %vm7993_vm2, %v650_v43, %v654_v25  ;;  %7355 = vmatpush3.bf16.msra.mxu0 %v7824_v21  ;;  %v681_v9 = vshrl.u32 %v566_v59, 16  ;;  %v684_v10 = vshll.u32 %v566_v59, 16  ;;  %v6340_v17 = vld [vmem:[%s7970_s14 + $0x90] sm:$0xe]  ;;  %v696_v25 = vrot.slane %v694_v16, 4  ;;  %v7840_v7 = vld [vmem:[%s9087_s1 + $0xb8] sm:$0xff]  }
  0x63   : > { %v6068_v61 = vcombine.low %v645_v49, %v655_v55  ;;  %7356 = vmatprep.subr.bf16.mxu0 %v7826_v37  ;;  %v6366_v31 = vrot.slane %v6340_v17, 9  ;;  %v705_v43 = vshrl.u32 %v569_v32, 16  ;;  %v710_v54 = vrot.slane %v708_v44, 5 }
  0x64   : > { %v683_v20 = vrot.slane %v681_v9, 4  ;;  %v686_v21 = vrot.slane %v684_v10, 5  ;;  %v697_v36 = vor.u32 %v696_v25, %v692_v22  ;;  %v718_v55 = vshrl.u32 %v570_v39, 16  ;;  %v7832_v25 = vld [vmem:[%s9087_s1 + $0xa8] sm:$0xff]  }
  0x65   : > { %v707_v53 = vrot.slane %v705_v43, 4  ;;  %v716_v59 = vrot.slane %v714_v50, 5  ;;  %v3428_v16 = vrot.slane %v3426_v8, 4  ;;  %v738_v17 = vshll.u32 %v573_v62, 16 }
  0x66   : > { %7119 = vmatmul.mubr.bf16.vlgmr.msra.gmra.mrb[0].mxu1 %v6068_v61  ;;  %7357 = vmatpush3.bf16.msra.mxu0 %v7826_v37  ;;  %v687_v30 = vor.u32 %v686_v21, %v683_v20  ;;  %v702_v37 = vrot.slane %v700_v26, 5  ;;  %v698_v46 = vrot.slane %v697_v36, 4  ;;  %v572_v61 = vld [vmem:[%s7970_s14 + $0x3c] sm:$0xf]  ;;  %v6347_v20 = vld [vmem:[%s7970_s14 + $0xac] sm:$0xf] }
  0x67   : > { %7151 = vmatpush3.bf16.msra.mxu1 %v8194_v47  ;;  %v6341_v47 = vld [vmem:[%s7970_s14 + $0x94] sm:$0xf]  ;;  %7390 = vmatprep.subr.bf16.mxu0 %v8258_v18  ;;  %v711_v1 = vor.u32 %v710_v54, %v707_v53  ;;  %v732_v13 = vshll.u32 %v572_v61, 16  ;;  %v740_v27 = vrot.slane %v738_v17, 5  ;;  %v744_v28 = vrot.slane %v742_v19, 4 }
  0x68   : > { %7152 = vmatprep.subr.bf16.mxu1 %v7821_v2  ;;  %v3419_v38 = vrot.slane %v6341_v47, 5  ;;  %v688_v41 = vrot.slane %v687_v30, 4  ;;  %7122 = vmatprep.mubr.bf16.mxu1 %v6069_v35  ;;  %v703_v57 = vsel %vm7993_vm2, %v698_v46, %v702_v37  ;;  %v575_v35 = vld [vmem:[%s7970_s14 + $0x48] sm:$0xf]  ;;  %v7836_v36 = vld [vmem:[%s9087_s1 + $0xb0] sm:$0xff]   ;;  %v3433_v40 = vrot.slane %v6347_v20, 5 }
  0x69   : > { %7327 = vmatmul.mubr.bf16.gmra.mrb[16].mxu0 %v6396_v56  ;;  %v6345_v56 = vld [vmem:[%s7970_s14 + $0xa4] sm:$0x1]  ;;  %v712_v10 = vrot.slane %v711_v1, 4  ;;  %v734_v23 = vrot.slane %v732_v13, 5  ;;  %v3436_v44 = vrot.slane %v6348_v24, 5  ;;  %v753_v45 = vshrl.u32 %v575_v35, 16 }
  0x6a   : > { %7330 = vmatprep.mubr.bf16.mxu0 %v6397_v29  ;;  %v3420_v48 = vsel %vm8093_vm5, %v6366_v31, %v3419_v38  ;;  %v3421_v49 = vrot.slane %v3419_v38, 4  ;;  %v693_v52 = vsel %vm7993_vm2, %v688_v41, %v692_v22  ;;  %v3429_v9 = vrot.slane %v6345_v56, 5  ;;  %v576_v41 = vld [vmem:[%s7970_s14 + $0x4c] sm:$0xf]  ;;  %v6350_v53 = vld [vmem:[%s7970_s14 + $0xb8] sm:$0xf] }
  0x6b   : > { %7153 = vmatpush3.bf16.msra.mxu1 %v7821_v2  ;;  %v6070_v63 = vcombine.low %v693_v52, %v703_v57  ;;  %v720_v2 = vrot.slane %v718_v55, 4  ;;  %v717_v21 = vsel %vm7993_vm2, %v712_v10, %v716_v59  ;;  %v748_v29 = vshll.u32 %v574_v3, 16 }
  0x6c   : > { %7154 = vmatprep.subr.bf16.mxu1 %v7823_v12  ;;  %v3423_v58 = vsel %vm8093_vm5, %v3421_v49, %v3422_v42  ;;  %v3430_v26 = vsel %vm8093_vm5, %v3428_v16, %v3429_v9  ;;  %v745_v38 = vor.u32 %v744_v28, %v740_v27  ;;  %v577_v42 = vld [vmem:[%s7970_s14 + $0x50] sm:$0x1]  ;;  %v756_v46 = vshll.u32 %v575_v35, 16  ;;  %v6352_v16 = vld [vmem:[%s7970_s14 + $0xc0] sm:$0xe] }
  0x6d   : > { %v6398_v0 = vcombine.low %v3420_v48, %v3423_v58  ;;  %v721_v11 = vor.u32 %v720_v2, %v716_v59  ;;  %v6399_v31 = vcombine.low %v3427_v15, %v3430_v26  ;;  %v750_v39 = vrot.slane %v748_v29, 5  ;;  %v6349_v48 = vld [vmem:[%s7970_s14 + $0xb4] sm:$0xe]  ;;  %v6351_v58 = vld [vmem:[%s7970_s14 + $0xbc] sm:$0x1] }
  0x6e   : > { %7123 = vmatmul.mubr.bf16.gmra.mrb[4].mxu1 %v6070_v63  ;;  %v746_v49 = vrot.slane %v745_v38, 4  ;;  %v3435_v51 = vrot.slane %v3433_v40, 4  ;;  %v762_v52 = vshll.u32 %v576_v41, 16  ;;  %v755_v55 = vrot.slane %v753_v45, 4  ;;  %v578_v63 = vld [vmem:[%s7970_s14 + $0x54] sm:$0xf] }
  0x6f   : > { %7155 = vmatpush3.bf16.msra.mxu1 %v7823_v12  ;;  %v729_v12 = vshrl.u32 %v572_v61, 16  ;;  %v722_v22 = vrot.slane %v721_v11, 4  ;;  %v758_v56 = vrot.slane %v756_v46, 5  ;;  %v766_v57 = vshrl.u32 %v576_v41, 16  ;;  %v6354_v26 = vld [vmem:[%s7970_s14 + $0xc8] sm:$0x1] }
  0x70   : > { %7156 = vmatprep.subr.bf16.mxu1 %v7825_v34  ;;  %v751_v59 = vsel %vm7993_vm2, %v746_v49, %v750_v39  ;;  %v3437_v60 = vsel %vm8093_vm5, %v3435_v51, %v3436_v44  ;;  %v764_v61 = vrot.slane %v762_v52, 5  ;;  %v772_v62 = vshll.u32 %v577_v42, 16  ;;  %v582_v42 = vld [vmem:[%s7970_s14 + $0x64] sm:$0xf] }
  0x71   : > { %7331 = vmatmul.mubr.bf16.gmra.mrb[20].mxu0 %v6398_v0  ;;  %v731_v47 = vrot.slane %v729_v12, 4  ;;  %v727_v30 = vsel %vm7993_vm2, %v722_v22, %v726_v6  ;;  %v579_v0 = vld [vmem:[%s7970_s14 + $0x58] sm:$0xf]  ;;  %v759_v3 = vor.u32 %v758_v56, %v755_v55  ;;  %v580_v6 = vld [vmem:[%s7970_s14 + $0x5c] sm:$0x1]  ;;  %v6369_v9 = vrot.slane %v6349_v48, 9 }
  0x72   : > { %v6071_v37 = vcombine.low %v717_v21, %v727_v30  ;;  %7334 = vmatprep.mubr.bf16.mxu0 %v6399_v31  ;;  %v774_v8 = vrot.slane %v772_v62, 5  ;;  %v3440_v10 = vrot.slane %v6350_v53, 5  ;;  %v3443_v11 = vrot.slane %v6351_v58, 5  ;;  %v6353_v22 = vld [vmem:[%s7970_s14 + $0xc4] sm:$0xf] }
  0x73   : > { %7157 = vmatpush3.bf16.msra.mxu1 %v7825_v34  ;;  %v735_v32 = vor.u32 %v734_v23, %v731_v47  ;;  %v6368_v34 = vrot.slane %v6346_v14, 9  ;;  %v760_v12 = vrot.slane %v759_v3, 4  ;;  %v777_v14 = vshrl.u32 %v578_v63, 16  ;;  %v584_v58 = vld [vmem:[%s7970_s14 + $0x6c] sm:$0xf] }
  0x74   : > { %7158 = vmatprep.subr.bf16.mxu1 %v7828_v5  ;;  %7126 = vmatprep.mubr.bf16.mxu1 %v6071_v37  ;;  %v780_v15 = vshll.u32 %v578_v63, 16  ;;  %v3441_v17 = vsel %vm8093_vm5, %v6369_v9, %v3440_v10  ;;  %v3442_v19 = vrot.slane %v3440_v10, 4  ;;  %v786_v20 = vshll.u32 %v579_v0, 16  ;;  %v581_v37 = vld [vmem:[%s7970_s14 + $0x60] sm:$0xf] }
  0x75   : > { %v736_v43 = vrot.slane %v735_v32, 4  ;;  %v3434_v50 = vsel %vm8093_vm5, %v6368_v34, %v3433_v40  ;;  %v790_v21 = vshrl.u32 %v579_v0, 16  ;;  %v765_v47 = vsel %vm7993_vm2, %v760_v12, %v764_v61  ;;  %v585_v63 = vld [vmem:[%s7970_s14 + $0x70] sm:$0xf]  ;;  %v586_v0 = vld [vmem:[%s7970_s14 + $0x74] sm:$0x1] }
  0x76   : > { %v6400_v2 = vcombine.low %v3434_v50, %v3437_v60  ;;  %v779_v24 = vrot.slane %v777_v14, 4  ;;  %v3444_v28 = vsel %vm8093_vm5, %v3442_v19, %v3443_v11  ;;  %v788_v29 = vrot.slane %v786_v20, 5 }
  0x77   : > { %7159 = vmatpush3.bf16.msra.mxu1 %v7828_v5  ;;  %v741_v54 = vsel %vm7993_vm2, %v736_v43, %v740_v27  ;;  %v768_v5 = vrot.slane %v766_v57, 4  ;;  %v8339_v27 = vld [vmem:[%s9087_s1 + $0xc0] sm:$0xff]   ;;  %v792_v30 = vrot.slane %v790_v21, 4  ;;  %v796_v31 = vshll.u32 %v580_v6, 16  ;;  %v583_v43 = vld [vmem:[%s7970_s14 + $0x68] sm:$0x1] }
  0x78   : > { %7160 = vmatprep.subr.bf16.mxu1 %v7832_v25  ;;  %v6072_v1 = vcombine.low %v741_v54, %v751_v59  ;;  %v6401_v34 = vcombine.low %v3441_v17, %v3444_v28  ;;  %v3447_v41 = vrot.slane %v6353_v22, 5  ;;  %v3450_v45 = vrot.slane %v6354_v26, 5  ;;  %v7827_v57 = vld [vmem:[%s7970_s14 + $0x18] sm:$0xff]   ;;  %v7829_v22 = vld [vmem:[%s7970_s14 + $0x24] sm:$0xff]   ;;  %v7831_v26 = vld [vmem:[%s7970_s14 + $0x30] sm:$0xff]  }
  0x79   : > { %7335 = vmatmul.mubr.bf16.gmra.mrb[24].mxu0 %v6400_v2  ;;  %v769_v13 = vor.u32 %v768_v5, %v764_v61  ;;  %v793_v39 = vor.u32 %v792_v30, %v788_v29  ;;  %v798_v40 = vrot.slane %v796_v31, 5  ;;  %v801_v46 = vshrl.u32 %v581_v37, 16 }
  0x7a   : > { %7127 = vmatmul.mubr.bf16.gmra.mrb[8].mxu1 %v6072_v1  ;;  %7338 = vmatprep.mubr.bf16.mxu0 %v6401_v34  ;;  %v804_v48 = vshll.u32 %v581_v37, 16  ;;  %v3449_v51 = vrot.slane %v3447_v41, 4  ;;  %v810_v52 = vshll.u32 %v582_v42, 16  ;;  %v814_v56 = vshrl.u32 %v582_v42, 16  ;;  %v590_v37 = vld [vmem:[%s7970_s14 + $0x84] sm:$0xf] }
  0x7b   : > { %7161 = vmatpush3.bf16.msra.mxu1 %v7832_v25  ;;  %v770_v23 = vrot.slane %v769_v13, 4  ;;  %v782_v25 = vrot.slane %v780_v15, 5  ;;  %v794_v49 = vrot.slane %v793_v39, 4  ;;  %v803_v54 = vrot.slane %v801_v46, 4 }
  0x7c   : > { %7162 = vmatprep.subr.bf16.mxu1 %v7836_v36  ;;  %v806_v55 = vrot.slane %v804_v48, 5  ;;  %v3451_v60 = vsel %vm8093_vm5, %v3449_v51, %v3450_v45  ;;  %v812_v61 = vrot.slane %v810_v52, 5  ;;  %v820_v62 = vshll.u32 %v583_v43, 16  ;;  %v591_v43 = vld [vmem:[%s7970_s14 + $0x88] sm:$0xf] }
  0x7d   : > { %v775_v32 = vsel %vm7993_vm2, %v770_v23, %v774_v8  ;;  %v783_v35 = vor.u32 %v782_v25, %v779_v24  ;;  %v799_v59 = vsel %vm7993_vm2, %v794_v49, %v798_v40  ;;  %v816_v5 = vrot.slane %v814_v56, 4  ;;  %v587_v23 = vld [vmem:[%s7970_s14 + $0x78] sm:$0xf]  ;;  %v588_v24 = vld [vmem:[%s7970_s14 + $0x7c] sm:$0xf] }
  0x7e   : > { %v6073_v38 = vcombine.low %v765_v47, %v775_v32  ;;  %v807_v3 = vor.u32 %v806_v55, %v803_v54  ;;  %v822_v6 = vrot.slane %v820_v62, 5  ;;  %v828_v8 = vshll.u32 %v584_v58, 16  ;;  %v589_v25 = vld [vmem:[%s7970_s14 + $0x80] sm:$0x1]  ;;  %v592_v48 = vld [vmem:[%s7970_s14 + $0x8c] sm:$0x1] }
  0x7f   : > { %7163 = vmatpush3.bf16.msra.mxu1 %v7836_v36  ;;  %v6370_v36 = vrot.slane %v6352_v16, 9  ;;  %v784_v44 = vrot.slane %v783_v35, 4  ;;  %v834_v9 = vshll.u32 %v585_v63, 16  ;;  %v817_v11 = vor.u32 %v816_v5, %v812_v61  ;;  %v7838_v54 = vld [vmem:[%s9087_s1 + $0x1d0] sm:$0xff]  }
  0x80   : > { %7164 = vmatprep.subr.bf16.mxu1 %v7840_v7  ;;  %7130 = vmatprep.mubr.bf16.mxu1 %v6073_v38  ;;  %v808_v10 = vrot.slane %v807_v3, 4  ;;  %v838_v12 = vshrl.u32 %v585_v63, 16  ;;  %v844_v13 = vshll.u32 %v586_v0, 16  ;;  %v830_v15 = vrot.slane %v828_v8, 5  ;;  %v7834_v38 = vld [vmem:[%s9087_s1 + $0x1c8] sm:$0xff]   ;;  %v7833_v63 = vld [vmem:[%s7970_s14 + $0x3c] sm:$0xff]  }
  0x81   : > { %v3448_v50 = vsel %vm8093_vm5, %v6370_v36, %v3447_v41  ;;  %v789_v53 = vsel %vm7993_vm2, %v784_v44, %v788_v29  ;;  %v836_v16 = vrot.slane %v834_v9, 5  ;;  %v818_v19 = vrot.slane %v817_v11, 4  ;;  %v7835_v3 = vld [vmem:[%s7970_s14 + $0x48] sm:$0xff]   ;;  %v594_v8 = vld [vmem:[%s7970_s14 + $0x94] sm:$0xf] }
  0x82   : > { %v6074_v1 = vcombine.low %v789_v53, %v799_v59  ;;  %v6402_v2 = vcombine.low %v3448_v50, %v3451_v60  ;;  %v813_v17 = vsel %vm7993_vm2, %v808_v10, %v812_v61  ;;  %v840_v20 = vrot.slane %v838_v12, 4  ;;  %v595_v9 = vld [vmem:[%s7970_s14 + $0x98] sm:$0x1] }
  0x83   : > { %7165 = vmatpush3.bf16.msra.mxu1 %v7840_v7  ;;  %v825_v7 = vshrl.u32 %v584_v58, 16  ;;  %v846_v21 = vrot.slane %v844_v13, 5  ;;  %v823_v28 = vsel %vm7993_vm2, %v818_v19, %v822_v6  ;;  %v849_v30 = vshrl.u32 %v587_v23, 16 }
  0x84   : > { %7198 = vmatprep.subr.bf16.mxu1 %v8339_v27  ;;  %7131 = vmatmul.mubr.bf16.gmra.mrb[12].mxu1 %v6074_v1  ;;  %v841_v29 = vor.u32 %v840_v20, %v836_v16  ;;  %v852_v31 = vshll.u32 %v587_v23, 16  ;;  %v6075_v32 = vcombine.low %v813_v17, %v823_v28  ;;  %v858_v35 = vshll.u32 %v588_v24, 16  ;;  %v596_v20 = vld [vmem:[%s7970_s14 + $0x9c] sm:$0xf] }
  0x85   : > { %7339 = vmatmul.mubr.bf16.gmra.mrb[28].mxu0 %v6402_v2  ;;  %v827_v14 = vrot.slane %v825_v7, 4  ;;  %v862_v36 = vshrl.u32 %v588_v24, 16  ;;  %v851_v40 = vrot.slane %v849_v30, 4  ;;  %v868_v42 = vshll.u32 %v589_v25, 16  ;;  %v593_v2 = vld [vmem:[%s7970_s14 + $0x90] sm:$0xf] }
  0x86   : > { %7358 = vmatprep.mubr.bf16.mxu0 %v7827_v57  ;;  %v842_v39 = vrot.slane %v841_v29, 4  ;;  %v854_v41 = vrot.slane %v852_v31, 5  ;;  %7134 = vmatprep.mubr.bf16.mxu1 %v6075_v32  ;;  %v860_v45 = vrot.slane %v858_v35, 5  ;;  %v873_v49 = vshrl.u32 %v590_v37, 16  ;;  %v597_v24 = vld [vmem:[%s7970_s14 + $0xa0] sm:$0xf] }
  0x87   : > { %v831_v47 = vor.u32 %v830_v15, %v827_v14  ;;  %v864_v46 = vrot.slane %v862_v36, 4  ;;  %v870_v52 = vrot.slane %v868_v42, 5  ;;  %v876_v53 = vshll.u32 %v590_v37, 16  ;;  %v7842_v14 = vld [vmem:[%s9087_s1 + $0x1d8] sm:$0xff]   ;;  %v598_v29 = vld [vmem:[%s7970_s14 + $0xa4] sm:$0x1] }
  0x88   : > { %v847_v50 = vsel %vm7993_vm2, %v842_v39, %v846_v21  ;;  %v855_v51 = vor.u32 %v854_v41, %v851_v40  ;;  %v875_v57 = vrot.slane %v873_v49, 4  ;;  %v882_v58 = vshll.u32 %v591_v43, 16  ;;  %v7846_v36 = vld [vmem:[%s9087_s1 + $0x1e0] sm:$0xff]  }
  0x89   : > { %v832_v34 = vrot.slane %v831_v47, 4  ;;  %v865_v56 = vor.u32 %v864_v46, %v860_v45  ;;  %v878_v60 = vrot.slane %v876_v53, 5  ;;  %v886_v61 = vshrl.u32 %v591_v43, 16  ;;  %v599_v53 = vld [vmem:[%s7970_s14 + $0xa8] sm:$0xf] }
  0x8a   : > { %v856_v59 = vrot.slane %v855_v51, 4  ;;  %v892_v62 = vshll.u32 %v592_v48, 16  ;;  %v884_v1 = vrot.slane %v882_v58, 5  ;;  %v897_v11 = vshrl.u32 %v593_v2, 16  ;;  %v601_v58 = vld [vmem:[%s7970_s14 + $0xb0] sm:$0x1] }
  0x8b   : > { %v837_v44 = vsel %vm7993_vm2, %v832_v34, %v836_v16  ;;  %v866_v0 = vrot.slane %v865_v56, 4  ;;  %v879_v5 = vor.u32 %v878_v60, %v875_v57  ;;  %v888_v6 = vrot.slane %v886_v61, 4 }
  0x8c   : > { %v6076_v55 = vcombine.low %v837_v44, %v847_v50  ;;  %v894_v7 = vrot.slane %v892_v62, 5  ;;  %v900_v12 = vshll.u32 %v593_v2, 16  ;;  %v906_v13 = vshll.u32 %v594_v8, 16  ;;  %v7839_v50 = vld [vmem:[%s7970_s14 + $0x60] sm:$0xff]  }
  0x8d   : > { %7359 = vmatmul.mubr.bf16.vlgmr.msra.gmra.mrb[0].mxu0 %v7829_v22  ;;  %v871_v10 = vsel %vm7993_vm2, %v866_v0, %v870_v52  ;;  %v880_v16 = vrot.slane %v879_v5, 4  ;;  %v889_v17 = vor.u32 %v888_v6, %v884_v1  ;;  %v910_v19 = vshrl.u32 %v594_v8, 16  ;;  %v7850_v0 = vld [vmem:[%s9087_s1 + $0x1e8] sm:$0xff]   ;;  %v602_v5 = vld [vmem:[%s7970_s14 + $0xb4] sm:$0xf] }
  0x8e   : > { %7391 = vmatpush3.bf16.msra.mxu0 %v8258_v18  ;;  %7362 = vmatprep.mubr.bf16.mxu0 %v7831_v26  ;;  %v861_v18 = vsel %vm7993_vm2, %v856_v59, %v860_v45  ;;  %v899_v21 = vrot.slane %v897_v11, 4  ;;  %v902_v22 = vrot.slane %v900_v12, 5  ;;  %v908_v47 = vrot.slane %v906_v13, 5  ;;  %v7837_v45 = vld [vmem:[%s7970_s14 + $0x54] sm:$0xff]  }
  0x8f   : > { %7392 = vmatprep.subr.bf16.mxu0 %v7834_v38  ;;  %7135 = vmatmul.mubr.bf16.gmra.mrb[16].mxu1 %v6076_v55  ;;  %v6077_v15 = vcombine.low %v861_v18, %v871_v10  ;;  %v916_v23 = vshll.u32 %v595_v9, 16  ;;  %v885_v25 = vsel %vm7993_vm2, %v880_v16, %v884_v1  ;;  %v890_v26 = vrot.slane %v889_v17, 4  ;;  %v603_v9 = vld [vmem:[%s7970_s14 + $0xb8] sm:$0xf]  ;;  %v604_v10 = vld [vmem:[%s7970_s14 + $0xbc] sm:$0x1] }
  0x90   : > { %v912_v28 = vrot.slane %v910_v19, 4  ;;  %v921_v30 = vshrl.u32 %v596_v20, 16  ;;  %v903_v31 = vor.u32 %v902_v22, %v899_v21  ;;  %v924_v34 = vshll.u32 %v596_v20, 16 }
  0x91   : > { %7138 = vmatprep.mubr.bf16.mxu1 %v6077_v15  ;;  %v918_v32 = vrot.slane %v916_v23, 5  ;;  %v930_v35 = vshll.u32 %v597_v24, 16  ;;  %v895_v37 = vsel %vm7993_vm2, %v890_v26, %v894_v7  ;;  %v934_v40 = vshrl.u32 %v597_v24, 16  ;;  %v7854_v15 = vld [vmem:[%s9087_s1 + $0x1f0] sm:$0xff]  }
  0x92   : > { %7393 = vmatpush3.bf16.msra.mxu0 %v7834_v38  ;;  %v913_v38 = vor.u32 %v912_v28, %v908_v47  ;;  %v923_v39 = vrot.slane %v921_v30, 4  ;;  %v6078_v41 = vcombine.low %v885_v25, %v895_v37  ;;  %v904_v42 = vrot.slane %v903_v31, 4  ;;  %v7841_v24 = vld [vmem:[%s7970_s14 + $0x6c] sm:$0xff]   ;;  %v1378_v37 = vld [vmem:[%s7970_s14] sm:$0xe] }
  0x93   : > { %7394 = vmatprep.subr.bf16.mxu0 %v7838_v54  ;;  %v926_v43 = vrot.slane %v924_v34, 5  ;;  %v932_v44 = vrot.slane %v930_v35, 5  ;;  %v936_v48 = vrot.slane %v934_v40, 4  ;;  %v940_v49 = vshll.u32 %v598_v29, 16  ;;  %v7843_v29 = vld [vmem:[%s7970_s14 + $0x78] sm:$0xff]  }
  0x94   : > { %v914_v46 = vrot.slane %v913_v38, 4  ;;  %v909_v51 = vsel %vm7993_vm2, %v904_v42, %v908_v47  ;;  %v945_v59 = vshrl.u32 %v599_v53, 16  ;;  %v948_v62 = vshll.u32 %v599_v53, 16  ;;  %v7858_v34 = vld [vmem:[%s9087_s1 + $0x1f8] sm:$0xff]   ;;  %v1379_v38 = vld [vmem:[%s7970_s14 + $0x4] sm:$0xf] }
  0x95   : > { %7363 = vmatmul.mubr.bf16.gmra.mrb[4].mxu0 %v7833_v63  ;;  %v927_v52 = vor.u32 %v926_v43, %v923_v39  ;;  %v937_v56 = vor.u32 %v936_v48, %v932_v44  ;;  %v942_v57 = vrot.slane %v940_v49, 5  ;;  %v964_v18 = vshll.u32 %v601_v58, 16  ;;  %v1380_v39 = vld [vmem:[%s7970_s14 + $0x8] sm:$0x1]  ;;  %v1381_v48 = vld [vmem:[%s7970_s14 + $0xc] sm:$0xe] }
  0x96   : > { %7366 = vmatprep.mubr.bf16.mxu0 %v7835_v3  ;;  %7395 = vmatpush3.bf16.msra.mxu0 %v7838_v54  ;;  %v600_v54 = vld [vmem:[%s7970_s14 + $0xac] sm:$0xf]  ;;  %v919_v55 = vsel %vm7993_vm2, %v914_v46, %v918_v32  ;;  %v947_v2 = vrot.slane %v945_v59, 4  ;;  %v950_v7 = vrot.slane %v948_v62, 5  ;;  %v972_v19 = vshll.u32 %v602_v5, 16 }
  0x97   : > { %7396 = vmatprep.subr.bf16.mxu0 %v7842_v14  ;;  %7139 = vmatmul.mubr.bf16.gmra.mrb[20].mxu1 %v6078_v41  ;;  %v6079_v60 = vcombine.low %v909_v51, %v919_v55  ;;  %v928_v61 = vrot.slane %v927_v52, 4  ;;  %v954_v63 = vshll.u32 %v600_v54, 16  ;;  %v938_v1 = vrot.slane %v937_v56, 4  ;;  %v1382_v49 = vld [vmem:[%s7970_s14 + $0x10] sm:$0xf]  ;;  %v7845_v55 = vld [vmem:[%s7970_s14 + $0x84] sm:$0xff]  }
  0x98   : > { %v958_v3 = vshrl.u32 %v600_v54, 16  ;;  %v966_v13 = vrot.slane %v964_v18, 5  ;;  %v951_v17 = vor.u32 %v950_v7, %v947_v2  ;;  %v978_v20 = vshll.u32 %v603_v9, 16  ;;  %v1383_v53 = vld [vmem:[%s7970_s14 + $0x14] sm:$0x1]  ;;  %v8449_v56 = vld [vmem:[%s9087_s1 + $0x200] sm:$0xff]  }
  0x99   : > { %7142 = vmatprep.mubr.bf16.mxu1 %v6079_v60  ;;  %v933_v6 = vsel %vm7993_vm2, %v928_v61, %v932_v44  ;;  %v956_v8 = vrot.slane %v954_v63, 5  ;;  %v943_v11 = vsel %vm7993_vm2, %v938_v1, %v942_v57  ;;  %v982_v47 = vshrl.u32 %v603_v9, 16  ;;  %v1384_v1 = vld [vmem:[%s7970_s14 + $0x18] sm:$0xe]  ;;  %v7847_v2 = vld [vmem:[%s7970_s14 + $0x90] sm:$0xff]  }
  0x9a   : > { %7397 = vmatpush3.bf16.msra.mxu0 %v7842_v14  ;;  %v960_v12 = vrot.slane %v958_v3, 4  ;;  %v969_v14 = vshrl.u32 %v602_v5, 16  ;;  %v6080_v16 = vcombine.low %v933_v6, %v943_v11  ;;  %v988_v23 = vshll.u32 %v604_v10, 16  ;;  %v1385_v3 = vld [vmem:[%s7970_s14 + $0x1c] sm:$0xf] }
  0x9b   : > { %7398 = vmatprep.subr.bf16.mxu0 %v7846_v36  ;;  %v952_v25 = vrot.slane %v951_v17, 4  ;;  %v974_v26 = vrot.slane %v972_v19, 5  ;;  %v980_v28 = vrot.slane %v978_v20, 5  ;;  %v984_v31 = vrot.slane %v982_v47, 4  ;;  %v1386_v18 = vld [vmem:[%s7970_s14 + $0x20] sm:$0x1] }
  0x9c   : > { %v961_v21 = vor.u32 %v960_v12, %v956_v8  ;;  %v971_v22 = vrot.slane %v969_v14, 4  ;;  %v990_v32 = vrot.slane %v988_v23, 5  ;;  %v6091_v42 = vrot.slane %v1378_v37, 9  ;;  %v1387_v10 = vld [vmem:[%s7970_s14 + $0x24] sm:$0xe]  ;;  %v7849_v47 = vld [vmem:[%s7970_s14 + $0x9c] sm:$0xff]  }
  0x9d   : > { %7367 = vmatmul.mubr.bf16.gmra.mrb[8].mxu0 %v7837_v45  ;;  %v957_v35 = vsel %vm7993_vm2, %v952_v25, %v956_v8  ;;  %v985_v41 = vor.u32 %v984_v31, %v980_v28  ;;  %v1479_v43 = vrot.slane %v1379_v38, 5  ;;  %v1482_v46 = vrot.slane %v1380_v39, 5  ;;  %v1388_v11 = vld [vmem:[%s7970_s14 + $0x28] sm:$0xf]  ;;  %v1389_v12 = vld [vmem:[%s7970_s14 + $0x2c] sm:$0x1] }
  0x9e   : > { %7370 = vmatprep.mubr.bf16.mxu0 %v7839_v50  ;;  %7399 = vmatpush3.bf16.msra.mxu0 %v7846_v36  ;;  %v962_v30 = vrot.slane %v961_v21, 4  ;;  %v975_v36 = vor.u32 %v974_v26, %v971_v22  ;;  %v6092_v54 = vrot.slane %v1381_v48, 9  ;;  %v1486_v58 = vrot.slane %v1382_v49, 5  ;;  %v7848_v22 = vld [vmem:[%s9087_s1 + $0xc8] sm:$0xff]   ;;  %v1391_v25 = vld [vmem:[%s7970_s14 + $0x34] sm:$0xf] }
  0x9f   : > { %7400 = vmatprep.subr.bf16.mxu0 %v7850_v0  ;;  %7143 = vmatmul.mubr.bf16.gmra.mrb[24].mxu1 %v6080_v16  ;;  %v986_v50 = vrot.slane %v985_v41, 4  ;;  %v1480_v51 = vsel %vm8093_vm5, %v6091_v42, %v1479_v43  ;;  %v1481_v52 = vrot.slane %v1479_v43, 4  ;;  %v1489_v59 = vrot.slane %v1383_v53, 5  ;;  %v1392_v26 = vld [vmem:[%s7970_s14 + $0x38] sm:$0x1]  ;;  %v7851_v31 = vld [vmem:[%s7970_s14 + $0xa8] sm:$0xff]  }
  0xa0   : > { %v967_v40 = vsel %vm7993_vm2, %v962_v30, %v966_v13  ;;  %v976_v45 = vrot.slane %v975_v36, 4  ;;  %v6093_v5 = vrot.slane %v1384_v1, 9  ;;  %v1493_v6 = vrot.slane %v1385_v3, 5  ;;  %v1395_v36 = vld [vmem:[%s7970_s14 + $0x44] sm:$0x1]  ;;  %v7853_v48 = vld [vmem:[%s7970_s14 + $0xb4] sm:$0xff]  }
  0xa1   : > { %v6081_v44 = vcombine.low %v957_v35, %v967_v40  ;;  %v991_v60 = vsel %vm7993_vm2, %v986_v50, %v990_v32  ;;  %v1483_v61 = vsel %vm8093_vm5, %v1481_v52, %v1482_v46  ;;  %v1496_v7 = vrot.slane %v1386_v18, 5  ;;  %v1393_v32 = vld [vmem:[%s7970_s14 + $0x3c] sm:$0xe]  ;;  %v1394_v35 = vld [vmem:[%s7970_s14 + $0x40] sm:$0xf]  ;;  %v7852_v40 = vld [vmem:[%s9087_s1 + $0xd0] sm:$0xff]  }
  0xa2   : > { %7401 = vmatpush3.bf16.msra.mxu0 %v7850_v0  ;;  %v981_v57 = vsel %vm7993_vm2, %v976_v45, %v980_v28  ;;  %v6123_v63 = vcombine.low %v1480_v51, %v1483_v61  ;;  %v1488_v0 = vrot.slane %v1486_v58, 4  ;;  %v1487_v8 = vsel %vm8093_vm5, %v6092_v54, %v1486_v58  ;;  %v1397_v49 = vld [vmem:[%s7970_s14 + $0x4c] sm:$0xf]  ;;  %v1398_v50 = vld [vmem:[%s7970_s14 + $0x50] sm:$0x1]  ;;  %v7856_v52 = vld [vmem:[%s9087_s1 + $0xd8] sm:$0xff]  }
  0xa3   : > { %7402 = vmatprep.subr.bf16.mxu0 %v7854_v15  ;;  %7146 = vmatprep.mubr.bf16.mxu1 %v6081_v44  ;;  %v6082_v62 = vcombine.low %v981_v57, %v991_v60  ;;  %v1494_v13 = vsel %vm8093_vm5, %v6093_v5, %v1493_v6  ;;  %v1495_v14 = vrot.slane %v1493_v6, 4  ;;  %v6094_v16 = vrot.slane %v1387_v10, 9  ;;  %v1396_v44 = vld [vmem:[%s7970_s14 + $0x48] sm:$0xe]  ;;  %v1399_v57 = vld [vmem:[%s7970_s14 + $0x54] sm:$0xe] }
  0xa4   : > { %v1490_v9 = vsel %vm8093_vm5, %v1488_v0, %v1489_v59  ;;  %v1503_v21 = vrot.slane %v1389_v12, 5  ;;  %v1510_v30 = vrot.slane %v1392_v26, 5  ;;  %v1514_v39 = vrot.slane %v1394_v35, 5  ;;  %v1400_v58 = vld [vmem:[%s7970_s14 + $0x58] sm:$0xf]  ;;  %v7855_v61 = vld [vmem:[%s7970_s14 + $0xc0] sm:$0xff]  }
  0xa5   : > { %7371 = vmatmul.mubr.bf16.gmra.mrb[12].mxu0 %v7841_v24  ;;  %v6124_v17 = vcombine.low %v1487_v8, %v1490_v9  ;;  %v1497_v19 = vsel %vm8093_vm5, %v1495_v14, %v1496_v7  ;;  %v1390_v24 = vld [vmem:[%s7970_s14 + $0x30] sm:$0xe]  ;;  %v6096_v42 = vrot.slane %v1393_v32, 9  ;;  %v1517_v43 = vrot.slane %v1395_v36, 5  ;;  %v1401_v59 = vld [vmem:[%s7970_s14 + $0x5c] sm:$0x1] }
  0xa6   : > { %7374 = vmatprep.mubr.bf16.mxu0 %v7843_v29  ;;  %7403 = vmatpush3.bf16.msra.mxu0 %v7854_v15  ;;  %v1500_v15 = vrot.slane %v1388_v11, 5  ;;  %v6125_v23 = vcombine.low %v1494_v13, %v1497_v19  ;;  %v6095_v28 = vrot.slane %v1390_v24, 9  ;;  %v1507_v29 = vrot.slane %v1391_v25, 5  ;;  %v7859_v6 = vld [vmem:[%s9087_s1 + $0xe0] sm:$0xff]   ;;  %v1404_v11 = vld [vmem:[%s7970_s14 + $0x68] sm:$0x1] }
  0xa7   : > { %7404 = vmatprep.subr.bf16.mxu0 %v7858_v34  ;;  %7147 = vmatmul.mubr.bf16.gmra.mrb[28].mxu1 %v6082_v62  ;;  %v1516_v46 = vrot.slane %v1514_v39, 4  ;;  %v6097_v51 = vrot.slane %v1396_v44, 9  ;;  %v1521_v54 = vrot.slane %v1397_v49, 5  ;;  %v6098_v62 = vrot.slane %v1399_v57, 9  ;;  %v1402_v7 = vld [vmem:[%s7970_s14 + $0x60] sm:$0xe] }
  0xa8   : > { %7166 = vmatprep.mubr.bf16.mxu1 %v6123_v63  ;;  %v1502_v20 = vrot.slane %v1500_v15, 4  ;;  %v1501_v37 = vsel %vm8093_vm5, %v6094_v16, %v1500_v15  ;;  %v1528_v63 = vrot.slane %v1400_v58, 5  ;;  %v1515_v0 = vsel %vm8093_vm5, %v6096_v42, %v1514_v39  ;;  %v1403_v8 = vld [vmem:[%s7970_s14 + $0x64] sm:$0xf]  ;;  %v6483_v13 = vld [vmem:[%s7970_s14 + $0x18] sm:$0xf] }
  0xa9   : > { %v1523_v60 = vrot.slane %v1521_v54, 4  ;;  %v1518_v1 = vsel %vm8093_vm5, %v1516_v46, %v1517_v43  ;;  %v1522_v3 = vsel %vm8093_vm5, %v6097_v51, %v1521_v54  ;;  %v1535_v12 = vrot.slane %v1403_v8, 5  ;;  %v7857_v16 = vld [vmem:[%s7970_s14 + $0xcc] sm:$0xff]   ;;  %v6484_v19 = vld [vmem:[%s7970_s14 + $0x1c] sm:$0xf] }
  0xaa   : > { %7405 = vmatpush3.bf16.msra.mxu0 %v7858_v34  ;;  %v1509_v34 = vrot.slane %v1507_v29, 4  ;;  %v1504_v38 = vsel %vm8093_vm5, %v1502_v20, %v1503_v21  ;;  %v1530_v5 = vrot.slane %v1528_v63, 4  ;;  %v6128_v9 = vcombine.low %v1515_v0, %v1518_v1  ;;  %v6485_v20 = vld [vmem:[%s7970_s14 + $0x20] sm:$0x1]  ;;  %v1405_v26 = vld [vmem:[%s7970_s14 + $0x6c] sm:$0xe] }
  0xab   : > { %7438 = vmatprep.subr.bf16.mxu0 %v8449_v56  ;;  %v6126_v45 = vcombine.low %v1501_v37, %v1504_v38  ;;  %v8522_v10 = vsel %vm8093_vm5, %v6098_v62, %v1528_v63  ;;  %v4338_v21 = vshrl.u32 %v6483_v13, 16  ;;  %v4341_v24 = vshll.u32 %v6483_v13, 16  ;;  %v1407_v36 = vld [vmem:[%s7970_s14 + $0x74] sm:$0x1]  ;;  %v6486_v46 = vld [vmem:[%s7970_s14 + $0x24] sm:$0xf] }
  0xac   : > { %v1511_v41 = vsel %vm8093_vm5, %v1509_v34, %v1510_v30  ;;  %v4347_v25 = vshll.u32 %v6484_v19, 16  ;;  %v4357_v30 = vshll.u32 %v6485_v20, 16  ;;  %v6100_v32 = vrot.slane %v1405_v26, 9  ;;  %v6488_v51 = vld [vmem:[%s7970_s14 + $0x2c] sm:$0x1] }
  0xad   : > { %7375 = vmatmul.mubr.bf16.gmra.mrb[16].mxu0 %v7845_v55  ;;  %v1524_v55 = vrot.slane %v1398_v50, 5  ;;  %v4343_v34 = vrot.slane %v4341_v24, 5  ;;  %v6487_v50 = vld [vmem:[%s7970_s14 + $0x28] sm:$0xf]  ;;  %v1410_v8 = vld [vmem:[%s7970_s14 + $0x80] sm:$0x1] }
  0xae   : > { %7378 = vmatprep.mubr.bf16.mxu0 %v7847_v2  ;;  %v1531_v2 = vrot.slane %v1401_v59, 5  ;;  %v4349_v35 = vrot.slane %v4347_v25, 5  ;;  %v4359_v44 = vrot.slane %v4357_v30, 5  ;;  %v4371_v57 = vshll.u32 %v6487_v50, 16  ;;  %v6491_v20 = vld [vmem:[%s7970_s14 + $0x38] sm:$0x1] }
  0xaf   : > { %7167 = vmatmul.mubr.bf16.vlgmr.msra.gmra.mrb[0].mxu1 %v6124_v17  ;;  %v1525_v18 = vsel %vm8093_vm5, %v1523_v60, %v1524_v55  ;;  %v6099_v17 = vrot.slane %v1402_v7, 9  ;;  %v4375_v58 = vshrl.u32 %v6487_v50, 16  ;;  %v1409_v7 = vld [vmem:[%s7970_s14 + $0x7c] sm:$0xf]  ;;  %v1411_v26 = vld [vmem:[%s7970_s14 + $0x84] sm:$0xe] }
  0xb0   : > { %7199 = vmatpush3.bf16.msra.mxu1 %v8339_v27  ;;  %7170 = vmatprep.mubr.bf16.mxu1 %v6125_v23  ;;  %v1508_v27 = vsel %vm8093_vm5, %v6095_v28, %v1507_v29  ;;  %v6129_v14 = vcombine.low %v1522_v3, %v1525_v18  ;;  %v8528_v15 = vsel %vm8093_vm5, %v1530_v5, %v1531_v2  ;;  %v1538_v23 = vrot.slane %v1404_v11, 5  ;;  %v1408_v3 = vld [vmem:[%s7970_s14 + $0x78] sm:$0xe] }
  0xb1   : > { %7200 = vmatprep.subr.bf16.mxu1 %v7848_v22  ;;  %v6127_v53 = vcombine.low %v1508_v27, %v1511_v41  ;;  %v4340_v28 = vrot.slane %v4338_v21, 4  ;;  %v4351_v29 = vshrl.u32 %v6484_v19, 16  ;;  %v6130_v38 = vcombine.low %v8522_v10, %v8528_v15  ;;  %v7863_v41 = vld [vmem:[%s9087_s1 + $0xf0] sm:$0xff]   ;;  %v7865_v10 = vld [vmem:[%s9087_s1 + $0xf8] sm:$0xff]  }
  0xb2   : > { %v1536_v39 = vsel %vm8093_vm5, %v6099_v17, %v1535_v12  ;;  %v1545_v27 = vrot.slane %v1407_v36, 5  ;;  %v4373_v0 = vrot.slane %v4371_v57, 5  ;;  %v4377_v1 = vrot.slane %v4375_v58, 4  ;;  %v6489_v15 = vld [vmem:[%s7970_s14 + $0x30] sm:$0xf] }
  0xb3   : > { %v4344_v43 = vor.u32 %v4343_v34, %v4340_v28  ;;  %v4381_v2 = vshll.u32 %v6488_v51, 16  ;;  %v1552_v19 = vrot.slane %v1410_v8, 5  ;;  %v4386_v21 = vshrl.u32 %v6489_v15, 16 }
  0xb4   : > { %7201 = vmatpush3.bf16.msra.mxu1 %v7848_v22  ;;  %v7861_v22 = vld [vmem:[%s9087_s1 + $0xe8] sm:$0xff]  }
  0xb5   : > { %7379 = vmatmul.mubr.bf16.gmra.mrb[20].mxu0 %v7849_v47  ;;  %7202 = vmatprep.subr.bf16.mxu1 %v7852_v40  ;;  %v1537_v47 = vrot.slane %v1535_v12, 4  ;;  %v4345_v54 = vrot.slane %v4344_v43, 4  ;;  %v4378_v12 = vor.u32 %v4377_v1, %v4373_v0  ;;  %v4383_v13 = vrot.slane %v4381_v2, 5  ;;  %v6492_v43 = vld [vmem:[%s7970_s14 + $0x3c] sm:$0xf] }
  0xb6   : > { %7382 = vmatprep.mubr.bf16.mxu0 %v7851_v31  ;;  %v1406_v31 = vld [vmem:[%s7970_s14 + $0x70] sm:$0xf] }
  0xb7   : > { %7171 = vmatmul.mubr.bf16.gmra.mrb[4].mxu1 %v6126_v45  ;;  %v1542_v37 = vrot.slane %v1406_v31, 5  ;;  %v1539_v42 = vsel %vm8093_vm5, %v1537_v47, %v1538_v23  ;;  %v4350_v63 = vsel %vm7993_vm2, %v4345_v54, %v4349_v35  ;;  %v4379_v47 = vrot.slane %v4378_v12, 4  ;;  %v7866_v12 = vld [vmem:[%s9087_s1 + $0x218] sm:$0xff]  }
  0xb8   : > { %7174 = vmatprep.mubr.bf16.mxu1 %v6127_v53  ;;  %7203 = vmatpush3.bf16.msra.mxu1 %v7852_v40  ;;  %v4353_v40 = vrot.slane %v4351_v29, 4  ;;  %v4365_v53 = vshll.u32 %v6486_v46, 16  ;;  %v6131_v59 = vcombine.low %v1536_v39, %v1539_v42  ;;  %v4388_v29 = vrot.slane %v4386_v21, 4 }
  0xb9   : > { %7204 = vmatprep.subr.bf16.mxu1 %v7856_v52  ;;  %v1544_v45 = vrot.slane %v1542_v37, 4  ;;  %v8551_v49 = vsel %vm8093_vm5, %v6100_v32, %v1542_v37  ;;  %v1412_v32 = vld [vmem:[%s7970_s14 + $0x88] sm:$0xf]  ;;  %v4384_v34 = vsel %vm7993_vm2, %v4379_v47, %v4383_v13  ;;  %v4405_v37 = vshll.u32 %v6491_v20, 16 }
  0xba   : > { %v4367_v62 = vrot.slane %v4365_v53, 5  ;;  %v4410_v53 = vshrl.u32 %v6492_v43, 16  ;;  %v4413_v54 = vshll.u32 %v6492_v43, 16 }
  0xbb   : > { %v8557_v55 = vsel %vm8093_vm5, %v1544_v45, %v1545_v27  ;;  %v6102_v45 = vrot.slane %v1411_v26, 9 }
  0xbc   : > { %7205 = vmatpush3.bf16.msra.mxu1 %v7856_v52  ;;  %v4362_v52 = vshrl.u32 %v6486_v46, 16  ;;  %v6132_v5 = vcombine.low %v8551_v49, %v8557_v55  ;;  %v1556_v46 = vrot.slane %v1412_v32, 5  ;;  %v6493_v49 = vld [vmem:[%s7970_s14 + $0x40] sm:$0xf] }
  0xbd   : > { %7383 = vmatmul.mubr.bf16.gmra.mrb[24].mxu0 %v7853_v48  ;;  %7206 = vmatprep.subr.bf16.mxu1 %v7859_v6  ;;  %v4354_v48 = vor.u32 %v4353_v40, %v4349_v35  ;;  %v4419_v58 = vshll.u32 %v6493_v49, 16 }
  0xbe   : > { %7386 = vmatprep.mubr.bf16.mxu0 %v7855_v61  ;;  %v4364_v61 = vrot.slane %v4362_v52, 4  ;;  %v6494_v52 = vld [vmem:[%s7970_s14 + $0x44] sm:$0x1]  ;;  %v1557_v55 = vsel %vm8093_vm5, %v6102_v45, %v1556_v46  ;;  %v1558_v57 = vrot.slane %v1556_v46, 4 }
  0xbf   : > { %7175 = vmatmul.mubr.bf16.gmra.mrb[8].mxu1 %v6128_v9  ;;  %v4355_v60 = vrot.slane %v4354_v48, 4  ;;  %v6101_v9 = vrot.slane %v1408_v3, 9  ;;  %v4421_v2 = vrot.slane %v4419_v58, 5  ;;  %v7869_v45 = vld [vmem:[%s9087_s1 + $0x220] sm:$0xff]  }
  0xc0   : > { %7178 = vmatprep.mubr.bf16.mxu1 %v6129_v14  ;;  %7207 = vmatpush3.bf16.msra.mxu1 %v7859_v6  ;;  %v4368_v6 = vor.u32 %v4367_v62, %v4364_v61  ;;  %v1549_v14 = vrot.slane %v1409_v7, 5  ;;  %v4412_v62 = vrot.slane %v4410_v53, 4 }
  0xc1   : > { %7208 = vmatprep.subr.bf16.mxu1 %v7861_v22  ;;  %v4360_v18 = vsel %vm7993_vm2, %v4355_v60, %v4359_v44  ;;  %v4407_v44 = vrot.slane %v4405_v37, 5  ;;  %v8597_v60 = vld [vmem:[%s9087_s1 + $0x100] sm:$0xff]  }
  0xc2   : > { %v6547_v11 = vcombine.low %v4350_v63, %v4360_v18  ;;  %v4369_v17 = vrot.slane %v4368_v6, 4  ;;  %v1550_v23 = vsel %vm8093_vm5, %v6101_v9, %v1549_v14  ;;  %v1551_v24 = vrot.slane %v1549_v14, 4  ;;  %v1415_v9 = vld [vmem:[%s7970_s14 + $0x94] sm:$0xf] }
  0xc3   : > { %v4415_v63 = vrot.slane %v4413_v54, 5  ;;  %v4429_v18 = vshll.u32 %v6494_v52, 16  ;;  %v6500_v54 = vld [vmem:[%s7970_s14 + $0x5c] sm:$0x1] }
  0xc4   : > { %7209 = vmatpush3.bf16.msra.mxu1 %v7861_v22  ;;  %v4389_v22 = vshll.u32 %v6489_v15, 16  ;;  %v4374_v28 = vsel %vm7993_vm2, %v4369_v17, %v4373_v0  ;;  %v1553_v35 = vsel %vm8093_vm5, %v1551_v24, %v1552_v19  ;;  %v7864_v0 = vld [vmem:[%s9087_s1 + $0x210] sm:$0xff]   ;;  %v6495_v17 = vld [vmem:[%s7970_s14 + $0x48] sm:$0xf]  ;;  %v6496_v19 = vld [vmem:[%s7970_s14 + $0x4c] sm:$0xf] }
  0xc5   : > { %7387 = vmatmul.mubr.bf16.gmra.mrb[28].mxu0 %v7857_v16  ;;  %7210 = vmatprep.subr.bf16.mxu1 %v7863_v41  ;;  %v6490_v16 = vld [vmem:[%s7970_s14 + $0x34] sm:$0xf]  ;;  %v6548_v39 = vcombine.low %v4374_v28, %v4384_v34  ;;  %v6133_v40 = vcombine.low %v1550_v23, %v1553_v35  ;;  %v4416_v8 = vor.u32 %v4415_v63, %v4412_v62  ;;  %v4431_v15 = vrot.slane %v4429_v18, 5  ;;  %v1418_v35 = vld [vmem:[%s7970_s14 + $0xa0] sm:$0xf] }
  0xc6   : > { %7406 = vmatprep.mubr.bf16.mxu0 %v6547_v11  ;;  %v4395_v25 = vshll.u32 %v6490_v16, 16  ;;  %v4391_v30 = vrot.slane %v4389_v22, 5  ;;  %v4399_v31 = vshrl.u32 %v6490_v16, 16  ;;  %v1563_v16 = vrot.slane %v1415_v9, 5  ;;  %v6497_v22 = vld [vmem:[%s7970_s14 + $0x50] sm:$0x1] }
  0xc7   : > { %7179 = vmatmul.mubr.bf16.gmra.mrb[12].mxu1 %v6130_v38  ;;  %v1413_v38 = vld [vmem:[%s7970_s14 + $0x8c] sm:$0x1]  ;;  %v4417_v20 = vrot.slane %v4416_v8, 4  ;;  %v4434_v47 = vshrl.u32 %v6495_v17, 16  ;;  %v4437_v23 = vshll.u32 %v6495_v17, 16  ;;  %v4443_v28 = vshll.u32 %v6496_v19, 16 }
  0xc8   : > { %7182 = vmatprep.mubr.bf16.mxu1 %v6131_v59  ;;  %7211 = vmatpush3.bf16.msra.mxu1 %v7863_v41  ;;  %v4397_v36 = vrot.slane %v4395_v25, 5  ;;  %v4392_v27 = vor.u32 %v4391_v30, %v4388_v29  ;;  %v4401_v42 = vrot.slane %v4399_v31, 4  ;;  %v7862_v41 = vld [vmem:[%s9087_s1 + $0x208] sm:$0xff]   ;;  %v1559_v48 = vrot.slane %v1413_v38, 5  ;;  %v1417_v29 = vld [vmem:[%s7970_s14 + $0x9c] sm:$0xe] }
  0xc9   : > { %7212 = vmatprep.subr.bf16.mxu1 %v7865_v10  ;;  %v4423_v59 = vshrl.u32 %v6493_v49, 16  ;;  %v1565_v26 = vrot.slane %v1563_v16, 4  ;;  %v4422_v30 = vsel %vm7993_vm2, %v4417_v20, %v4421_v2  ;;  %v4436_v31 = vrot.slane %v4434_v47, 4  ;;  %v6501_v20 = vld [vmem:[%s7970_s14 + $0x60] sm:$0xf] }
  0xca   : > { %v4393_v50 = vrot.slane %v4392_v27, 4  ;;  %v4402_v51 = vor.u32 %v4401_v42, %v4397_v36  ;;  %v1560_v1 = vsel %vm8093_vm5, %v1558_v57, %v1559_v48  ;;  %v4439_v32 = vrot.slane %v4437_v23, 5  ;;  %v6503_v23 = vld [vmem:[%s7970_s14 + $0x68] sm:$0x1] }
  0xcb   : > { %v4425_v3 = vrot.slane %v4423_v59, 4  ;;  %v6134_v7 = vcombine.low %v1557_v55, %v1560_v1  ;;  %v4447_v34 = vshrl.u32 %v6496_v19, 16  ;;  %v4445_v38 = vrot.slane %v4443_v28, 5 }
  0xcc   : > { %7213 = vmatpush3.bf16.msra.mxu1 %v7865_v10  ;;  %v4398_v61 = vsel %vm7993_vm2, %v4393_v50, %v4397_v36  ;;  %v1416_v10 = vld [vmem:[%s7970_s14 + $0x98] sm:$0x1]  ;;  %v4440_v43 = vor.u32 %v4439_v32, %v4436_v31  ;;  %v6104_v48 = vrot.slane %v1417_v29, 9  ;;  %v1570_v49 = vrot.slane %v1418_v35, 5  ;;  %v1423_v31 = vld [vmem:[%s7970_s14 + $0xb4] sm:$0xe] }
  0xcd   : > { %7407 = vmatmul.mubr.bf16.vlgmr.msra.gmra.mrb[0].mxu0 %v6548_v39  ;;  %7486 = vmatprep.subr.bf16.mxu1 %v8597_v60  ;;  %v4426_v14 = vor.u32 %v4425_v3, %v4421_v2  ;;  %v1566_v21 = vrot.slane %v1416_v10, 5  ;;  %v4453_v39 = vshll.u32 %v6497_v22, 16  ;;  %v7872_v2 = vld [vmem:[%s9087_s1 + $0x228] sm:$0xff]  }
  0xce   : > { %7439 = vmatpush3.bf16.msra.mxu0 %v8449_v56  ;;  %v4403_v56 = vrot.slane %v4402_v51, 4  ;;  %v6499_v51 = vld [vmem:[%s7970_s14 + $0x58] sm:$0xf]  ;;  %v4441_v52 = vrot.slane %v4440_v43, 4  ;;  %v1571_v58 = vsel %vm8093_vm5, %v6104_v48, %v1570_v49  ;;  %v1572_v59 = vrot.slane %v1570_v49, 4 }
  0xcf   : > { %7183 = vmatmul.mubr.bf16.gmra.mrb[16].mxu1 %v6132_v5  ;;  %7440 = vmatprep.subr.bf16.mxu0 %v7862_v41  ;;  %v1414_v5 = vld [vmem:[%s7970_s14 + $0x90] sm:$0xe]  ;;  %v4427_v24 = vrot.slane %v4426_v14, 4  ;;  %v1567_v37 = vsel %vm8093_vm5, %v1565_v26, %v1566_v21  ;;  %v4455_v46 = vrot.slane %v4453_v39, 5  ;;  %v6502_v21 = vld [vmem:[%s7970_s14 + $0x64] sm:$0xf] }
  0xd0   : > { %7186 = vmatprep.mubr.bf16.mxu1 %v6133_v40  ;;  %v4408_v6 = vsel %vm7993_vm2, %v4403_v56, %v4407_v44  ;;  %v6103_v11 = vrot.slane %v1414_v5, 9  ;;  %v1419_v40 = vld [vmem:[%s7970_s14 + $0xa4] sm:$0x1]  ;;  %v6498_v44 = vld [vmem:[%s7970_s14 + $0x54] sm:$0xf]  ;;  %v4471_v56 = vshrl.u32 %v6499_v51, 16  ;;  %v4446_v62 = vsel %vm7993_vm2, %v4441_v52, %v4445_v38 }
  0xd1   : > { %v6549_v13 = vcombine.low %v4398_v61, %v4408_v6  ;;  %v4432_v36 = vsel %vm7993_vm2, %v4427_v24, %v4431_v15  ;;  %v1573_v50 = vrot.slane %v1419_v40, 5  ;;  %v4458_v55 = vshrl.u32 %v6498_v44, 16  ;;  %v7875_v14 = vld [vmem:[%s9087_s1 + $0x230] sm:$0xff]   ;;  %v7878_v48 = vld [vmem:[%s9087_s1 + $0x238] sm:$0xff]  }
  0xd2   : > { %7441 = vmatpush3.bf16.msra.mxu0 %v7862_v41  ;;  %v1564_v25 = vsel %vm8093_vm5, %v6103_v11, %v1563_v16  ;;  %v6550_v27 = vcombine.low %v4422_v30, %v4432_v36  ;;  %v4449_v41 = vrot.slane %v4447_v34, 4  ;;  %v4461_v57 = vshll.u32 %v6498_v44, 16  ;;  %v1421_v11 = vld [vmem:[%s7970_s14 + $0xac] sm:$0xf] }
  0xd3   : > { %7442 = vmatprep.subr.bf16.mxu0 %v7864_v0  ;;  %7410 = vmatprep.mubr.bf16.mxu0 %v6549_v13  ;;  %v6135_v42 = vcombine.low %v1564_v25, %v1567_v37  ;;  %v4467_v61 = vshll.u32 %v6499_v51, 16  ;;  %v1574_v3 = vsel %vm8093_vm5, %v1572_v59, %v1573_v50  ;;  %v4473_v5 = vrot.slane %v4471_v56, 4  ;;  %v1424_v37 = vld [vmem:[%s7970_s14 + $0xb8] sm:$0xf] }
  0xd4   : > { %v4450_v53 = vor.u32 %v4449_v41, %v4445_v38  ;;  %v4463_v1 = vrot.slane %v4461_v57, 5  ;;  %v4477_v6 = vshll.u32 %v6500_v54, 16  ;;  %v6136_v9 = vcombine.low %v1571_v58, %v1574_v3  ;;  %v6506_v57 = vld [vmem:[%s7970_s14 + $0x74] sm:$0x1] }
  0xd5   : > { %7411 = vmatmul.mubr.bf16.gmra.mrb[4].mxu0 %v6550_v27  ;;  %v4469_v18 = vrot.slane %v4467_v61, 5  ;;  %v1577_v19 = vrot.slane %v1421_v11, 5  ;;  %v4482_v24 = vshrl.u32 %v6501_v20, 16  ;;  %v4485_v25 = vshll.u32 %v6501_v20, 16 }
  0xd6   : > { %7443 = vmatpush3.bf16.msra.mxu0 %v7864_v0  ;;  %v4451_v63 = vrot.slane %v4450_v53, 4  ;;  %v4460_v0 = vrot.slane %v4458_v55, 4  ;;  %v4479_v17 = vrot.slane %v4477_v6, 5  ;;  %v4491_v30 = vshll.u32 %v6502_v21, 16  ;;  %v6505_v53 = vld [vmem:[%s7970_s14 + $0x70] sm:$0xf] }
  0xd7   : > { %7187 = vmatmul.mubr.bf16.gmra.mrb[20].mxu1 %v6134_v7  ;;  %7444 = vmatprep.subr.bf16.mxu0 %v7866_v12  ;;  %v1420_v7 = vld [vmem:[%s7970_s14 + $0xa8] sm:$0xe]  ;;  %v4474_v16 = vor.u32 %v4473_v5, %v4469_v18  ;;  %v1579_v29 = vrot.slane %v1577_v19, 4  ;;  %v4484_v34 = vrot.slane %v4482_v24, 4  ;;  %v4487_v35 = vrot.slane %v4485_v25, 5 }
  0xd8   : > { %7190 = vmatprep.mubr.bf16.mxu1 %v6135_v42  ;;  %v4456_v8 = vsel %vm7993_vm2, %v4451_v63, %v4455_v46  ;;  %v4464_v10 = vor.u32 %v4463_v1, %v4460_v0  ;;  %v6105_v13 = vrot.slane %v1420_v7, 9  ;;  %v4495_v36 = vshrl.u32 %v6502_v21, 16  ;;  %v1425_v42 = vld [vmem:[%s7970_s14 + $0xbc] sm:$0x1]  ;;  %v6504_v46 = vld [vmem:[%s7970_s14 + $0x6c] sm:$0xf] }
  0xd9   : > { %v6551_v15 = vcombine.low %v4446_v62, %v4456_v8  ;;  %v4475_v26 = vrot.slane %v4474_v16, 4  ;;  %v4493_v40 = vrot.slane %v4491_v30, 5  ;;  %v4501_v27 = vshll.u32 %v6503_v23, 16  ;;  %v7867_v8 = vld [vmem:[%s7970_s14 + $0xc] sm:$0xff]  }
  0xda   : > { %7445 = vmatpush3.bf16.msra.mxu0 %v7866_v12  ;;  %v1422_v12 = vld [vmem:[%s7970_s14 + $0xb0] sm:$0x1]  ;;  %v4465_v22 = vrot.slane %v4464_v10, 4  ;;  %v1578_v28 = vsel %vm8093_vm5, %v6105_v13, %v1577_v19  ;;  %v4488_v44 = vor.u32 %v4487_v35, %v4484_v34  ;;  %v6106_v50 = vrot.slane %v1423_v31, 9  ;;  %v6508_v13 = vld [vmem:[%s7970_s14 + $0x7c] sm:$0xf] }
  0xdb   : > { %7446 = vmatprep.subr.bf16.mxu0 %v7869_v45  ;;  %v1580_v47 = vrot.slane %v1422_v12, 5  ;;  %7414 = vmatprep.mubr.bf16.mxu0 %v6551_v15  ;;  %v4480_v38 = vsel %vm7993_vm2, %v4475_v26, %v4479_v17  ;;  %v4503_v49 = vrot.slane %v4501_v27, 5  ;;  %v1584_v51 = vrot.slane %v1424_v37, 5  ;;  %v6507_v12 = vld [vmem:[%s7970_s14 + $0x78] sm:$0xf] }
  0xdc   : > { %v4470_v32 = vsel %vm7993_vm2, %v4465_v22, %v4469_v18  ;;  %v1587_v52 = vrot.slane %v1425_v42, 5  ;;  %v4489_v54 = vrot.slane %v4488_v44, 4  ;;  %v4506_v58 = vshrl.u32 %v6504_v46, 16  ;;  %v6509_v17 = vld [vmem:[%s7970_s14 + $0x80] sm:$0x1] }
  0xdd   : > { %v1581_v39 = vsel %vm8093_vm5, %v1579_v29, %v1580_v47  ;;  %v6552_v43 = vcombine.low %v4470_v32, %v4480_v38  ;;  %v4509_v59 = vshll.u32 %v6504_v46, 16  ;;  %v1585_v61 = vsel %vm8093_vm5, %v6106_v50, %v1584_v51  ;;  %v6510_v26 = vld [vmem:[%s7970_s14 + $0x84] sm:$0xf]  ;;  %v6511_v32 = vld [vmem:[%s7970_s14 + $0x88] sm:$0xf] }
  0xde   : > { %7447 = vmatpush3.bf16.msra.mxu0 %v7869_v45  ;;  %v6137_v41 = vcombine.low %v1578_v28, %v1581_v39  ;;  %v4497_v45 = vrot.slane %v4495_v36, 4  ;;  %v1586_v56 = vrot.slane %v1584_v51, 4  ;;  %v4515_v62 = vshll.u32 %v6505_v53, 16  ;;  %v7868_v36 = vld [vmem:[%s7970_s14 + $0x18] sm:$0xff]   ;;  %v6512_v37 = vld [vmem:[%s7970_s14 + $0x8c] sm:$0x1] }
  0xdf   : > { %7191 = vmatmul.mubr.bf16.gmra.mrb[24].mxu1 %v6136_v9  ;;  %7448 = vmatprep.subr.bf16.mxu0 %v7872_v2  ;;  %v4519_v63 = vshrl.u32 %v6505_v53, 16  ;;  %v4494_v0 = vsel %vm7993_vm2, %v4489_v54, %v4493_v40  ;;  %v4511_v3 = vrot.slane %v4509_v59, 5  ;;  %v4525_v7 = vshll.u32 %v6506_v57, 16  ;;  %v6514_v57 = vld [vmem:[%s7970_s14 + $0x94] sm:$0xf] }
  0xe0   : > { %7415 = vmatmul.mubr.bf16.gmra.mrb[8].mxu0 %v6552_v43  ;;  %7194 = vmatprep.mubr.bf16.mxu1 %v6137_v41  ;;  %v4498_v55 = vor.u32 %v4497_v45, %v4493_v40  ;;  %v1588_v18 = vsel %vm8093_vm5, %v1586_v56, %v1587_v52  ;;  %v4517_v5 = vrot.slane %v4515_v62, 5  ;;  %v4530_v19 = vshrl.u32 %v6507_v12, 16  ;;  %v7870_v41 = vld [vmem:[%s7970_s14 + $0x24] sm:$0xff]  }
  0xe1   : > { %v4521_v6 = vrot.slane %v4519_v63, 4  ;;  %v6138_v10 = vcombine.low %v1585_v61, %v1588_v18  ;;  %v4527_v16 = vrot.slane %v4525_v7, 5  ;;  %v4533_v21 = vshll.u32 %v6507_v12, 16  ;;  %v6515_v61 = vld [vmem:[%s7970_s14 + $0x98] sm:$0x1] }
  0xe2   : > { %7449 = vmatpush3.bf16.msra.mxu0 %v7872_v2  ;;  %v4499_v1 = vrot.slane %v4498_v55, 4  ;;  %v4508_v2 = vrot.slane %v4506_v58, 4  ;;  %v4539_v22 = vshll.u32 %v6508_v13, 16  ;;  %v4543_v47 = vshrl.u32 %v6508_v13, 16  ;;  %v6513_v55 = vld [vmem:[%s7970_s14 + $0x90] sm:$0xf] }
  0xe3   : > { %7450 = vmatprep.subr.bf16.mxu0 %v7875_v14  ;;  %v4522_v15 = vor.u32 %v4521_v6, %v4517_v5  ;;  %v4532_v24 = vrot.slane %v4530_v19, 4  ;;  %v4549_v25 = vshll.u32 %v6509_v17, 16  ;;  %v4535_v29 = vrot.slane %v4533_v21, 5  ;;  %v6518_v12 = vld [vmem:[%s7970_s14 + $0xa4] sm:$0x1]  ;;  %v7871_v17 = vld [vmem:[%s7970_s14 + $0x30] sm:$0xff]  }
  0xe4   : > { %v4504_v9 = vsel %vm7993_vm2, %v4499_v1, %v4503_v49  ;;  %v4512_v11 = vor.u32 %v4511_v3, %v4508_v2  ;;  %v4541_v30 = vrot.slane %v4539_v22, 5  ;;  %v4545_v31 = vrot.slane %v4543_v47, 4  ;;  %v6516_v3 = vld [vmem:[%s7970_s14 + $0x9c] sm:$0xf] }
  0xe5   : > { %v4523_v23 = vrot.slane %v4522_v15, 4  ;;  %v4551_v35 = vrot.slane %v4549_v25, 5  ;;  %v4554_v38 = vshrl.u32 %v6510_v26, 16  ;;  %v4557_v39 = vshll.u32 %v6510_v26, 16 }
  0xe6   : > { %7451 = vmatpush3.bf16.msra.mxu0 %v7875_v14  ;;  %v6553_v14 = vcombine.low %v4494_v0, %v4504_v9  ;;  %v4513_v20 = vrot.slane %v4512_v11, 4  ;;  %v4536_v27 = vor.u32 %v4535_v29, %v4532_v24  ;;  %v4546_v42 = vor.u32 %v4545_v31, %v4541_v30  ;;  %v6517_v9 = vld [vmem:[%s7970_s14 + $0xa0] sm:$0xf]  ;;  %v7889_v29 = vld [vmem:[%s9087_s1 + $0x110] sm:$0xff]  }
  0xe7   : > { %7452 = vmatprep.subr.bf16.mxu0 %v7878_v48  ;;  %7195 = vmatmul.mubr.bf16.gmra.mrb[28].mxu1 %v6138_v10  ;;  %v4528_v34 = vsel %vm7993_vm2, %v4523_v23, %v4527_v16  ;;  %v4563_v43 = vshll.u32 %v6511_v32, 16  ;;  %v4556_v44 = vrot.slane %v4554_v38, 4  ;;  %v4559_v45 = vrot.slane %v4557_v39, 5  ;;  %v7873_v23 = vld [vmem:[%s7970_s14 + $0x3c] sm:$0xff]   ;;  %v6520_v38 = vld [vmem:[%s7970_s14 + $0xac] sm:$0xf] }
  0xe8   : > { %7418 = vmatprep.mubr.bf16.mxu0 %v6553_v14  ;;  %7214 = vmatprep.mubr.bf16.mxu1 %v7867_v8  ;;  %v4518_v28 = vsel %vm7993_vm2, %v4513_v20, %v4517_v5  ;;  %v4567_v46 = vshrl.u32 %v6511_v32, 16  ;;  %v4537_v49 = vrot.slane %v4536_v27, 4  ;;  %v4547_v50 = vrot.slane %v4546_v42, 4  ;;  %v7888_v8 = vld [vmem:[%s9087_s1 + $0x108] sm:$0xff]   ;;  %v6521_v39 = vld [vmem:[%s7970_s14 + $0xb0] sm:$0x1] }
  0xe9   : > { %v6554_v40 = vcombine.low %v4518_v28, %v4528_v34  ;;  %v4565_v51 = vrot.slane %v4563_v43, 5  ;;  %v4560_v52 = vor.u32 %v4559_v45, %v4556_v44  ;;  %v4578_v56 = vshrl.u32 %v6513_v55, 16  ;;  %v6519_v34 = vld [vmem:[%s7970_s14 + $0xa8] sm:$0xf] }
  0xea   : > { %7453 = vmatpush3.bf16.msra.mxu0 %v7878_v48  ;;  %v4573_v48 = vshll.u32 %v6512_v37, 16  ;;  %v4569_v53 = vrot.slane %v4567_v46, 4  ;;  %v4542_v58 = vsel %vm7993_vm2, %v4537_v49, %v4541_v30  ;;  %v4552_v59 = vsel %vm7993_vm2, %v4547_v50, %v4551_v35  ;;  %v7874_v49 = vld [vmem:[%s7970_s14 + $0x48] sm:$0xff]   ;;  %v7890_v50 = vld [vmem:[%s9087_s1 + $0x118] sm:$0xff]  }
  0xeb   : > { %7419 = vmatmul.mubr.bf16.gmra.mrb[12].mxu0 %v6554_v40  ;;  %v4581_v62 = vshll.u32 %v6513_v55, 16  ;;  %v6555_v63 = vcombine.low %v4542_v58, %v4552_v59  ;;  %v4561_v0 = vrot.slane %v4560_v52, 4  ;;  %v4587_v2 = vshll.u32 %v6514_v57, 16  ;;  %v6522_v55 = vld [vmem:[%s7970_s14 + $0xb4] sm:$0xf] }
  0xec   : > { %v4575_v54 = vrot.slane %v4573_v48, 5  ;;  %v4570_v1 = vor.u32 %v4569_v53, %v4565_v51  ;;  %v4580_v18 = vrot.slane %v4578_v56, 4  ;;  %v4591_v6 = vshrl.u32 %v6514_v57, 16  ;;  %v7876_v57 = vld [vmem:[%s7970_s14 + $0x54] sm:$0xff]  }
  0xed   : > { %v4583_v5 = vrot.slane %v4581_v62, 5  ;;  %v4597_v7 = vshll.u32 %v6515_v61, 16  ;;  %7422 = vmatprep.mubr.bf16.mxu0 %v6555_v63  ;;  %v4566_v10 = vsel %vm7993_vm2, %v4561_v0, %v4565_v51  ;;  %v4589_v11 = vrot.slane %v4587_v2, 5  ;;  %v6523_v56 = vld [vmem:[%s7970_s14 + $0xb8] sm:$0xf] }
  0xee   : > { %v4602_v13 = vshrl.u32 %v6516_v3, 16  ;;  %v4593_v15 = vrot.slane %v4591_v6, 4  ;;  %v4605_v19 = vshll.u32 %v6516_v3, 16  ;;  %v4611_v22 = vshll.u32 %v6517_v9, 16  ;;  %v6524_v62 = vld [vmem:[%s7970_s14 + $0xbc] sm:$0x1] }
  0xef   : > { %7215 = vmatmul.mubr.bf16.vlgmr.msra.gmra.mrb[0].mxu1 %v7868_v36  ;;  %v4584_v14 = vor.u32 %v4583_v5, %v4580_v18  ;;  %v4599_v16 = vrot.slane %v4597_v7, 5  ;;  %v4615_v47 = vshrl.u32 %v6517_v9, 16  ;;  %v4621_v32 = vshll.u32 %v6518_v12, 16  ;;  %v7891_v7 = vld [vmem:[%s9087_s1 + $0x120] sm:$0xff]  }
  0xf0   : > { %7494 = vmatpush3.bf16.msra.mxu1 %v8597_v60  ;;  %7218 = vmatprep.mubr.bf16.mxu1 %v7870_v41  ;;  %v4571_v60 = vrot.slane %v4570_v1, 4  ;;  %v4604_v21 = vrot.slane %v4602_v13, 4  ;;  %v4594_v26 = vor.u32 %v4593_v15, %v4589_v11  ;;  %v4607_v28 = vrot.slane %v4605_v19, 5  ;;  %v6526_v15 = vld [vmem:[%s7970_s14 + $0xc4] sm:$0xf] }
  0xf1   : > { %7487 = vmatprep.subr.bf16.mxu1 %v7888_v8  ;;  %v4585_v25 = vrot.slane %v4584_v14, 4  ;;  %v4613_v30 = vrot.slane %v4611_v22, 5  ;;  %v4617_v31 = vrot.slane %v4615_v47, 4  ;;  %v4626_v40 = vshrl.u32 %v6519_v34, 16 }
  0xf2   : > { %v4576_v20 = vsel %vm7993_vm2, %v4571_v60, %v4575_v54  ;;  %v4595_v36 = vrot.slane %v4594_v26, 4  ;;  %v4608_v37 = vor.u32 %v4607_v28, %v4604_v21  ;;  %v4623_v42 = vrot.slane %v4621_v32, 5  ;;  %v6527_v21 = vld [vmem:[%s7970_s14 + $0xc8] sm:$0x1]  ;;  %v7877_v26 = vld [vmem:[%s7970_s14 + $0x60] sm:$0xff]  }
  0xf3   : > { %v6556_v24 = vcombine.low %v4566_v10, %v4576_v20  ;;  %v4590_v35 = vsel %vm7993_vm2, %v4585_v25, %v4589_v11  ;;  %v4618_v27 = vor.u32 %v4617_v31, %v4613_v30  ;;  %v4629_v43 = vshll.u32 %v6519_v34, 16  ;;  %v6525_v11 = vld [vmem:[%s7970_s14 + $0xc0] sm:$0xf]  ;;  %v7892_v28 = vld [vmem:[%s9087_s1 + $0x128] sm:$0xff]  }
  0xf4   : > { %7495 = vmatpush3.bf16.msra.mxu1 %v7888_v8  ;;  %v4635_v41 = vshll.u32 %v6520_v38, 16  ;;  %v4600_v44 = vsel %vm7993_vm2, %v4595_v36, %v4599_v16  ;;  %v4609_v45 = vrot.slane %v4608_v37, 4  ;;  %v4628_v46 = vrot.slane %v4626_v40, 4  ;;  %v6528_v34 = vld [vmem:[%s7970_s14 + $0xcc] sm:$0xf] }
  0xf5   : > { %7488 = vmatprep.subr.bf16.mxu1 %v7889_v29  ;;  %7423 = vmatmul.mubr.bf16.gmra.mrb[16].mxu0 %v6556_v24  ;;  %v4639_v48 = vshrl.u32 %v6520_v38, 16  ;;  %v6557_v51 = vcombine.low %v4590_v35, %v4600_v44  ;;  %v4619_v52 = vrot.slane %v4618_v27, 4  ;;  %v4631_v53 = vrot.slane %v4629_v43, 5  ;;  %v6529_v35 = vld [vmem:[%s7970_s14 + $0xd0] sm:$0xf] }
  0xf6   : > { %v4637_v54 = vrot.slane %v4635_v41, 5  ;;  %v4614_v58 = vsel %vm7993_vm2, %v4609_v45, %v4613_v30  ;;  %v4645_v61 = vshll.u32 %v6521_v39, 16  ;;  %v4650_v1 = vshrl.u32 %v6522_v55, 16  ;;  %v7879_v36 = vld [vmem:[%s7970_s14 + $0x6c] sm:$0xff]   ;;  %v6530_v40 = vld [vmem:[%s7970_s14 + $0xd4] sm:$0x1] }
  0xf7   : > { %7219 = vmatmul.mubr.bf16.gmra.mrb[4].mxu1 %v7871_v17  ;;  %v4641_v59 = vrot.slane %v4639_v48, 4  ;;  %7426 = vmatprep.mubr.bf16.mxu0 %v6557_v51  ;;  %v4624_v63 = vsel %vm7993_vm2, %v4619_v52, %v4623_v42  ;;  %v4632_v0 = vor.u32 %v4631_v53, %v4628_v46  ;;  %v4653_v2 = vshll.u32 %v6522_v55, 16 }
  0xf8   : > { %7222 = vmatprep.mubr.bf16.mxu1 %v7873_v23  ;;  %7496 = vmatpush3.bf16.msra.mxu1 %v7889_v29  ;;  %v6558_v3 = vcombine.low %v4614_v58, %v4624_v63  ;;  %v4647_v5 = vrot.slane %v4645_v61, 5  ;;  %v4659_v6 = vshll.u32 %v6523_v56, 16  ;;  %v4652_v9 = vrot.slane %v4650_v1, 4  ;;  %v6571_v61 = vld [vmem:[%s7970_s14 + $0x18] sm:$0xe] }
  0xf9   : > { %7489 = vmatprep.subr.bf16.mxu1 %v7890_v50  ;;  %v4642_v18 = vor.u32 %v4641_v59, %v4637_v54  ;;  %v4633_v8 = vrot.slane %v4632_v0, 4  ;;  %v4655_v10 = vrot.slane %v4653_v2, 5  ;;  %v4663_v60 = vshrl.u32 %v6523_v56, 16  ;;  %v6572_v56 = vld [vmem:[%s7970_s14 + $0x1c] sm:$0xf] }
  0xfa   : > { %v4661_v13 = vrot.slane %v4659_v6, 5  ;;  %v4669_v14 = vshll.u32 %v6524_v62, 16  ;;  %v4674_v16 = vshrl.u32 %v6525_v11, 16  ;;  %v4677_v22 = vshll.u32 %v6525_v11, 16  ;;  %v6573_v0 = vld [vmem:[%s7970_s14 + $0x20] sm:$0x1] }
  0xfb   : > { %v4643_v12 = vrot.slane %v4642_v18, 4  ;;  %v4638_v17 = vsel %vm7993_vm2, %v4633_v8, %v4637_v54  ;;  %v4656_v19 = vor.u32 %v4655_v10, %v4652_v9  ;;  %v4665_v20 = vrot.slane %v4663_v60, 4  ;;  %v7880_v6 = vld [vmem:[%s7970_s14 + $0x78] sm:$0xff]   ;;  %v6574_v60 = vld [vmem:[%s7970_s14 + $0x24] sm:$0xe] }
  0xfc   : > { %7497 = vmatpush3.bf16.msra.mxu1 %v7890_v50  ;;  %v4671_v23 = vrot.slane %v4669_v14, 5  ;;  %v4676_v24 = vrot.slane %v4674_v16, 4  ;;  %v4683_v25 = vshll.u32 %v6526_v15, 16  ;;  %v4679_v32 = vrot.slane %v4677_v22, 5  ;;  %v7893_v50 = vld [vmem:[%s9087_s1 + $0x130] sm:$0xff]   ;;  %v7881_v16 = vld [vmem:[%s7970_s14 + $0x84] sm:$0xff]  }
  0xfd   : > { %7490 = vmatprep.subr.bf16.mxu1 %v7891_v7  ;;  %7427 = vmatmul.mubr.bf16.gmra.mrb[20].mxu0 %v6558_v3  ;;  %v4648_v47 = vsel %vm7993_vm2, %v4643_v12, %v4647_v5  ;;  %v4657_v30 = vrot.slane %v4656_v19, 4  ;;  %v4666_v31 = vor.u32 %v4665_v20, %v4661_v13  ;;  %v4687_v38 = vshrl.u32 %v6526_v15, 16  ;;  %v6575_v11 = vld [vmem:[%s7970_s14 + $0x28] sm:$0xf]  ;;  %v6576_v15 = vld [vmem:[%s7970_s14 + $0x2c] sm:$0x1] }
  0xfe   : > { %v6559_v29 = vcombine.low %v4638_v17, %v4648_v47  ;;  %v4685_v37 = vrot.slane %v4683_v25, 5  ;;  %v4693_v39 = vshll.u32 %v6527_v21, 16  ;;  %v4698_v27 = vshrl.u32 %v6528_v34, 16  ;;  %v6577_v22 = vld [vmem:[%s7970_s14 + $0x30] sm:$0xe] }
  0xff   : > { %7223 = vmatmul.mubr.bf16.gmra.mrb[8].mxu1 %v7874_v49  ;;  %v4662_v42 = vsel %vm7993_vm2, %v4657_v30, %v4661_v13  ;;  %v4667_v43 = vrot.slane %v4666_v31, 4  ;;  %v4680_v41 = vor.u32 %v4679_v32, %v4676_v24  ;;  %v4701_v44 = vshll.u32 %v6528_v34, 16  ;;  %v6578_v25 = vld [vmem:[%s7970_s14 + $0x34] sm:$0xf] }
 0x100   : > { %7226 = vmatprep.mubr.bf16.mxu1 %v7876_v57  ;;  %7498 = vmatpush3.bf16.msra.mxu1 %v7891_v7  ;;  %v4689_v45 = vrot.slane %v4687_v38, 4  ;;  %v4695_v46 = vrot.slane %v4693_v39, 5  ;;  %v4700_v48 = vrot.slane %v4698_v27, 4  ;;  %v4707_v49 = vshll.u32 %v6529_v35, 16  ;;  %v7894_v7 = vld [vmem:[%s9087_s1 + $0x138] sm:$0xff]  }
 0x101   : > { %7491 = vmatprep.subr.bf16.mxu1 %v7892_v28  ;;  %7430 = vmatprep.mubr.bf16.mxu0 %v6559_v29  ;;  %v4672_v51 = vsel %vm7993_vm2, %v4667_v43, %v4671_v23  ;;  %v4681_v52 = vrot.slane %v4680_v41, 4  ;;  %v4703_v53 = vrot.slane %v4701_v44, 5  ;;  %v4711_v54 = vshrl.u32 %v6529_v35, 16  ;;  %v6582_v38 = vld [vmem:[%s7970_s14 + $0x44] sm:$0x1] }
 0x102   : > { %v6560_v55 = vcombine.low %v4662_v42, %v4672_v51  ;;  %v4690_v57 = vor.u32 %v4689_v45, %v4685_v37  ;;  %v4709_v58 = vrot.slane %v4707_v49, 5  ;;  %v4717_v59 = vshll.u32 %v6530_v40, 16  ;;  %v7882_v42 = vld [vmem:[%s7970_s14 + $0x90] sm:$0xff]   ;;  %v6583_v41 = vld [vmem:[%s7970_s14 + $0x48] sm:$0xe] }
 0x103   : > { %v4704_v62 = vor.u32 %v4703_v53, %v4700_v48  ;;  %v4713_v63 = vrot.slane %v4711_v54, 4  ;;  %v6619_v1 = vrot.slane %v6571_v61, 9  ;;  %v4686_v2 = vsel %vm7993_vm2, %v4681_v52, %v4685_v37  ;;  %v6581_v37 = vld [vmem:[%s7970_s14 + $0x40] sm:$0xf]  ;;  %v6584_v49 = vld [vmem:[%s7970_s14 + $0x4c] sm:$0xf] }
 0x104   : > { %7499 = vmatpush3.bf16.msra.mxu1 %v7892_v28  ;;  %v4691_v3 = vrot.slane %v4690_v57, 4  ;;  %v5205_v18 = vrot.slane %v6572_v56, 5  ;;  %v5208_v5 = vrot.slane %v6573_v0, 5  ;;  %v4719_v10 = vrot.slane %v4717_v59, 5  ;;  %v7883_v48 = vld [vmem:[%s7970_s14 + $0x9c] sm:$0xff]  }
 0x105   : > { %7492 = vmatprep.subr.bf16.mxu1 %v7893_v50  ;;  %7431 = vmatmul.mubr.bf16.gmra.mrb[24].mxu0 %v6560_v55  ;;  %v4705_v8 = vrot.slane %v4704_v62, 4  ;;  %v4714_v9 = vor.u32 %v4713_v63, %v4709_v58  ;;  %v5212_v21 = vrot.slane %v6575_v11, 5  ;;  %v6620_v23 = vrot.slane %v6574_v60, 9  ;;  %v6586_v57 = vld [vmem:[%s7970_s14 + $0x54] sm:$0xe] }
 0x106   : > { %v4696_v12 = vsel %vm7993_vm2, %v4691_v3, %v4695_v46  ;;  %v5206_v13 = vsel %vm8093_vm5, %v6619_v1, %v5205_v18  ;;  %v5207_v14 = vrot.slane %v5205_v18, 4  ;;  %v5215_v24 = vrot.slane %v6576_v15, 5  ;;  %v6588_v59 = vld [vmem:[%s7970_s14 + $0x5c] sm:$0x1]  ;;  %v6589_v18 = vld [vmem:[%s7970_s14 + $0x60] sm:$0xe] }
 0x107   : > { %7227 = vmatmul.mubr.bf16.gmra.mrb[12].mxu1 %v7877_v26  ;;  %v6561_v17 = vcombine.low %v4686_v2, %v4696_v12  ;;  %v4710_v19 = vsel %vm7993_vm2, %v4705_v8, %v4709_v58  ;;  %v4715_v20 = vrot.slane %v4714_v9, 4  ;;  %v6579_v26 = vld [vmem:[%s7970_s14 + $0x38] sm:$0x1]  ;;  %v5214_v30 = vrot.slane %v5212_v21, 4  ;;  %v6591_v8 = vld [vmem:[%s7970_s14 + $0x68] sm:$0x1] }
 0x108   : > { %7230 = vmatprep.mubr.bf16.mxu1 %v7879_v36  ;;  %7500 = vmatpush3.bf16.msra.mxu1 %v7893_v50  ;;  %v5209_v47 = vsel %vm8093_vm5, %v5207_v14, %v5208_v5  ;;  %v6621_v31 = vrot.slane %v6577_v22, 9  ;;  %v5219_v34 = vrot.slane %v6578_v25, 5  ;;  %v5222_v35 = vrot.slane %v6579_v26, 5  ;;  %v6580_v36 = vld [vmem:[%s7970_s14 + $0x3c] sm:$0xe]  ;;  %v7884_v15 = vld [vmem:[%s7970_s14 + $0xa8] sm:$0xff]  }
 0x109   : > { %7493 = vmatprep.subr.bf16.mxu1 %v7894_v7  ;;  %7434 = vmatprep.mubr.bf16.mxu0 %v6561_v17  ;;  %v4720_v28 = vsel %vm7993_vm2, %v4715_v20, %v4719_v10  ;;  %v6651_v29 = vcombine.low %v5206_v13, %v5209_v47  ;;  %v6622_v39 = vrot.slane %v6580_v36, 9  ;;  %v5226_v40 = vrot.slane %v6581_v37, 5  ;;  %v6585_v50 = vld [vmem:[%s7970_s14 + $0x50] sm:$0x1]  ;;  %v6587_v58 = vld [vmem:[%s7970_s14 + $0x58] sm:$0xf] }
 0x10a   : > { %v6562_v32 = vcombine.low %v4710_v19, %v4720_v28  ;;  %v5221_v27 = vrot.slane %v5219_v34, 4  ;;  %v5229_v43 = vrot.slane %v6582_v38, 5  ;;  %v5213_v44 = vsel %vm8093_vm5, %v6620_v23, %v5212_v21  ;;  %v6590_v5 = vld [vmem:[%s7970_s14 + $0x64] sm:$0xf]  ;;  %v6592_v13 = vld [vmem:[%s7970_s14 + $0x6c] sm:$0xe] }
 0x10b   : > { %v5216_v45 = vsel %vm8093_vm5, %v5214_v30, %v5215_v24  ;;  %v5228_v46 = vrot.slane %v5226_v40, 4  ;;  %v6623_v51 = vrot.slane %v6583_v41, 9  ;;  %v5220_v52 = vsel %vm8093_vm5, %v6621_v31, %v5219_v34  ;;  %v6593_v19 = vld [vmem:[%s7970_s14 + $0x70] sm:$0xf]  ;;  %v6594_v20 = vld [vmem:[%s7970_s14 + $0x74] sm:$0x1] }
 0x10c   : > { %7501 = vmatpush3.bf16.msra.mxu1 %v7894_v7  ;;  %v5223_v53 = vsel %vm8093_vm5, %v5221_v27, %v5222_v35  ;;  %v5233_v54 = vrot.slane %v6584_v49, 5  ;;  %v5236_v55 = vrot.slane %v6585_v50, 5  ;;  %v6652_v61 = vcombine.low %v5213_v44, %v5216_v45  ;;  %v7885_v23 = vld [vmem:[%s7970_s14 + $0xb4] sm:$0xff]   ;;  %v6243_v26 = vld [vmem:[%s7970_s14 + $0x6c] sm:$0xf] }
 0x10d   : > { %7435 = vmatmul.mubr.bf16.gmra.mrb[28].mxu0 %v6562_v32  ;;  %v8807_v56 = vsel %vm8093_vm5, %v6622_v39, %v5226_v40  ;;  %v6624_v63 = vrot.slane %v6586_v57, 9  ;;  %v6653_v0 = vcombine.low %v5220_v52, %v5223_v53  ;;  %v8811_v1 = vsel %vm8093_vm5, %v5228_v46, %v5229_v43  ;;  %v6244_v28 = vld [vmem:[%s7970_s14 + $0x70] sm:$0xf]  ;;  %v6245_v31 = vld [vmem:[%s7970_s14 + $0x74] sm:$0x1] }
 0x10e   : > { %7454 = vmatprep.mubr.bf16.mxu0 %v6651_v29  ;;  %v5235_v62 = vrot.slane %v5233_v54, 4  ;;  %v5240_v2 = vrot.slane %v6587_v58, 5  ;;  %v5243_v3 = vrot.slane %v6588_v59, 5  ;;  %v6625_v9 = vrot.slane %v6589_v18, 9  ;;  %v6595_v35 = vld [vmem:[%s7970_s14 + $0x78] sm:$0xe] }
 0x10f   : > { %7231 = vmatmul.mubr.bf16.gmra.mrb[16].mxu1 %v7880_v6  ;;  %v8817_v6 = vsel %vm8093_vm5, %v6623_v51, %v5233_v54  ;;  %v5247_v10 = vrot.slane %v6590_v5, 5  ;;  %v5250_v12 = vrot.slane %v6591_v8, 5  ;;  %v6654_v14 = vcombine.low %v8807_v56, %v8811_v1  ;;  %v6596_v40 = vld [vmem:[%s7970_s14 + $0x7c] sm:$0xf]  ;;  %v6597_v27 = vld [vmem:[%s7970_s14 + $0x80] sm:$0x1] }
 0x110   : > { %7234 = vmatprep.mubr.bf16.mxu1 %v7881_v16  ;;  %v8821_v7 = vsel %vm8093_vm5, %v5235_v62, %v5236_v55  ;;  %v8826_v60 = vsel %vm8093_vm5, %v6624_v63, %v5240_v2  ;;  %v5242_v11 = vrot.slane %v5240_v2, 4  ;;  %v6626_v21 = vrot.slane %v6592_v13, 9  ;;  %v6246_v45 = vld [vmem:[%s7970_s14 + $0x78] sm:$0xf]  ;;  %v6247_v51 = vld [vmem:[%s7970_s14 + $0x7c] sm:$0xf] }
 0x111   : > { %v8834_v16 = vsel %vm8093_vm5, %v6625_v9, %v5247_v10  ;;  %v5249_v17 = vrot.slane %v5247_v10, 4  ;;  %v6655_v22 = vcombine.low %v8817_v6, %v8821_v7  ;;  %v5254_v24 = vrot.slane %v6593_v19, 5  ;;  %v6248_v57 = vld [vmem:[%s7970_s14 + $0x80] sm:$0x1]  ;;  %v6598_v62 = vld [vmem:[%s7970_s14 + $0x84] sm:$0xe] }
 0x112   : > { %v8842_v47 = vsel %vm8093_vm5, %v5242_v11, %v5243_v3  ;;  %v5257_v25 = vrot.slane %v6594_v20, 5  ;;  %v2667_v32 = vshrl.u32 %v6243_v26, 16  ;;  %v2670_v34 = vshll.u32 %v6243_v26, 16  ;;  %v6599_v3 = vld [vmem:[%s7970_s14 + $0x88] sm:$0xf]  ;;  %v7886_v9 = vld [vmem:[%s7970_s14 + $0xc0] sm:$0xff]  }
 0x113   : > { %v6656_v29 = vcombine.low %v8826_v60, %v8842_v47  ;;  %v8851_v30 = vsel %vm8093_vm5, %v5249_v17, %v5250_v12  ;;  %v8859_v37 = vsel %vm8093_vm5, %v6626_v21, %v5254_v24  ;;  %v5256_v38 = vrot.slane %v5254_v24, 4  ;;  %v6600_v8 = vld [vmem:[%s7970_s14 + $0x8c] sm:$0x1]  ;;  %v6250_v21 = vld [vmem:[%s7970_s14 + $0x88] sm:$0xf] }
 0x114   : > { %v6657_v36 = vcombine.low %v8834_v16, %v8851_v30  ;;  %v2676_v39 = vshll.u32 %v6244_v28, 16  ;;  %v2672_v43 = vrot.slane %v2670_v34, 5  ;;  %v2680_v41 = vshrl.u32 %v6244_v28, 16 }
 0x115   : > { %7455 = vmatmul.mubr.bf16.vlgmr.msra.gmra.mrb[0].mxu0 %v6652_v61  ;;  %v2686_v44 = vshll.u32 %v6245_v31, 16  ;;  %v8866_v46 = vsel %vm8093_vm5, %v5256_v38, %v5257_v25  ;;  %v6627_v49 = vrot.slane %v6595_v35, 9  ;;  %v5261_v50 = vrot.slane %v6596_v40, 5  ;;  %v6251_v31 = vld [vmem:[%s7970_s14 + $0x8c] sm:$0x1] }
 0x116   : > { %7458 = vmatprep.mubr.bf16.mxu0 %v6653_v0  ;;  %v6658_v52 = vcombine.low %v8859_v37, %v8866_v46  ;;  %v2682_v54 = vrot.slane %v2680_v41, 4  ;;  %v5264_v61 = vrot.slane %v6597_v27, 5  ;;  %v2691_v56 = vshrl.u32 %v6246_v45, 16  ;;  %v6601_v27 = vld [vmem:[%s7970_s14 + $0x90] sm:$0xe] }
 0x117   : > { %7235 = vmatmul.mubr.bf16.gmra.mrb[20].mxu1 %v7882_v42  ;;  %v2669_v42 = vrot.slane %v2667_v32, 4  ;;  %v2688_v55 = vrot.slane %v2686_v44, 5  ;;  %v8874_v58 = vsel %vm8093_vm5, %v6627_v49, %v5261_v50  ;;  %v5263_v59 = vrot.slane %v5261_v50, 4 }
 0x118   : > { %7238 = vmatprep.mubr.bf16.mxu1 %v7883_v48  ;;  %v2678_v48 = vrot.slane %v2676_v39, 5  ;;  %v2694_v1 = vshll.u32 %v6246_v45, 16  ;;  %v2700_v2 = vshll.u32 %v6247_v51, 16  ;;  %v2693_v5 = vrot.slane %v2691_v56, 4  ;;  %v6602_v45 = vld [vmem:[%s7970_s14 + $0x94] sm:$0xf] }
 0x119   : > { %v2673_v53 = vor.u32 %v2672_v43, %v2669_v42  ;;  %v8880_v18 = vsel %vm8093_vm5, %v5263_v59, %v5264_v61  ;;  %v2704_v6 = vshrl.u32 %v6247_v51, 16  ;;  %v2710_v7 = vshll.u32 %v6248_v57, 16  ;;  %v6253_v57 = vld [vmem:[%s7970_s14 + $0x94] sm:$0xf] }
 0x11a   : > { %v2683_v0 = vor.u32 %v2682_v54, %v2678_v48  ;;  %v6659_v12 = vcombine.low %v8874_v58, %v8880_v18  ;;  %v2696_v13 = vrot.slane %v2694_v1, 5  ;;  %v6628_v20 = vrot.slane %v6598_v62, 9  ;;  %v6252_v54 = vld [vmem:[%s7970_s14 + $0x90] sm:$0xf]  ;;  %v6604_v1 = vld [vmem:[%s7970_s14 + $0x9c] sm:$0xe] }
 0x11b   : > { %v2674_v63 = vrot.slane %v2673_v53, 4  ;;  %v2706_v17 = vrot.slane %v2704_v6, 4  ;;  %v2712_v19 = vrot.slane %v2710_v7, 5  ;;  %v5268_v24 = vrot.slane %v6599_v3, 5  ;;  %v6603_v53 = vld [vmem:[%s7970_s14 + $0x98] sm:$0x1] }
 0x11c   : > { %v2684_v11 = vrot.slane %v2683_v0, 4  ;;  %v5271_v25 = vrot.slane %v6600_v8, 5  ;;  %v2724_v40 = vshll.u32 %v6250_v21, 16  ;;  %v2728_v44 = vshrl.u32 %v6250_v21, 16  ;;  %v6605_v7 = vld [vmem:[%s7970_s14 + $0xa0] sm:$0xf] }
 0x11d   : > { %7459 = vmatmul.mubr.bf16.gmra.mrb[4].mxu0 %v6654_v14  ;;  %v2679_v10 = vsel %vm7993_vm2, %v2674_v63, %v2678_v48  ;;  %v6249_v14 = vld [vmem:[%s7970_s14 + $0x84] sm:$0xf]  ;;  %v8895_v38 = vsel %vm8093_vm5, %v6628_v20, %v5268_v24  ;;  %v5270_v39 = vrot.slane %v5268_v24, 4  ;;  %v2734_v51 = vshll.u32 %v6251_v31, 16  ;;  %v6254_v63 = vld [vmem:[%s7970_s14 + $0x98] sm:$0x1] }
 0x11e   : > { %7462 = vmatprep.mubr.bf16.mxu0 %v6655_v22  ;;  %v2689_v22 = vsel %vm7993_vm2, %v2684_v11, %v2688_v55  ;;  %v2715_v32 = vshrl.u32 %v6249_v14, 16  ;;  %v2718_v34 = vshll.u32 %v6249_v14, 16  ;;  %v2726_v50 = vrot.slane %v2724_v40, 5  ;;  %v6255_v20 = vld [vmem:[%s7970_s14 + $0x9c] sm:$0xf] }
 0x11f   : > { %7239 = vmatmul.mubr.bf16.gmra.mrb[24].mxu1 %v7884_v15  ;;  %v2702_v15 = vrot.slane %v2700_v2, 5  ;;  %v6291_v26 = vcombine.low %v2679_v10, %v2689_v22  ;;  %v8906_v49 = vsel %vm8093_vm5, %v5270_v39, %v5271_v25  ;;  %v2730_v55 = vrot.slane %v2728_v44, 4  ;;  %v6256_v25 = vld [vmem:[%s7970_s14 + $0xa0] sm:$0xf]  ;;  %v6257_v39 = vld [vmem:[%s7970_s14 + $0xa4] sm:$0x1] }
 0x120   : > { %7242 = vmatprep.mubr.bf16.mxu1 %v7885_v23  ;;  %v2697_v23 = vor.u32 %v2696_v13, %v2693_v5  ;;  %v2717_v43 = vrot.slane %v2715_v32, 4  ;;  %v2720_v41 = vrot.slane %v2718_v34, 5  ;;  %v6660_v47 = vcombine.low %v8895_v38, %v8906_v49  ;;  %v6606_v13 = vld [vmem:[%s7970_s14 + $0xa4] sm:$0x1]  ;;  %v6608_v44 = vld [vmem:[%s7970_s14 + $0xac] sm:$0xf] }
 0x121   : > { %v2707_v28 = vor.u32 %v2706_v17, %v2702_v15  ;;  %v2736_v61 = vrot.slane %v2734_v51, 5  ;;  %v6629_v56 = vrot.slane %v6601_v27, 9  ;;  %v5275_v62 = vrot.slane %v6602_v45, 5 }
 0x122   : > { %v2698_v35 = vrot.slane %v2697_v23, 4  ;;  %v2731_v16 = vor.u32 %v2730_v55, %v2726_v50  ;;  %v5278_v30 = vrot.slane %v6603_v53, 5  ;;  %v2742_v5 = vshll.u32 %v6252_v54, 16  ;;  %v6609_v53 = vld [vmem:[%s7970_s14 + $0xb0] sm:$0x1] }
 0x123   : > { %v2708_v42 = vrot.slane %v2707_v28, 4  ;;  %v8922_v2 = vsel %vm8093_vm5, %v6629_v56, %v5275_v62  ;;  %v5277_v3 = vrot.slane %v5275_v62, 4  ;;  %v2748_v6 = vshll.u32 %v6253_v57, 16 }
 0x124   : > { %v2703_v48 = vsel %vm7993_vm2, %v2698_v35, %v2702_v15  ;;  %v2752_v11 = vshrl.u32 %v6253_v57, 16  ;;  %v2744_v15 = vrot.slane %v2742_v5, 5  ;;  %v6630_v24 = vrot.slane %v6604_v1, 9 }
 0x125   : > { %7463 = vmatmul.mubr.bf16.gmra.mrb[8].mxu0 %v6656_v29  ;;  %v2713_v60 = vsel %vm7993_vm2, %v2708_v42, %v2712_v19  ;;  %v2721_v29 = vor.u32 %v2720_v41, %v2717_v43  ;;  %v5279_v14 = vsel %vm8093_vm5, %v5277_v3, %v5278_v30  ;;  %v2750_v17 = vrot.slane %v2748_v6, 5  ;;  %v6607_v43 = vld [vmem:[%s7970_s14 + $0xa8] sm:$0xe] }
 0x126   : > { %7466 = vmatprep.mubr.bf16.mxu0 %v6657_v36  ;;  %v6292_v59 = vcombine.low %v2703_v48, %v2713_v60  ;;  %v2739_v36 = vshrl.u32 %v6252_v54, 16  ;;  %v2758_v19 = vshll.u32 %v6254_v63, 16  ;;  %v6661_v22 = vcombine.low %v8922_v2, %v5279_v14  ;;  %v6258_v54 = vld [vmem:[%s7970_s14 + $0xa8] sm:$0xf]  ;;  %v6610_v2 = vld [vmem:[%s7970_s14 + $0xb4] sm:$0xe] }
 0x127   : > { %7243 = vmatmul.mubr.bf16.gmra.mrb[28].mxu1 %v7886_v9  ;;  %v2722_v0 = vrot.slane %v2721_v29, 4  ;;  %v2732_v9 = vrot.slane %v2731_v16, 4  ;;  %v2754_v23 = vrot.slane %v2752_v11, 4  ;;  %v5282_v32 = vrot.slane %v6605_v7, 5  ;;  %v6612_v14 = vld [vmem:[%s7970_s14 + $0xbc] sm:$0x1] }
 0x128   : > { %7278 = vmatprep.mubr.bf16.mxu1 %v6291_v26  ;;  %v2741_v10 = vrot.slane %v2739_v36, 4  ;;  %v2760_v31 = vrot.slane %v2758_v19, 5  ;;  %v5285_v35 = vrot.slane %v6606_v13, 5  ;;  %v2763_v40 = vshrl.u32 %v6255_v20, 16 }
 0x129   : > { %v2727_v8 = vsel %vm7993_vm2, %v2722_v0, %v2726_v50  ;;  %v2737_v21 = vsel %vm7993_vm2, %v2732_v9, %v2736_v61  ;;  %v2755_v34 = vor.u32 %v2754_v23, %v2750_v17  ;;  %v2766_v27 = vshll.u32 %v6255_v20, 16  ;;  %v6260_v0 = vld [vmem:[%s7970_s14 + $0xb0] sm:$0x1]  ;;  %v6262_v23 = vld [vmem:[%s7970_s14 + $0xb8] sm:$0xf] }
 0x12a   : > { %v6293_v26 = vcombine.low %v2727_v8, %v2737_v21  ;;  %v2745_v28 = vor.u32 %v2744_v15, %v2741_v10  ;;  %v8944_v46 = vsel %vm8093_vm5, %v6630_v24, %v5282_v32  ;;  %v2772_v42 = vshll.u32 %v6256_v25, 16  ;;  %v6611_v8 = vld [vmem:[%s7970_s14 + $0xb8] sm:$0xf] }
 0x12b   : > { %v2756_v58 = vrot.slane %v2755_v34, 4  ;;  %v2765_v18 = vrot.slane %v2763_v40, 4  ;;  %v2776_v41 = vshrl.u32 %v6256_v25, 16  ;;  %v2782_v51 = vshll.u32 %v6257_v39, 16  ;;  %v6263_v34 = vld [vmem:[%s7970_s14 + $0xbc] sm:$0x1] }
 0x12c   : > { %v2746_v37 = vrot.slane %v2745_v28, 4  ;;  %v2774_v50 = vrot.slane %v2772_v42, 5  ;;  %v6631_v62 = vrot.slane %v6607_v43, 9  ;;  %v5289_v63 = vrot.slane %v6608_v44, 5 }
 0x12d   : > { %7467 = vmatmul.mubr.bf16.gmra.mrb[12].mxu0 %v6658_v52  ;;  %v5284_v52 = vrot.slane %v5282_v32, 4  ;;  %v2761_v60 = vsel %vm7993_vm2, %v2756_v58, %v2760_v31  ;;  %v2778_v57 = vrot.slane %v2776_v41, 4  ;;  %v2784_v56 = vrot.slane %v2782_v51, 5  ;;  %v6264_v51 = vld [vmem:[%s7970_s14 + $0xc0] sm:$0xf] }
 0x12e   : > { %7470 = vmatprep.mubr.bf16.mxu0 %v6659_v12  ;;  %v2768_v12 = vrot.slane %v2766_v27, 5  ;;  %v2751_v45 = vsel %vm7993_vm2, %v2746_v37, %v2750_v17  ;;  %v5292_v36 = vrot.slane %v6609_v53, 5  ;;  %v2787_v1 = vshrl.u32 %v6258_v54, 16  ;;  %v6261_v17 = vld [vmem:[%s7970_s14 + $0xb4] sm:$0xf] }
 0x12f   : > { %7279 = vmatmul.mubr.bf16.vlgmr.msra.gmra.mrb[16].mxu1 %v6292_v59  ;;  %v8952_v48 = vsel %vm8093_vm5, %v5284_v52, %v5285_v35  ;;  %v6259_v59 = vld [vmem:[%s7970_s14 + $0xac] sm:$0xf]  ;;  %v6294_v61 = vcombine.low %v2751_v45, %v2761_v60  ;;  %v2779_v30 = vor.u32 %v2778_v57, %v2774_v50  ;;  %v5290_v3 = vsel %vm8093_vm5, %v6631_v62, %v5289_v63  ;;  %v6613_v52 = vld [vmem:[%s7970_s14 + $0xc0] sm:$0xe] }
 0x130   : > { %7282 = vmatprep.mubr.bf16.mxu1 %v6293_v26  ;;  %v6662_v29 = vcombine.low %v8944_v46, %v8952_v48  ;;  %v2769_v55 = vor.u32 %v2768_v12, %v2765_v18  ;;  %v5291_v5 = vrot.slane %v5289_v63, 4  ;;  %v2790_v6 = vshll.u32 %v6258_v54, 16  ;;  %v6614_v12 = vld [vmem:[%s7970_s14 + $0xc4] sm:$0xf] }
 0x131   : > { %v2796_v7 = vshll.u32 %v6259_v59, 16  ;;  %v2780_v10 = vrot.slane %v2779_v30, 4  ;;  %v2789_v11 = vrot.slane %v2787_v1, 4  ;;  %v2800_v13 = vshrl.u32 %v6259_v59, 16 }
 0x132   : > { %v2770_v16 = vrot.slane %v2769_v55, 4  ;;  %v5293_v38 = vsel %vm8093_vm5, %v5291_v5, %v5292_v36  ;;  %v2792_v49 = vrot.slane %v2790_v6, 5  ;;  %v2806_v15 = vshll.u32 %v6260_v0, 16  ;;  %v6616_v5 = vld [vmem:[%s7970_s14 + $0xcc] sm:$0xe] }
 0x133   : > { %v2785_v19 = vsel %vm7993_vm2, %v2780_v10, %v2784_v56  ;;  %v6663_v20 = vcombine.low %v5290_v3, %v5293_v38  ;;  %v2802_v21 = vrot.slane %v2800_v13, 4  ;;  %v5296_v28 = vrot.slane %v6611_v8, 5  ;;  %v6617_v10 = vld [vmem:[%s7970_s14 + $0xd0] sm:$0xf] }
 0x134   : > { %v2775_v9 = vsel %vm7993_vm2, %v2770_v16, %v2774_v50  ;;  %v2793_v25 = vor.u32 %v2792_v49, %v2789_v11  ;;  %v2808_v26 = vrot.slane %v2806_v15, 5  ;;  %v5299_v32 = vrot.slane %v6612_v14, 5  ;;  %v6615_v50 = vld [vmem:[%s7970_s14 + $0xc8] sm:$0x1]  ;;  %v6618_v49 = vld [vmem:[%s7970_s14 + $0xd4] sm:$0x1] }
 0x135   : > { %7471 = vmatmul.mubr.bf16.gmra.mrb[16].mxu0 %v6660_v47  ;;  %v2798_v47 = vrot.slane %v2796_v7, 5  ;;  %v6295_v24 = vcombine.low %v2775_v9, %v2785_v19  ;;  %v2811_v35 = vshrl.u32 %v6261_v17, 16  ;;  %v2814_v39 = vshll.u32 %v6261_v17, 16  ;;  %v6266_v16 = vld [vmem:[%s7970_s14 + $0xc8] sm:$0x1] }
 0x136   : > { %7474 = vmatprep.mubr.bf16.mxu0 %v6661_v22  ;;  %v6632_v22 = vrot.slane %v6610_v2, 9  ;;  %v2794_v40 = vrot.slane %v2793_v25, 4  ;;  %v5298_v37 = vrot.slane %v5296_v28, 4  ;;  %v2820_v46 = vshll.u32 %v6262_v23, 16 }
 0x137   : > { %7283 = vmatmul.mubr.bf16.gmra.mrb[20].mxu1 %v6294_v61  ;;  %v2803_v31 = vor.u32 %v2802_v21, %v2798_v47  ;;  %v2813_v43 = vrot.slane %v2811_v35, 4  ;;  %v2816_v58 = vrot.slane %v2814_v39, 5  ;;  %v2824_v18 = vshrl.u32 %v6262_v23, 16 }
 0x138   : > { %7286 = vmatprep.mubr.bf16.mxu1 %v6295_v24  ;;  %v5297_v27 = vsel %vm8093_vm5, %v6632_v22, %v5296_v28  ;;  %v2799_v41 = vsel %vm7993_vm2, %v2794_v40, %v2798_v47  ;;  %v5300_v44 = vsel %vm8093_vm5, %v5298_v37, %v5299_v32  ;;  %v2822_v45 = vrot.slane %v2820_v46, 5 }
 0x139   : > { %v2804_v42 = vrot.slane %v2803_v31, 4  ;;  %v2830_v48 = vshll.u32 %v6263_v34, 16  ;;  %v6664_v54 = vcombine.low %v5297_v27, %v5300_v44  ;;  %v2817_v60 = vor.u32 %v2816_v58, %v2813_v43 }
 0x13a   : > { %v2826_v55 = vrot.slane %v2824_v18, 4  ;;  %v6633_v61 = vrot.slane %v6613_v52, 9  ;;  %v5303_v56 = vrot.slane %v6614_v12, 5  ;;  %v5306_v0 = vrot.slane %v6615_v50, 5 }
 0x13b   : > { %v2809_v53 = vsel %vm7993_vm2, %v2804_v42, %v2808_v26  ;;  %v2832_v59 = vrot.slane %v2830_v48, 5  ;;  %v2818_v62 = vrot.slane %v2817_v60, 4  ;;  %v2835_v30 = vshrl.u32 %v6264_v51, 16 }
 0x13c   : > { %v6296_v57 = vcombine.low %v2799_v41, %v2809_v53  ;;  %v2827_v63 = vor.u32 %v2826_v55, %v2822_v45  ;;  %v5304_v36 = vsel %vm8093_vm5, %v6633_v61, %v5303_v56  ;;  %v5305_v1 = vrot.slane %v5303_v56, 4 }
 0x13d   : > { %7475 = vmatmul.mubr.bf16.gmra.mrb[20].mxu0 %v6662_v29  ;;  %v6265_v29 = vld [vmem:[%s7970_s14 + $0xc4] sm:$0xf]  ;;  %v2838_v2 = vshll.u32 %v6264_v51, 16  ;;  %v2823_v6 = vsel %vm7993_vm2, %v2818_v62, %v2822_v45  ;;  %v2837_v8 = vrot.slane %v2835_v30, 4  ;;  %v2854_v38 = vshll.u32 %v6266_v16, 16 }
 0x13e   : > { %7478 = vmatprep.mubr.bf16.mxu0 %v6663_v20  ;;  %v2844_v3 = vshll.u32 %v6265_v29, 16  ;;  %v2828_v7 = vrot.slane %v2827_v63, 4  ;;  %v2848_v9 = vshrl.u32 %v6265_v29, 16  ;;  %v5307_v11 = vsel %vm8093_vm5, %v5305_v1, %v5306_v0 }
 0x13f   : > { %7287 = vmatmul.mubr.bf16.gmra.mrb[24].mxu1 %v6296_v57  ;;  %v2840_v13 = vrot.slane %v2838_v2, 5  ;;  %v6665_v15 = vcombine.low %v5304_v36, %v5307_v11  ;;  %v6634_v19 = vrot.slane %v6616_v5, 9  ;;  %v5310_v22 = vrot.slane %v6617_v10, 5 }
 0x140   : > { %v2846_v14 = vrot.slane %v2844_v3, 5  ;;  %v2833_v47 = vsel %vm7993_vm2, %v2828_v7, %v2832_v59  ;;  %v2850_v17 = vrot.slane %v2848_v9, 4  ;;  %v2856_v24 = vrot.slane %v2854_v38, 5 }
 0x141   : > { %v6297_v20 = vcombine.low %v2823_v6, %v2833_v47  ;;  %v2841_v21 = vor.u32 %v2840_v13, %v2837_v8  ;;  %v5313_v25 = vrot.slane %v6618_v49, 5  ;;  %v5311_v28 = vsel %vm8093_vm5, %v6634_v19, %v5310_v22 }
 0x142   : > { %v2851_v23 = vor.u32 %v2850_v17, %v2846_v14  ;;  %v5312_v31 = vrot.slane %v5310_v22, 4 }
 0x143   : > { %7290 = vmatprep.mubr.bf16.mxu1 %v6297_v20  ;;  %v2842_v26 = vrot.slane %v2841_v21, 4 }
 0x144   : > { %v2852_v32 = vrot.slane %v2851_v23, 4  ;;  %v5314_v35 = vsel %vm8093_vm5, %v5312_v31, %v5313_v25 }
 0x145   : > { %7479 = vmatmul.mubr.bf16.gmra.mrb[24].mxu0 %v6664_v54  ;;  %v2847_v34 = vsel %vm7993_vm2, %v2842_v26, %v2846_v14  ;;  %v6666_v40 = vcombine.low %v5311_v28, %v5314_v35  ;;  %v9023_v54 = vld [vmem:[%s9088_s2] ss:$0 sm:$0xff] }
 0x146   : > { %7482 = vmatprep.mubr.bf16.mxu0 %v6665_v15  ;;  %v2857_v39 = vsel %vm7993_vm2, %v2852_v32, %v2856_v24 }
 0x147   : > { %v6298_v27 = vcombine.low %v2847_v34, %v2857_v39 }
 0x149   : > { %7291 = vmatmul.mubr.bf16.gmra.mrb[28].mxu1 %v6298_v27 }
 0x14d   : > { %7483 = vmatmul.mubr.bf16.gmra.mrb[28].mxu0 %v6666_v40 }
 0x1c2   : > { %v7216_v37 = vpop.f32.mrb[0].mxu1 }
 0x1c3   : > { %v2203_v46 = vpop.f32.mrb[1].mxu1 }
 0x1c4   : > { %v7217_v52 = vpop.f32.mrb[2].mxu1 }
 0x1c5   : > { %v2206_v42 = vpop.f32.mrb[3].mxu1 }
 0x1ca   : > { %v7220_v43 = vpop.f32.mrb[4].mxu1 }
 0x1cb   : > { %v2219_v58 = vpop.f32.mrb[5].mxu1 }
 0x1cc   : > { %v7221_v18 = vpop.f32.mrb[6].mxu1 }
 0x1cd   : > { %v2222_v12 = vpop.f32.mrb[7].mxu1 }
 0x1d2   : > { %v7224_v41 = vpop.f32.mrb[8].mxu1 }
 0x1d3   : > { %v2235_v44 = vpop.f32.mrb[9].mxu1 }
 0x1d4   : > { %v7225_v45 = vpop.f32.mrb[10].mxu1 }
 0x1d5   : > { %v2238_v4 = vpop.f32.mrb[11].mxu1 }
 0x1da   : > { %v9012_v48 = vpop.f32.mrb[12].mxu1 }
 0x1db   : > { %v9014_v33 = vpop.f32.mrb[13].mxu1 }
 0x1dc   : > { %v9016_v50 = vpop.f32.mrb[14].mxu1 }
 0x1dd   : > { %v9018_v51 = vpop.f32.mrb[15].mxu1 }
 0x1e8   : > { %v7456_v53 = vpop.f32.mrb[0].mxu0 }
 0x1e9   : > { %v7502_v60 = vadd.f32 %v7456_v53, %v7216_v37  ;;  %v5478_v55 = vpop.f32.mrb[1].mxu0 }
 0x1ea   : > { %v7503_v29 = vadd.f32 %v5478_v55, %v2203_v46  ;;  %v7457_v57 = vpop.f32.mrb[2].mxu0 }
 0x1eb   : > { %v5742_v59 = vadd.f32 %v7502_v60, %v9023_v54  ;;  %v7504_v61 = vadd.f32 %v7457_v57, %v7217_v52  ;;  %v5481_v56 = vpop.f32.mrb[3].mxu0 }
 0x1ec   : > { %v5740_v62 = vadd.f32 %v7503_v29, %v9023_v54  ;;  %v7505_v63 = vadd.f32 %v5481_v56, %v2206_v42 }
 0x1ed   : > { %v5743_v0 = vadd.f32 %v7504_v61, %v9023_v54  ;;  %v5774_v30 = vmax.f32 %v5742_v59, 0.0 }
 0x1ee   : > { %v5741_v16 = vadd.f32 %v7505_v63, %v9023_v54  ;;  %v5772_v1 = vmax.f32 %v5740_v62, 0.0 }
 0x1ef   : > { %v5775_v36 = vmax.f32 %v5743_v0, 0.0 }
 0x1f0   : > { %v5773_v2 = vmax.f32 %v5741_v16, 0.0  ;;  %v7460_v3 = vpop.f32.mrb[4].mxu0 }
 0x1f1   : > { %v6751_v5 = vpack.c.bf16 %v5775_v36, %v5774_v30  ;;  %v7506_v6 = vadd.f32 %v7460_v3, %v7220_v43  ;;  %v5494_v7 = vpop.f32.mrb[5].mxu0 }
 0x1f2   : > { %v6746_v8 = vpack.c.bf16 %v5773_v2, %v5772_v1  ;;  %v7507_v9 = vadd.f32 %v5494_v7, %v2219_v58  ;;  %v7461_v10 = vpop.f32.mrb[6].mxu0 }
 0x1f3   : > { %6823 = vst [vmem:[%s9033_s10 + $0x8] sm:$0xff] %v6751_v5   ;;  %v5746_v11 = vadd.f32 %v7506_v6, %v9023_v54  ;;  %v7508_v13 = vadd.f32 %v7461_v10, %v7221_v18  ;;  %v5497_v14 = vpop.f32.mrb[7].mxu0 }
 0x1f4   : > { %6747 = vst [vmem:[%s9033_s10] sm:$0xff] %v6746_v8   ;;  %v5744_v38 = vadd.f32 %v7507_v9, %v9023_v54  ;;  %v7509_v49 = vadd.f32 %v5497_v14, %v2222_v12 }
 0x1f5   : > { %v5747_v47 = vadd.f32 %v7508_v13, %v9023_v54  ;;  %v5778_v17 = vmax.f32 %v5746_v11, 0.0 }
 0x1f6   : > { %v5745_v15 = vadd.f32 %v7509_v49, %v9023_v54  ;;  %v5776_v20 = vmax.f32 %v5744_v38, 0.0 }
 0x1f7   : > { %v5779_v19 = vmax.f32 %v5747_v47, 0.0 }
 0x1f8   : > { %v5777_v21 = vmax.f32 %v5745_v15, 0.0  ;;  %v7464_v22 = vpop.f32.mrb[8].mxu0 }
 0x1f9   : > { %v6761_v23 = vpack.c.bf16 %v5779_v19, %v5778_v17  ;;  %v7510_v24 = vadd.f32 %v7464_v22, %v7224_v41  ;;  %v5510_v25 = vpop.f32.mrb[9].mxu0 }
 0x1fa   : > { %v6756_v26 = vpack.c.bf16 %v5777_v21, %v5776_v20  ;;  %v7511_v28 = vadd.f32 %v5510_v25, %v2235_v44  ;;  %v7465_v31 = vpop.f32.mrb[10].mxu0 }
 0x1fb   : > { %6825 = vst [vmem:[%s9033_s10 + $0x18] sm:$0xff] %v6761_v23   ;;  %v5750_v32 = vadd.f32 %v7510_v24, %v9023_v54  ;;  %v7512_v34 = vadd.f32 %v7465_v31, %v7225_v45  ;;  %v5513_v35 = vpop.f32.mrb[11].mxu0 }
 0x1fc   : > { %6824 = vst [vmem:[%s9033_s10 + $0x10] sm:$0xff] %v6756_v26   ;;  %v5748_v39 = vadd.f32 %v7511_v28, %v9023_v54  ;;  %v7513_v40 = vadd.f32 %v5513_v35, %v2238_v4 }
 0x1fd   : > { %v5751_v27 = vadd.f32 %v7512_v34, %v9023_v54  ;;  %v5782_v52 = vmax.f32 %v5750_v32, 0.0 }
 0x1fe   : > { %v5749_v37 = vadd.f32 %v7513_v40, %v9023_v54  ;;  %v5780_v58 = vmax.f32 %v5748_v39, 0.0 }
 0x1ff   : > { %v5783_v42 = vmax.f32 %v5751_v27, 0.0 }
 0x200   : > { %v5781_v18 = vmax.f32 %v5749_v37, 0.0  ;;  %v7468_v12 = vpop.f32.mrb[12].mxu0 }
 0x201   : > { %v6771_v44 = vpack.c.bf16 %v5783_v42, %v5782_v52  ;;  %v7514_v45 = vadd.f32 %v7468_v12, %v9012_v48  ;;  %v5526_v53 = vpop.f32.mrb[13].mxu0 }
 0x202   : > { %v7280_v46 = vpop.f32.mrb[16].mxu1  ;;  %v6766_v4 = vpack.c.bf16 %v5781_v18, %v5780_v58  ;;  %v7515_v55 = vadd.f32 %v5526_v53, %v9014_v33  ;;  %v7469_v29 = vpop.f32.mrb[14].mxu0 }
 0x203   : > { %v3085_v43 = vpop.f32.mrb[17].mxu1  ;;  %6827 = vst [vmem:[%s9033_s10 + $0x28] sm:$0xff] %v6771_v44   ;;  %v5754_v57 = vadd.f32 %v7514_v45, %v9023_v54  ;;  %v7516_v59 = vadd.f32 %v7469_v29, %v9016_v50  ;;  %v5529_v61 = vpop.f32.mrb[15].mxu0 }
 0x204   : > { %v7281_v41 = vpop.f32.mrb[18].mxu1  ;;  %6826 = vst [vmem:[%s9033_s10 + $0x20] sm:$0xff] %v6766_v4   ;;  %v5752_v56 = vadd.f32 %v7515_v55, %v9023_v54  ;;  %v7517_v62 = vadd.f32 %v5529_v61, %v9018_v51 }
 0x205   : > { %v3088_v60 = vpop.f32.mrb[19].mxu1  ;;  %v5755_v63 = vadd.f32 %v7516_v59, %v9023_v54  ;;  %v5786_v0 = vmax.f32 %v5754_v57, 0.0 }
 0x206   : > { %v5753_v48 = vadd.f32 %v7517_v62, %v9023_v54  ;;  %v5784_v33 = vmax.f32 %v5752_v56, 0.0 }
 0x207   : > { %v5787_v16 = vmax.f32 %v5755_v63, 0.0 }
 0x208   : > { %v5785_v30 = vmax.f32 %v5753_v48, 0.0  ;;  %v7472_v36 = vpop.f32.mrb[16].mxu0 }
 0x209   : > { %v6781_v2 = vpack.c.bf16 %v5787_v16, %v5786_v0  ;;  %v7518_v50 = vadd.f32 %v7472_v36, %v7280_v46  ;;  %v5542_v3 = vpop.f32.mrb[17].mxu0 }
 0x20a   : > { %v7284_v1 = vpop.f32.mrb[20].mxu1  ;;  %v6776_v6 = vpack.c.bf16 %v5785_v30, %v5784_v33  ;;  %v7519_v7 = vadd.f32 %v5542_v3, %v3085_v43  ;;  %v7473_v8 = vpop.f32.mrb[18].mxu0 }
 0x20b   : > { %v3101_v5 = vpop.f32.mrb[21].mxu1  ;;  %6829 = vst [vmem:[%s9033_s10 + $0x38] sm:$0xff] %v6781_v2   ;;  %v5758_v9 = vadd.f32 %v7518_v50, %v9023_v54  ;;  %v7520_v10 = vadd.f32 %v7473_v8, %v7281_v41  ;;  %v5545_v11 = vpop.f32.mrb[19].mxu0 }
 0x20c   : > { %v7285_v51 = vpop.f32.mrb[22].mxu1  ;;  %6828 = vst [vmem:[%s9033_s10 + $0x30] sm:$0xff] %v6776_v6   ;;  %v5756_v14 = vadd.f32 %v7519_v7, %v9023_v54  ;;  %v7521_v38 = vadd.f32 %v5545_v11, %v3088_v60 }
 0x20d   : > { %v3104_v13 = vpop.f32.mrb[23].mxu1  ;;  %v5759_v49 = vadd.f32 %v7520_v10, %v9023_v54  ;;  %v5790_v15 = vmax.f32 %v5758_v9, 0.0 }
 0x20e   : > { %v5757_v47 = vadd.f32 %v7521_v38, %v9023_v54  ;;  %v5788_v19 = vmax.f32 %v5756_v14, 0.0 }
 0x20f   : > { %v5791_v17 = vmax.f32 %v5759_v49, 0.0 }
 0x210   : > { %v5789_v20 = vmax.f32 %v5757_v47, 0.0  ;;  %v7476_v21 = vpop.f32.mrb[20].mxu0 }
 0x211   : > { %v6791_v22 = vpack.c.bf16 %v5791_v17, %v5790_v15  ;;  %v7522_v23 = vadd.f32 %v7476_v21, %v7284_v1  ;;  %v5558_v24 = vpop.f32.mrb[21].mxu0 }
 0x212   : > { %v6786_v25 = vpack.c.bf16 %v5789_v20, %v5788_v19  ;;  %v7523_v26 = vadd.f32 %v5558_v24, %v3101_v5  ;;  %v7477_v28 = vpop.f32.mrb[22].mxu0  ;;  %v7288_v40 = vpop.f32.mrb[24].mxu1 }
 0x213   : > { %6831 = vst [vmem:[%s9033_s10 + $0x48] sm:$0xff] %v6791_v22   ;;  %v5762_v31 = vadd.f32 %v7522_v23, %v9023_v54  ;;  %v7524_v32 = vadd.f32 %v7477_v28, %v7285_v51  ;;  %v5561_v34 = vpop.f32.mrb[23].mxu0  ;;  %v3117_v37 = vpop.f32.mrb[25].mxu1 }
 0x214   : > { %6830 = vst [vmem:[%s9033_s10 + $0x40] sm:$0xff] %v6786_v25   ;;  %v5760_v35 = vadd.f32 %v7523_v26, %v9023_v54  ;;  %v7525_v39 = vadd.f32 %v5561_v34, %v3104_v13  ;;  %v7289_v52 = vpop.f32.mrb[26].mxu1 }
 0x215   : > { %v5763_v27 = vadd.f32 %v7524_v32, %v9023_v54  ;;  %v5794_v42 = vmax.f32 %v5762_v31, 0.0  ;;  %v3120_v58 = vpop.f32.mrb[27].mxu1 }
 0x216   : > { %v5761_v46 = vadd.f32 %v7525_v39, %v9023_v54  ;;  %v5792_v18 = vmax.f32 %v5760_v35, 0.0 }
 0x217   : > { %v5795_v43 = vmax.f32 %v5763_v27, 0.0 }
 0x218   : > { %v5793_v12 = vmax.f32 %v5761_v46, 0.0  ;;  %v7480_v41 = vpop.f32.mrb[24].mxu0 }
 0x219   : > { %v6801_v44 = vpack.c.bf16 %v5795_v43, %v5794_v42  ;;  %v7526_v45 = vadd.f32 %v7480_v41, %v7288_v40  ;;  %v5574_v53 = vpop.f32.mrb[25].mxu0 }
 0x21a   : > { %v6796_v60 = vpack.c.bf16 %v5793_v12, %v5792_v18  ;;  %v7527_v4 = vadd.f32 %v5574_v53, %v3117_v37  ;;  %v7481_v55 = vpop.f32.mrb[26].mxu0 }
 0x21b   : > { %6833 = vst [vmem:[%s9033_s10 + $0x58] sm:$0xff] %v6801_v44   ;;  %v5766_v29 = vadd.f32 %v7526_v45, %v9023_v54  ;;  %v7528_v57 = vadd.f32 %v7481_v55, %v7289_v52  ;;  %v5577_v59 = vpop.f32.mrb[27].mxu0 }
 0x21c   : > { %6832 = vst [vmem:[%s9033_s10 + $0x50] sm:$0xff] %v6796_v60   ;;  %v5764_v61 = vadd.f32 %v7527_v4, %v9023_v54  ;;  %v7529_v56 = vadd.f32 %v5577_v59, %v3120_v58  ;;  %v7292_v30 = vpop.f32.mrb[28].mxu1 }
 0x21d   : > { %v5767_v62 = vadd.f32 %v7528_v57, %v9023_v54  ;;  %v5798_v48 = vmax.f32 %v5766_v29, 0.0  ;;  %v3133_v50 = vpop.f32.mrb[29].mxu1 }
 0x21e   : > { %v5765_v63 = vadd.f32 %v7529_v56, %v9023_v54  ;;  %v5796_v16 = vmax.f32 %v5764_v61, 0.0  ;;  %v7293_v7 = vpop.f32.mrb[30].mxu1 }
 0x21f   : > { %v5799_v0 = vmax.f32 %v5767_v62, 0.0  ;;  %v3136_v10 = vpop.f32.mrb[31].mxu1 }
 0x220   : > { %v5797_v33 = vmax.f32 %v5765_v63, 0.0  ;;  %v7484_v36 = vpop.f32.mrb[28].mxu0 }
 0x221   : > { %v6811_v1 = vpack.c.bf16 %v5799_v0, %v5798_v48  ;;  %v7530_v2 = vadd.f32 %v7484_v36, %v7292_v30  ;;  %v5590_v3 = vpop.f32.mrb[29].mxu0 }
 0x222   : > { %v6806_v5 = vpack.c.bf16 %v5797_v33, %v5796_v16  ;;  %v7531_v6 = vadd.f32 %v5590_v3, %v3133_v50  ;;  %v7485_v8 = vpop.f32.mrb[30].mxu0 }
 0x223   : > { %6835 = vst [vmem:[%s9033_s10 + $0x68] sm:$0xff] %v6811_v1   ;;  %v5770_v51 = vadd.f32 %v7530_v2, %v9023_v54  ;;  %v7532_v9 = vadd.f32 %v7485_v8, %v7293_v7  ;;  %v5593_v11 = vpop.f32.mrb[31].mxu0 }
 0x224   : > { %6834 = vst [vmem:[%s9033_s10 + $0x60] sm:$0xff] %v6806_v5   ;;  %v5768_v13 = vadd.f32 %v7531_v6, %v9023_v54  ;;  %v7533_v14 = vadd.f32 %v5593_v11, %v3136_v10 }
 0x225   : > { %v5771_v38 = vadd.f32 %v7532_v9, %v9023_v54  ;;  %v5802_v47 = vmax.f32 %v5770_v51, 0.0 }
 0x226   : > { %v5769_v49 = vadd.f32 %v7533_v14, %v9023_v54  ;;  %v5800_v17 = vmax.f32 %v5768_v13, 0.0 }
 0x227   : > { %v5803_v15 = vmax.f32 %v5771_v38, 0.0 }
 0x228   : > { %v5801_v19 = vmax.f32 %v5769_v49, 0.0 }
 0x229   : > { %v6821_v20 = vpack.c.bf16 %v5803_v15, %v5802_v47 }
 0x22a   : > { %v6816_v21 = vpack.c.bf16 %v5801_v19, %v5800_v17 }
 0x22b   : > { %6837 = vst [vmem:[%s9033_s10 + $0x78] sm:$0xff] %v6821_v20  }
 0x22c   : > { %6836 = vst [vmem:[%s9033_s10 + $0x70] sm:$0xff] %v6816_v21  }
 0x22d PF: > { %s13_s12 = sadd.s32 1, %s7901_s12  }
 0x22e   : > { %p10_p4 = scmp.ge.s32.totalorder %s13_s12, 4  }
 0x230   :  { %12 = sbr.rel (!%p10_p4) target bundleno = 1 (0x1), region = 72 }

</bundles_post_ra>
